<compile_context>
chip_gen: v7x
topology: tpu7x:2x2x1
jax: 0.10.0
libtpu: 0.0.40
codegen_flags: <defaults>
</compile_context>

<pallas_src>
import math

import numpy as np
import jax
import jax.numpy as jnp
from jax import lax
from jax.experimental import pallas as pl
from jax.experimental.pallas import tpu as pltpu

KERNEL_SIZE = 5          # CausalConvBlock kernel size (torch default)
SCINET_LEVEL = 3         # SCINet default current_level
N_DEPTHS = SCINET_LEVEL + 1
_CP = pltpu.CompilerParams(dimension_semantics=("arbitrary",))


def _spec(shape):
    n = len(shape)
    return pl.BlockSpec(shape, lambda i, n=n: (0,) * n)


# ------------------------------ fused kernel --------------------------------

def _model_kernel(*refs):
    (x_ref, cmat_ref, nsmat_ref, icmat_ref, ismat_ref,
     gw_ref, gb_ref, boh_ref, cav_ref, cvar_ref, cexp_ref,
     pe_ref, wproj_ref) = refs[:13]
    o_ref = refs[-1]
    tref = refs[13:-1]
    nd = len(tref) // 6
    eo = [tref[6 * d + 0] for d in range(nd)]   # (2, B*L/2, B*L)   even/odd selection
    zz = [tref[6 * d + 1] for d in range(nd)]   # (2, B*L, B*L/2)   zip_up_the_pants
    p1 = [tref[6 * d + 2] for d in range(nd)]   # (K, B*(L/2+p), B*L/2)  pad+shift, conv1
    p2 = [tref[6 * d + 3] for d in range(nd)]   # (K, B*L/2, B*(L/2+p))  shift, conv2
    wt = [tref[6 * d + 4] for d in range(nd)]   # (4K, 2NE, 2NE)    block-diag conv weights
    bt = [tref[6 * d + 5] for d in range(nd)]   # (4, 1, 2NE)       conv biases

    S, BE = x_ref.shape
    B = cav_ref.shape[1]
    E = BE // B
    K = p1[0].shape[0]

    def mm(a, b_):
        return jnp.dot(a, b_, preferred_element_type=jnp.float32)

    # -------- FreqDecompMoE (rows = time, lanes = batch*channel) --------
    x = x_ref[...]                                  # (S, B*E)
    cav = cav_ref[...]                              # (B*E, B)  channel mean (1/E)
    cvar = cvar_ref[...]                            # (B*E, B)  unbiased (1/(E-1))
    cexp = cexp_ref[...]                            # (B, B*E)  expand per-batch scalar

    mu_b = mm(x, cav)                               # per (t, b) channel mean, (S, B)
    mu = mm(mu_b, cexp)                             # (S, B*E)
    xc = x - mu
    var_b = mm(xc * xc, cvar) + 1e-5                # torch.var unbiased + eps
    rstd_b = lax.rsqrt(var_b)
    std_b = var_b * rstd_b                          # sqrt(var + eps)
    xn = xc * mm(rstd_b, cexp)

    xr = mm(cmat_ref[...], xn)                      # Re rfft over time, (F, B*E)
    xi = mm(nsmat_ref[...], xn)                     # Im rfft
    mag = jnp.sqrt(xr * xr + xi * xi)

    gin = mm(mag, cav)                              # |X| channel mean, (F, B)
    logits = mm(gw_ref[...], gin) + gb_ref[...]     # (NE, B)
    mx = jnp.max(logits, axis=0, keepdims=True)
    ex = jnp.exp(logits - mx)
    gate = ex * pl.reciprocal(jnp.sum(ex, axis=0, keepdims=True), approx=True)
    wf = mm(boh_ref[...], gate)                     # per-frequency expert weight, (F, B)
    wfl = mm(wf, cexp)                              # (F, B*E)

    y = mm(icmat_ref[...], xr * wfl) + mm(ismat_ref[...], xi * wfl)   # irfft, (S, B*E)
    h = y * mm(std_b, cexp) + mu                    # MoE output

    # -------- forecast normalization + positional encoding --------
    means = jnp.mean(h, axis=0, keepdims=True)      # (1, B*E), over time
    hc = h - means
    vt = jnp.mean(hc * hc, axis=0, keepdims=True) + 1e-5      # unbiased=False
    rstdev = lax.rsqrt(vt)
    stdev = vt * rstdev
    hn_l = hc * rstdev + pe_ref[...]                # (S, B*E)

    # layout switch for the tree: rows = (batch, time), lanes = channel
    hn_r = jnp.concatenate([hn_l[:, bi * E:(bi + 1) * E] for bi in range(B)], axis=0)

    # -------- SCINet tree, breadth-first (all 2^d sibling nodes batched on lanes) -----
    def ccb(z, d, pair):
        """One pair of CausalConvBlocks for every node at depth d, batched on lanes."""
        base = pair * 2 * K
        acc = bt[d][pair * 2]                       # (1, 2NE) bias, broadcast over rows
        for k in range(K):
            acc = acc + mm(mm(p1[d][k], z), wt[d][base + k])
        hcv = jnp.maximum(acc, 0.01 * acc)          # LeakyReLU(0.01); Dropout(0.0) = id
        acc2 = bt[d][pair * 2 + 1]
        for k in range(K):
            acc2 = acc2 + mm(mm(p2[d][k], hcv), wt[d][base + K + k])
        return jnp.tanh(acc2)

    X = hn_r                                        # depth-0 input, (B*S, E)
    for d in range(nd):
        ne = (2 ** d) * E                           # lanes per branch at this depth
        Xe = mm(eo[d][0], X)                        # even rows of every node, (B*L/2, NE)
        Xo = mm(eo[d][1], X)                        # odd rows
        g = ccb(jnp.concatenate([Xo, Xe], axis=1), d, 0)   # [modules_even(Xo)|modules_odd(Xe)]
        Xe_t = Xe * jnp.exp(g[:, :ne])
        Xo_t = Xo * jnp.exp(g[:, ne:])
        hh = ccb(jnp.concatenate([Xo_t, Xe_t], axis=1), d, 1)  # [interactor_even|interactor_odd]
        Xe_u = Xe_t + hh[:, :ne]
        Xo_u = Xo_t - hh[:, ne:]
        X = jnp.concatenate([Xe_u, Xo_u], axis=1)   # next depth: [even children | odd children]

    Y = X                                           # deepest level outputs, (B, 2^nd*E)
    for d in reversed(range(nd)):                   # zip_up_the_pants, bottom-up
        ne = (2 ** d) * E
        Y = mm(zz[d][0], Y[:, :ne]) + mm(zz[d][1], Y[:, ne:])

    dec_r = Y + hn_r                                # residual, (B*S, E)

    # -------- 1x1 projection over time + de-normalization --------
    dec_l = jnp.concatenate([dec_r[bi * S:(bi + 1) * S, :] for bi in range(B)], axis=1)
    out = mm(wproj_ref[...], dec_l)                 # (S+P, B*E)
    o_ref[...] = out * stdev + means                # zero prefix + reshape done in wrapper


# ------------------------------ JAX wrapper ---------------------------------

def model_forward(params, consts, x):
    b, s, e = x.shape
    fl = s // 2 + 1
    sp = params['Wproj'].shape[0]                   # seq_len + pred_len
    assert consts['pe'].shape == (s, b * e), "constants were built for a different (S, B, E)"

    # learnable, sorted, non-overlapping band boundaries -> per-frequency one-hot
    bb = jax.nn.sigmoid(params['band_boundaries'])
    bb = jnp.sort(bb)
    bb = jnp.concatenate([jnp.zeros((1,), bb.dtype), bb, jnp.ones((1,), bb.dtype)])
    idx = (bb * fl).astype(jnp.int32)
    idx = idx.at[-1].set(fl)
    fr = jnp.arange(fl)
    boh = ((fr[:, None] >= idx[None, :-1]) &
           (fr[:, None] < idx[None, 1:])).astype(jnp.float32)        # (F, NE)

    x_l = x.transpose(1, 0, 2).reshape(s, b * e)    # rows = time, lanes = (batch, channel)

    args = [x_l, consts['cmat'], consts['nsmat'], consts['icmat'], consts['ismat'],
            params['gate_w'], params['gate_b'], boh,
            consts['cav'], consts['cvar'], consts['cexp'], consts['pe'], params['Wproj']]
    for d in range(N_DEPTHS):
        args += [consts['eo'][d], consts['zz'][d], consts['p1'][d], consts['p2'][d],
                 params['W'][d], params['B'][d]]

    out_shape = (sp, b * e)
    out = pl.pallas_call(
        _model_kernel,
        grid=(1,),
        in_specs=[_spec(a.shape) for a in args],
        out_specs=_spec(out_shape),
        out_shape=jax.ShapeDtypeStruct(out_shape, jnp.float32),
        compiler_params=_CP,
    )(*args)

    dec = out.reshape(sp, b, e).transpose(1, 0, 2)              # (B, S+P, E)
    zeros = jnp.zeros((b, s, e), dec.dtype)                     # torch.cat([zeros_like(x), dec])
    return jnp.concatenate([zeros, dec], axis=1)                # (B, 2S+P, E)


# ------------------------- constants & parameters ---------------------------

def build_constants(seq_len, enc_in, batch):
    """Data-independent constants: DFT matrices, PE, stat-expansion and tree selection
    matrices (even/odd split, zip, replication-pad + tap-shift) per tree depth."""
    s, e, b = seq_len, enc_in, batch
    assert e > 1, "enc_in must be > 1 (unbiased channel variance)"
    assert s % (2 ** N_DEPTHS) == 0, "seq_len must be divisible by 2**(level+1)"
    fl = s // 2 + 1
    K = KERNEL_SIZE
    pad = K - 1

    t = np.arange(s, dtype=np.float64)
    f = np.arange(fl, dtype=np.float64)
    ang = 2.0 * math.pi * np.outer(f, t) / s
    cmat = np.cos(ang)
    nsmat = -np.sin(ang)
    coef = np.full(fl, 2.0)
    coef[0] = 1.0
    if s % 2 == 0:
        coef[-1] = 1.0
    icmat = (np.cos(ang).T * coef[None, :]) / s
    ismat = (-np.sin(ang).T * coef[None, :]) / s

    pe_hidden = e + (e % 2)
    num_ts = pe_hidden // 2
    log_inc = math.log(10000.0) / max(num_ts - 1, 1)
    inv_ts = np.exp(np.arange(num_ts, dtype=np.float64) * -log_inc)
    scaled = np.outer(np.arange(s, dtype=np.float64), inv_ts)
    sig = np.concatenate([np.sin(scaled), np.cos(scaled)], axis=1)[:, :e]
    pe = np.tile(sig, (1, b))                                      # (S, B*E)

    cav = np.zeros((b * e, b))
    cvar = np.zeros((b * e, b))
    cexp = np.zeros((b, b * e))
    for bi in range(b):
        cav[bi * e:(bi + 1) * e, bi] = 1.0 / e
        cvar[bi * e:(bi + 1) * e, bi] = 1.0 / (e - 1)
        cexp[bi, bi * e:(bi + 1) * e] = 1.0

    eo, zz, p1, p2 = [], [], [], []
    L = s
    for _ in range(N_DEPTHS):
        lh = L // 2
        l1 = lh + pad
        es = np.zeros((b * lh, b * L))
        od = np.zeros((b * lh, b * L))
        ze = np.zeros((b * L, b * lh))
        zo = np.zeros((b * L, b * lh))
        for bi in range(b):
            for i in range(lh):
                es[bi * lh + i, bi * L + 2 * i] = 1.0
                od[bi * lh + i, bi * L + 2 * i + 1] = 1.0
                ze[bi * L + 2 * i, bi * lh + i] = 1.0
                zo[bi * L + 2 * i + 1, bi * lh + i] = 1.0
        p1m = np.zeros((K, b * l1, b * lh))
        p2m = np.zeros((K, b * lh, b * l1))
        for k in range(K):
            for bi in range(b):
                for tt in range(l1):                  # replication pad folded into P1
                    src = min(max(tt + k - pad, 0), lh - 1)
                    p1m[k, bi * l1 + tt, bi * lh + src] = 1.0
                for tt in range(lh):
                    p2m[k, bi * lh + tt, bi * l1 + tt + k] = 1.0
        eo.append(np.stack([es, od]))
        zz.append(np.stack([ze, zo]))
        p1.append(p1m)
        p2.append(p2m)
        L = lh

    f32 = lambda a: jnp.asarray(a, jnp.float32)
    return {
        'cmat': f32(cmat), 'nsmat': f32(nsmat), 'icmat': f32(icmat), 'ismat': f32(ismat),
        'pe': f32(pe), 'cav': f32(cav), 'cvar': f32(cvar), 'cexp': f32(cexp),
        'eo': [f32(a) for a in eo], 'zz': [f32(a) for a in zz],
        'p1': [f32(a) for a in p1], 'p2': [f32(a) for a in p2],
    }


def init_params(key, seq_len, pred_len, enc_in, expert_num):
    """Random params; conv weights pre-packed block-diagonally per tree depth so that all
    sibling SCIBlocks and both even/odd branches are evaluated by single matmuls."""
    K, e = KERNEL_SIZE, enc_in
    fl = seq_len // 2 + 1
    keys = jax.random.split(key, 4 + 2 * N_DEPTHS)
    cb = 1.0 / math.sqrt(e * K)

    Ws, Bs = [], []
    for d in range(N_DEPTHS):
        n = 2 ** d                                   # sibling nodes at this depth
        kw, kb = keys[4 + 2 * d], keys[5 + 2 * d]
        # raw layout: (node, conv_block[me, mo, ie, io], layer, tap, c_in, c_out)
        w_raw = np.asarray(jax.random.uniform(kw, (n, 4, 2, K, e, e), jnp.float32, -cb, cb))
        b_raw = np.asarray(jax.random.uniform(kb, (n, 4, 2, e), jnp.float32, -cb, cb))
        ne2 = 2 * n * e
        wp = np.zeros((4 * K, ne2, ne2), np.float32)
        bp = np.zeros((4, 1, ne2), np.float32)
        for pair in range(2):                        # 0 = modules pair, 1 = interactor pair
            for layer in range(2):                   # conv1, conv2
                si = pair * 2 + layer
                for br in range(2):                  # 0 = *_even block, 1 = *_odd block
                    cb_idx = pair * 2 + br           # [modules_even, modules_odd, interactor_even, interactor_odd]
                    for node in range(n):
                        r0 = (br * n + node) * e
                        for k in range(K):
                            wp[si * K + k, r0:r0 + e, r0:r0 + e] = w_raw[node, cb_idx, layer, k]
                        bp[si, 0, r0:r0 + e] = b_raw[node, cb_idx, layer]
        Ws.append(jnp.asarray(wp))
        Bs.append(jnp.asarray(bp))

    gb = 1.0 / math.sqrt(fl)
    pb = 1.0 / math.sqrt(seq_len)
    return {
        'band_boundaries': jax.random.uniform(keys[0], (expert_num - 1,), jnp.float32),
        'gate_w': jax.random.uniform(keys[1], (expert_num, fl), jnp.float32, -gb, gb),
        'gate_b': jax.random.uniform(keys[2], (expert_num, 1), jnp.float32, -gb, gb),
        # num_stacks == 1 projection: Conv1d(seq_len -> seq_len + pred_len, k=1, no bias)
        'Wproj': jax.random.uniform(keys[3], (seq_len + pred_len, seq_len),
                                    jnp.float32, -pb, pb),
        'W': Ws, 'B': Bs,
    }


if __name__ == "__main__":
    B, SEQ_LEN, PRED_LEN, ENC_IN, EXPERT_NUM = 2, 16, 8, 8, 4
    key = jax.random.PRNGKey(0)
    kp, kx = jax.random.split(key)
    params = init_params(kp, SEQ_LEN, PRED_LEN, ENC_IN, EXPERT_NUM)
    consts = build_constants(SEQ_LEN, ENC_IN, B)
    x_enc = jax.random.normal(kx, (B, SEQ_LEN, ENC_IN), jnp.float32)

    fwd = jax.jit(model_forward)
    out = jax.block_until_ready(fwd(params, consts, x_enc))

    assert out.shape == (B, 2 * SEQ_LEN + PRED_LEN, ENC_IN), out.shape
    assert bool(jnp.all(jnp.isfinite(out)))
    print("KERNEL_OK")
</pallas_src>

<mosaic_0001>
module attributes {stable_mosaic.version = 11 : i64} {
  func.func @_model_kernel(%arg0: i32, %arg1: memref<16x16xf32, #tpu.memory_space<vmem>>, %arg2: memref<9x16xf32, #tpu.memory_space<vmem>>, %arg3: memref<9x16xf32, #tpu.memory_space<vmem>>, %arg4: memref<16x9xf32, #tpu.memory_space<vmem>>, %arg5: memref<16x9xf32, #tpu.memory_space<vmem>>, %arg6: memref<4x9xf32, #tpu.memory_space<vmem>>, %arg7: memref<4x1xf32, #tpu.memory_space<vmem>>, %arg8: memref<9x4xf32, #tpu.memory_space<vmem>>, %arg9: memref<16x2xf32, #tpu.memory_space<vmem>>, %arg10: memref<16x2xf32, #tpu.memory_space<vmem>>, %arg11: memref<2x16xf32, #tpu.memory_space<vmem>>, %arg12: memref<16x16xf32, #tpu.memory_space<vmem>>, %arg13: memref<24x16xf32, #tpu.memory_space<vmem>>, %arg14: memref<2x16x32xf32, #tpu.memory_space<vmem>>, %arg15: memref<2x32x16xf32, #tpu.memory_space<vmem>>, %arg16: memref<5x24x16xf32, #tpu.memory_space<vmem>>, %arg17: memref<5x16x24xf32, #tpu.memory_space<vmem>>, %arg18: memref<20x16x16xf32, #tpu.memory_space<vmem>>, %arg19: memref<4x1x16xf32, #tpu.memory_space<vmem>>, %arg20: memref<2x8x16xf32, #tpu.memory_space<vmem>>, %arg21: memref<2x16x8xf32, #tpu.memory_space<vmem>>, %arg22: memref<5x16x8xf32, #tpu.memory_space<vmem>>, %arg23: memref<5x8x16xf32, #tpu.memory_space<vmem>>, %arg24: memref<20x32x32xf32, #tpu.memory_space<vmem>>, %arg25: memref<4x1x32xf32, #tpu.memory_space<vmem>>, %arg26: memref<2x4x8xf32, #tpu.memory_space<vmem>>, %arg27: memref<2x8x4xf32, #tpu.memory_space<vmem>>, %arg28: memref<5x12x4xf32, #tpu.memory_space<vmem>>, %arg29: memref<5x4x12xf32, #tpu.memory_space<vmem>>, %arg30: memref<20x64x64xf32, #tpu.memory_space<vmem>>, %arg31: memref<4x1x64xf32, #tpu.memory_space<vmem>>, %arg32: memref<2x2x4xf32, #tpu.memory_space<vmem>>, %arg33: memref<2x4x2xf32, #tpu.memory_space<vmem>>, %arg34: memref<5x10x2xf32, #tpu.memory_space<vmem>>, %arg35: memref<5x2x10xf32, #tpu.memory_space<vmem>>, %arg36: memref<20x128x128xf32, #tpu.memory_space<vmem>>, %arg37: memref<4x1x128xf32, #tpu.memory_space<vmem>>, %arg38: memref<24x16xf32, #tpu.memory_space<vmem>>) attributes {dimension_semantics = [#tpu.dimension_semantics<arbitrary>], iteration_bounds = array<i64: 1>, scalar_prefetch = 0 : i64, scratch_operands = 0 : i64, tpu.core_type = #tpu.core_type<tc>, window_params = [{pipeline_mode = #tpu.pipeline_mode<synchronous>, transform_indices = @transform_0, window_bounds = array<i64: 16, 16>}, {pipeline_mode = #tpu.pipeline_mode<synchronous>, transform_indices = @transform_1, window_bounds = array<i64: 9, 16>}, {pipeline_mode = #tpu.pipeline_mode<synchronous>, transform_indices = @transform_2, window_bounds = array<i64: 9, 16>}, {pipeline_mode = #tpu.pipeline_mode<synchronous>, transform_indices = @transform_3, window_bounds = array<i64: 16, 9>}, {pipeline_mode = #tpu.pipeline_mode<synchronous>, transform_indices = @transform_4, window_bounds = array<i64: 16, 9>}, {pipeline_mode = #tpu.pipeline_mode<synchronous>, transform_indices = @transform_5, window_bounds = array<i64: 4, 9>}, {pipeline_mode = #tpu.pipeline_mode<synchronous>, transform_indices = @transform_6, window_bounds = array<i64: 4, 1>}, {pipeline_mode = #tpu.pipeline_mode<synchronous>, transform_indices = @transform_7, window_bounds = array<i64: 9, 4>}, {pipeline_mode = #tpu.pipeline_mode<synchronous>, transform_indices = @transform_8, window_bounds = array<i64: 16, 2>}, {pipeline_mode = #tpu.pipeline_mode<synchronous>, transform_indices = @transform_9, window_bounds = array<i64: 16, 2>}, {pipeline_mode = #tpu.pipeline_mode<synchronous>, transform_indices = @transform_10, window_bounds = array<i64: 2, 16>}, {pipeline_mode = #tpu.pipeline_mode<synchronous>, transform_indices = @transform_11, window_bounds = array<i64: 16, 16>}, {pipeline_mode = #tpu.pipeline_mode<synchronous>, transform_indices = @transform_12, window_bounds = array<i64: 24, 16>}, {pipeline_mode = #tpu.pipeline_mode<synchronous>, transform_indices = @transform_13, window_bounds = array<i64: 2, 16, 32>}, {pipeline_mode = #tpu.pipeline_mode<synchronous>, transform_indices = @transform_14, window_bounds = array<i64: 2, 32, 16>}, {pipeline_mode = #tpu.pipeline_mode<synchronous>, transform_indices = @transform_15, window_bounds = array<i64: 5, 24, 16>}, {pipeline_mode = #tpu.pipeline_mode<synchronous>, transform_indices = @transform_16, window_bounds = array<i64: 5, 16, 24>}, {pipeline_mode = #tpu.pipeline_mode<synchronous>, transform_indices = @transform_17, window_bounds = array<i64: 20, 16, 16>}, {pipeline_mode = #tpu.pipeline_mode<synchronous>, transform_indices = @transform_18, window_bounds = array<i64: 4, 1, 16>}, {pipeline_mode = #tpu.pipeline_mode<synchronous>, transform_indices = @transform_19, window_bounds = array<i64: 2, 8, 16>}, {pipeline_mode = #tpu.pipeline_mode<synchronous>, transform_indices = @transform_20, window_bounds = array<i64: 2, 16, 8>}, {pipeline_mode = #tpu.pipeline_mode<synchronous>, transform_indices = @transform_21, window_bounds = array<i64: 5, 16, 8>}, {pipeline_mode = #tpu.pipeline_mode<synchronous>, transform_indices = @transform_22, window_bounds = array<i64: 5, 8, 16>}, {pipeline_mode = #tpu.pipeline_mode<synchronous>, transform_indices = @transform_23, window_bounds = array<i64: 20, 32, 32>}, {pipeline_mode = #tpu.pipeline_mode<synchronous>, transform_indices = @transform_24, window_bounds = array<i64: 4, 1, 32>}, {pipeline_mode = #tpu.pipeline_mode<synchronous>, transform_indices = @transform_25, window_bounds = array<i64: 2, 4, 8>}, {pipeline_mode = #tpu.pipeline_mode<synchronous>, transform_indices = @transform_26, window_bounds = array<i64: 2, 8, 4>}, {pipeline_mode = #tpu.pipeline_mode<synchronous>, transform_indices = @transform_27, window_bounds = array<i64: 5, 12, 4>}, {pipeline_mode = #tpu.pipeline_mode<synchronous>, transform_indices = @transform_28, window_bounds = array<i64: 5, 4, 12>}, {pipeline_mode = #tpu.pipeline_mode<synchronous>, transform_indices = @transform_29, window_bounds = array<i64: 20, 64, 64>}, {pipeline_mode = #tpu.pipeline_mode<synchronous>, transform_indices = @transform_30, window_bounds = array<i64: 4, 1, 64>}, {pipeline_mode = #tpu.pipeline_mode<synchronous>, transform_indices = @transform_31, window_bounds = array<i64: 2, 2, 4>}, {pipeline_mode = #tpu.pipeline_mode<synchronous>, transform_indices = @transform_32, window_bounds = array<i64: 2, 4, 2>}, {pipeline_mode = #tpu.pipeline_mode<synchronous>, transform_indices = @transform_33, window_bounds = array<i64: 5, 10, 2>}, {pipeline_mode = #tpu.pipeline_mode<synchronous>, transform_indices = @transform_34, window_bounds = array<i64: 5, 2, 10>}, {pipeline_mode = #tpu.pipeline_mode<synchronous>, transform_indices = @transform_35, window_bounds = array<i64: 20, 128, 128>}, {pipeline_mode = #tpu.pipeline_mode<synchronous>, transform_indices = @transform_36, window_bounds = array<i64: 4, 1, 128>}, {pipeline_mode = #tpu.pipeline_mode<synchronous>, transform_indices = @transform_37, window_bounds = array<i64: 24, 16>}]} {
    %c0 = arith.constant 0 : index
    %c0_0 = arith.constant 0 : index
    %0 = vector.load %arg1[%c0, %c0_0] : memref<16x16xf32, #tpu.memory_space<vmem>>, vector<16x16xf32>
    %c0_1 = arith.constant 0 : index
    %c0_2 = arith.constant 0 : index
    %1 = vector.load %arg9[%c0_1, %c0_2] : memref<16x2xf32, #tpu.memory_space<vmem>>, vector<16x2xf32>
    %c0_3 = arith.constant 0 : index
    %c0_4 = arith.constant 0 : index
    %2 = vector.load %arg10[%c0_3, %c0_4] : memref<16x2xf32, #tpu.memory_space<vmem>>, vector<16x2xf32>
    %c0_5 = arith.constant 0 : index
    %c0_6 = arith.constant 0 : index
    %3 = vector.load %arg11[%c0_5, %c0_6] : memref<2x16xf32, #tpu.memory_space<vmem>>, vector<2x16xf32>
    %cst = arith.constant dense<0.000000e+00> : vector<16x2xf32>
    %4 = tpu.matmul %0, %1, %cst {dimension_numbers = #tpu.dot_dimension_numbers<[1], [0], [0], [1], [0, 0, 1, 1], [], []>} : vector<16x16xf32>, vector<16x2xf32>, vector<16x2xf32> -> vector<16x2xf32>
    %cst_7 = arith.constant dense<0.000000e+00> : vector<16x16xf32>
    %5 = tpu.matmul %4, %3, %cst_7 {dimension_numbers = #tpu.dot_dimension_numbers<[1], [0], [0], [1], [0, 0, 1, 1], [], []>} : vector<16x2xf32>, vector<2x16xf32>, vector<16x16xf32> -> vector<16x16xf32>
    %6 = arith.subf %0, %5 : vector<16x16xf32>
    %7 = arith.mulf %6, %6 : vector<16x16xf32>
    %cst_8 = arith.constant dense<0.000000e+00> : vector<16x2xf32>
    %8 = tpu.matmul %7, %2, %cst_8 {dimension_numbers = #tpu.dot_dimension_numbers<[1], [0], [0], [1], [0, 0, 1, 1], [], []>} : vector<16x16xf32>, vector<16x2xf32>, vector<16x2xf32> -> vector<16x2xf32>
    %cst_9 = arith.constant 9.99999974E-6 : f32
    %9 = vector.broadcast %cst_9 : f32 to vector<16x2xf32>
    %10 = arith.addf %8, %9 : vector<16x2xf32>
    %11 = math.rsqrt %10 : vector<16x2xf32>
    %12 = arith.mulf %10, %11 : vector<16x2xf32>
    %cst_10 = arith.constant dense<0.000000e+00> : vector<16x16xf32>
    %13 = tpu.matmul %11, %3, %cst_10 {dimension_numbers = #tpu.dot_dimension_numbers<[1], [0], [0], [1], [0, 0, 1, 1], [], []>} : vector<16x2xf32>, vector<2x16xf32>, vector<16x16xf32> -> vector<16x16xf32>
    %14 = arith.mulf %6, %13 : vector<16x16xf32>
    %c0_11 = arith.constant 0 : index
    %c0_12 = arith.constant 0 : index
    %15 = vector.load %arg2[%c0_11, %c0_12] : memref<9x16xf32, #tpu.memory_space<vmem>>, vector<9x16xf32>
    %cst_13 = arith.constant dense<0.000000e+00> : vector<9x16xf32>
    %16 = tpu.matmul %15, %14, %cst_13 {dimension_numbers = #tpu.dot_dimension_numbers<[1], [0], [0], [1], [0, 0, 1, 1], [], []>} : vector<9x16xf32>, vector<16x16xf32>, vector<9x16xf32> -> vector<9x16xf32>
    %c0_14 = arith.constant 0 : index
    %c0_15 = arith.constant 0 : index
    %17 = vector.load %arg3[%c0_14, %c0_15] : memref<9x16xf32, #tpu.memory_space<vmem>>, vector<9x16xf32>
    %cst_16 = arith.constant dense<0.000000e+00> : vector<9x16xf32>
    %18 = tpu.matmul %17, %14, %cst_16 {dimension_numbers = #tpu.dot_dimension_numbers<[1], [0], [0], [1], [0, 0, 1, 1], [], []>} : vector<9x16xf32>, vector<16x16xf32>, vector<9x16xf32> -> vector<9x16xf32>
    %19 = arith.mulf %16, %16 : vector<9x16xf32>
    %20 = arith.mulf %18, %18 : vector<9x16xf32>
    %21 = arith.addf %19, %20 : vector<9x16xf32>
    %22 = math.sqrt %21 : vector<9x16xf32>
    %cst_17 = arith.constant dense<0.000000e+00> : vector<9x2xf32>
    %23 = tpu.matmul %22, %1, %cst_17 {dimension_numbers = #tpu.dot_dimension_numbers<[1], [0], [0], [1], [0, 0, 1, 1], [], []>} : vector<9x16xf32>, vector<16x2xf32>, vector<9x2xf32> -> vector<9x2xf32>
    %c0_18 = arith.constant 0 : index
    %c0_19 = arith.constant 0 : index
    %24 = vector.load %arg6[%c0_18, %c0_19] : memref<4x9xf32, #tpu.memory_space<vmem>>, vector<4x9xf32>
    %cst_20 = arith.constant dense<0.000000e+00> : vector<4x2xf32>
    %25 = tpu.matmul %24, %23, %cst_20 {dimension_numbers = #tpu.dot_dimension_numbers<[1], [0], [0], [1], [0, 0, 1, 1], [], []>} : vector<4x9xf32>, vector<9x2xf32>, vector<4x2xf32> -> vector<4x2xf32>
    %c0_21 = arith.constant 0 : index
    %c0_22 = arith.constant 0 : index
    %26 = vector.load %arg7[%c0_21, %c0_22] : memref<4x1xf32, #tpu.memory_space<vmem>>, vector<4x1xf32>
    %27 = vector.broadcast %26 : vector<4x1xf32> to vector<4x2xf32>
    %28 = arith.addf %25, %27 : vector<4x2xf32>
    %cst_23 = arith.constant dense<0xFF800000> : vector<2xf32>
    %29 = vector.multi_reduction <maximumf>, %28, %cst_23 [0] : vector<4x2xf32> to vector<2xf32>
    %30 = vector.shape_cast %29 : vector<2xf32> to vector<1x2xf32>
    %31 = vector.broadcast %30 : vector<1x2xf32> to vector<4x2xf32>
    %32 = arith.subf %28, %31 : vector<4x2xf32>
    %33 = math.exp %32 : vector<4x2xf32>
    %cst_24 = arith.constant dense<0.000000e+00> : vector<2xf32>
    %34 = vector.multi_reduction <add>, %33, %cst_24 [0] : vector<4x2xf32> to vector<2xf32>
    %35 = vector.shape_cast %34 : vector<2xf32> to vector<1x2xf32>
    %36 = tpu.reciprocal %35 {approx = true} : vector<1x2xf32> -> vector<1x2xf32>
    %37 = vector.broadcast %36 : vector<1x2xf32> to vector<4x2xf32>
    %38 = arith.mulf %33, %37 : vector<4x2xf32>
    %c0_25 = arith.constant 0 : index
    %c0_26 = arith.constant 0 : index
    %39 = vector.load %arg8[%c0_25, %c0_26] : memref<9x4xf32, #tpu.memory_space<vmem>>, vector<9x4xf32>
    %cst_27 = arith.constant dense<0.000000e+00> : vector<9x2xf32>
    %40 = tpu.matmul %39, %38, %cst_27 {dimension_numbers = #tpu.dot_dimension_numbers<[1], [0], [0], [1], [0, 0, 1, 1], [], []>} : vector<9x4xf32>, vector<4x2xf32>, vector<9x2xf32> -> vector<9x2xf32>
    %cst_28 = arith.constant dense<0.000000e+00> : vector<9x16xf32>
    %41 = tpu.matmul %40, %3, %cst_28 {dimension_numbers = #tpu.dot_dimension_numbers<[1], [0], [0], [1], [0, 0, 1, 1], [], []>} : vector<9x2xf32>, vector<2x16xf32>, vector<9x16xf32> -> vector<9x16xf32>
    %c0_29 = arith.constant 0 : index
    %c0_30 = arith.constant 0 : index
    %42 = vector.load %arg4[%c0_29, %c0_30] : memref<16x9xf32, #tpu.memory_space<vmem>>, vector<16x9xf32>
    %43 = arith.mulf %16, %41 : vector<9x16xf32>
    %cst_31 = arith.constant dense<0.000000e+00> : vector<16x16xf32>
    %44 = tpu.matmul %42, %43, %cst_31 {dimension_numbers = #tpu.dot_dimension_numbers<[1], [0], [0], [1], [0, 0, 1, 1], [], []>} : vector<16x9xf32>, vector<9x16xf32>, vector<16x16xf32> -> vector<16x16xf32>
    %c0_32 = arith.constant 0 : index
    %c0_33 = arith.constant 0 : index
    %45 = vector.load %arg5[%c0_32, %c0_33] : memref<16x9xf32, #tpu.memory_space<vmem>>, vector<16x9xf32>
    %46 = arith.mulf %18, %41 : vector<9x16xf32>
    %cst_34 = arith.constant dense<0.000000e+00> : vector<16x16xf32>
    %47 = tpu.matmul %45, %46, %cst_34 {dimension_numbers = #tpu.dot_dimension_numbers<[1], [0], [0], [1], [0, 0, 1, 1], [], []>} : vector<16x9xf32>, vector<9x16xf32>, vector<16x16xf32> -> vector<16x16xf32>
    %48 = arith.addf %44, %47 : vector<16x16xf32>
    %cst_35 = arith.constant dense<0.000000e+00> : vector<16x16xf32>
    %49 = tpu.matmul %12, %3, %cst_35 {dimension_numbers = #tpu.dot_dimension_numbers<[1], [0], [0], [1], [0, 0, 1, 1], [], []>} : vector<16x2xf32>, vector<2x16xf32>, vector<16x16xf32> -> vector<16x16xf32>
    %50 = arith.mulf %48, %49 : vector<16x16xf32>
    %51 = arith.addf %50, %5 : vector<16x16xf32>
    %cst_36 = arith.constant dense<0.000000e+00> : vector<16xf32>
    %52 = vector.multi_reduction <add>, %51, %cst_36 [0] : vector<16x16xf32> to vector<16xf32>
    %53 = vector.shape_cast %52 : vector<16xf32> to vector<1x16xf32>
    %cst_37 = arith.constant 1.600000e+01 : f32
    %54 = vector.broadcast %cst_37 : f32 to vector<1x16xf32>
    %55 = arith.divf %53, %54 : vector<1x16xf32>
    %56 = vector.broadcast %55 : vector<1x16xf32> to vector<16x16xf32>
    %57 = arith.subf %51, %56 : vector<16x16xf32>
    %58 = arith.mulf %57, %57 : vector<16x16xf32>
    %cst_38 = arith.constant dense<0.000000e+00> : vector<16xf32>
    %59 = vector.multi_reduction <add>, %58, %cst_38 [0] : vector<16x16xf32> to vector<16xf32>
    %60 = vector.shape_cast %59 : vector<16xf32> to vector<1x16xf32>
    %cst_39 = arith.constant 1.600000e+01 : f32
    %61 = vector.broadcast %cst_39 : f32 to vector<1x16xf32>
    %62 = arith.divf %60, %61 : vector<1x16xf32>
    %cst_40 = arith.constant 9.99999974E-6 : f32
    %63 = vector.broadcast %cst_40 : f32 to vector<1x16xf32>
    %64 = arith.addf %62, %63 : vector<1x16xf32>
    %65 = math.rsqrt %64 : vector<1x16xf32>
    %66 = arith.mulf %64, %65 : vector<1x16xf32>
    %67 = vector.broadcast %65 : vector<1x16xf32> to vector<16x16xf32>
    %68 = arith.mulf %57, %67 : vector<16x16xf32>
    %c0_41 = arith.constant 0 : index
    %c0_42 = arith.constant 0 : index
    %69 = vector.load %arg12[%c0_41, %c0_42] : memref<16x16xf32, #tpu.memory_space<vmem>>, vector<16x16xf32>
    %70 = arith.addf %68, %69 : vector<16x16xf32>
    %71 = vector.extract_strided_slice %70 {offsets = [0, 0], sizes = [16, 8], strides = [1, 1]} : vector<16x16xf32> to vector<16x8xf32>
    %72 = vector.extract_strided_slice %70 {offsets = [0, 8], sizes = [16, 8], strides = [1, 1]} : vector<16x16xf32> to vector<16x8xf32>
    %73 = tpu.concatenate %71, %72 in 0 : vector<16x8xf32>, vector<16x8xf32> -> vector<32x8xf32>
    %c0_43 = arith.constant 0 : index
    %c0_44 = arith.constant 0 : index
    %c0_45 = arith.constant 0 : index
    %74 = vector.load %arg14[%c0_43, %c0_44, %c0_45] : memref<2x16x32xf32, #tpu.memory_space<vmem>>, vector<1x16x32xf32>
    %75 = vector.shape_cast %74 : vector<1x16x32xf32> to vector<16x32xf32>
    %cst_46 = arith.constant dense<0.000000e+00> : vector<16x8xf32>
    %76 = tpu.matmul %75, %73, %cst_46 {dimension_numbers = #tpu.dot_dimension_numbers<[1], [0], [0], [1], [0, 0, 1, 1], [], []>} : vector<16x32xf32>, vector<32x8xf32>, vector<16x8xf32> -> vector<16x8xf32>
    %c1 = arith.constant 1 : index
    %c0_47 = arith.constant 0 : index
    %c0_48 = arith.constant 0 : index
    %77 = vector.load %arg14[%c1, %c0_47, %c0_48] : memref<2x16x32xf32, #tpu.memory_space<vmem>>, vector<1x16x32xf32>
    %78 = vector.shape_cast %77 : vector<1x16x32xf32> to vector<16x32xf32>
    %cst_49 = arith.constant dense<0.000000e+00> : vector<16x8xf32>
    %79 = tpu.matmul %78, %73, %cst_49 {dimension_numbers = #tpu.dot_dimension_numbers<[1], [0], [0], [1], [0, 0, 1, 1], [], []>} : vector<16x32xf32>, vector<32x8xf32>, vector<16x8xf32> -> vector<16x8xf32>
    %80 = tpu.concatenate %79, %76 in 1 : vector<16x8xf32>, vector<16x8xf32> -> vector<16x16xf32>
    %c0_50 = arith.constant 0 : index
    %c0_51 = arith.constant 0 : index
    %c0_52 = arith.constant 0 : index
    %81 = vector.load %arg19[%c0_50, %c0_51, %c0_52] : memref<4x1x16xf32, #tpu.memory_space<vmem>>, vector<1x1x16xf32>
    %82 = vector.shape_cast %81 : vector<1x1x16xf32> to vector<1x16xf32>
    %c0_53 = arith.constant 0 : index
    %c0_54 = arith.constant 0 : index
    %c0_55 = arith.constant 0 : index
    %83 = vector.load %arg16[%c0_53, %c0_54, %c0_55] : memref<5x24x16xf32, #tpu.memory_space<vmem>>, vector<1x24x16xf32>
    %84 = vector.shape_cast %83 : vector<1x24x16xf32> to vector<24x16xf32>
    %cst_56 = arith.constant dense<0.000000e+00> : vector<24x16xf32>
    %85 = tpu.matmul %84, %80, %cst_56 {dimension_numbers = #tpu.dot_dimension_numbers<[1], [0], [0], [1], [0, 0, 1, 1], [], []>} : vector<24x16xf32>, vector<16x16xf32>, vector<24x16xf32> -> vector<24x16xf32>
    %c0_57 = arith.constant 0 : index
    %c0_58 = arith.constant 0 : index
    %c0_59 = arith.constant 0 : index
    %86 = vector.load %arg18[%c0_57, %c0_58, %c0_59] : memref<20x16x16xf32, #tpu.memory_space<vmem>>, vector<1x16x16xf32>
    %87 = vector.shape_cast %86 : vector<1x16x16xf32> to vector<16x16xf32>
    %cst_60 = arith.constant dense<0.000000e+00> : vector<24x16xf32>
    %88 = tpu.matmul %85, %87, %cst_60 {dimension_numbers = #tpu.dot_dimension_numbers<[1], [0], [0], [1], [0, 0, 1, 1], [], []>} : vector<24x16xf32>, vector<16x16xf32>, vector<24x16xf32> -> vector<24x16xf32>
    %89 = vector.broadcast %82 : vector<1x16xf32> to vector<24x16xf32>
    %90 = arith.addf %89, %88 : vector<24x16xf32>
    %c1_61 = arith.constant 1 : index
    %c0_62 = arith.constant 0 : index
    %c0_63 = arith.constant 0 : index
    %91 = vector.load %arg16[%c1_61, %c0_62, %c0_63] : memref<5x24x16xf32, #tpu.memory_space<vmem>>, vector<1x24x16xf32>
    %92 = vector.shape_cast %91 : vector<1x24x16xf32> to vector<24x16xf32>
    %cst_64 = arith.constant dense<0.000000e+00> : vector<24x16xf32>
    %93 = tpu.matmul %92, %80, %cst_64 {dimension_numbers = #tpu.dot_dimension_numbers<[1], [0], [0], [1], [0, 0, 1, 1], [], []>} : vector<24x16xf32>, vector<16x16xf32>, vector<24x16xf32> -> vector<24x16xf32>
    %c1_65 = arith.constant 1 : index
    %c0_66 = arith.constant 0 : index
    %c0_67 = arith.constant 0 : index
    %94 = vector.load %arg18[%c1_65, %c0_66, %c0_67] : memref<20x16x16xf32, #tpu.memory_space<vmem>>, vector<1x16x16xf32>
    %95 = vector.shape_cast %94 : vector<1x16x16xf32> to vector<16x16xf32>
    %cst_68 = arith.constant dense<0.000000e+00> : vector<24x16xf32>
    %96 = tpu.matmul %93, %95, %cst_68 {dimension_numbers = #tpu.dot_dimension_numbers<[1], [0], [0], [1], [0, 0, 1, 1], [], []>} : vector<24x16xf32>, vector<16x16xf32>, vector<24x16xf32> -> vector<24x16xf32>
    %97 = arith.addf %90, %96 : vector<24x16xf32>
    %c2 = arith.constant 2 : index
    %c0_69 = arith.constant 0 : index
    %c0_70 = arith.constant 0 : index
    %98 = vector.load %arg16[%c2, %c0_69, %c0_70] : memref<5x24x16xf32, #tpu.memory_space<vmem>>, vector<1x24x16xf32>
    %99 = vector.shape_cast %98 : vector<1x24x16xf32> to vector<24x16xf32>
    %cst_71 = arith.constant dense<0.000000e+00> : vector<24x16xf32>
    %100 = tpu.matmul %99, %80, %cst_71 {dimension_numbers = #tpu.dot_dimension_numbers<[1], [0], [0], [1], [0, 0, 1, 1], [], []>} : vector<24x16xf32>, vector<16x16xf32>, vector<24x16xf32> -> vector<24x16xf32>
    %c2_72 = arith.constant 2 : index
    %c0_73 = arith.constant 0 : index
    %c0_74 = arith.constant 0 : index
    %101 = vector.load %arg18[%c2_72, %c0_73, %c0_74] : memref<20x16x16xf32, #tpu.memory_space<vmem>>, vector<1x16x16xf32>
    %102 = vector.shape_cast %101 : vector<1x16x16xf32> to vector<16x16xf32>
    %cst_75 = arith.constant dense<0.000000e+00> : vector<24x16xf32>
    %103 = tpu.matmul %100, %102, %cst_75 {dimension_numbers = #tpu.dot_dimension_numbers<[1], [0], [0], [1], [0, 0, 1, 1], [], []>} : vector<24x16xf32>, vector<16x16xf32>, vector<24x16xf32> -> vector<24x16xf32>
    %104 = arith.addf %97, %103 : vector<24x16xf32>
    %c3 = arith.constant 3 : index
    %c0_76 = arith.constant 0 : index
    %c0_77 = arith.constant 0 : index
    %105 = vector.load %arg16[%c3, %c0_76, %c0_77] : memref<5x24x16xf32, #tpu.memory_space<vmem>>, vector<1x24x16xf32>
    %106 = vector.shape_cast %105 : vector<1x24x16xf32> to vector<24x16xf32>
    %cst_78 = arith.constant dense<0.000000e+00> : vector<24x16xf32>
    %107 = tpu.matmul %106, %80, %cst_78 {dimension_numbers = #tpu.dot_dimension_numbers<[1], [0], [0], [1], [0, 0, 1, 1], [], []>} : vector<24x16xf32>, vector<16x16xf32>, vector<24x16xf32> -> vector<24x16xf32>
    %c3_79 = arith.constant 3 : index
    %c0_80 = arith.constant 0 : index
    %c0_81 = arith.constant 0 : index
    %108 = vector.load %arg18[%c3_79, %c0_80, %c0_81] : memref<20x16x16xf32, #tpu.memory_space<vmem>>, vector<1x16x16xf32>
    %109 = vector.shape_cast %108 : vector<1x16x16xf32> to vector<16x16xf32>
    %cst_82 = arith.constant dense<0.000000e+00> : vector<24x16xf32>
    %110 = tpu.matmul %107, %109, %cst_82 {dimension_numbers = #tpu.dot_dimension_numbers<[1], [0], [0], [1], [0, 0, 1, 1], [], []>} : vector<24x16xf32>, vector<16x16xf32>, vector<24x16xf32> -> vector<24x16xf32>
    %111 = arith.addf %104, %110 : vector<24x16xf32>
    %c4 = arith.constant 4 : index
    %c0_83 = arith.constant 0 : index
    %c0_84 = arith.constant 0 : index
    %112 = vector.load %arg16[%c4, %c0_83, %c0_84] : memref<5x24x16xf32, #tpu.memory_space<vmem>>, vector<1x24x16xf32>
    %113 = vector.shape_cast %112 : vector<1x24x16xf32> to vector<24x16xf32>
    %cst_85 = arith.constant dense<0.000000e+00> : vector<24x16xf32>
    %114 = tpu.matmul %113, %80, %cst_85 {dimension_numbers = #tpu.dot_dimension_numbers<[1], [0], [0], [1], [0, 0, 1, 1], [], []>} : vector<24x16xf32>, vector<16x16xf32>, vector<24x16xf32> -> vector<24x16xf32>
    %c4_86 = arith.constant 4 : index
    %c0_87 = arith.constant 0 : index
    %c0_88 = arith.constant 0 : index
    %115 = vector.load %arg18[%c4_86, %c0_87, %c0_88] : memref<20x16x16xf32, #tpu.memory_space<vmem>>, vector<1x16x16xf32>
    %116 = vector.shape_cast %115 : vector<1x16x16xf32> to vector<16x16xf32>
    %cst_89 = arith.constant dense<0.000000e+00> : vector<24x16xf32>
    %117 = tpu.matmul %114, %116, %cst_89 {dimension_numbers = #tpu.dot_dimension_numbers<[1], [0], [0], [1], [0, 0, 1, 1], [], []>} : vector<24x16xf32>, vector<16x16xf32>, vector<24x16xf32> -> vector<24x16xf32>
    %118 = arith.addf %111, %117 : vector<24x16xf32>
    %cst_90 = arith.constant 0.00999999977 : f32
    %119 = vector.broadcast %cst_90 : f32 to vector<24x16xf32>
    %120 = arith.mulf %119, %118 : vector<24x16xf32>
    %121 = arith.maximumf %118, %120 : vector<24x16xf32>
    %c1_91 = arith.constant 1 : index
    %c0_92 = arith.constant 0 : index
    %c0_93 = arith.constant 0 : index
    %122 = vector.load %arg19[%c1_91, %c0_92, %c0_93] : memref<4x1x16xf32, #tpu.memory_space<vmem>>, vector<1x1x16xf32>
    %123 = vector.shape_cast %122 : vector<1x1x16xf32> to vector<1x16xf32>
    %c0_94 = arith.constant 0 : index
    %c0_95 = arith.constant 0 : index
    %c0_96 = arith.constant 0 : index
    %124 = vector.load %arg17[%c0_94, %c0_95, %c0_96] : memref<5x16x24xf32, #tpu.memory_space<vmem>>, vector<1x16x24xf32>
    %125 = vector.shape_cast %124 : vector<1x16x24xf32> to vector<16x24xf32>
    %cst_97 = arith.constant dense<0.000000e+00> : vector<16x16xf32>
    %126 = tpu.matmul %125, %121, %cst_97 {dimension_numbers = #tpu.dot_dimension_numbers<[1], [0], [0], [1], [0, 0, 1, 1], [], []>} : vector<16x24xf32>, vector<24x16xf32>, vector<16x16xf32> -> vector<16x16xf32>
    %c5 = arith.constant 5 : index
    %c0_98 = arith.constant 0 : index
    %c0_99 = arith.constant 0 : index
    %127 = vector.load %arg18[%c5, %c0_98, %c0_99] : memref<20x16x16xf32, #tpu.memory_space<vmem>>, vector<1x16x16xf32>
    %128 = vector.shape_cast %127 : vector<1x16x16xf32> to vector<16x16xf32>
    %cst_100 = arith.constant dense<0.000000e+00> : vector<16x16xf32>
    %129 = tpu.matmul %126, %128, %cst_100 {dimension_numbers = #tpu.dot_dimension_numbers<[1], [0], [0], [1], [0, 0, 1, 1], [], []>} : vector<16x16xf32>, vector<16x16xf32>, vector<16x16xf32> -> vector<16x16xf32>
    %130 = vector.broadcast %123 : vector<1x16xf32> to vector<16x16xf32>
    %131 = arith.addf %130, %129 : vector<16x16xf32>
    %c1_101 = arith.constant 1 : index
    %c0_102 = arith.constant 0 : index
    %c0_103 = arith.constant 0 : index
    %132 = vector.load %arg17[%c1_101, %c0_102, %c0_103] : memref<5x16x24xf32, #tpu.memory_space<vmem>>, vector<1x16x24xf32>
    %133 = vector.shape_cast %132 : vector<1x16x24xf32> to vector<16x24xf32>
    %cst_104 = arith.constant dense<0.000000e+00> : vector<16x16xf32>
    %134 = tpu.matmul %133, %121, %cst_104 {dimension_numbers = #tpu.dot_dimension_numbers<[1], [0], [0], [1], [0, 0, 1, 1], [], []>} : vector<16x24xf32>, vector<24x16xf32>, vector<16x16xf32> -> vector<16x16xf32>
    %c6 = arith.constant 6 : index
    %c0_105 = arith.constant 0 : index
    %c0_106 = arith.constant 0 : index
    %135 = vector.load %arg18[%c6, %c0_105, %c0_106] : memref<20x16x16xf32, #tpu.memory_space<vmem>>, vector<1x16x16xf32>
    %136 = vector.shape_cast %135 : vector<1x16x16xf32> to vector<16x16xf32>
    %cst_107 = arith.constant dense<0.000000e+00> : vector<16x16xf32>
    %137 = tpu.matmul %134, %136, %cst_107 {dimension_numbers = #tpu.dot_dimension_numbers<[1], [0], [0], [1], [0, 0, 1, 1], [], []>} : vector<16x16xf32>, vector<16x16xf32>, vector<16x16xf32> -> vector<16x16xf32>
    %138 = arith.addf %131, %137 : vector<16x16xf32>
    %c2_108 = arith.constant 2 : index
    %c0_109 = arith.constant 0 : index
    %c0_110 = arith.constant 0 : index
    %139 = vector.load %arg17[%c2_108, %c0_109, %c0_110] : memref<5x16x24xf32, #tpu.memory_space<vmem>>, vector<1x16x24xf32>
    %140 = vector.shape_cast %139 : vector<1x16x24xf32> to vector<16x24xf32>
    %cst_111 = arith.constant dense<0.000000e+00> : vector<16x16xf32>
    %141 = tpu.matmul %140, %121, %cst_111 {dimension_numbers = #tpu.dot_dimension_numbers<[1], [0], [0], [1], [0, 0, 1, 1], [], []>} : vector<16x24xf32>, vector<24x16xf32>, vector<16x16xf32> -> vector<16x16xf32>
    %c7 = arith.constant 7 : index
    %c0_112 = arith.constant 0 : index
    %c0_113 = arith.constant 0 : index
    %142 = vector.load %arg18[%c7, %c0_112, %c0_113] : memref<20x16x16xf32, #tpu.memory_space<vmem>>, vector<1x16x16xf32>
    %143 = vector.shape_cast %142 : vector<1x16x16xf32> to vector<16x16xf32>
    %cst_114 = arith.constant dense<0.000000e+00> : vector<16x16xf32>
    %144 = tpu.matmul %141, %143, %cst_114 {dimension_numbers = #tpu.dot_dimension_numbers<[1], [0], [0], [1], [0, 0, 1, 1], [], []>} : vector<16x16xf32>, vector<16x16xf32>, vector<16x16xf32> -> vector<16x16xf32>
    %145 = arith.addf %138, %144 : vector<16x16xf32>
    %c3_115 = arith.constant 3 : index
    %c0_116 = arith.constant 0 : index
    %c0_117 = arith.constant 0 : index
    %146 = vector.load %arg17[%c3_115, %c0_116, %c0_117] : memref<5x16x24xf32, #tpu.memory_space<vmem>>, vector<1x16x24xf32>
    %147 = vector.shape_cast %146 : vector<1x16x24xf32> to vector<16x24xf32>
    %cst_118 = arith.constant dense<0.000000e+00> : vector<16x16xf32>
    %148 = tpu.matmul %147, %121, %cst_118 {dimension_numbers = #tpu.dot_dimension_numbers<[1], [0], [0], [1], [0, 0, 1, 1], [], []>} : vector<16x24xf32>, vector<24x16xf32>, vector<16x16xf32> -> vector<16x16xf32>
    %c8 = arith.constant 8 : index
    %c0_119 = arith.constant 0 : index
    %c0_120 = arith.constant 0 : index
    %149 = vector.load %arg18[%c8, %c0_119, %c0_120] : memref<20x16x16xf32, #tpu.memory_space<vmem>>, vector<1x16x16xf32>
    %150 = vector.shape_cast %149 : vector<1x16x16xf32> to vector<16x16xf32>
    %cst_121 = arith.constant dense<0.000000e+00> : vector<16x16xf32>
    %151 = tpu.matmul %148, %150, %cst_121 {dimension_numbers = #tpu.dot_dimension_numbers<[1], [0], [0], [1], [0, 0, 1, 1], [], []>} : vector<16x16xf32>, vector<16x16xf32>, vector<16x16xf32> -> vector<16x16xf32>
    %152 = arith.addf %145, %151 : vector<16x16xf32>
    %c4_122 = arith.constant 4 : index
    %c0_123 = arith.constant 0 : index
    %c0_124 = arith.constant 0 : index
    %153 = vector.load %arg17[%c4_122, %c0_123, %c0_124] : memref<5x16x24xf32, #tpu.memory_space<vmem>>, vector<1x16x24xf32>
    %154 = vector.shape_cast %153 : vector<1x16x24xf32> to vector<16x24xf32>
    %cst_125 = arith.constant dense<0.000000e+00> : vector<16x16xf32>
    %155 = tpu.matmul %154, %121, %cst_125 {dimension_numbers = #tpu.dot_dimension_numbers<[1], [0], [0], [1], [0, 0, 1, 1], [], []>} : vector<16x24xf32>, vector<24x16xf32>, vector<16x16xf32> -> vector<16x16xf32>
    %c9 = arith.constant 9 : index
    %c0_126 = arith.constant 0 : index
    %c0_127 = arith.constant 0 : index
    %156 = vector.load %arg18[%c9, %c0_126, %c0_127] : memref<20x16x16xf32, #tpu.memory_space<vmem>>, vector<1x16x16xf32>
    %157 = vector.shape_cast %156 : vector<1x16x16xf32> to vector<16x16xf32>
    %cst_128 = arith.constant dense<0.000000e+00> : vector<16x16xf32>
    %158 = tpu.matmul %155, %157, %cst_128 {dimension_numbers = #tpu.dot_dimension_numbers<[1], [0], [0], [1], [0, 0, 1, 1], [], []>} : vector<16x16xf32>, vector<16x16xf32>, vector<16x16xf32> -> vector<16x16xf32>
    %159 = arith.addf %152, %158 : vector<16x16xf32>
    %160 = math.tanh %159 : vector<16x16xf32>
    %161 = vector.extract_strided_slice %160 {offsets = [0, 0], sizes = [16, 8], strides = [1, 1]} : vector<16x16xf32> to vector<16x8xf32>
    %162 = math.exp %161 : vector<16x8xf32>
    %163 = arith.mulf %76, %162 : vector<16x8xf32>
    %164 = vector.extract_strided_slice %160 {offsets = [0, 8], sizes = [16, 8], strides = [1, 1]} : vector<16x16xf32> to vector<16x8xf32>
    %165 = math.exp %164 : vector<16x8xf32>
    %166 = arith.mulf %79, %165 : vector<16x8xf32>
    %167 = tpu.concatenate %166, %163 in 1 : vector<16x8xf32>, vector<16x8xf32> -> vector<16x16xf32>
    %c2_129 = arith.constant 2 : index
    %c0_130 = arith.constant 0 : index
    %c0_131 = arith.constant 0 : index
    %168 = vector.load %arg19[%c2_129, %c0_130, %c0_131] : memref<4x1x16xf32, #tpu.memory_space<vmem>>, vector<1x1x16xf32>
    %169 = vector.shape_cast %168 : vector<1x1x16xf32> to vector<1x16xf32>
    %c0_132 = arith.constant 0 : index
    %c0_133 = arith.constant 0 : index
    %c0_134 = arith.constant 0 : index
    %170 = vector.load %arg16[%c0_132, %c0_133, %c0_134] : memref<5x24x16xf32, #tpu.memory_space<vmem>>, vector<1x24x16xf32>
    %171 = vector.shape_cast %170 : vector<1x24x16xf32> to vector<24x16xf32>
    %cst_135 = arith.constant dense<0.000000e+00> : vector<24x16xf32>
    %172 = tpu.matmul %171, %167, %cst_135 {dimension_numbers = #tpu.dot_dimension_numbers<[1], [0], [0], [1], [0, 0, 1, 1], [], []>} : vector<24x16xf32>, vector<16x16xf32>, vector<24x16xf32> -> vector<24x16xf32>
    %c10 = arith.constant 10 : index
    %c0_136 = arith.constant 0 : index
    %c0_137 = arith.constant 0 : index
    %173 = vector.load %arg18[%c10, %c0_136, %c0_137] : memref<20x16x16xf32, #tpu.memory_space<vmem>>, vector<1x16x16xf32>
    %174 = vector.shape_cast %173 : vector<1x16x16xf32> to vector<16x16xf32>
    %cst_138 = arith.constant dense<0.000000e+00> : vector<24x16xf32>
    %175 = tpu.matmul %172, %174, %cst_138 {dimension_numbers = #tpu.dot_dimension_numbers<[1], [0], [0], [1], [0, 0, 1, 1], [], []>} : vector<24x16xf32>, vector<16x16xf32>, vector<24x16xf32> -> vector<24x16xf32>
    %176 = vector.broadcast %169 : vector<1x16xf32> to vector<24x16xf32>
    %177 = arith.addf %176, %175 : vector<24x16xf32>
    %c1_139 = arith.constant 1 : index
    %c0_140 = arith.constant 0 : index
    %c0_141 = arith.constant 0 : index
    %178 = vector.load %arg16[%c1_139, %c0_140, %c0_141] : memref<5x24x16xf32, #tpu.memory_space<vmem>>, vector<1x24x16xf32>
    %179 = vector.shape_cast %178 : vector<1x24x16xf32> to vector<24x16xf32>
    %cst_142 = arith.constant dense<0.000000e+00> : vector<24x16xf32>
    %180 = tpu.matmul %179, %167, %cst_142 {dimension_numbers = #tpu.dot_dimension_numbers<[1], [0], [0], [1], [0, 0, 1, 1], [], []>} : vector<24x16xf32>, vector<16x16xf32>, vector<24x16xf32> -> vector<24x16xf32>
    %c11 = arith.constant 11 : index
    %c0_143 = arith.constant 0 : index
    %c0_144 = arith.constant 0 : index
    %181 = vector.load %arg18[%c11, %c0_143, %c0_144] : memref<20x16x16xf32, #tpu.memory_space<vmem>>, vector<1x16x16xf32>
    %182 = vector.shape_cast %181 : vector<1x16x16xf32> to vector<16x16xf32>
    %cst_145 = arith.constant dense<0.000000e+00> : vector<24x16xf32>
    %183 = tpu.matmul %180, %182, %cst_145 {dimension_numbers = #tpu.dot_dimension_numbers<[1], [0], [0], [1], [0, 0, 1, 1], [], []>} : vector<24x16xf32>, vector<16x16xf32>, vector<24x16xf32> -> vector<24x16xf32>
    %184 = arith.addf %177, %183 : vector<24x16xf32>
    %c2_146 = arith.constant 2 : index
    %c0_147 = arith.constant 0 : index
    %c0_148 = arith.constant 0 : index
    %185 = vector.load %arg16[%c2_146, %c0_147, %c0_148] : memref<5x24x16xf32, #tpu.memory_space<vmem>>, vector<1x24x16xf32>
    %186 = vector.shape_cast %185 : vector<1x24x16xf32> to vector<24x16xf32>
    %cst_149 = arith.constant dense<0.000000e+00> : vector<24x16xf32>
    %187 = tpu.matmul %186, %167, %cst_149 {dimension_numbers = #tpu.dot_dimension_numbers<[1], [0], [0], [1], [0, 0, 1, 1], [], []>} : vector<24x16xf32>, vector<16x16xf32>, vector<24x16xf32> -> vector<24x16xf32>
    %c12 = arith.constant 12 : index
    %c0_150 = arith.constant 0 : index
    %c0_151 = arith.constant 0 : index
    %188 = vector.load %arg18[%c12, %c0_150, %c0_151] : memref<20x16x16xf32, #tpu.memory_space<vmem>>, vector<1x16x16xf32>
    %189 = vector.shape_cast %188 : vector<1x16x16xf32> to vector<16x16xf32>
    %cst_152 = arith.constant dense<0.000000e+00> : vector<24x16xf32>
    %190 = tpu.matmul %187, %189, %cst_152 {dimension_numbers = #tpu.dot_dimension_numbers<[1], [0], [0], [1], [0, 0, 1, 1], [], []>} : vector<24x16xf32>, vector<16x16xf32>, vector<24x16xf32> -> vector<24x16xf32>
    %191 = arith.addf %184, %190 : vector<24x16xf32>
    %c3_153 = arith.constant 3 : index
    %c0_154 = arith.constant 0 : index
    %c0_155 = arith.constant 0 : index
    %192 = vector.load %arg16[%c3_153, %c0_154, %c0_155] : memref<5x24x16xf32, #tpu.memory_space<vmem>>, vector<1x24x16xf32>
    %193 = vector.shape_cast %192 : vector<1x24x16xf32> to vector<24x16xf32>
    %cst_156 = arith.constant dense<0.000000e+00> : vector<24x16xf32>
    %194 = tpu.matmul %193, %167, %cst_156 {dimension_numbers = #tpu.dot_dimension_numbers<[1], [0], [0], [1], [0, 0, 1, 1], [], []>} : vector<24x16xf32>, vector<16x16xf32>, vector<24x16xf32> -> vector<24x16xf32>
    %c13 = arith.constant 13 : index
    %c0_157 = arith.constant 0 : index
    %c0_158 = arith.constant 0 : index
    %195 = vector.load %arg18[%c13, %c0_157, %c0_158] : memref<20x16x16xf32, #tpu.memory_space<vmem>>, vector<1x16x16xf32>
    %196 = vector.shape_cast %195 : vector<1x16x16xf32> to vector<16x16xf32>
    %cst_159 = arith.constant dense<0.000000e+00> : vector<24x16xf32>
    %197 = tpu.matmul %194, %196, %cst_159 {dimension_numbers = #tpu.dot_dimension_numbers<[1], [0], [0], [1], [0, 0, 1, 1], [], []>} : vector<24x16xf32>, vector<16x16xf32>, vector<24x16xf32> -> vector<24x16xf32>
    %198 = arith.addf %191, %197 : vector<24x16xf32>
    %c4_160 = arith.constant 4 : index
    %c0_161 = arith.constant 0 : index
    %c0_162 = arith.constant 0 : index
    %199 = vector.load %arg16[%c4_160, %c0_161, %c0_162] : memref<5x24x16xf32, #tpu.memory_space<vmem>>, vector<1x24x16xf32>
    %200 = vector.shape_cast %199 : vector<1x24x16xf32> to vector<24x16xf32>
    %cst_163 = arith.constant dense<0.000000e+00> : vector<24x16xf32>
    %201 = tpu.matmul %200, %167, %cst_163 {dimension_numbers = #tpu.dot_dimension_numbers<[1], [0], [0], [1], [0, 0, 1, 1], [], []>} : vector<24x16xf32>, vector<16x16xf32>, vector<24x16xf32> -> vector<24x16xf32>
    %c14 = arith.constant 14 : index
    %c0_164 = arith.constant 0 : index
    %c0_165 = arith.constant 0 : index
    %202 = vector.load %arg18[%c14, %c0_164, %c0_165] : memref<20x16x16xf32, #tpu.memory_space<vmem>>, vector<1x16x16xf32>
    %203 = vector.shape_cast %202 : vector<1x16x16xf32> to vector<16x16xf32>
    %cst_166 = arith.constant dense<0.000000e+00> : vector<24x16xf32>
    %204 = tpu.matmul %201, %203, %cst_166 {dimension_numbers = #tpu.dot_dimension_numbers<[1], [0], [0], [1], [0, 0, 1, 1], [], []>} : vector<24x16xf32>, vector<16x16xf32>, vector<24x16xf32> -> vector<24x16xf32>
    %205 = arith.addf %198, %204 : vector<24x16xf32>
    %cst_167 = arith.constant 0.00999999977 : f32
    %206 = vector.broadcast %cst_167 : f32 to vector<24x16xf32>
    %207 = arith.mulf %206, %205 : vector<24x16xf32>
    %208 = arith.maximumf %205, %207 : vector<24x16xf32>
    %c3_168 = arith.constant 3 : index
    %c0_169 = arith.constant 0 : index
    %c0_170 = arith.constant 0 : index
    %209 = vector.load %arg19[%c3_168, %c0_169, %c0_170] : memref<4x1x16xf32, #tpu.memory_space<vmem>>, vector<1x1x16xf32>
    %210 = vector.shape_cast %209 : vector<1x1x16xf32> to vector<1x16xf32>
    %c0_171 = arith.constant 0 : index
    %c0_172 = arith.constant 0 : index
    %c0_173 = arith.constant 0 : index
    %211 = vector.load %arg17[%c0_171, %c0_172, %c0_173] : memref<5x16x24xf32, #tpu.memory_space<vmem>>, vector<1x16x24xf32>
    %212 = vector.shape_cast %211 : vector<1x16x24xf32> to vector<16x24xf32>
    %cst_174 = arith.constant dense<0.000000e+00> : vector<16x16xf32>
    %213 = tpu.matmul %212, %208, %cst_174 {dimension_numbers = #tpu.dot_dimension_numbers<[1], [0], [0], [1], [0, 0, 1, 1], [], []>} : vector<16x24xf32>, vector<24x16xf32>, vector<16x16xf32> -> vector<16x16xf32>
    %c15 = arith.constant 15 : index
    %c0_175 = arith.constant 0 : index
    %c0_176 = arith.constant 0 : index
    %214 = vector.load %arg18[%c15, %c0_175, %c0_176] : memref<20x16x16xf32, #tpu.memory_space<vmem>>, vector<1x16x16xf32>
    %215 = vector.shape_cast %214 : vector<1x16x16xf32> to vector<16x16xf32>
    %cst_177 = arith.constant dense<0.000000e+00> : vector<16x16xf32>
    %216 = tpu.matmul %213, %215, %cst_177 {dimension_numbers = #tpu.dot_dimension_numbers<[1], [0], [0], [1], [0, 0, 1, 1], [], []>} : vector<16x16xf32>, vector<16x16xf32>, vector<16x16xf32> -> vector<16x16xf32>
    %217 = vector.broadcast %210 : vector<1x16xf32> to vector<16x16xf32>
    %218 = arith.addf %217, %216 : vector<16x16xf32>
    %c1_178 = arith.constant 1 : index
    %c0_179 = arith.constant 0 : index
    %c0_180 = arith.constant 0 : index
    %219 = vector.load %arg17[%c1_178, %c0_179, %c0_180] : memref<5x16x24xf32, #tpu.memory_space<vmem>>, vector<1x16x24xf32>
    %220 = vector.shape_cast %219 : vector<1x16x24xf32> to vector<16x24xf32>
    %cst_181 = arith.constant dense<0.000000e+00> : vector<16x16xf32>
    %221 = tpu.matmul %220, %208, %cst_181 {dimension_numbers = #tpu.dot_dimension_numbers<[1], [0], [0], [1], [0, 0, 1, 1], [], []>} : vector<16x24xf32>, vector<24x16xf32>, vector<16x16xf32> -> vector<16x16xf32>
    %c16 = arith.constant 16 : index
    %c0_182 = arith.constant 0 : index
    %c0_183 = arith.constant 0 : index
    %222 = vector.load %arg18[%c16, %c0_182, %c0_183] : memref<20x16x16xf32, #tpu.memory_space<vmem>>, vector<1x16x16xf32>
    %223 = vector.shape_cast %222 : vector<1x16x16xf32> to vector<16x16xf32>
    %cst_184 = arith.constant dense<0.000000e+00> : vector<16x16xf32>
    %224 = tpu.matmul %221, %223, %cst_184 {dimension_numbers = #tpu.dot_dimension_numbers<[1], [0], [0], [1], [0, 0, 1, 1], [], []>} : vector<16x16xf32>, vector<16x16xf32>, vector<16x16xf32> -> vector<16x16xf32>
    %225 = arith.addf %218, %224 : vector<16x16xf32>
    %c2_185 = arith.constant 2 : index
    %c0_186 = arith.constant 0 : index
    %c0_187 = arith.constant 0 : index
    %226 = vector.load %arg17[%c2_185, %c0_186, %c0_187] : memref<5x16x24xf32, #tpu.memory_space<vmem>>, vector<1x16x24xf32>
    %227 = vector.shape_cast %226 : vector<1x16x24xf32> to vector<16x24xf32>
    %cst_188 = arith.constant dense<0.000000e+00> : vector<16x16xf32>
    %228 = tpu.matmul %227, %208, %cst_188 {dimension_numbers = #tpu.dot_dimension_numbers<[1], [0], [0], [1], [0, 0, 1, 1], [], []>} : vector<16x24xf32>, vector<24x16xf32>, vector<16x16xf32> -> vector<16x16xf32>
    %c17 = arith.constant 17 : index
    %c0_189 = arith.constant 0 : index
    %c0_190 = arith.constant 0 : index
    %229 = vector.load %arg18[%c17, %c0_189, %c0_190] : memref<20x16x16xf32, #tpu.memory_space<vmem>>, vector<1x16x16xf32>
    %230 = vector.shape_cast %229 : vector<1x16x16xf32> to vector<16x16xf32>
    %cst_191 = arith.constant dense<0.000000e+00> : vector<16x16xf32>
    %231 = tpu.matmul %228, %230, %cst_191 {dimension_numbers = #tpu.dot_dimension_numbers<[1], [0], [0], [1], [0, 0, 1, 1], [], []>} : vector<16x16xf32>, vector<16x16xf32>, vector<16x16xf32> -> vector<16x16xf32>
    %232 = arith.addf %225, %231 : vector<16x16xf32>
    %c3_192 = arith.constant 3 : index
    %c0_193 = arith.constant 0 : index
    %c0_194 = arith.constant 0 : index
    %233 = vector.load %arg17[%c3_192, %c0_193, %c0_194] : memref<5x16x24xf32, #tpu.memory_space<vmem>>, vector<1x16x24xf32>
    %234 = vector.shape_cast %233 : vector<1x16x24xf32> to vector<16x24xf32>
    %cst_195 = arith.constant dense<0.000000e+00> : vector<16x16xf32>
    %235 = tpu.matmul %234, %208, %cst_195 {dimension_numbers = #tpu.dot_dimension_numbers<[1], [0], [0], [1], [0, 0, 1, 1], [], []>} : vector<16x24xf32>, vector<24x16xf32>, vector<16x16xf32> -> vector<16x16xf32>
    %c18 = arith.constant 18 : index
    %c0_196 = arith.constant 0 : index
    %c0_197 = arith.constant 0 : index
    %236 = vector.load %arg18[%c18, %c0_196, %c0_197] : memref<20x16x16xf32, #tpu.memory_space<vmem>>, vector<1x16x16xf32>
    %237 = vector.shape_cast %236 : vector<1x16x16xf32> to vector<16x16xf32>
    %cst_198 = arith.constant dense<0.000000e+00> : vector<16x16xf32>
    %238 = tpu.matmul %235, %237, %cst_198 {dimension_numbers = #tpu.dot_dimension_numbers<[1], [0], [0], [1], [0, 0, 1, 1], [], []>} : vector<16x16xf32>, vector<16x16xf32>, vector<16x16xf32> -> vector<16x16xf32>
    %239 = arith.addf %232, %238 : vector<16x16xf32>
    %c4_199 = arith.constant 4 : index
    %c0_200 = arith.constant 0 : index
    %c0_201 = arith.constant 0 : index
    %240 = vector.load %arg17[%c4_199, %c0_200, %c0_201] : memref<5x16x24xf32, #tpu.memory_space<vmem>>, vector<1x16x24xf32>
    %241 = vector.shape_cast %240 : vector<1x16x24xf32> to vector<16x24xf32>
    %cst_202 = arith.constant dense<0.000000e+00> : vector<16x16xf32>
    %242 = tpu.matmul %241, %208, %cst_202 {dimension_numbers = #tpu.dot_dimension_numbers<[1], [0], [0], [1], [0, 0, 1, 1], [], []>} : vector<16x24xf32>, vector<24x16xf32>, vector<16x16xf32> -> vector<16x16xf32>
    %c19 = arith.constant 19 : index
    %c0_203 = arith.constant 0 : index
    %c0_204 = arith.constant 0 : index
    %243 = vector.load %arg18[%c19, %c0_203, %c0_204] : memref<20x16x16xf32, #tpu.memory_space<vmem>>, vector<1x16x16xf32>
    %244 = vector.shape_cast %243 : vector<1x16x16xf32> to vector<16x16xf32>
    %cst_205 = arith.constant dense<0.000000e+00> : vector<16x16xf32>
    %245 = tpu.matmul %242, %244, %cst_205 {dimension_numbers = #tpu.dot_dimension_numbers<[1], [0], [0], [1], [0, 0, 1, 1], [], []>} : vector<16x16xf32>, vector<16x16xf32>, vector<16x16xf32> -> vector<16x16xf32>
    %246 = arith.addf %239, %245 : vector<16x16xf32>
    %247 = math.tanh %246 : vector<16x16xf32>
    %248 = vector.extract_strided_slice %247 {offsets = [0, 0], sizes = [16, 8], strides = [1, 1]} : vector<16x16xf32> to vector<16x8xf32>
    %249 = arith.addf %163, %248 : vector<16x8xf32>
    %250 = vector.extract_strided_slice %247 {offsets = [0, 8], sizes = [16, 8], strides = [1, 1]} : vector<16x16xf32> to vector<16x8xf32>
    %251 = arith.subf %166, %250 : vector<16x8xf32>
    %252 = tpu.concatenate %249, %251 in 1 : vector<16x8xf32>, vector<16x8xf32> -> vector<16x16xf32>
    %c0_206 = arith.constant 0 : index
    %c0_207 = arith.constant 0 : index
    %c0_208 = arith.constant 0 : index
    %253 = vector.load %arg20[%c0_206, %c0_207, %c0_208] : memref<2x8x16xf32, #tpu.memory_space<vmem>>, vector<1x8x16xf32>
    %254 = vector.shape_cast %253 : vector<1x8x16xf32> to vector<8x16xf32>
    %cst_209 = arith.constant dense<0.000000e+00> : vector<8x16xf32>
    %255 = tpu.matmul %254, %252, %cst_209 {dimension_numbers = #tpu.dot_dimension_numbers<[1], [0], [0], [1], [0, 0, 1, 1], [], []>} : vector<8x16xf32>, vector<16x16xf32>, vector<8x16xf32> -> vector<8x16xf32>
    %c1_210 = arith.constant 1 : index
    %c0_211 = arith.constant 0 : index
    %c0_212 = arith.constant 0 : index
    %256 = vector.load %arg20[%c1_210, %c0_211, %c0_212] : memref<2x8x16xf32, #tpu.memory_space<vmem>>, vector<1x8x16xf32>
    %257 = vector.shape_cast %256 : vector<1x8x16xf32> to vector<8x16xf32>
    %cst_213 = arith.constant dense<0.000000e+00> : vector<8x16xf32>
    %258 = tpu.matmul %257, %252, %cst_213 {dimension_numbers = #tpu.dot_dimension_numbers<[1], [0], [0], [1], [0, 0, 1, 1], [], []>} : vector<8x16xf32>, vector<16x16xf32>, vector<8x16xf32> -> vector<8x16xf32>
    %259 = tpu.concatenate %258, %255 in 1 : vector<8x16xf32>, vector<8x16xf32> -> vector<8x32xf32>
    %c0_214 = arith.constant 0 : index
    %c0_215 = arith.constant 0 : index
    %c0_216 = arith.constant 0 : index
    %260 = vector.load %arg25[%c0_214, %c0_215, %c0_216] : memref<4x1x32xf32, #tpu.memory_space<vmem>>, vector<1x1x32xf32>
    %261 = vector.shape_cast %260 : vector<1x1x32xf32> to vector<1x32xf32>
    %c0_217 = arith.constant 0 : index
    %c0_218 = arith.constant 0 : index
    %c0_219 = arith.constant 0 : index
    %262 = vector.load %arg22[%c0_217, %c0_218, %c0_219] : memref<5x16x8xf32, #tpu.memory_space<vmem>>, vector<1x16x8xf32>
    %263 = vector.shape_cast %262 : vector<1x16x8xf32> to vector<16x8xf32>
    %cst_220 = arith.constant dense<0.000000e+00> : vector<16x32xf32>
    %264 = tpu.matmul %263, %259, %cst_220 {dimension_numbers = #tpu.dot_dimension_numbers<[1], [0], [0], [1], [0, 0, 1, 1], [], []>} : vector<16x8xf32>, vector<8x32xf32>, vector<16x32xf32> -> vector<16x32xf32>
    %c0_221 = arith.constant 0 : index
    %c0_222 = arith.constant 0 : index
    %c0_223 = arith.constant 0 : index
    %265 = vector.load %arg24[%c0_221, %c0_222, %c0_223] : memref<20x32x32xf32, #tpu.memory_space<vmem>>, vector<1x32x32xf32>
    %266 = vector.shape_cast %265 : vector<1x32x32xf32> to vector<32x32xf32>
    %cst_224 = arith.constant dense<0.000000e+00> : vector<16x32xf32>
    %267 = tpu.matmul %264, %266, %cst_224 {dimension_numbers = #tpu.dot_dimension_numbers<[1], [0], [0], [1], [0, 0, 1, 1], [], []>} : vector<16x32xf32>, vector<32x32xf32>, vector<16x32xf32> -> vector<16x32xf32>
    %268 = vector.broadcast %261 : vector<1x32xf32> to vector<16x32xf32>
    %269 = arith.addf %268, %267 : vector<16x32xf32>
    %c1_225 = arith.constant 1 : index
    %c0_226 = arith.constant 0 : index
    %c0_227 = arith.constant 0 : index
    %270 = vector.load %arg22[%c1_225, %c0_226, %c0_227] : memref<5x16x8xf32, #tpu.memory_space<vmem>>, vector<1x16x8xf32>
    %271 = vector.shape_cast %270 : vector<1x16x8xf32> to vector<16x8xf32>
    %cst_228 = arith.constant dense<0.000000e+00> : vector<16x32xf32>
    %272 = tpu.matmul %271, %259, %cst_228 {dimension_numbers = #tpu.dot_dimension_numbers<[1], [0], [0], [1], [0, 0, 1, 1], [], []>} : vector<16x8xf32>, vector<8x32xf32>, vector<16x32xf32> -> vector<16x32xf32>
    %c1_229 = arith.constant 1 : index
    %c0_230 = arith.constant 0 : index
    %c0_231 = arith.constant 0 : index
    %273 = vector.load %arg24[%c1_229, %c0_230, %c0_231] : memref<20x32x32xf32, #tpu.memory_space<vmem>>, vector<1x32x32xf32>
    %274 = vector.shape_cast %273 : vector<1x32x32xf32> to vector<32x32xf32>
    %cst_232 = arith.constant dense<0.000000e+00> : vector<16x32xf32>
    %275 = tpu.matmul %272, %274, %cst_232 {dimension_numbers = #tpu.dot_dimension_numbers<[1], [0], [0], [1], [0, 0, 1, 1], [], []>} : vector<16x32xf32>, vector<32x32xf32>, vector<16x32xf32> -> vector<16x32xf32>
    %276 = arith.addf %269, %275 : vector<16x32xf32>
    %c2_233 = arith.constant 2 : index
    %c0_234 = arith.constant 0 : index
    %c0_235 = arith.constant 0 : index
    %277 = vector.load %arg22[%c2_233, %c0_234, %c0_235] : memref<5x16x8xf32, #tpu.memory_space<vmem>>, vector<1x16x8xf32>
    %278 = vector.shape_cast %277 : vector<1x16x8xf32> to vector<16x8xf32>
    %cst_236 = arith.constant dense<0.000000e+00> : vector<16x32xf32>
    %279 = tpu.matmul %278, %259, %cst_236 {dimension_numbers = #tpu.dot_dimension_numbers<[1], [0], [0], [1], [0, 0, 1, 1], [], []>} : vector<16x8xf32>, vector<8x32xf32>, vector<16x32xf32> -> vector<16x32xf32>
    %c2_237 = arith.constant 2 : index
    %c0_238 = arith.constant 0 : index
    %c0_239 = arith.constant 0 : index
    %280 = vector.load %arg24[%c2_237, %c0_238, %c0_239] : memref<20x32x32xf32, #tpu.memory_space<vmem>>, vector<1x32x32xf32>
    %281 = vector.shape_cast %280 : vector<1x32x32xf32> to vector<32x32xf32>
    %cst_240 = arith.constant dense<0.000000e+00> : vector<16x32xf32>
    %282 = tpu.matmul %279, %281, %cst_240 {dimension_numbers = #tpu.dot_dimension_numbers<[1], [0], [0], [1], [0, 0, 1, 1], [], []>} : vector<16x32xf32>, vector<32x32xf32>, vector<16x32xf32> -> vector<16x32xf32>
    %283 = arith.addf %276, %282 : vector<16x32xf32>
    %c3_241 = arith.constant 3 : index
    %c0_242 = arith.constant 0 : index
    %c0_243 = arith.constant 0 : index
    %284 = vector.load %arg22[%c3_241, %c0_242, %c0_243] : memref<5x16x8xf32, #tpu.memory_space<vmem>>, vector<1x16x8xf32>
    %285 = vector.shape_cast %284 : vector<1x16x8xf32> to vector<16x8xf32>
    %cst_244 = arith.constant dense<0.000000e+00> : vector<16x32xf32>
    %286 = tpu.matmul %285, %259, %cst_244 {dimension_numbers = #tpu.dot_dimension_numbers<[1], [0], [0], [1], [0, 0, 1, 1], [], []>} : vector<16x8xf32>, vector<8x32xf32>, vector<16x32xf32> -> vector<16x32xf32>
    %c3_245 = arith.constant 3 : index
    %c0_246 = arith.constant 0 : index
    %c0_247 = arith.constant 0 : index
    %287 = vector.load %arg24[%c3_245, %c0_246, %c0_247] : memref<20x32x32xf32, #tpu.memory_space<vmem>>, vector<1x32x32xf32>
    %288 = vector.shape_cast %287 : vector<1x32x32xf32> to vector<32x32xf32>
    %cst_248 = arith.constant dense<0.000000e+00> : vector<16x32xf32>
    %289 = tpu.matmul %286, %288, %cst_248 {dimension_numbers = #tpu.dot_dimension_numbers<[1], [0], [0], [1], [0, 0, 1, 1], [], []>} : vector<16x32xf32>, vector<32x32xf32>, vector<16x32xf32> -> vector<16x32xf32>
    %290 = arith.addf %283, %289 : vector<16x32xf32>
    %c4_249 = arith.constant 4 : index
    %c0_250 = arith.constant 0 : index
    %c0_251 = arith.constant 0 : index
    %291 = vector.load %arg22[%c4_249, %c0_250, %c0_251] : memref<5x16x8xf32, #tpu.memory_space<vmem>>, vector<1x16x8xf32>
    %292 = vector.shape_cast %291 : vector<1x16x8xf32> to vector<16x8xf32>
    %cst_252 = arith.constant dense<0.000000e+00> : vector<16x32xf32>
    %293 = tpu.matmul %292, %259, %cst_252 {dimension_numbers = #tpu.dot_dimension_numbers<[1], [0], [0], [1], [0, 0, 1, 1], [], []>} : vector<16x8xf32>, vector<8x32xf32>, vector<16x32xf32> -> vector<16x32xf32>
    %c4_253 = arith.constant 4 : index
    %c0_254 = arith.constant 0 : index
    %c0_255 = arith.constant 0 : index
    %294 = vector.load %arg24[%c4_253, %c0_254, %c0_255] : memref<20x32x32xf32, #tpu.memory_space<vmem>>, vector<1x32x32xf32>
    %295 = vector.shape_cast %294 : vector<1x32x32xf32> to vector<32x32xf32>
    %cst_256 = arith.constant dense<0.000000e+00> : vector<16x32xf32>
    %296 = tpu.matmul %293, %295, %cst_256 {dimension_numbers = #tpu.dot_dimension_numbers<[1], [0], [0], [1], [0, 0, 1, 1], [], []>} : vector<16x32xf32>, vector<32x32xf32>, vector<16x32xf32> -> vector<16x32xf32>
    %297 = arith.addf %290, %296 : vector<16x32xf32>
    %cst_257 = arith.constant 0.00999999977 : f32
    %298 = vector.broadcast %cst_257 : f32 to vector<16x32xf32>
    %299 = arith.mulf %298, %297 : vector<16x32xf32>
    %300 = arith.maximumf %297, %299 : vector<16x32xf32>
    %c1_258 = arith.constant 1 : index
    %c0_259 = arith.constant 0 : index
    %c0_260 = arith.constant 0 : index
    %301 = vector.load %arg25[%c1_258, %c0_259, %c0_260] : memref<4x1x32xf32, #tpu.memory_space<vmem>>, vector<1x1x32xf32>
    %302 = vector.shape_cast %301 : vector<1x1x32xf32> to vector<1x32xf32>
    %c0_261 = arith.constant 0 : index
    %c0_262 = arith.constant 0 : index
    %c0_263 = arith.constant 0 : index
    %303 = vector.load %arg23[%c0_261, %c0_262, %c0_263] : memref<5x8x16xf32, #tpu.memory_space<vmem>>, vector<1x8x16xf32>
    %304 = vector.shape_cast %303 : vector<1x8x16xf32> to vector<8x16xf32>
    %cst_264 = arith.constant dense<0.000000e+00> : vector<8x32xf32>
    %305 = tpu.matmul %304, %300, %cst_264 {dimension_numbers = #tpu.dot_dimension_numbers<[1], [0], [0], [1], [0, 0, 1, 1], [], []>} : vector<8x16xf32>, vector<16x32xf32>, vector<8x32xf32> -> vector<8x32xf32>
    %c5_265 = arith.constant 5 : index
    %c0_266 = arith.constant 0 : index
    %c0_267 = arith.constant 0 : index
    %306 = vector.load %arg24[%c5_265, %c0_266, %c0_267] : memref<20x32x32xf32, #tpu.memory_space<vmem>>, vector<1x32x32xf32>
    %307 = vector.shape_cast %306 : vector<1x32x32xf32> to vector<32x32xf32>
    %cst_268 = arith.constant dense<0.000000e+00> : vector<8x32xf32>
    %308 = tpu.matmul %305, %307, %cst_268 {dimension_numbers = #tpu.dot_dimension_numbers<[1], [0], [0], [1], [0, 0, 1, 1], [], []>} : vector<8x32xf32>, vector<32x32xf32>, vector<8x32xf32> -> vector<8x32xf32>
    %309 = vector.broadcast %302 : vector<1x32xf32> to vector<8x32xf32>
    %310 = arith.addf %309, %308 : vector<8x32xf32>
    %c1_269 = arith.constant 1 : index
    %c0_270 = arith.constant 0 : index
    %c0_271 = arith.constant 0 : index
    %311 = vector.load %arg23[%c1_269, %c0_270, %c0_271] : memref<5x8x16xf32, #tpu.memory_space<vmem>>, vector<1x8x16xf32>
    %312 = vector.shape_cast %311 : vector<1x8x16xf32> to vector<8x16xf32>
    %cst_272 = arith.constant dense<0.000000e+00> : vector<8x32xf32>
    %313 = tpu.matmul %312, %300, %cst_272 {dimension_numbers = #tpu.dot_dimension_numbers<[1], [0], [0], [1], [0, 0, 1, 1], [], []>} : vector<8x16xf32>, vector<16x32xf32>, vector<8x32xf32> -> vector<8x32xf32>
    %c6_273 = arith.constant 6 : index
    %c0_274 = arith.constant 0 : index
    %c0_275 = arith.constant 0 : index
    %314 = vector.load %arg24[%c6_273, %c0_274, %c0_275] : memref<20x32x32xf32, #tpu.memory_space<vmem>>, vector<1x32x32xf32>
    %315 = vector.shape_cast %314 : vector<1x32x32xf32> to vector<32x32xf32>
    %cst_276 = arith.constant dense<0.000000e+00> : vector<8x32xf32>
    %316 = tpu.matmul %313, %315, %cst_276 {dimension_numbers = #tpu.dot_dimension_numbers<[1], [0], [0], [1], [0, 0, 1, 1], [], []>} : vector<8x32xf32>, vector<32x32xf32>, vector<8x32xf32> -> vector<8x32xf32>
    %317 = arith.addf %310, %316 : vector<8x32xf32>
    %c2_277 = arith.constant 2 : index
    %c0_278 = arith.constant 0 : index
    %c0_279 = arith.constant 0 : index
    %318 = vector.load %arg23[%c2_277, %c0_278, %c0_279] : memref<5x8x16xf32, #tpu.memory_space<vmem>>, vector<1x8x16xf32>
    %319 = vector.shape_cast %318 : vector<1x8x16xf32> to vector<8x16xf32>
    %cst_280 = arith.constant dense<0.000000e+00> : vector<8x32xf32>
    %320 = tpu.matmul %319, %300, %cst_280 {dimension_numbers = #tpu.dot_dimension_numbers<[1], [0], [0], [1], [0, 0, 1, 1], [], []>} : vector<8x16xf32>, vector<16x32xf32>, vector<8x32xf32> -> vector<8x32xf32>
    %c7_281 = arith.constant 7 : index
    %c0_282 = arith.constant 0 : index
    %c0_283 = arith.constant 0 : index
    %321 = vector.load %arg24[%c7_281, %c0_282, %c0_283] : memref<20x32x32xf32, #tpu.memory_space<vmem>>, vector<1x32x32xf32>
    %322 = vector.shape_cast %321 : vector<1x32x32xf32> to vector<32x32xf32>
    %cst_284 = arith.constant dense<0.000000e+00> : vector<8x32xf32>
    %323 = tpu.matmul %320, %322, %cst_284 {dimension_numbers = #tpu.dot_dimension_numbers<[1], [0], [0], [1], [0, 0, 1, 1], [], []>} : vector<8x32xf32>, vector<32x32xf32>, vector<8x32xf32> -> vector<8x32xf32>
    %324 = arith.addf %317, %323 : vector<8x32xf32>
    %c3_285 = arith.constant 3 : index
    %c0_286 = arith.constant 0 : index
    %c0_287 = arith.constant 0 : index
    %325 = vector.load %arg23[%c3_285, %c0_286, %c0_287] : memref<5x8x16xf32, #tpu.memory_space<vmem>>, vector<1x8x16xf32>
    %326 = vector.shape_cast %325 : vector<1x8x16xf32> to vector<8x16xf32>
    %cst_288 = arith.constant dense<0.000000e+00> : vector<8x32xf32>
    %327 = tpu.matmul %326, %300, %cst_288 {dimension_numbers = #tpu.dot_dimension_numbers<[1], [0], [0], [1], [0, 0, 1, 1], [], []>} : vector<8x16xf32>, vector<16x32xf32>, vector<8x32xf32> -> vector<8x32xf32>
    %c8_289 = arith.constant 8 : index
    %c0_290 = arith.constant 0 : index
    %c0_291 = arith.constant 0 : index
    %328 = vector.load %arg24[%c8_289, %c0_290, %c0_291] : memref<20x32x32xf32, #tpu.memory_space<vmem>>, vector<1x32x32xf32>
    %329 = vector.shape_cast %328 : vector<1x32x32xf32> to vector<32x32xf32>
    %cst_292 = arith.constant dense<0.000000e+00> : vector<8x32xf32>
    %330 = tpu.matmul %327, %329, %cst_292 {dimension_numbers = #tpu.dot_dimension_numbers<[1], [0], [0], [1], [0, 0, 1, 1], [], []>} : vector<8x32xf32>, vector<32x32xf32>, vector<8x32xf32> -> vector<8x32xf32>
    %331 = arith.addf %324, %330 : vector<8x32xf32>
    %c4_293 = arith.constant 4 : index
    %c0_294 = arith.constant 0 : index
    %c0_295 = arith.constant 0 : index
    %332 = vector.load %arg23[%c4_293, %c0_294, %c0_295] : memref<5x8x16xf32, #tpu.memory_space<vmem>>, vector<1x8x16xf32>
    %333 = vector.shape_cast %332 : vector<1x8x16xf32> to vector<8x16xf32>
    %cst_296 = arith.constant dense<0.000000e+00> : vector<8x32xf32>
    %334 = tpu.matmul %333, %300, %cst_296 {dimension_numbers = #tpu.dot_dimension_numbers<[1], [0], [0], [1], [0, 0, 1, 1], [], []>} : vector<8x16xf32>, vector<16x32xf32>, vector<8x32xf32> -> vector<8x32xf32>
    %c9_297 = arith.constant 9 : index
    %c0_298 = arith.constant 0 : index
    %c0_299 = arith.constant 0 : index
    %335 = vector.load %arg24[%c9_297, %c0_298, %c0_299] : memref<20x32x32xf32, #tpu.memory_space<vmem>>, vector<1x32x32xf32>
    %336 = vector.shape_cast %335 : vector<1x32x32xf32> to vector<32x32xf32>
    %cst_300 = arith.constant dense<0.000000e+00> : vector<8x32xf32>
    %337 = tpu.matmul %334, %336, %cst_300 {dimension_numbers = #tpu.dot_dimension_numbers<[1], [0], [0], [1], [0, 0, 1, 1], [], []>} : vector<8x32xf32>, vector<32x32xf32>, vector<8x32xf32> -> vector<8x32xf32>
    %338 = arith.addf %331, %337 : vector<8x32xf32>
    %339 = math.tanh %338 : vector<8x32xf32>
    %340 = vector.extract_strided_slice %339 {offsets = [0, 0], sizes = [8, 16], strides = [1, 1]} : vector<8x32xf32> to vector<8x16xf32>
    %341 = math.exp %340 : vector<8x16xf32>
    %342 = arith.mulf %255, %341 : vector<8x16xf32>
    %343 = vector.extract_strided_slice %339 {offsets = [0, 16], sizes = [8, 16], strides = [1, 1]} : vector<8x32xf32> to vector<8x16xf32>
    %344 = math.exp %343 : vector<8x16xf32>
    %345 = arith.mulf %258, %344 : vector<8x16xf32>
    %346 = tpu.concatenate %345, %342 in 1 : vector<8x16xf32>, vector<8x16xf32> -> vector<8x32xf32>
    %c2_301 = arith.constant 2 : index
    %c0_302 = arith.constant 0 : index
    %c0_303 = arith.constant 0 : index
    %347 = vector.load %arg25[%c2_301, %c0_302, %c0_303] : memref<4x1x32xf32, #tpu.memory_space<vmem>>, vector<1x1x32xf32>
    %348 = vector.shape_cast %347 : vector<1x1x32xf32> to vector<1x32xf32>
    %c0_304 = arith.constant 0 : index
    %c0_305 = arith.constant 0 : index
    %c0_306 = arith.constant 0 : index
    %349 = vector.load %arg22[%c0_304, %c0_305, %c0_306] : memref<5x16x8xf32, #tpu.memory_space<vmem>>, vector<1x16x8xf32>
    %350 = vector.shape_cast %349 : vector<1x16x8xf32> to vector<16x8xf32>
    %cst_307 = arith.constant dense<0.000000e+00> : vector<16x32xf32>
    %351 = tpu.matmul %350, %346, %cst_307 {dimension_numbers = #tpu.dot_dimension_numbers<[1], [0], [0], [1], [0, 0, 1, 1], [], []>} : vector<16x8xf32>, vector<8x32xf32>, vector<16x32xf32> -> vector<16x32xf32>
    %c10_308 = arith.constant 10 : index
    %c0_309 = arith.constant 0 : index
    %c0_310 = arith.constant 0 : index
    %352 = vector.load %arg24[%c10_308, %c0_309, %c0_310] : memref<20x32x32xf32, #tpu.memory_space<vmem>>, vector<1x32x32xf32>
    %353 = vector.shape_cast %352 : vector<1x32x32xf32> to vector<32x32xf32>
    %cst_311 = arith.constant dense<0.000000e+00> : vector<16x32xf32>
    %354 = tpu.matmul %351, %353, %cst_311 {dimension_numbers = #tpu.dot_dimension_numbers<[1], [0], [0], [1], [0, 0, 1, 1], [], []>} : vector<16x32xf32>, vector<32x32xf32>, vector<16x32xf32> -> vector<16x32xf32>
    %355 = vector.broadcast %348 : vector<1x32xf32> to vector<16x32xf32>
    %356 = arith.addf %355, %354 : vector<16x32xf32>
    %c1_312 = arith.constant 1 : index
    %c0_313 = arith.constant 0 : index
    %c0_314 = arith.constant 0 : index
    %357 = vector.load %arg22[%c1_312, %c0_313, %c0_314] : memref<5x16x8xf32, #tpu.memory_space<vmem>>, vector<1x16x8xf32>
    %358 = vector.shape_cast %357 : vector<1x16x8xf32> to vector<16x8xf32>
    %cst_315 = arith.constant dense<0.000000e+00> : vector<16x32xf32>
    %359 = tpu.matmul %358, %346, %cst_315 {dimension_numbers = #tpu.dot_dimension_numbers<[1], [0], [0], [1], [0, 0, 1, 1], [], []>} : vector<16x8xf32>, vector<8x32xf32>, vector<16x32xf32> -> vector<16x32xf32>
    %c11_316 = arith.constant 11 : index
    %c0_317 = arith.constant 0 : index
    %c0_318 = arith.constant 0 : index
    %360 = vector.load %arg24[%c11_316, %c0_317, %c0_318] : memref<20x32x32xf32, #tpu.memory_space<vmem>>, vector<1x32x32xf32>
    %361 = vector.shape_cast %360 : vector<1x32x32xf32> to vector<32x32xf32>
    %cst_319 = arith.constant dense<0.000000e+00> : vector<16x32xf32>
    %362 = tpu.matmul %359, %361, %cst_319 {dimension_numbers = #tpu.dot_dimension_numbers<[1], [0], [0], [1], [0, 0, 1, 1], [], []>} : vector<16x32xf32>, vector<32x32xf32>, vector<16x32xf32> -> vector<16x32xf32>
    %363 = arith.addf %356, %362 : vector<16x32xf32>
    %c2_320 = arith.constant 2 : index
    %c0_321 = arith.constant 0 : index
    %c0_322 = arith.constant 0 : index
    %364 = vector.load %arg22[%c2_320, %c0_321, %c0_322] : memref<5x16x8xf32, #tpu.memory_space<vmem>>, vector<1x16x8xf32>
    %365 = vector.shape_cast %364 : vector<1x16x8xf32> to vector<16x8xf32>
    %cst_323 = arith.constant dense<0.000000e+00> : vector<16x32xf32>
    %366 = tpu.matmul %365, %346, %cst_323 {dimension_numbers = #tpu.dot_dimension_numbers<[1], [0], [0], [1], [0, 0, 1, 1], [], []>} : vector<16x8xf32>, vector<8x32xf32>, vector<16x32xf32> -> vector<16x32xf32>
    %c12_324 = arith.constant 12 : index
    %c0_325 = arith.constant 0 : index
    %c0_326 = arith.constant 0 : index
    %367 = vector.load %arg24[%c12_324, %c0_325, %c0_326] : memref<20x32x32xf32, #tpu.memory_space<vmem>>, vector<1x32x32xf32>
    %368 = vector.shape_cast %367 : vector<1x32x32xf32> to vector<32x32xf32>
    %cst_327 = arith.constant dense<0.000000e+00> : vector<16x32xf32>
    %369 = tpu.matmul %366, %368, %cst_327 {dimension_numbers = #tpu.dot_dimension_numbers<[1], [0], [0], [1], [0, 0, 1, 1], [], []>} : vector<16x32xf32>, vector<32x32xf32>, vector<16x32xf32> -> vector<16x32xf32>
    %370 = arith.addf %363, %369 : vector<16x32xf32>
    %c3_328 = arith.constant 3 : index
    %c0_329 = arith.constant 0 : index
    %c0_330 = arith.constant 0 : index
    %371 = vector.load %arg22[%c3_328, %c0_329, %c0_330] : memref<5x16x8xf32, #tpu.memory_space<vmem>>, vector<1x16x8xf32>
    %372 = vector.shape_cast %371 : vector<1x16x8xf32> to vector<16x8xf32>
    %cst_331 = arith.constant dense<0.000000e+00> : vector<16x32xf32>
    %373 = tpu.matmul %372, %346, %cst_331 {dimension_numbers = #tpu.dot_dimension_numbers<[1], [0], [0], [1], [0, 0, 1, 1], [], []>} : vector<16x8xf32>, vector<8x32xf32>, vector<16x32xf32> -> vector<16x32xf32>
    %c13_332 = arith.constant 13 : index
    %c0_333 = arith.constant 0 : index
    %c0_334 = arith.constant 0 : index
    %374 = vector.load %arg24[%c13_332, %c0_333, %c0_334] : memref<20x32x32xf32, #tpu.memory_space<vmem>>, vector<1x32x32xf32>
    %375 = vector.shape_cast %374 : vector<1x32x32xf32> to vector<32x32xf32>
    %cst_335 = arith.constant dense<0.000000e+00> : vector<16x32xf32>
    %376 = tpu.matmul %373, %375, %cst_335 {dimension_numbers = #tpu.dot_dimension_numbers<[1], [0], [0], [1], [0, 0, 1, 1], [], []>} : vector<16x32xf32>, vector<32x32xf32>, vector<16x32xf32> -> vector<16x32xf32>
    %377 = arith.addf %370, %376 : vector<16x32xf32>
    %c4_336 = arith.constant 4 : index
    %c0_337 = arith.constant 0 : index
    %c0_338 = arith.constant 0 : index
    %378 = vector.load %arg22[%c4_336, %c0_337, %c0_338] : memref<5x16x8xf32, #tpu.memory_space<vmem>>, vector<1x16x8xf32>
    %379 = vector.shape_cast %378 : vector<1x16x8xf32> to vector<16x8xf32>
    %cst_339 = arith.constant dense<0.000000e+00> : vector<16x32xf32>
    %380 = tpu.matmul %379, %346, %cst_339 {dimension_numbers = #tpu.dot_dimension_numbers<[1], [0], [0], [1], [0, 0, 1, 1], [], []>} : vector<16x8xf32>, vector<8x32xf32>, vector<16x32xf32> -> vector<16x32xf32>
    %c14_340 = arith.constant 14 : index
    %c0_341 = arith.constant 0 : index
    %c0_342 = arith.constant 0 : index
    %381 = vector.load %arg24[%c14_340, %c0_341, %c0_342] : memref<20x32x32xf32, #tpu.memory_space<vmem>>, vector<1x32x32xf32>
    %382 = vector.shape_cast %381 : vector<1x32x32xf32> to vector<32x32xf32>
    %cst_343 = arith.constant dense<0.000000e+00> : vector<16x32xf32>
    %383 = tpu.matmul %380, %382, %cst_343 {dimension_numbers = #tpu.dot_dimension_numbers<[1], [0], [0], [1], [0, 0, 1, 1], [], []>} : vector<16x32xf32>, vector<32x32xf32>, vector<16x32xf32> -> vector<16x32xf32>
    %384 = arith.addf %377, %383 : vector<16x32xf32>
    %cst_344 = arith.constant 0.00999999977 : f32
    %385 = vector.broadcast %cst_344 : f32 to vector<16x32xf32>
    %386 = arith.mulf %385, %384 : vector<16x32xf32>
    %387 = arith.maximumf %384, %386 : vector<16x32xf32>
    %c3_345 = arith.constant 3 : index
    %c0_346 = arith.constant 0 : index
    %c0_347 = arith.constant 0 : index
    %388 = vector.load %arg25[%c3_345, %c0_346, %c0_347] : memref<4x1x32xf32, #tpu.memory_space<vmem>>, vector<1x1x32xf32>
    %389 = vector.shape_cast %388 : vector<1x1x32xf32> to vector<1x32xf32>
    %c0_348 = arith.constant 0 : index
    %c0_349 = arith.constant 0 : index
    %c0_350 = arith.constant 0 : index
    %390 = vector.load %arg23[%c0_348, %c0_349, %c0_350] : memref<5x8x16xf32, #tpu.memory_space<vmem>>, vector<1x8x16xf32>
    %391 = vector.shape_cast %390 : vector<1x8x16xf32> to vector<8x16xf32>
    %cst_351 = arith.constant dense<0.000000e+00> : vector<8x32xf32>
    %392 = tpu.matmul %391, %387, %cst_351 {dimension_numbers = #tpu.dot_dimension_numbers<[1], [0], [0], [1], [0, 0, 1, 1], [], []>} : vector<8x16xf32>, vector<16x32xf32>, vector<8x32xf32> -> vector<8x32xf32>
    %c15_352 = arith.constant 15 : index
    %c0_353 = arith.constant 0 : index
    %c0_354 = arith.constant 0 : index
    %393 = vector.load %arg24[%c15_352, %c0_353, %c0_354] : memref<20x32x32xf32, #tpu.memory_space<vmem>>, vector<1x32x32xf32>
    %394 = vector.shape_cast %393 : vector<1x32x32xf32> to vector<32x32xf32>
    %cst_355 = arith.constant dense<0.000000e+00> : vector<8x32xf32>
    %395 = tpu.matmul %392, %394, %cst_355 {dimension_numbers = #tpu.dot_dimension_numbers<[1], [0], [0], [1], [0, 0, 1, 1], [], []>} : vector<8x32xf32>, vector<32x32xf32>, vector<8x32xf32> -> vector<8x32xf32>
    %396 = vector.broadcast %389 : vector<1x32xf32> to vector<8x32xf32>
    %397 = arith.addf %396, %395 : vector<8x32xf32>
    %c1_356 = arith.constant 1 : index
    %c0_357 = arith.constant 0 : index
    %c0_358 = arith.constant 0 : index
    %398 = vector.load %arg23[%c1_356, %c0_357, %c0_358] : memref<5x8x16xf32, #tpu.memory_space<vmem>>, vector<1x8x16xf32>
    %399 = vector.shape_cast %398 : vector<1x8x16xf32> to vector<8x16xf32>
    %cst_359 = arith.constant dense<0.000000e+00> : vector<8x32xf32>
    %400 = tpu.matmul %399, %387, %cst_359 {dimension_numbers = #tpu.dot_dimension_numbers<[1], [0], [0], [1], [0, 0, 1, 1], [], []>} : vector<8x16xf32>, vector<16x32xf32>, vector<8x32xf32> -> vector<8x32xf32>
    %c16_360 = arith.constant 16 : index
    %c0_361 = arith.constant 0 : index
    %c0_362 = arith.constant 0 : index
    %401 = vector.load %arg24[%c16_360, %c0_361, %c0_362] : memref<20x32x32xf32, #tpu.memory_space<vmem>>, vector<1x32x32xf32>
    %402 = vector.shape_cast %401 : vector<1x32x32xf32> to vector<32x32xf32>
    %cst_363 = arith.constant dense<0.000000e+00> : vector<8x32xf32>
    %403 = tpu.matmul %400, %402, %cst_363 {dimension_numbers = #tpu.dot_dimension_numbers<[1], [0], [0], [1], [0, 0, 1, 1], [], []>} : vector<8x32xf32>, vector<32x32xf32>, vector<8x32xf32> -> vector<8x32xf32>
    %404 = arith.addf %397, %403 : vector<8x32xf32>
    %c2_364 = arith.constant 2 : index
    %c0_365 = arith.constant 0 : index
    %c0_366 = arith.constant 0 : index
    %405 = vector.load %arg23[%c2_364, %c0_365, %c0_366] : memref<5x8x16xf32, #tpu.memory_space<vmem>>, vector<1x8x16xf32>
    %406 = vector.shape_cast %405 : vector<1x8x16xf32> to vector<8x16xf32>
    %cst_367 = arith.constant dense<0.000000e+00> : vector<8x32xf32>
    %407 = tpu.matmul %406, %387, %cst_367 {dimension_numbers = #tpu.dot_dimension_numbers<[1], [0], [0], [1], [0, 0, 1, 1], [], []>} : vector<8x16xf32>, vector<16x32xf32>, vector<8x32xf32> -> vector<8x32xf32>
    %c17_368 = arith.constant 17 : index
    %c0_369 = arith.constant 0 : index
    %c0_370 = arith.constant 0 : index
    %408 = vector.load %arg24[%c17_368, %c0_369, %c0_370] : memref<20x32x32xf32, #tpu.memory_space<vmem>>, vector<1x32x32xf32>
    %409 = vector.shape_cast %408 : vector<1x32x32xf32> to vector<32x32xf32>
    %cst_371 = arith.constant dense<0.000000e+00> : vector<8x32xf32>
    %410 = tpu.matmul %407, %409, %cst_371 {dimension_numbers = #tpu.dot_dimension_numbers<[1], [0], [0], [1], [0, 0, 1, 1], [], []>} : vector<8x32xf32>, vector<32x32xf32>, vector<8x32xf32> -> vector<8x32xf32>
    %411 = arith.addf %404, %410 : vector<8x32xf32>
    %c3_372 = arith.constant 3 : index
    %c0_373 = arith.constant 0 : index
    %c0_374 = arith.constant 0 : index
    %412 = vector.load %arg23[%c3_372, %c0_373, %c0_374] : memref<5x8x16xf32, #tpu.memory_space<vmem>>, vector<1x8x16xf32>
    %413 = vector.shape_cast %412 : vector<1x8x16xf32> to vector<8x16xf32>
    %cst_375 = arith.constant dense<0.000000e+00> : vector<8x32xf32>
    %414 = tpu.matmul %413, %387, %cst_375 {dimension_numbers = #tpu.dot_dimension_numbers<[1], [0], [0], [1], [0, 0, 1, 1], [], []>} : vector<8x16xf32>, vector<16x32xf32>, vector<8x32xf32> -> vector<8x32xf32>
    %c18_376 = arith.constant 18 : index
    %c0_377 = arith.constant 0 : index
    %c0_378 = arith.constant 0 : index
    %415 = vector.load %arg24[%c18_376, %c0_377, %c0_378] : memref<20x32x32xf32, #tpu.memory_space<vmem>>, vector<1x32x32xf32>
    %416 = vector.shape_cast %415 : vector<1x32x32xf32> to vector<32x32xf32>
    %cst_379 = arith.constant dense<0.000000e+00> : vector<8x32xf32>
    %417 = tpu.matmul %414, %416, %cst_379 {dimension_numbers = #tpu.dot_dimension_numbers<[1], [0], [0], [1], [0, 0, 1, 1], [], []>} : vector<8x32xf32>, vector<32x32xf32>, vector<8x32xf32> -> vector<8x32xf32>
    %418 = arith.addf %411, %417 : vector<8x32xf32>
    %c4_380 = arith.constant 4 : index
    %c0_381 = arith.constant 0 : index
    %c0_382 = arith.constant 0 : index
    %419 = vector.load %arg23[%c4_380, %c0_381, %c0_382] : memref<5x8x16xf32, #tpu.memory_space<vmem>>, vector<1x8x16xf32>
    %420 = vector.shape_cast %419 : vector<1x8x16xf32> to vector<8x16xf32>
    %cst_383 = arith.constant dense<0.000000e+00> : vector<8x32xf32>
    %421 = tpu.matmul %420, %387, %cst_383 {dimension_numbers = #tpu.dot_dimension_numbers<[1], [0], [0], [1], [0, 0, 1, 1], [], []>} : vector<8x16xf32>, vector<16x32xf32>, vector<8x32xf32> -> vector<8x32xf32>
    %c19_384 = arith.constant 19 : index
    %c0_385 = arith.constant 0 : index
    %c0_386 = arith.constant 0 : index
    %422 = vector.load %arg24[%c19_384, %c0_385, %c0_386] : memref<20x32x32xf32, #tpu.memory_space<vmem>>, vector<1x32x32xf32>
    %423 = vector.shape_cast %422 : vector<1x32x32xf32> to vector<32x32xf32>
    %cst_387 = arith.constant dense<0.000000e+00> : vector<8x32xf32>
    %424 = tpu.matmul %421, %423, %cst_387 {dimension_numbers = #tpu.dot_dimension_numbers<[1], [0], [0], [1], [0, 0, 1, 1], [], []>} : vector<8x32xf32>, vector<32x32xf32>, vector<8x32xf32> -> vector<8x32xf32>
    %425 = arith.addf %418, %424 : vector<8x32xf32>
    %426 = math.tanh %425 : vector<8x32xf32>
    %427 = vector.extract_strided_slice %426 {offsets = [0, 0], sizes = [8, 16], strides = [1, 1]} : vector<8x32xf32> to vector<8x16xf32>
    %428 = arith.addf %342, %427 : vector<8x16xf32>
    %429 = vector.extract_strided_slice %426 {offsets = [0, 16], sizes = [8, 16], strides = [1, 1]} : vector<8x32xf32> to vector<8x16xf32>
    %430 = arith.subf %345, %429 : vector<8x16xf32>
    %431 = tpu.concatenate %428, %430 in 1 : vector<8x16xf32>, vector<8x16xf32> -> vector<8x32xf32>
    %c0_388 = arith.constant 0 : index
    %c0_389 = arith.constant 0 : index
    %c0_390 = arith.constant 0 : index
    %432 = vector.load %arg26[%c0_388, %c0_389, %c0_390] : memref<2x4x8xf32, #tpu.memory_space<vmem>>, vector<1x4x8xf32>
    %433 = vector.shape_cast %432 : vector<1x4x8xf32> to vector<4x8xf32>
    %cst_391 = arith.constant dense<0.000000e+00> : vector<4x32xf32>
    %434 = tpu.matmul %433, %431, %cst_391 {dimension_numbers = #tpu.dot_dimension_numbers<[1], [0], [0], [1], [0, 0, 1, 1], [], []>} : vector<4x8xf32>, vector<8x32xf32>, vector<4x32xf32> -> vector<4x32xf32>
    %c1_392 = arith.constant 1 : index
    %c0_393 = arith.constant 0 : index
    %c0_394 = arith.constant 0 : index
    %435 = vector.load %arg26[%c1_392, %c0_393, %c0_394] : memref<2x4x8xf32, #tpu.memory_space<vmem>>, vector<1x4x8xf32>
    %436 = vector.shape_cast %435 : vector<1x4x8xf32> to vector<4x8xf32>
    %cst_395 = arith.constant dense<0.000000e+00> : vector<4x32xf32>
    %437 = tpu.matmul %436, %431, %cst_395 {dimension_numbers = #tpu.dot_dimension_numbers<[1], [0], [0], [1], [0, 0, 1, 1], [], []>} : vector<4x8xf32>, vector<8x32xf32>, vector<4x32xf32> -> vector<4x32xf32>
    %438 = tpu.concatenate %437, %434 in 1 : vector<4x32xf32>, vector<4x32xf32> -> vector<4x64xf32>
    %c0_396 = arith.constant 0 : index
    %c0_397 = arith.constant 0 : index
    %c0_398 = arith.constant 0 : index
    %439 = vector.load %arg31[%c0_396, %c0_397, %c0_398] : memref<4x1x64xf32, #tpu.memory_space<vmem>>, vector<1x1x64xf32>
    %440 = vector.shape_cast %439 : vector<1x1x64xf32> to vector<1x64xf32>
    %c0_399 = arith.constant 0 : index
    %c0_400 = arith.constant 0 : index
    %c0_401 = arith.constant 0 : index
    %441 = vector.load %arg28[%c0_399, %c0_400, %c0_401] : memref<5x12x4xf32, #tpu.memory_space<vmem>>, vector<1x12x4xf32>
    %442 = vector.shape_cast %441 : vector<1x12x4xf32> to vector<12x4xf32>
    %cst_402 = arith.constant dense<0.000000e+00> : vector<12x64xf32>
    %443 = tpu.matmul %442, %438, %cst_402 {dimension_numbers = #tpu.dot_dimension_numbers<[1], [0], [0], [1], [0, 0, 1, 1], [], []>} : vector<12x4xf32>, vector<4x64xf32>, vector<12x64xf32> -> vector<12x64xf32>
    %c0_403 = arith.constant 0 : index
    %c0_404 = arith.constant 0 : index
    %c0_405 = arith.constant 0 : index
    %444 = vector.load %arg30[%c0_403, %c0_404, %c0_405] : memref<20x64x64xf32, #tpu.memory_space<vmem>>, vector<1x64x64xf32>
    %445 = vector.shape_cast %444 : vector<1x64x64xf32> to vector<64x64xf32>
    %cst_406 = arith.constant dense<0.000000e+00> : vector<12x64xf32>
    %446 = tpu.matmul %443, %445, %cst_406 {dimension_numbers = #tpu.dot_dimension_numbers<[1], [0], [0], [1], [0, 0, 1, 1], [], []>} : vector<12x64xf32>, vector<64x64xf32>, vector<12x64xf32> -> vector<12x64xf32>
    %447 = vector.broadcast %440 : vector<1x64xf32> to vector<12x64xf32>
    %448 = arith.addf %447, %446 : vector<12x64xf32>
    %c1_407 = arith.constant 1 : index
    %c0_408 = arith.constant 0 : index
    %c0_409 = arith.constant 0 : index
    %449 = vector.load %arg28[%c1_407, %c0_408, %c0_409] : memref<5x12x4xf32, #tpu.memory_space<vmem>>, vector<1x12x4xf32>
    %450 = vector.shape_cast %449 : vector<1x12x4xf32> to vector<12x4xf32>
    %cst_410 = arith.constant dense<0.000000e+00> : vector<12x64xf32>
    %451 = tpu.matmul %450, %438, %cst_410 {dimension_numbers = #tpu.dot_dimension_numbers<[1], [0], [0], [1], [0, 0, 1, 1], [], []>} : vector<12x4xf32>, vector<4x64xf32>, vector<12x64xf32> -> vector<12x64xf32>
    %c1_411 = arith.constant 1 : index
    %c0_412 = arith.constant 0 : index
    %c0_413 = arith.constant 0 : index
    %452 = vector.load %arg30[%c1_411, %c0_412, %c0_413] : memref<20x64x64xf32, #tpu.memory_space<vmem>>, vector<1x64x64xf32>
    %453 = vector.shape_cast %452 : vector<1x64x64xf32> to vector<64x64xf32>
    %cst_414 = arith.constant dense<0.000000e+00> : vector<12x64xf32>
    %454 = tpu.matmul %451, %453, %cst_414 {dimension_numbers = #tpu.dot_dimension_numbers<[1], [0], [0], [1], [0, 0, 1, 1], [], []>} : vector<12x64xf32>, vector<64x64xf32>, vector<12x64xf32> -> vector<12x64xf32>
    %455 = arith.addf %448, %454 : vector<12x64xf32>
    %c2_415 = arith.constant 2 : index
    %c0_416 = arith.constant 0 : index
    %c0_417 = arith.constant 0 : index
    %456 = vector.load %arg28[%c2_415, %c0_416, %c0_417] : memref<5x12x4xf32, #tpu.memory_space<vmem>>, vector<1x12x4xf32>
    %457 = vector.shape_cast %456 : vector<1x12x4xf32> to vector<12x4xf32>
    %cst_418 = arith.constant dense<0.000000e+00> : vector<12x64xf32>
    %458 = tpu.matmul %457, %438, %cst_418 {dimension_numbers = #tpu.dot_dimension_numbers<[1], [0], [0], [1], [0, 0, 1, 1], [], []>} : vector<12x4xf32>, vector<4x64xf32>, vector<12x64xf32> -> vector<12x64xf32>
    %c2_419 = arith.constant 2 : index
    %c0_420 = arith.constant 0 : index
    %c0_421 = arith.constant 0 : index
    %459 = vector.load %arg30[%c2_419, %c0_420, %c0_421] : memref<20x64x64xf32, #tpu.memory_space<vmem>>, vector<1x64x64xf32>
    %460 = vector.shape_cast %459 : vector<1x64x64xf32> to vector<64x64xf32>
    %cst_422 = arith.constant dense<0.000000e+00> : vector<12x64xf32>
    %461 = tpu.matmul %458, %460, %cst_422 {dimension_numbers = #tpu.dot_dimension_numbers<[1], [0], [0], [1], [0, 0, 1, 1], [], []>} : vector<12x64xf32>, vector<64x64xf32>, vector<12x64xf32> -> vector<12x64xf32>
    %462 = arith.addf %455, %461 : vector<12x64xf32>
    %c3_423 = arith.constant 3 : index
    %c0_424 = arith.constant 0 : index
    %c0_425 = arith.constant 0 : index
    %463 = vector.load %arg28[%c3_423, %c0_424, %c0_425] : memref<5x12x4xf32, #tpu.memory_space<vmem>>, vector<1x12x4xf32>
    %464 = vector.shape_cast %463 : vector<1x12x4xf32> to vector<12x4xf32>
    %cst_426 = arith.constant dense<0.000000e+00> : vector<12x64xf32>
    %465 = tpu.matmul %464, %438, %cst_426 {dimension_numbers = #tpu.dot_dimension_numbers<[1], [0], [0], [1], [0, 0, 1, 1], [], []>} : vector<12x4xf32>, vector<4x64xf32>, vector<12x64xf32> -> vector<12x64xf32>
    %c3_427 = arith.constant 3 : index
    %c0_428 = arith.constant 0 : index
    %c0_429 = arith.constant 0 : index
    %466 = vector.load %arg30[%c3_427, %c0_428, %c0_429] : memref<20x64x64xf32, #tpu.memory_space<vmem>>, vector<1x64x64xf32>
    %467 = vector.shape_cast %466 : vector<1x64x64xf32> to vector<64x64xf32>
    %cst_430 = arith.constant dense<0.000000e+00> : vector<12x64xf32>
    %468 = tpu.matmul %465, %467, %cst_430 {dimension_numbers = #tpu.dot_dimension_numbers<[1], [0], [0], [1], [0, 0, 1, 1], [], []>} : vector<12x64xf32>, vector<64x64xf32>, vector<12x64xf32> -> vector<12x64xf32>
    %469 = arith.addf %462, %468 : vector<12x64xf32>
    %c4_431 = arith.constant 4 : index
    %c0_432 = arith.constant 0 : index
    %c0_433 = arith.constant 0 : index
    %470 = vector.load %arg28[%c4_431, %c0_432, %c0_433] : memref<5x12x4xf32, #tpu.memory_space<vmem>>, vector<1x12x4xf32>
    %471 = vector.shape_cast %470 : vector<1x12x4xf32> to vector<12x4xf32>
    %cst_434 = arith.constant dense<0.000000e+00> : vector<12x64xf32>
    %472 = tpu.matmul %471, %438, %cst_434 {dimension_numbers = #tpu.dot_dimension_numbers<[1], [0], [0], [1], [0, 0, 1, 1], [], []>} : vector<12x4xf32>, vector<4x64xf32>, vector<12x64xf32> -> vector<12x64xf32>
    %c4_435 = arith.constant 4 : index
    %c0_436 = arith.constant 0 : index
    %c0_437 = arith.constant 0 : index
    %473 = vector.load %arg30[%c4_435, %c0_436, %c0_437] : memref<20x64x64xf32, #tpu.memory_space<vmem>>, vector<1x64x64xf32>
    %474 = vector.shape_cast %473 : vector<1x64x64xf32> to vector<64x64xf32>
    %cst_438 = arith.constant dense<0.000000e+00> : vector<12x64xf32>
    %475 = tpu.matmul %472, %474, %cst_438 {dimension_numbers = #tpu.dot_dimension_numbers<[1], [0], [0], [1], [0, 0, 1, 1], [], []>} : vector<12x64xf32>, vector<64x64xf32>, vector<12x64xf32> -> vector<12x64xf32>
    %476 = arith.addf %469, %475 : vector<12x64xf32>
    %cst_439 = arith.constant 0.00999999977 : f32
    %477 = vector.broadcast %cst_439 : f32 to vector<12x64xf32>
    %478 = arith.mulf %477, %476 : vector<12x64xf32>
    %479 = arith.maximumf %476, %478 : vector<12x64xf32>
    %c1_440 = arith.constant 1 : index
    %c0_441 = arith.constant 0 : index
    %c0_442 = arith.constant 0 : index
    %480 = vector.load %arg31[%c1_440, %c0_441, %c0_442] : memref<4x1x64xf32, #tpu.memory_space<vmem>>, vector<1x1x64xf32>
    %481 = vector.shape_cast %480 : vector<1x1x64xf32> to vector<1x64xf32>
    %c0_443 = arith.constant 0 : index
    %c0_444 = arith.constant 0 : index
    %c0_445 = arith.constant 0 : index
    %482 = vector.load %arg29[%c0_443, %c0_444, %c0_445] : memref<5x4x12xf32, #tpu.memory_space<vmem>>, vector<1x4x12xf32>
    %483 = vector.shape_cast %482 : vector<1x4x12xf32> to vector<4x12xf32>
    %cst_446 = arith.constant dense<0.000000e+00> : vector<4x64xf32>
    %484 = tpu.matmul %483, %479, %cst_446 {dimension_numbers = #tpu.dot_dimension_numbers<[1], [0], [0], [1], [0, 0, 1, 1], [], []>} : vector<4x12xf32>, vector<12x64xf32>, vector<4x64xf32> -> vector<4x64xf32>
    %c5_447 = arith.constant 5 : index
    %c0_448 = arith.constant 0 : index
    %c0_449 = arith.constant 0 : index
    %485 = vector.load %arg30[%c5_447, %c0_448, %c0_449] : memref<20x64x64xf32, #tpu.memory_space<vmem>>, vector<1x64x64xf32>
    %486 = vector.shape_cast %485 : vector<1x64x64xf32> to vector<64x64xf32>
    %cst_450 = arith.constant dense<0.000000e+00> : vector<4x64xf32>
    %487 = tpu.matmul %484, %486, %cst_450 {dimension_numbers = #tpu.dot_dimension_numbers<[1], [0], [0], [1], [0, 0, 1, 1], [], []>} : vector<4x64xf32>, vector<64x64xf32>, vector<4x64xf32> -> vector<4x64xf32>
    %488 = vector.broadcast %481 : vector<1x64xf32> to vector<4x64xf32>
    %489 = arith.addf %488, %487 : vector<4x64xf32>
    %c1_451 = arith.constant 1 : index
    %c0_452 = arith.constant 0 : index
    %c0_453 = arith.constant 0 : index
    %490 = vector.load %arg29[%c1_451, %c0_452, %c0_453] : memref<5x4x12xf32, #tpu.memory_space<vmem>>, vector<1x4x12xf32>
    %491 = vector.shape_cast %490 : vector<1x4x12xf32> to vector<4x12xf32>
    %cst_454 = arith.constant dense<0.000000e+00> : vector<4x64xf32>
    %492 = tpu.matmul %491, %479, %cst_454 {dimension_numbers = #tpu.dot_dimension_numbers<[1], [0], [0], [1], [0, 0, 1, 1], [], []>} : vector<4x12xf32>, vector<12x64xf32>, vector<4x64xf32> -> vector<4x64xf32>
    %c6_455 = arith.constant 6 : index
    %c0_456 = arith.constant 0 : index
    %c0_457 = arith.constant 0 : index
    %493 = vector.load %arg30[%c6_455, %c0_456, %c0_457] : memref<20x64x64xf32, #tpu.memory_space<vmem>>, vector<1x64x64xf32>
    %494 = vector.shape_cast %493 : vector<1x64x64xf32> to vector<64x64xf32>
    %cst_458 = arith.constant dense<0.000000e+00> : vector<4x64xf32>
    %495 = tpu.matmul %492, %494, %cst_458 {dimension_numbers = #tpu.dot_dimension_numbers<[1], [0], [0], [1], [0, 0, 1, 1], [], []>} : vector<4x64xf32>, vector<64x64xf32>, vector<4x64xf32> -> vector<4x64xf32>
    %496 = arith.addf %489, %495 : vector<4x64xf32>
    %c2_459 = arith.constant 2 : index
    %c0_460 = arith.constant 0 : index
    %c0_461 = arith.constant 0 : index
    %497 = vector.load %arg29[%c2_459, %c0_460, %c0_461] : memref<5x4x12xf32, #tpu.memory_space<vmem>>, vector<1x4x12xf32>
    %498 = vector.shape_cast %497 : vector<1x4x12xf32> to vector<4x12xf32>
    %cst_462 = arith.constant dense<0.000000e+00> : vector<4x64xf32>
    %499 = tpu.matmul %498, %479, %cst_462 {dimension_numbers = #tpu.dot_dimension_numbers<[1], [0], [0], [1], [0, 0, 1, 1], [], []>} : vector<4x12xf32>, vector<12x64xf32>, vector<4x64xf32> -> vector<4x64xf32>
    %c7_463 = arith.constant 7 : index
    %c0_464 = arith.constant 0 : index
    %c0_465 = arith.constant 0 : index
    %500 = vector.load %arg30[%c7_463, %c0_464, %c0_465] : memref<20x64x64xf32, #tpu.memory_space<vmem>>, vector<1x64x64xf32>
    %501 = vector.shape_cast %500 : vector<1x64x64xf32> to vector<64x64xf32>
    %cst_466 = arith.constant dense<0.000000e+00> : vector<4x64xf32>
    %502 = tpu.matmul %499, %501, %cst_466 {dimension_numbers = #tpu.dot_dimension_numbers<[1], [0], [0], [1], [0, 0, 1, 1], [], []>} : vector<4x64xf32>, vector<64x64xf32>, vector<4x64xf32> -> vector<4x64xf32>
    %503 = arith.addf %496, %502 : vector<4x64xf32>
    %c3_467 = arith.constant 3 : index
    %c0_468 = arith.constant 0 : index
    %c0_469 = arith.constant 0 : index
    %504 = vector.load %arg29[%c3_467, %c0_468, %c0_469] : memref<5x4x12xf32, #tpu.memory_space<vmem>>, vector<1x4x12xf32>
    %505 = vector.shape_cast %504 : vector<1x4x12xf32> to vector<4x12xf32>
    %cst_470 = arith.constant dense<0.000000e+00> : vector<4x64xf32>
    %506 = tpu.matmul %505, %479, %cst_470 {dimension_numbers = #tpu.dot_dimension_numbers<[1], [0], [0], [1], [0, 0, 1, 1], [], []>} : vector<4x12xf32>, vector<12x64xf32>, vector<4x64xf32> -> vector<4x64xf32>
    %c8_471 = arith.constant 8 : index
    %c0_472 = arith.constant 0 : index
    %c0_473 = arith.constant 0 : index
    %507 = vector.load %arg30[%c8_471, %c0_472, %c0_473] : memref<20x64x64xf32, #tpu.memory_space<vmem>>, vector<1x64x64xf32>
    %508 = vector.shape_cast %507 : vector<1x64x64xf32> to vector<64x64xf32>
    %cst_474 = arith.constant dense<0.000000e+00> : vector<4x64xf32>
    %509 = tpu.matmul %506, %508, %cst_474 {dimension_numbers = #tpu.dot_dimension_numbers<[1], [0], [0], [1], [0, 0, 1, 1], [], []>} : vector<4x64xf32>, vector<64x64xf32>, vector<4x64xf32> -> vector<4x64xf32>
    %510 = arith.addf %503, %509 : vector<4x64xf32>
    %c4_475 = arith.constant 4 : index
    %c0_476 = arith.constant 0 : index
    %c0_477 = arith.constant 0 : index
    %511 = vector.load %arg29[%c4_475, %c0_476, %c0_477] : memref<5x4x12xf32, #tpu.memory_space<vmem>>, vector<1x4x12xf32>
    %512 = vector.shape_cast %511 : vector<1x4x12xf32> to vector<4x12xf32>
    %cst_478 = arith.constant dense<0.000000e+00> : vector<4x64xf32>
    %513 = tpu.matmul %512, %479, %cst_478 {dimension_numbers = #tpu.dot_dimension_numbers<[1], [0], [0], [1], [0, 0, 1, 1], [], []>} : vector<4x12xf32>, vector<12x64xf32>, vector<4x64xf32> -> vector<4x64xf32>
    %c9_479 = arith.constant 9 : index
    %c0_480 = arith.constant 0 : index
    %c0_481 = arith.constant 0 : index
    %514 = vector.load %arg30[%c9_479, %c0_480, %c0_481] : memref<20x64x64xf32, #tpu.memory_space<vmem>>, vector<1x64x64xf32>
    %515 = vector.shape_cast %514 : vector<1x64x64xf32> to vector<64x64xf32>
    %cst_482 = arith.constant dense<0.000000e+00> : vector<4x64xf32>
    %516 = tpu.matmul %513, %515, %cst_482 {dimension_numbers = #tpu.dot_dimension_numbers<[1], [0], [0], [1], [0, 0, 1, 1], [], []>} : vector<4x64xf32>, vector<64x64xf32>, vector<4x64xf32> -> vector<4x64xf32>
    %517 = arith.addf %510, %516 : vector<4x64xf32>
    %518 = math.tanh %517 : vector<4x64xf32>
    %519 = vector.extract_strided_slice %518 {offsets = [0, 0], sizes = [4, 32], strides = [1, 1]} : vector<4x64xf32> to vector<4x32xf32>
    %520 = math.exp %519 : vector<4x32xf32>
    %521 = arith.mulf %434, %520 : vector<4x32xf32>
    %522 = vector.extract_strided_slice %518 {offsets = [0, 32], sizes = [4, 32], strides = [1, 1]} : vector<4x64xf32> to vector<4x32xf32>
    %523 = math.exp %522 : vector<4x32xf32>
    %524 = arith.mulf %437, %523 : vector<4x32xf32>
    %525 = tpu.concatenate %524, %521 in 1 : vector<4x32xf32>, vector<4x32xf32> -> vector<4x64xf32>
    %c2_483 = arith.constant 2 : index
    %c0_484 = arith.constant 0 : index
    %c0_485 = arith.constant 0 : index
    %526 = vector.load %arg31[%c2_483, %c0_484, %c0_485] : memref<4x1x64xf32, #tpu.memory_space<vmem>>, vector<1x1x64xf32>
    %527 = vector.shape_cast %526 : vector<1x1x64xf32> to vector<1x64xf32>
    %c0_486 = arith.constant 0 : index
    %c0_487 = arith.constant 0 : index
    %c0_488 = arith.constant 0 : index
    %528 = vector.load %arg28[%c0_486, %c0_487, %c0_488] : memref<5x12x4xf32, #tpu.memory_space<vmem>>, vector<1x12x4xf32>
    %529 = vector.shape_cast %528 : vector<1x12x4xf32> to vector<12x4xf32>
    %cst_489 = arith.constant dense<0.000000e+00> : vector<12x64xf32>
    %530 = tpu.matmul %529, %525, %cst_489 {dimension_numbers = #tpu.dot_dimension_numbers<[1], [0], [0], [1], [0, 0, 1, 1], [], []>} : vector<12x4xf32>, vector<4x64xf32>, vector<12x64xf32> -> vector<12x64xf32>
    %c10_490 = arith.constant 10 : index
    %c0_491 = arith.constant 0 : index
    %c0_492 = arith.constant 0 : index
    %531 = vector.load %arg30[%c10_490, %c0_491, %c0_492] : memref<20x64x64xf32, #tpu.memory_space<vmem>>, vector<1x64x64xf32>
    %532 = vector.shape_cast %531 : vector<1x64x64xf32> to vector<64x64xf32>
    %cst_493 = arith.constant dense<0.000000e+00> : vector<12x64xf32>
    %533 = tpu.matmul %530, %532, %cst_493 {dimension_numbers = #tpu.dot_dimension_numbers<[1], [0], [0], [1], [0, 0, 1, 1], [], []>} : vector<12x64xf32>, vector<64x64xf32>, vector<12x64xf32> -> vector<12x64xf32>
    %534 = vector.broadcast %527 : vector<1x64xf32> to vector<12x64xf32>
    %535 = arith.addf %534, %533 : vector<12x64xf32>
    %c1_494 = arith.constant 1 : index
    %c0_495 = arith.constant 0 : index
    %c0_496 = arith.constant 0 : index
    %536 = vector.load %arg28[%c1_494, %c0_495, %c0_496] : memref<5x12x4xf32, #tpu.memory_space<vmem>>, vector<1x12x4xf32>
    %537 = vector.shape_cast %536 : vector<1x12x4xf32> to vector<12x4xf32>
    %cst_497 = arith.constant dense<0.000000e+00> : vector<12x64xf32>
    %538 = tpu.matmul %537, %525, %cst_497 {dimension_numbers = #tpu.dot_dimension_numbers<[1], [0], [0], [1], [0, 0, 1, 1], [], []>} : vector<12x4xf32>, vector<4x64xf32>, vector<12x64xf32> -> vector<12x64xf32>
    %c11_498 = arith.constant 11 : index
    %c0_499 = arith.constant 0 : index
    %c0_500 = arith.constant 0 : index
    %539 = vector.load %arg30[%c11_498, %c0_499, %c0_500] : memref<20x64x64xf32, #tpu.memory_space<vmem>>, vector<1x64x64xf32>
    %540 = vector.shape_cast %539 : vector<1x64x64xf32> to vector<64x64xf32>
    %cst_501 = arith.constant dense<0.000000e+00> : vector<12x64xf32>
    %541 = tpu.matmul %538, %540, %cst_501 {dimension_numbers = #tpu.dot_dimension_numbers<[1], [0], [0], [1], [0, 0, 1, 1], [], []>} : vector<12x64xf32>, vector<64x64xf32>, vector<12x64xf32> -> vector<12x64xf32>
    %542 = arith.addf %535, %541 : vector<12x64xf32>
    %c2_502 = arith.constant 2 : index
    %c0_503 = arith.constant 0 : index
    %c0_504 = arith.constant 0 : index
    %543 = vector.load %arg28[%c2_502, %c0_503, %c0_504] : memref<5x12x4xf32, #tpu.memory_space<vmem>>, vector<1x12x4xf32>
    %544 = vector.shape_cast %543 : vector<1x12x4xf32> to vector<12x4xf32>
    %cst_505 = arith.constant dense<0.000000e+00> : vector<12x64xf32>
    %545 = tpu.matmul %544, %525, %cst_505 {dimension_numbers = #tpu.dot_dimension_numbers<[1], [0], [0], [1], [0, 0, 1, 1], [], []>} : vector<12x4xf32>, vector<4x64xf32>, vector<12x64xf32> -> vector<12x64xf32>
    %c12_506 = arith.constant 12 : index
    %c0_507 = arith.constant 0 : index
    %c0_508 = arith.constant 0 : index
    %546 = vector.load %arg30[%c12_506, %c0_507, %c0_508] : memref<20x64x64xf32, #tpu.memory_space<vmem>>, vector<1x64x64xf32>
    %547 = vector.shape_cast %546 : vector<1x64x64xf32> to vector<64x64xf32>
    %cst_509 = arith.constant dense<0.000000e+00> : vector<12x64xf32>
    %548 = tpu.matmul %545, %547, %cst_509 {dimension_numbers = #tpu.dot_dimension_numbers<[1], [0], [0], [1], [0, 0, 1, 1], [], []>} : vector<12x64xf32>, vector<64x64xf32>, vector<12x64xf32> -> vector<12x64xf32>
    %549 = arith.addf %542, %548 : vector<12x64xf32>
    %c3_510 = arith.constant 3 : index
    %c0_511 = arith.constant 0 : index
    %c0_512 = arith.constant 0 : index
    %550 = vector.load %arg28[%c3_510, %c0_511, %c0_512] : memref<5x12x4xf32, #tpu.memory_space<vmem>>, vector<1x12x4xf32>
    %551 = vector.shape_cast %550 : vector<1x12x4xf32> to vector<12x4xf32>
    %cst_513 = arith.constant dense<0.000000e+00> : vector<12x64xf32>
    %552 = tpu.matmul %551, %525, %cst_513 {dimension_numbers = #tpu.dot_dimension_numbers<[1], [0], [0], [1], [0, 0, 1, 1], [], []>} : vector<12x4xf32>, vector<4x64xf32>, vector<12x64xf32> -> vector<12x64xf32>
    %c13_514 = arith.constant 13 : index
    %c0_515 = arith.constant 0 : index
    %c0_516 = arith.constant 0 : index
    %553 = vector.load %arg30[%c13_514, %c0_515, %c0_516] : memref<20x64x64xf32, #tpu.memory_space<vmem>>, vector<1x64x64xf32>
    %554 = vector.shape_cast %553 : vector<1x64x64xf32> to vector<64x64xf32>
    %cst_517 = arith.constant dense<0.000000e+00> : vector<12x64xf32>
    %555 = tpu.matmul %552, %554, %cst_517 {dimension_numbers = #tpu.dot_dimension_numbers<[1], [0], [0], [1], [0, 0, 1, 1], [], []>} : vector<12x64xf32>, vector<64x64xf32>, vector<12x64xf32> -> vector<12x64xf32>
    %556 = arith.addf %549, %555 : vector<12x64xf32>
    %c4_518 = arith.constant 4 : index
    %c0_519 = arith.constant 0 : index
    %c0_520 = arith.constant 0 : index
    %557 = vector.load %arg28[%c4_518, %c0_519, %c0_520] : memref<5x12x4xf32, #tpu.memory_space<vmem>>, vector<1x12x4xf32>
    %558 = vector.shape_cast %557 : vector<1x12x4xf32> to vector<12x4xf32>
    %cst_521 = arith.constant dense<0.000000e+00> : vector<12x64xf32>
    %559 = tpu.matmul %558, %525, %cst_521 {dimension_numbers = #tpu.dot_dimension_numbers<[1], [0], [0], [1], [0, 0, 1, 1], [], []>} : vector<12x4xf32>, vector<4x64xf32>, vector<12x64xf32> -> vector<12x64xf32>
    %c14_522 = arith.constant 14 : index
    %c0_523 = arith.constant 0 : index
    %c0_524 = arith.constant 0 : index
    %560 = vector.load %arg30[%c14_522, %c0_523, %c0_524] : memref<20x64x64xf32, #tpu.memory_space<vmem>>, vector<1x64x64xf32>
    %561 = vector.shape_cast %560 : vector<1x64x64xf32> to vector<64x64xf32>
    %cst_525 = arith.constant dense<0.000000e+00> : vector<12x64xf32>
    %562 = tpu.matmul %559, %561, %cst_525 {dimension_numbers = #tpu.dot_dimension_numbers<[1], [0], [0], [1], [0, 0, 1, 1], [], []>} : vector<12x64xf32>, vector<64x64xf32>, vector<12x64xf32> -> vector<12x64xf32>
    %563 = arith.addf %556, %562 : vector<12x64xf32>
    %cst_526 = arith.constant 0.00999999977 : f32
    %564 = vector.broadcast %cst_526 : f32 to vector<12x64xf32>
    %565 = arith.mulf %564, %563 : vector<12x64xf32>
    %566 = arith.maximumf %563, %565 : vector<12x64xf32>
    %c3_527 = arith.constant 3 : index
    %c0_528 = arith.constant 0 : index
    %c0_529 = arith.constant 0 : index
    %567 = vector.load %arg31[%c3_527, %c0_528, %c0_529] : memref<4x1x64xf32, #tpu.memory_space<vmem>>, vector<1x1x64xf32>
    %568 = vector.shape_cast %567 : vector<1x1x64xf32> to vector<1x64xf32>
    %c0_530 = arith.constant 0 : index
    %c0_531 = arith.constant 0 : index
    %c0_532 = arith.constant 0 : index
    %569 = vector.load %arg29[%c0_530, %c0_531, %c0_532] : memref<5x4x12xf32, #tpu.memory_space<vmem>>, vector<1x4x12xf32>
    %570 = vector.shape_cast %569 : vector<1x4x12xf32> to vector<4x12xf32>
    %cst_533 = arith.constant dense<0.000000e+00> : vector<4x64xf32>
    %571 = tpu.matmul %570, %566, %cst_533 {dimension_numbers = #tpu.dot_dimension_numbers<[1], [0], [0], [1], [0, 0, 1, 1], [], []>} : vector<4x12xf32>, vector<12x64xf32>, vector<4x64xf32> -> vector<4x64xf32>
    %c15_534 = arith.constant 15 : index
    %c0_535 = arith.constant 0 : index
    %c0_536 = arith.constant 0 : index
    %572 = vector.load %arg30[%c15_534, %c0_535, %c0_536] : memref<20x64x64xf32, #tpu.memory_space<vmem>>, vector<1x64x64xf32>
    %573 = vector.shape_cast %572 : vector<1x64x64xf32> to vector<64x64xf32>
    %cst_537 = arith.constant dense<0.000000e+00> : vector<4x64xf32>
    %574 = tpu.matmul %571, %573, %cst_537 {dimension_numbers = #tpu.dot_dimension_numbers<[1], [0], [0], [1], [0, 0, 1, 1], [], []>} : vector<4x64xf32>, vector<64x64xf32>, vector<4x64xf32> -> vector<4x64xf32>
    %575 = vector.broadcast %568 : vector<1x64xf32> to vector<4x64xf32>
    %576 = arith.addf %575, %574 : vector<4x64xf32>
    %c1_538 = arith.constant 1 : index
    %c0_539 = arith.constant 0 : index
    %c0_540 = arith.constant 0 : index
    %577 = vector.load %arg29[%c1_538, %c0_539, %c0_540] : memref<5x4x12xf32, #tpu.memory_space<vmem>>, vector<1x4x12xf32>
    %578 = vector.shape_cast %577 : vector<1x4x12xf32> to vector<4x12xf32>
    %cst_541 = arith.constant dense<0.000000e+00> : vector<4x64xf32>
    %579 = tpu.matmul %578, %566, %cst_541 {dimension_numbers = #tpu.dot_dimension_numbers<[1], [0], [0], [1], [0, 0, 1, 1], [], []>} : vector<4x12xf32>, vector<12x64xf32>, vector<4x64xf32> -> vector<4x64xf32>
    %c16_542 = arith.constant 16 : index
    %c0_543 = arith.constant 0 : index
    %c0_544 = arith.constant 0 : index
    %580 = vector.load %arg30[%c16_542, %c0_543, %c0_544] : memref<20x64x64xf32, #tpu.memory_space<vmem>>, vector<1x64x64xf32>
    %581 = vector.shape_cast %580 : vector<1x64x64xf32> to vector<64x64xf32>
    %cst_545 = arith.constant dense<0.000000e+00> : vector<4x64xf32>
    %582 = tpu.matmul %579, %581, %cst_545 {dimension_numbers = #tpu.dot_dimension_numbers<[1], [0], [0], [1], [0, 0, 1, 1], [], []>} : vector<4x64xf32>, vector<64x64xf32>, vector<4x64xf32> -> vector<4x64xf32>
    %583 = arith.addf %576, %582 : vector<4x64xf32>
    %c2_546 = arith.constant 2 : index
    %c0_547 = arith.constant 0 : index
    %c0_548 = arith.constant 0 : index
    %584 = vector.load %arg29[%c2_546, %c0_547, %c0_548] : memref<5x4x12xf32, #tpu.memory_space<vmem>>, vector<1x4x12xf32>
    %585 = vector.shape_cast %584 : vector<1x4x12xf32> to vector<4x12xf32>
    %cst_549 = arith.constant dense<0.000000e+00> : vector<4x64xf32>
    %586 = tpu.matmul %585, %566, %cst_549 {dimension_numbers = #tpu.dot_dimension_numbers<[1], [0], [0], [1], [0, 0, 1, 1], [], []>} : vector<4x12xf32>, vector<12x64xf32>, vector<4x64xf32> -> vector<4x64xf32>
    %c17_550 = arith.constant 17 : index
    %c0_551 = arith.constant 0 : index
    %c0_552 = arith.constant 0 : index
    %587 = vector.load %arg30[%c17_550, %c0_551, %c0_552] : memref<20x64x64xf32, #tpu.memory_space<vmem>>, vector<1x64x64xf32>
    %588 = vector.shape_cast %587 : vector<1x64x64xf32> to vector<64x64xf32>
    %cst_553 = arith.constant dense<0.000000e+00> : vector<4x64xf32>
    %589 = tpu.matmul %586, %588, %cst_553 {dimension_numbers = #tpu.dot_dimension_numbers<[1], [0], [0], [1], [0, 0, 1, 1], [], []>} : vector<4x64xf32>, vector<64x64xf32>, vector<4x64xf32> -> vector<4x64xf32>
    %590 = arith.addf %583, %589 : vector<4x64xf32>
    %c3_554 = arith.constant 3 : index
    %c0_555 = arith.constant 0 : index
    %c0_556 = arith.constant 0 : index
    %591 = vector.load %arg29[%c3_554, %c0_555, %c0_556] : memref<5x4x12xf32, #tpu.memory_space<vmem>>, vector<1x4x12xf32>
    %592 = vector.shape_cast %591 : vector<1x4x12xf32> to vector<4x12xf32>
    %cst_557 = arith.constant dense<0.000000e+00> : vector<4x64xf32>
    %593 = tpu.matmul %592, %566, %cst_557 {dimension_numbers = #tpu.dot_dimension_numbers<[1], [0], [0], [1], [0, 0, 1, 1], [], []>} : vector<4x12xf32>, vector<12x64xf32>, vector<4x64xf32> -> vector<4x64xf32>
    %c18_558 = arith.constant 18 : index
    %c0_559 = arith.constant 0 : index
    %c0_560 = arith.constant 0 : index
    %594 = vector.load %arg30[%c18_558, %c0_559, %c0_560] : memref<20x64x64xf32, #tpu.memory_space<vmem>>, vector<1x64x64xf32>
    %595 = vector.shape_cast %594 : vector<1x64x64xf32> to vector<64x64xf32>
    %cst_561 = arith.constant dense<0.000000e+00> : vector<4x64xf32>
    %596 = tpu.matmul %593, %595, %cst_561 {dimension_numbers = #tpu.dot_dimension_numbers<[1], [0], [0], [1], [0, 0, 1, 1], [], []>} : vector<4x64xf32>, vector<64x64xf32>, vector<4x64xf32> -> vector<4x64xf32>
    %597 = arith.addf %590, %596 : vector<4x64xf32>
    %c4_562 = arith.constant 4 : index
    %c0_563 = arith.constant 0 : index
    %c0_564 = arith.constant 0 : index
    %598 = vector.load %arg29[%c4_562, %c0_563, %c0_564] : memref<5x4x12xf32, #tpu.memory_space<vmem>>, vector<1x4x12xf32>
    %599 = vector.shape_cast %598 : vector<1x4x12xf32> to vector<4x12xf32>
    %cst_565 = arith.constant dense<0.000000e+00> : vector<4x64xf32>
    %600 = tpu.matmul %599, %566, %cst_565 {dimension_numbers = #tpu.dot_dimension_numbers<[1], [0], [0], [1], [0, 0, 1, 1], [], []>} : vector<4x12xf32>, vector<12x64xf32>, vector<4x64xf32> -> vector<4x64xf32>
    %c19_566 = arith.constant 19 : index
    %c0_567 = arith.constant 0 : index
    %c0_568 = arith.constant 0 : index
    %601 = vector.load %arg30[%c19_566, %c0_567, %c0_568] : memref<20x64x64xf32, #tpu.memory_space<vmem>>, vector<1x64x64xf32>
    %602 = vector.shape_cast %601 : vector<1x64x64xf32> to vector<64x64xf32>
    %cst_569 = arith.constant dense<0.000000e+00> : vector<4x64xf32>
    %603 = tpu.matmul %600, %602, %cst_569 {dimension_numbers = #tpu.dot_dimension_numbers<[1], [0], [0], [1], [0, 0, 1, 1], [], []>} : vector<4x64xf32>, vector<64x64xf32>, vector<4x64xf32> -> vector<4x64xf32>
    %604 = arith.addf %597, %603 : vector<4x64xf32>
    %605 = math.tanh %604 : vector<4x64xf32>
    %606 = vector.extract_strided_slice %605 {offsets = [0, 0], sizes = [4, 32], strides = [1, 1]} : vector<4x64xf32> to vector<4x32xf32>
    %607 = arith.addf %521, %606 : vector<4x32xf32>
    %608 = vector.extract_strided_slice %605 {offsets = [0, 32], sizes = [4, 32], strides = [1, 1]} : vector<4x64xf32> to vector<4x32xf32>
    %609 = arith.subf %524, %608 : vector<4x32xf32>
    %610 = tpu.concatenate %607, %609 in 1 : vector<4x32xf32>, vector<4x32xf32> -> vector<4x64xf32>
    %c0_570 = arith.constant 0 : index
    %c0_571 = arith.constant 0 : index
    %c0_572 = arith.constant 0 : index
    %611 = vector.load %arg32[%c0_570, %c0_571, %c0_572] : memref<2x2x4xf32, #tpu.memory_space<vmem>>, vector<1x2x4xf32>
    %612 = vector.shape_cast %611 : vector<1x2x4xf32> to vector<2x4xf32>
    %cst_573 = arith.constant dense<0.000000e+00> : vector<2x64xf32>
    %613 = tpu.matmul %612, %610, %cst_573 {dimension_numbers = #tpu.dot_dimension_numbers<[1], [0], [0], [1], [0, 0, 1, 1], [], []>} : vector<2x4xf32>, vector<4x64xf32>, vector<2x64xf32> -> vector<2x64xf32>
    %c1_574 = arith.constant 1 : index
    %c0_575 = arith.constant 0 : index
    %c0_576 = arith.constant 0 : index
    %614 = vector.load %arg32[%c1_574, %c0_575, %c0_576] : memref<2x2x4xf32, #tpu.memory_space<vmem>>, vector<1x2x4xf32>
    %615 = vector.shape_cast %614 : vector<1x2x4xf32> to vector<2x4xf32>
    %cst_577 = arith.constant dense<0.000000e+00> : vector<2x64xf32>
    %616 = tpu.matmul %615, %610, %cst_577 {dimension_numbers = #tpu.dot_dimension_numbers<[1], [0], [0], [1], [0, 0, 1, 1], [], []>} : vector<2x4xf32>, vector<4x64xf32>, vector<2x64xf32> -> vector<2x64xf32>
    %617 = tpu.concatenate %616, %613 in 1 : vector<2x64xf32>, vector<2x64xf32> -> vector<2x128xf32>
    %c0_578 = arith.constant 0 : index
    %c0_579 = arith.constant 0 : index
    %c0_580 = arith.constant 0 : index
    %618 = vector.load %arg37[%c0_578, %c0_579, %c0_580] : memref<4x1x128xf32, #tpu.memory_space<vmem>>, vector<1x1x128xf32>
    %619 = vector.shape_cast %618 : vector<1x1x128xf32> to vector<1x128xf32>
    %c0_581 = arith.constant 0 : index
    %c0_582 = arith.constant 0 : index
    %c0_583 = arith.constant 0 : index
    %620 = vector.load %arg34[%c0_581, %c0_582, %c0_583] : memref<5x10x2xf32, #tpu.memory_space<vmem>>, vector<1x10x2xf32>
    %621 = vector.shape_cast %620 : vector<1x10x2xf32> to vector<10x2xf32>
    %cst_584 = arith.constant dense<0.000000e+00> : vector<10x128xf32>
    %622 = tpu.matmul %621, %617, %cst_584 {dimension_numbers = #tpu.dot_dimension_numbers<[1], [0], [0], [1], [0, 0, 1, 1], [], []>} : vector<10x2xf32>, vector<2x128xf32>, vector<10x128xf32> -> vector<10x128xf32>
    %c0_585 = arith.constant 0 : index
    %c0_586 = arith.constant 0 : index
    %c0_587 = arith.constant 0 : index
    %623 = vector.load %arg36[%c0_585, %c0_586, %c0_587] : memref<20x128x128xf32, #tpu.memory_space<vmem>>, vector<1x128x128xf32>
    %624 = vector.shape_cast %623 : vector<1x128x128xf32> to vector<128x128xf32>
    %cst_588 = arith.constant dense<0.000000e+00> : vector<10x128xf32>
    %625 = tpu.matmul %622, %624, %cst_588 {dimension_numbers = #tpu.dot_dimension_numbers<[1], [0], [0], [1], [0, 0, 1, 1], [], []>} : vector<10x128xf32>, vector<128x128xf32>, vector<10x128xf32> -> vector<10x128xf32>
    %626 = vector.broadcast %619 : vector<1x128xf32> to vector<10x128xf32>
    %627 = arith.addf %626, %625 : vector<10x128xf32>
    %c1_589 = arith.constant 1 : index
    %c0_590 = arith.constant 0 : index
    %c0_591 = arith.constant 0 : index
    %628 = vector.load %arg34[%c1_589, %c0_590, %c0_591] : memref<5x10x2xf32, #tpu.memory_space<vmem>>, vector<1x10x2xf32>
    %629 = vector.shape_cast %628 : vector<1x10x2xf32> to vector<10x2xf32>
    %cst_592 = arith.constant dense<0.000000e+00> : vector<10x128xf32>
    %630 = tpu.matmul %629, %617, %cst_592 {dimension_numbers = #tpu.dot_dimension_numbers<[1], [0], [0], [1], [0, 0, 1, 1], [], []>} : vector<10x2xf32>, vector<2x128xf32>, vector<10x128xf32> -> vector<10x128xf32>
    %c1_593 = arith.constant 1 : index
    %c0_594 = arith.constant 0 : index
    %c0_595 = arith.constant 0 : index
    %631 = vector.load %arg36[%c1_593, %c0_594, %c0_595] : memref<20x128x128xf32, #tpu.memory_space<vmem>>, vector<1x128x128xf32>
    %632 = vector.shape_cast %631 : vector<1x128x128xf32> to vector<128x128xf32>
    %cst_596 = arith.constant dense<0.000000e+00> : vector<10x128xf32>
    %633 = tpu.matmul %630, %632, %cst_596 {dimension_numbers = #tpu.dot_dimension_numbers<[1], [0], [0], [1], [0, 0, 1, 1], [], []>} : vector<10x128xf32>, vector<128x128xf32>, vector<10x128xf32> -> vector<10x128xf32>
    %634 = arith.addf %627, %633 : vector<10x128xf32>
    %c2_597 = arith.constant 2 : index
    %c0_598 = arith.constant 0 : index
    %c0_599 = arith.constant 0 : index
    %635 = vector.load %arg34[%c2_597, %c0_598, %c0_599] : memref<5x10x2xf32, #tpu.memory_space<vmem>>, vector<1x10x2xf32>
    %636 = vector.shape_cast %635 : vector<1x10x2xf32> to vector<10x2xf32>
    %cst_600 = arith.constant dense<0.000000e+00> : vector<10x128xf32>
    %637 = tpu.matmul %636, %617, %cst_600 {dimension_numbers = #tpu.dot_dimension_numbers<[1], [0], [0], [1], [0, 0, 1, 1], [], []>} : vector<10x2xf32>, vector<2x128xf32>, vector<10x128xf32> -> vector<10x128xf32>
    %c2_601 = arith.constant 2 : index
    %c0_602 = arith.constant 0 : index
    %c0_603 = arith.constant 0 : index
    %638 = vector.load %arg36[%c2_601, %c0_602, %c0_603] : memref<20x128x128xf32, #tpu.memory_space<vmem>>, vector<1x128x128xf32>
    %639 = vector.shape_cast %638 : vector<1x128x128xf32> to vector<128x128xf32>
    %cst_604 = arith.constant dense<0.000000e+00> : vector<10x128xf32>
    %640 = tpu.matmul %637, %639, %cst_604 {dimension_numbers = #tpu.dot_dimension_numbers<[1], [0], [0], [1], [0, 0, 1, 1], [], []>} : vector<10x128xf32>, vector<128x128xf32>, vector<10x128xf32> -> vector<10x128xf32>
    %641 = arith.addf %634, %640 : vector<10x128xf32>
    %c3_605 = arith.constant 3 : index
    %c0_606 = arith.constant 0 : index
    %c0_607 = arith.constant 0 : index
    %642 = vector.load %arg34[%c3_605, %c0_606, %c0_607] : memref<5x10x2xf32, #tpu.memory_space<vmem>>, vector<1x10x2xf32>
    %643 = vector.shape_cast %642 : vector<1x10x2xf32> to vector<10x2xf32>
    %cst_608 = arith.constant dense<0.000000e+00> : vector<10x128xf32>
    %644 = tpu.matmul %643, %617, %cst_608 {dimension_numbers = #tpu.dot_dimension_numbers<[1], [0], [0], [1], [0, 0, 1, 1], [], []>} : vector<10x2xf32>, vector<2x128xf32>, vector<10x128xf32> -> vector<10x128xf32>
    %c3_609 = arith.constant 3 : index
    %c0_610 = arith.constant 0 : index
    %c0_611 = arith.constant 0 : index
    %645 = vector.load %arg36[%c3_609, %c0_610, %c0_611] : memref<20x128x128xf32, #tpu.memory_space<vmem>>, vector<1x128x128xf32>
    %646 = vector.shape_cast %645 : vector<1x128x128xf32> to vector<128x128xf32>
    %cst_612 = arith.constant dense<0.000000e+00> : vector<10x128xf32>
    %647 = tpu.matmul %644, %646, %cst_612 {dimension_numbers = #tpu.dot_dimension_numbers<[1], [0], [0], [1], [0, 0, 1, 1], [], []>} : vector<10x128xf32>, vector<128x128xf32>, vector<10x128xf32> -> vector<10x128xf32>
    %648 = arith.addf %641, %647 : vector<10x128xf32>
    %c4_613 = arith.constant 4 : index
    %c0_614 = arith.constant 0 : index
    %c0_615 = arith.constant 0 : index
    %649 = vector.load %arg34[%c4_613, %c0_614, %c0_615] : memref<5x10x2xf32, #tpu.memory_space<vmem>>, vector<1x10x2xf32>
    %650 = vector.shape_cast %649 : vector<1x10x2xf32> to vector<10x2xf32>
    %cst_616 = arith.constant dense<0.000000e+00> : vector<10x128xf32>
    %651 = tpu.matmul %650, %617, %cst_616 {dimension_numbers = #tpu.dot_dimension_numbers<[1], [0], [0], [1], [0, 0, 1, 1], [], []>} : vector<10x2xf32>, vector<2x128xf32>, vector<10x128xf32> -> vector<10x128xf32>
    %c4_617 = arith.constant 4 : index
    %c0_618 = arith.constant 0 : index
    %c0_619 = arith.constant 0 : index
    %652 = vector.load %arg36[%c4_617, %c0_618, %c0_619] : memref<20x128x128xf32, #tpu.memory_space<vmem>>, vector<1x128x128xf32>
    %653 = vector.shape_cast %652 : vector<1x128x128xf32> to vector<128x128xf32>
    %cst_620 = arith.constant dense<0.000000e+00> : vector<10x128xf32>
    %654 = tpu.matmul %651, %653, %cst_620 {dimension_numbers = #tpu.dot_dimension_numbers<[1], [0], [0], [1], [0, 0, 1, 1], [], []>} : vector<10x128xf32>, vector<128x128xf32>, vector<10x128xf32> -> vector<10x128xf32>
    %655 = arith.addf %648, %654 : vector<10x128xf32>
    %cst_621 = arith.constant 0.00999999977 : f32
    %656 = vector.broadcast %cst_621 : f32 to vector<10x128xf32>
    %657 = arith.mulf %656, %655 : vector<10x128xf32>
    %658 = arith.maximumf %655, %657 : vector<10x128xf32>
    %c1_622 = arith.constant 1 : index
    %c0_623 = arith.constant 0 : index
    %c0_624 = arith.constant 0 : index
    %659 = vector.load %arg37[%c1_622, %c0_623, %c0_624] : memref<4x1x128xf32, #tpu.memory_space<vmem>>, vector<1x1x128xf32>
    %660 = vector.shape_cast %659 : vector<1x1x128xf32> to vector<1x128xf32>
    %c0_625 = arith.constant 0 : index
    %c0_626 = arith.constant 0 : index
    %c0_627 = arith.constant 0 : index
    %661 = vector.load %arg35[%c0_625, %c0_626, %c0_627] : memref<5x2x10xf32, #tpu.memory_space<vmem>>, vector<1x2x10xf32>
    %662 = vector.shape_cast %661 : vector<1x2x10xf32> to vector<2x10xf32>
    %cst_628 = arith.constant dense<0.000000e+00> : vector<2x128xf32>
    %663 = tpu.matmul %662, %658, %cst_628 {dimension_numbers = #tpu.dot_dimension_numbers<[1], [0], [0], [1], [0, 0, 1, 1], [], []>} : vector<2x10xf32>, vector<10x128xf32>, vector<2x128xf32> -> vector<2x128xf32>
    %c5_629 = arith.constant 5 : index
    %c0_630 = arith.constant 0 : index
    %c0_631 = arith.constant 0 : index
    %664 = vector.load %arg36[%c5_629, %c0_630, %c0_631] : memref<20x128x128xf32, #tpu.memory_space<vmem>>, vector<1x128x128xf32>
    %665 = vector.shape_cast %664 : vector<1x128x128xf32> to vector<128x128xf32>
    %cst_632 = arith.constant dense<0.000000e+00> : vector<2x128xf32>
    %666 = tpu.matmul %663, %665, %cst_632 {dimension_numbers = #tpu.dot_dimension_numbers<[1], [0], [0], [1], [0, 0, 1, 1], [], []>} : vector<2x128xf32>, vector<128x128xf32>, vector<2x128xf32> -> vector<2x128xf32>
    %667 = vector.broadcast %660 : vector<1x128xf32> to vector<2x128xf32>
    %668 = arith.addf %667, %666 : vector<2x128xf32>
    %c1_633 = arith.constant 1 : index
    %c0_634 = arith.constant 0 : index
    %c0_635 = arith.constant 0 : index
    %669 = vector.load %arg35[%c1_633, %c0_634, %c0_635] : memref<5x2x10xf32, #tpu.memory_space<vmem>>, vector<1x2x10xf32>
    %670 = vector.shape_cast %669 : vector<1x2x10xf32> to vector<2x10xf32>
    %cst_636 = arith.constant dense<0.000000e+00> : vector<2x128xf32>
    %671 = tpu.matmul %670, %658, %cst_636 {dimension_numbers = #tpu.dot_dimension_numbers<[1], [0], [0], [1], [0, 0, 1, 1], [], []>} : vector<2x10xf32>, vector<10x128xf32>, vector<2x128xf32> -> vector<2x128xf32>
    %c6_637 = arith.constant 6 : index
    %c0_638 = arith.constant 0 : index
    %c0_639 = arith.constant 0 : index
    %672 = vector.load %arg36[%c6_637, %c0_638, %c0_639] : memref<20x128x128xf32, #tpu.memory_space<vmem>>, vector<1x128x128xf32>
    %673 = vector.shape_cast %672 : vector<1x128x128xf32> to vector<128x128xf32>
    %cst_640 = arith.constant dense<0.000000e+00> : vector<2x128xf32>
    %674 = tpu.matmul %671, %673, %cst_640 {dimension_numbers = #tpu.dot_dimension_numbers<[1], [0], [0], [1], [0, 0, 1, 1], [], []>} : vector<2x128xf32>, vector<128x128xf32>, vector<2x128xf32> -> vector<2x128xf32>
    %675 = arith.addf %668, %674 : vector<2x128xf32>
    %c2_641 = arith.constant 2 : index
    %c0_642 = arith.constant 0 : index
    %c0_643 = arith.constant 0 : index
    %676 = vector.load %arg35[%c2_641, %c0_642, %c0_643] : memref<5x2x10xf32, #tpu.memory_space<vmem>>, vector<1x2x10xf32>
    %677 = vector.shape_cast %676 : vector<1x2x10xf32> to vector<2x10xf32>
    %cst_644 = arith.constant dense<0.000000e+00> : vector<2x128xf32>
    %678 = tpu.matmul %677, %658, %cst_644 {dimension_numbers = #tpu.dot_dimension_numbers<[1], [0], [0], [1], [0, 0, 1, 1], [], []>} : vector<2x10xf32>, vector<10x128xf32>, vector<2x128xf32> -> vector<2x128xf32>
    %c7_645 = arith.constant 7 : index
    %c0_646 = arith.constant 0 : index
    %c0_647 = arith.constant 0 : index
    %679 = vector.load %arg36[%c7_645, %c0_646, %c0_647] : memref<20x128x128xf32, #tpu.memory_space<vmem>>, vector<1x128x128xf32>
    %680 = vector.shape_cast %679 : vector<1x128x128xf32> to vector<128x128xf32>
    %cst_648 = arith.constant dense<0.000000e+00> : vector<2x128xf32>
    %681 = tpu.matmul %678, %680, %cst_648 {dimension_numbers = #tpu.dot_dimension_numbers<[1], [0], [0], [1], [0, 0, 1, 1], [], []>} : vector<2x128xf32>, vector<128x128xf32>, vector<2x128xf32> -> vector<2x128xf32>
    %682 = arith.addf %675, %681 : vector<2x128xf32>
    %c3_649 = arith.constant 3 : index
    %c0_650 = arith.constant 0 : index
    %c0_651 = arith.constant 0 : index
    %683 = vector.load %arg35[%c3_649, %c0_650, %c0_651] : memref<5x2x10xf32, #tpu.memory_space<vmem>>, vector<1x2x10xf32>
    %684 = vector.shape_cast %683 : vector<1x2x10xf32> to vector<2x10xf32>
    %cst_652 = arith.constant dense<0.000000e+00> : vector<2x128xf32>
    %685 = tpu.matmul %684, %658, %cst_652 {dimension_numbers = #tpu.dot_dimension_numbers<[1], [0], [0], [1], [0, 0, 1, 1], [], []>} : vector<2x10xf32>, vector<10x128xf32>, vector<2x128xf32> -> vector<2x128xf32>
    %c8_653 = arith.constant 8 : index
    %c0_654 = arith.constant 0 : index
    %c0_655 = arith.constant 0 : index
    %686 = vector.load %arg36[%c8_653, %c0_654, %c0_655] : memref<20x128x128xf32, #tpu.memory_space<vmem>>, vector<1x128x128xf32>
    %687 = vector.shape_cast %686 : vector<1x128x128xf32> to vector<128x128xf32>
    %cst_656 = arith.constant dense<0.000000e+00> : vector<2x128xf32>
    %688 = tpu.matmul %685, %687, %cst_656 {dimension_numbers = #tpu.dot_dimension_numbers<[1], [0], [0], [1], [0, 0, 1, 1], [], []>} : vector<2x128xf32>, vector<128x128xf32>, vector<2x128xf32> -> vector<2x128xf32>
    %689 = arith.addf %682, %688 : vector<2x128xf32>
    %c4_657 = arith.constant 4 : index
    %c0_658 = arith.constant 0 : index
    %c0_659 = arith.constant 0 : index
    %690 = vector.load %arg35[%c4_657, %c0_658, %c0_659] : memref<5x2x10xf32, #tpu.memory_space<vmem>>, vector<1x2x10xf32>
    %691 = vector.shape_cast %690 : vector<1x2x10xf32> to vector<2x10xf32>
    %cst_660 = arith.constant dense<0.000000e+00> : vector<2x128xf32>
    %692 = tpu.matmul %691, %658, %cst_660 {dimension_numbers = #tpu.dot_dimension_numbers<[1], [0], [0], [1], [0, 0, 1, 1], [], []>} : vector<2x10xf32>, vector<10x128xf32>, vector<2x128xf32> -> vector<2x128xf32>
    %c9_661 = arith.constant 9 : index
    %c0_662 = arith.constant 0 : index
    %c0_663 = arith.constant 0 : index
    %693 = vector.load %arg36[%c9_661, %c0_662, %c0_663] : memref<20x128x128xf32, #tpu.memory_space<vmem>>, vector<1x128x128xf32>
    %694 = vector.shape_cast %693 : vector<1x128x128xf32> to vector<128x128xf32>
    %cst_664 = arith.constant dense<0.000000e+00> : vector<2x128xf32>
    %695 = tpu.matmul %692, %694, %cst_664 {dimension_numbers = #tpu.dot_dimension_numbers<[1], [0], [0], [1], [0, 0, 1, 1], [], []>} : vector<2x128xf32>, vector<128x128xf32>, vector<2x128xf32> -> vector<2x128xf32>
    %696 = arith.addf %689, %695 : vector<2x128xf32>
    %697 = math.tanh %696 : vector<2x128xf32>
    %698 = vector.extract_strided_slice %697 {offsets = [0, 0], sizes = [2, 64], strides = [1, 1]} : vector<2x128xf32> to vector<2x64xf32>
    %699 = math.exp %698 : vector<2x64xf32>
    %700 = arith.mulf %613, %699 : vector<2x64xf32>
    %701 = vector.extract_strided_slice %697 {offsets = [0, 64], sizes = [2, 64], strides = [1, 1]} : vector<2x128xf32> to vector<2x64xf32>
    %702 = math.exp %701 : vector<2x64xf32>
    %703 = arith.mulf %616, %702 : vector<2x64xf32>
    %704 = tpu.concatenate %703, %700 in 1 : vector<2x64xf32>, vector<2x64xf32> -> vector<2x128xf32>
    %c2_665 = arith.constant 2 : index
    %c0_666 = arith.constant 0 : index
    %c0_667 = arith.constant 0 : index
    %705 = vector.load %arg37[%c2_665, %c0_666, %c0_667] : memref<4x1x128xf32, #tpu.memory_space<vmem>>, vector<1x1x128xf32>
    %706 = vector.shape_cast %705 : vector<1x1x128xf32> to vector<1x128xf32>
    %c0_668 = arith.constant 0 : index
    %c0_669 = arith.constant 0 : index
    %c0_670 = arith.constant 0 : index
    %707 = vector.load %arg34[%c0_668, %c0_669, %c0_670] : memref<5x10x2xf32, #tpu.memory_space<vmem>>, vector<1x10x2xf32>
    %708 = vector.shape_cast %707 : vector<1x10x2xf32> to vector<10x2xf32>
    %cst_671 = arith.constant dense<0.000000e+00> : vector<10x128xf32>
    %709 = tpu.matmul %708, %704, %cst_671 {dimension_numbers = #tpu.dot_dimension_numbers<[1], [0], [0], [1], [0, 0, 1, 1], [], []>} : vector<10x2xf32>, vector<2x128xf32>, vector<10x128xf32> -> vector<10x128xf32>
    %c10_672 = arith.constant 10 : index
    %c0_673 = arith.constant 0 : index
    %c0_674 = arith.constant 0 : index
    %710 = vector.load %arg36[%c10_672, %c0_673, %c0_674] : memref<20x128x128xf32, #tpu.memory_space<vmem>>, vector<1x128x128xf32>
    %711 = vector.shape_cast %710 : vector<1x128x128xf32> to vector<128x128xf32>
    %cst_675 = arith.constant dense<0.000000e+00> : vector<10x128xf32>
    %712 = tpu.matmul %709, %711, %cst_675 {dimension_numbers = #tpu.dot_dimension_numbers<[1], [0], [0], [1], [0, 0, 1, 1], [], []>} : vector<10x128xf32>, vector<128x128xf32>, vector<10x128xf32> -> vector<10x128xf32>
    %713 = vector.broadcast %706 : vector<1x128xf32> to vector<10x128xf32>
    %714 = arith.addf %713, %712 : vector<10x128xf32>
    %c1_676 = arith.constant 1 : index
    %c0_677 = arith.constant 0 : index
    %c0_678 = arith.constant 0 : index
    %715 = vector.load %arg34[%c1_676, %c0_677, %c0_678] : memref<5x10x2xf32, #tpu.memory_space<vmem>>, vector<1x10x2xf32>
    %716 = vector.shape_cast %715 : vector<1x10x2xf32> to vector<10x2xf32>
    %cst_679 = arith.constant dense<0.000000e+00> : vector<10x128xf32>
    %717 = tpu.matmul %716, %704, %cst_679 {dimension_numbers = #tpu.dot_dimension_numbers<[1], [0], [0], [1], [0, 0, 1, 1], [], []>} : vector<10x2xf32>, vector<2x128xf32>, vector<10x128xf32> -> vector<10x128xf32>
    %c11_680 = arith.constant 11 : index
    %c0_681 = arith.constant 0 : index
    %c0_682 = arith.constant 0 : index
    %718 = vector.load %arg36[%c11_680, %c0_681, %c0_682] : memref<20x128x128xf32, #tpu.memory_space<vmem>>, vector<1x128x128xf32>
    %719 = vector.shape_cast %718 : vector<1x128x128xf32> to vector<128x128xf32>
    %cst_683 = arith.constant dense<0.000000e+00> : vector<10x128xf32>
    %720 = tpu.matmul %717, %719, %cst_683 {dimension_numbers = #tpu.dot_dimension_numbers<[1], [0], [0], [1], [0, 0, 1, 1], [], []>} : vector<10x128xf32>, vector<128x128xf32>, vector<10x128xf32> -> vector<10x128xf32>
    %721 = arith.addf %714, %720 : vector<10x128xf32>
    %c2_684 = arith.constant 2 : index
    %c0_685 = arith.constant 0 : index
    %c0_686 = arith.constant 0 : index
    %722 = vector.load %arg34[%c2_684, %c0_685, %c0_686] : memref<5x10x2xf32, #tpu.memory_space<vmem>>, vector<1x10x2xf32>
    %723 = vector.shape_cast %722 : vector<1x10x2xf32> to vector<10x2xf32>
    %cst_687 = arith.constant dense<0.000000e+00> : vector<10x128xf32>
    %724 = tpu.matmul %723, %704, %cst_687 {dimension_numbers = #tpu.dot_dimension_numbers<[1], [0], [0], [1], [0, 0, 1, 1], [], []>} : vector<10x2xf32>, vector<2x128xf32>, vector<10x128xf32> -> vector<10x128xf32>
    %c12_688 = arith.constant 12 : index
    %c0_689 = arith.constant 0 : index
    %c0_690 = arith.constant 0 : index
    %725 = vector.load %arg36[%c12_688, %c0_689, %c0_690] : memref<20x128x128xf32, #tpu.memory_space<vmem>>, vector<1x128x128xf32>
    %726 = vector.shape_cast %725 : vector<1x128x128xf32> to vector<128x128xf32>
    %cst_691 = arith.constant dense<0.000000e+00> : vector<10x128xf32>
    %727 = tpu.matmul %724, %726, %cst_691 {dimension_numbers = #tpu.dot_dimension_numbers<[1], [0], [0], [1], [0, 0, 1, 1], [], []>} : vector<10x128xf32>, vector<128x128xf32>, vector<10x128xf32> -> vector<10x128xf32>
    %728 = arith.addf %721, %727 : vector<10x128xf32>
    %c3_692 = arith.constant 3 : index
    %c0_693 = arith.constant 0 : index
    %c0_694 = arith.constant 0 : index
    %729 = vector.load %arg34[%c3_692, %c0_693, %c0_694] : memref<5x10x2xf32, #tpu.memory_space<vmem>>, vector<1x10x2xf32>
    %730 = vector.shape_cast %729 : vector<1x10x2xf32> to vector<10x2xf32>
    %cst_695 = arith.constant dense<0.000000e+00> : vector<10x128xf32>
    %731 = tpu.matmul %730, %704, %cst_695 {dimension_numbers = #tpu.dot_dimension_numbers<[1], [0], [0], [1], [0, 0, 1, 1], [], []>} : vector<10x2xf32>, vector<2x128xf32>, vector<10x128xf32> -> vector<10x128xf32>
    %c13_696 = arith.constant 13 : index
    %c0_697 = arith.constant 0 : index
    %c0_698 = arith.constant 0 : index
    %732 = vector.load %arg36[%c13_696, %c0_697, %c0_698] : memref<20x128x128xf32, #tpu.memory_space<vmem>>, vector<1x128x128xf32>
    %733 = vector.shape_cast %732 : vector<1x128x128xf32> to vector<128x128xf32>
    %cst_699 = arith.constant dense<0.000000e+00> : vector<10x128xf32>
    %734 = tpu.matmul %731, %733, %cst_699 {dimension_numbers = #tpu.dot_dimension_numbers<[1], [0], [0], [1], [0, 0, 1, 1], [], []>} : vector<10x128xf32>, vector<128x128xf32>, vector<10x128xf32> -> vector<10x128xf32>
    %735 = arith.addf %728, %734 : vector<10x128xf32>
    %c4_700 = arith.constant 4 : index
    %c0_701 = arith.constant 0 : index
    %c0_702 = arith.constant 0 : index
    %736 = vector.load %arg34[%c4_700, %c0_701, %c0_702] : memref<5x10x2xf32, #tpu.memory_space<vmem>>, vector<1x10x2xf32>
    %737 = vector.shape_cast %736 : vector<1x10x2xf32> to vector<10x2xf32>
    %cst_703 = arith.constant dense<0.000000e+00> : vector<10x128xf32>
    %738 = tpu.matmul %737, %704, %cst_703 {dimension_numbers = #tpu.dot_dimension_numbers<[1], [0], [0], [1], [0, 0, 1, 1], [], []>} : vector<10x2xf32>, vector<2x128xf32>, vector<10x128xf32> -> vector<10x128xf32>
    %c14_704 = arith.constant 14 : index
    %c0_705 = arith.constant 0 : index
    %c0_706 = arith.constant 0 : index
    %739 = vector.load %arg36[%c14_704, %c0_705, %c0_706] : memref<20x128x128xf32, #tpu.memory_space<vmem>>, vector<1x128x128xf32>
    %740 = vector.shape_cast %739 : vector<1x128x128xf32> to vector<128x128xf32>
    %cst_707 = arith.constant dense<0.000000e+00> : vector<10x128xf32>
    %741 = tpu.matmul %738, %740, %cst_707 {dimension_numbers = #tpu.dot_dimension_numbers<[1], [0], [0], [1], [0, 0, 1, 1], [], []>} : vector<10x128xf32>, vector<128x128xf32>, vector<10x128xf32> -> vector<10x128xf32>
    %742 = arith.addf %735, %741 : vector<10x128xf32>
    %cst_708 = arith.constant 0.00999999977 : f32
    %743 = vector.broadcast %cst_708 : f32 to vector<10x128xf32>
    %744 = arith.mulf %743, %742 : vector<10x128xf32>
    %745 = arith.maximumf %742, %744 : vector<10x128xf32>
    %c3_709 = arith.constant 3 : index
    %c0_710 = arith.constant 0 : index
    %c0_711 = arith.constant 0 : index
    %746 = vector.load %arg37[%c3_709, %c0_710, %c0_711] : memref<4x1x128xf32, #tpu.memory_space<vmem>>, vector<1x1x128xf32>
    %747 = vector.shape_cast %746 : vector<1x1x128xf32> to vector<1x128xf32>
    %c0_712 = arith.constant 0 : index
    %c0_713 = arith.constant 0 : index
    %c0_714 = arith.constant 0 : index
    %748 = vector.load %arg35[%c0_712, %c0_713, %c0_714] : memref<5x2x10xf32, #tpu.memory_space<vmem>>, vector<1x2x10xf32>
    %749 = vector.shape_cast %748 : vector<1x2x10xf32> to vector<2x10xf32>
    %cst_715 = arith.constant dense<0.000000e+00> : vector<2x128xf32>
    %750 = tpu.matmul %749, %745, %cst_715 {dimension_numbers = #tpu.dot_dimension_numbers<[1], [0], [0], [1], [0, 0, 1, 1], [], []>} : vector<2x10xf32>, vector<10x128xf32>, vector<2x128xf32> -> vector<2x128xf32>
    %c15_716 = arith.constant 15 : index
    %c0_717 = arith.constant 0 : index
    %c0_718 = arith.constant 0 : index
    %751 = vector.load %arg36[%c15_716, %c0_717, %c0_718] : memref<20x128x128xf32, #tpu.memory_space<vmem>>, vector<1x128x128xf32>
    %752 = vector.shape_cast %751 : vector<1x128x128xf32> to vector<128x128xf32>
    %cst_719 = arith.constant dense<0.000000e+00> : vector<2x128xf32>
    %753 = tpu.matmul %750, %752, %cst_719 {dimension_numbers = #tpu.dot_dimension_numbers<[1], [0], [0], [1], [0, 0, 1, 1], [], []>} : vector<2x128xf32>, vector<128x128xf32>, vector<2x128xf32> -> vector<2x128xf32>
    %754 = vector.broadcast %747 : vector<1x128xf32> to vector<2x128xf32>
    %755 = arith.addf %754, %753 : vector<2x128xf32>
    %c1_720 = arith.constant 1 : index
    %c0_721 = arith.constant 0 : index
    %c0_722 = arith.constant 0 : index
    %756 = vector.load %arg35[%c1_720, %c0_721, %c0_722] : memref<5x2x10xf32, #tpu.memory_space<vmem>>, vector<1x2x10xf32>
    %757 = vector.shape_cast %756 : vector<1x2x10xf32> to vector<2x10xf32>
    %cst_723 = arith.constant dense<0.000000e+00> : vector<2x128xf32>
    %758 = tpu.matmul %757, %745, %cst_723 {dimension_numbers = #tpu.dot_dimension_numbers<[1], [0], [0], [1], [0, 0, 1, 1], [], []>} : vector<2x10xf32>, vector<10x128xf32>, vector<2x128xf32> -> vector<2x128xf32>
    %c16_724 = arith.constant 16 : index
    %c0_725 = arith.constant 0 : index
    %c0_726 = arith.constant 0 : index
    %759 = vector.load %arg36[%c16_724, %c0_725, %c0_726] : memref<20x128x128xf32, #tpu.memory_space<vmem>>, vector<1x128x128xf32>
    %760 = vector.shape_cast %759 : vector<1x128x128xf32> to vector<128x128xf32>
    %cst_727 = arith.constant dense<0.000000e+00> : vector<2x128xf32>
    %761 = tpu.matmul %758, %760, %cst_727 {dimension_numbers = #tpu.dot_dimension_numbers<[1], [0], [0], [1], [0, 0, 1, 1], [], []>} : vector<2x128xf32>, vector<128x128xf32>, vector<2x128xf32> -> vector<2x128xf32>
    %762 = arith.addf %755, %761 : vector<2x128xf32>
    %c2_728 = arith.constant 2 : index
    %c0_729 = arith.constant 0 : index
    %c0_730 = arith.constant 0 : index
    %763 = vector.load %arg35[%c2_728, %c0_729, %c0_730] : memref<5x2x10xf32, #tpu.memory_space<vmem>>, vector<1x2x10xf32>
    %764 = vector.shape_cast %763 : vector<1x2x10xf32> to vector<2x10xf32>
    %cst_731 = arith.constant dense<0.000000e+00> : vector<2x128xf32>
    %765 = tpu.matmul %764, %745, %cst_731 {dimension_numbers = #tpu.dot_dimension_numbers<[1], [0], [0], [1], [0, 0, 1, 1], [], []>} : vector<2x10xf32>, vector<10x128xf32>, vector<2x128xf32> -> vector<2x128xf32>
    %c17_732 = arith.constant 17 : index
    %c0_733 = arith.constant 0 : index
    %c0_734 = arith.constant 0 : index
    %766 = vector.load %arg36[%c17_732, %c0_733, %c0_734] : memref<20x128x128xf32, #tpu.memory_space<vmem>>, vector<1x128x128xf32>
    %767 = vector.shape_cast %766 : vector<1x128x128xf32> to vector<128x128xf32>
    %cst_735 = arith.constant dense<0.000000e+00> : vector<2x128xf32>
    %768 = tpu.matmul %765, %767, %cst_735 {dimension_numbers = #tpu.dot_dimension_numbers<[1], [0], [0], [1], [0, 0, 1, 1], [], []>} : vector<2x128xf32>, vector<128x128xf32>, vector<2x128xf32> -> vector<2x128xf32>
    %769 = arith.addf %762, %768 : vector<2x128xf32>
    %c3_736 = arith.constant 3 : index
    %c0_737 = arith.constant 0 : index
    %c0_738 = arith.constant 0 : index
    %770 = vector.load %arg35[%c3_736, %c0_737, %c0_738] : memref<5x2x10xf32, #tpu.memory_space<vmem>>, vector<1x2x10xf32>
    %771 = vector.shape_cast %770 : vector<1x2x10xf32> to vector<2x10xf32>
    %cst_739 = arith.constant dense<0.000000e+00> : vector<2x128xf32>
    %772 = tpu.matmul %771, %745, %cst_739 {dimension_numbers = #tpu.dot_dimension_numbers<[1], [0], [0], [1], [0, 0, 1, 1], [], []>} : vector<2x10xf32>, vector<10x128xf32>, vector<2x128xf32> -> vector<2x128xf32>
    %c18_740 = arith.constant 18 : index
    %c0_741 = arith.constant 0 : index
    %c0_742 = arith.constant 0 : index
    %773 = vector.load %arg36[%c18_740, %c0_741, %c0_742] : memref<20x128x128xf32, #tpu.memory_space<vmem>>, vector<1x128x128xf32>
    %774 = vector.shape_cast %773 : vector<1x128x128xf32> to vector<128x128xf32>
    %cst_743 = arith.constant dense<0.000000e+00> : vector<2x128xf32>
    %775 = tpu.matmul %772, %774, %cst_743 {dimension_numbers = #tpu.dot_dimension_numbers<[1], [0], [0], [1], [0, 0, 1, 1], [], []>} : vector<2x128xf32>, vector<128x128xf32>, vector<2x128xf32> -> vector<2x128xf32>
    %776 = arith.addf %769, %775 : vector<2x128xf32>
    %c4_744 = arith.constant 4 : index
    %c0_745 = arith.constant 0 : index
    %c0_746 = arith.constant 0 : index
    %777 = vector.load %arg35[%c4_744, %c0_745, %c0_746] : memref<5x2x10xf32, #tpu.memory_space<vmem>>, vector<1x2x10xf32>
    %778 = vector.shape_cast %777 : vector<1x2x10xf32> to vector<2x10xf32>
    %cst_747 = arith.constant dense<0.000000e+00> : vector<2x128xf32>
    %779 = tpu.matmul %778, %745, %cst_747 {dimension_numbers = #tpu.dot_dimension_numbers<[1], [0], [0], [1], [0, 0, 1, 1], [], []>} : vector<2x10xf32>, vector<10x128xf32>, vector<2x128xf32> -> vector<2x128xf32>
    %c19_748 = arith.constant 19 : index
    %c0_749 = arith.constant 0 : index
    %c0_750 = arith.constant 0 : index
    %780 = vector.load %arg36[%c19_748, %c0_749, %c0_750] : memref<20x128x128xf32, #tpu.memory_space<vmem>>, vector<1x128x128xf32>
    %781 = vector.shape_cast %780 : vector<1x128x128xf32> to vector<128x128xf32>
    %cst_751 = arith.constant dense<0.000000e+00> : vector<2x128xf32>
    %782 = tpu.matmul %779, %781, %cst_751 {dimension_numbers = #tpu.dot_dimension_numbers<[1], [0], [0], [1], [0, 0, 1, 1], [], []>} : vector<2x128xf32>, vector<128x128xf32>, vector<2x128xf32> -> vector<2x128xf32>
    %783 = arith.addf %776, %782 : vector<2x128xf32>
    %784 = math.tanh %783 : vector<2x128xf32>
    %785 = vector.extract_strided_slice %784 {offsets = [0, 0], sizes = [2, 64], strides = [1, 1]} : vector<2x128xf32> to vector<2x64xf32>
    %786 = arith.addf %700, %785 : vector<2x64xf32>
    %787 = vector.extract_strided_slice %784 {offsets = [0, 64], sizes = [2, 64], strides = [1, 1]} : vector<2x128xf32> to vector<2x64xf32>
    %788 = arith.subf %703, %787 : vector<2x64xf32>
    %789 = tpu.concatenate %786, %788 in 1 : vector<2x64xf32>, vector<2x64xf32> -> vector<2x128xf32>
    %c0_752 = arith.constant 0 : index
    %c0_753 = arith.constant 0 : index
    %c0_754 = arith.constant 0 : index
    %790 = vector.load %arg33[%c0_752, %c0_753, %c0_754] : memref<2x4x2xf32, #tpu.memory_space<vmem>>, vector<1x4x2xf32>
    %791 = vector.shape_cast %790 : vector<1x4x2xf32> to vector<4x2xf32>
    %792 = vector.extract_strided_slice %789 {offsets = [0, 0], sizes = [2, 64], strides = [1, 1]} : vector<2x128xf32> to vector<2x64xf32>
    %cst_755 = arith.constant dense<0.000000e+00> : vector<4x64xf32>
    %793 = tpu.matmul %791, %792, %cst_755 {dimension_numbers = #tpu.dot_dimension_numbers<[1], [0], [0], [1], [0, 0, 1, 1], [], []>} : vector<4x2xf32>, vector<2x64xf32>, vector<4x64xf32> -> vector<4x64xf32>
    %c1_756 = arith.constant 1 : index
    %c0_757 = arith.constant 0 : index
    %c0_758 = arith.constant 0 : index
    %794 = vector.load %arg33[%c1_756, %c0_757, %c0_758] : memref<2x4x2xf32, #tpu.memory_space<vmem>>, vector<1x4x2xf32>
    %795 = vector.shape_cast %794 : vector<1x4x2xf32> to vector<4x2xf32>
    %796 = vector.extract_strided_slice %789 {offsets = [0, 64], sizes = [2, 64], strides = [1, 1]} : vector<2x128xf32> to vector<2x64xf32>
    %cst_759 = arith.constant dense<0.000000e+00> : vector<4x64xf32>
    %797 = tpu.matmul %795, %796, %cst_759 {dimension_numbers = #tpu.dot_dimension_numbers<[1], [0], [0], [1], [0, 0, 1, 1], [], []>} : vector<4x2xf32>, vector<2x64xf32>, vector<4x64xf32> -> vector<4x64xf32>
    %798 = arith.addf %793, %797 : vector<4x64xf32>
    %c0_760 = arith.constant 0 : index
    %c0_761 = arith.constant 0 : index
    %c0_762 = arith.constant 0 : index
    %799 = vector.load %arg27[%c0_760, %c0_761, %c0_762] : memref<2x8x4xf32, #tpu.memory_space<vmem>>, vector<1x8x4xf32>
    %800 = vector.shape_cast %799 : vector<1x8x4xf32> to vector<8x4xf32>
    %801 = vector.extract_strided_slice %798 {offsets = [0, 0], sizes = [4, 32], strides = [1, 1]} : vector<4x64xf32> to vector<4x32xf32>
    %cst_763 = arith.constant dense<0.000000e+00> : vector<8x32xf32>
    %802 = tpu.matmul %800, %801, %cst_763 {dimension_numbers = #tpu.dot_dimension_numbers<[1], [0], [0], [1], [0, 0, 1, 1], [], []>} : vector<8x4xf32>, vector<4x32xf32>, vector<8x32xf32> -> vector<8x32xf32>
    %c1_764 = arith.constant 1 : index
    %c0_765 = arith.constant 0 : index
    %c0_766 = arith.constant 0 : index
    %803 = vector.load %arg27[%c1_764, %c0_765, %c0_766] : memref<2x8x4xf32, #tpu.memory_space<vmem>>, vector<1x8x4xf32>
    %804 = vector.shape_cast %803 : vector<1x8x4xf32> to vector<8x4xf32>
    %805 = vector.extract_strided_slice %798 {offsets = [0, 32], sizes = [4, 32], strides = [1, 1]} : vector<4x64xf32> to vector<4x32xf32>
    %cst_767 = arith.constant dense<0.000000e+00> : vector<8x32xf32>
    %806 = tpu.matmul %804, %805, %cst_767 {dimension_numbers = #tpu.dot_dimension_numbers<[1], [0], [0], [1], [0, 0, 1, 1], [], []>} : vector<8x4xf32>, vector<4x32xf32>, vector<8x32xf32> -> vector<8x32xf32>
    %807 = arith.addf %802, %806 : vector<8x32xf32>
    %c0_768 = arith.constant 0 : index
    %c0_769 = arith.constant 0 : index
    %c0_770 = arith.constant 0 : index
    %808 = vector.load %arg21[%c0_768, %c0_769, %c0_770] : memref<2x16x8xf32, #tpu.memory_space<vmem>>, vector<1x16x8xf32>
    %809 = vector.shape_cast %808 : vector<1x16x8xf32> to vector<16x8xf32>
    %810 = vector.extract_strided_slice %807 {offsets = [0, 0], sizes = [8, 16], strides = [1, 1]} : vector<8x32xf32> to vector<8x16xf32>
    %cst_771 = arith.constant dense<0.000000e+00> : vector<16x16xf32>
    %811 = tpu.matmul %809, %810, %cst_771 {dimension_numbers = #tpu.dot_dimension_numbers<[1], [0], [0], [1], [0, 0, 1, 1], [], []>} : vector<16x8xf32>, vector<8x16xf32>, vector<16x16xf32> -> vector<16x16xf32>
    %c1_772 = arith.constant 1 : index
    %c0_773 = arith.constant 0 : index
    %c0_774 = arith.constant 0 : index
    %812 = vector.load %arg21[%c1_772, %c0_773, %c0_774] : memref<2x16x8xf32, #tpu.memory_space<vmem>>, vector<1x16x8xf32>
    %813 = vector.shape_cast %812 : vector<1x16x8xf32> to vector<16x8xf32>
    %814 = vector.extract_strided_slice %807 {offsets = [0, 16], sizes = [8, 16], strides = [1, 1]} : vector<8x32xf32> to vector<8x16xf32>
    %cst_775 = arith.constant dense<0.000000e+00> : vector<16x16xf32>
    %815 = tpu.matmul %813, %814, %cst_775 {dimension_numbers = #tpu.dot_dimension_numbers<[1], [0], [0], [1], [0, 0, 1, 1], [], []>} : vector<16x8xf32>, vector<8x16xf32>, vector<16x16xf32> -> vector<16x16xf32>
    %816 = arith.addf %811, %815 : vector<16x16xf32>
    %c0_776 = arith.constant 0 : index
    %c0_777 = arith.constant 0 : index
    %c0_778 = arith.constant 0 : index
    %817 = vector.load %arg15[%c0_776, %c0_777, %c0_778] : memref<2x32x16xf32, #tpu.memory_space<vmem>>, vector<1x32x16xf32>
    %818 = vector.shape_cast %817 : vector<1x32x16xf32> to vector<32x16xf32>
    %819 = vector.extract_strided_slice %816 {offsets = [0, 0], sizes = [16, 8], strides = [1, 1]} : vector<16x16xf32> to vector<16x8xf32>
    %cst_779 = arith.constant dense<0.000000e+00> : vector<32x8xf32>
    %820 = tpu.matmul %818, %819, %cst_779 {dimension_numbers = #tpu.dot_dimension_numbers<[1], [0], [0], [1], [0, 0, 1, 1], [], []>} : vector<32x16xf32>, vector<16x8xf32>, vector<32x8xf32> -> vector<32x8xf32>
    %c1_780 = arith.constant 1 : index
    %c0_781 = arith.constant 0 : index
    %c0_782 = arith.constant 0 : index
    %821 = vector.load %arg15[%c1_780, %c0_781, %c0_782] : memref<2x32x16xf32, #tpu.memory_space<vmem>>, vector<1x32x16xf32>
    %822 = vector.shape_cast %821 : vector<1x32x16xf32> to vector<32x16xf32>
    %823 = vector.extract_strided_slice %816 {offsets = [0, 8], sizes = [16, 8], strides = [1, 1]} : vector<16x16xf32> to vector<16x8xf32>
    %cst_783 = arith.constant dense<0.000000e+00> : vector<32x8xf32>
    %824 = tpu.matmul %822, %823, %cst_783 {dimension_numbers = #tpu.dot_dimension_numbers<[1], [0], [0], [1], [0, 0, 1, 1], [], []>} : vector<32x16xf32>, vector<16x8xf32>, vector<32x8xf32> -> vector<32x8xf32>
    %825 = arith.addf %820, %824 : vector<32x8xf32>
    %826 = arith.addf %825, %73 : vector<32x8xf32>
    %827 = vector.extract_strided_slice %826 {offsets = [0, 0], sizes = [16, 8], strides = [1, 1]} : vector<32x8xf32> to vector<16x8xf32>
    %828 = vector.extract_strided_slice %826 {offsets = [16, 0], sizes = [16, 8], strides = [1, 1]} : vector<32x8xf32> to vector<16x8xf32>
    %829 = tpu.concatenate %827, %828 in 1 : vector<16x8xf32>, vector<16x8xf32> -> vector<16x16xf32>
    %c0_784 = arith.constant 0 : index
    %c0_785 = arith.constant 0 : index
    %830 = vector.load %arg13[%c0_784, %c0_785] : memref<24x16xf32, #tpu.memory_space<vmem>>, vector<24x16xf32>
    %cst_786 = arith.constant dense<0.000000e+00> : vector<24x16xf32>
    %831 = tpu.matmul %830, %829, %cst_786 {dimension_numbers = #tpu.dot_dimension_numbers<[1], [0], [0], [1], [0, 0, 1, 1], [], []>} : vector<24x16xf32>, vector<16x16xf32>, vector<24x16xf32> -> vector<24x16xf32>
    %832 = vector.broadcast %66 : vector<1x16xf32> to vector<24x16xf32>
    %833 = arith.mulf %831, %832 : vector<24x16xf32>
    %834 = vector.broadcast %55 : vector<1x16xf32> to vector<24x16xf32>
    %835 = arith.addf %833, %834 : vector<24x16xf32>
    %c0_787 = arith.constant 0 : index
    %c0_788 = arith.constant 0 : index
    %836 = vector.load %arg38[%c0_787, %c0_788] : memref<24x16xf32, #tpu.memory_space<vmem>>, vector<24x16xf32>
    tpu.vector_store %arg38[%c0_787, %c0_788], %835 {strides = array<i32>} : memref<24x16xf32, #tpu.memory_space<vmem>>, vector<24x16xf32>,
    return
  }
  func.func @transform_0(%arg0: i32) -> (i32, i32) {
    %c0_i32 = arith.constant 0 : i32
    %c0_i32_0 = arith.constant 0 : i32
    %c0_i32_1 = arith.constant 0 : i32
    return %c0_i32, %c0_i32_0 : i32, i32
  }
  func.func @transform_1(%arg0: i32) -> (i32, i32) {
    %c0_i32 = arith.constant 0 : i32
    %c0_i32_0 = arith.constant 0 : i32
    %c0_i32_1 = arith.constant 0 : i32
    return %c0_i32, %c0_i32_0 : i32, i32
  }
  func.func @transform_2(%arg0: i32) -> (i32, i32) {
    %c0_i32 = arith.constant 0 : i32
    %c0_i32_0 = arith.constant 0 : i32
    %c0_i32_1 = arith.constant 0 : i32
    return %c0_i32, %c0_i32_0 : i32, i32
  }
  func.func @transform_3(%arg0: i32) -> (i32, i32) {
    %c0_i32 = arith.constant 0 : i32
    %c0_i32_0 = arith.constant 0 : i32
    %c0_i32_1 = arith.constant 0 : i32
    return %c0_i32, %c0_i32_0 : i32, i32
  }
  func.func @transform_4(%arg0: i32) -> (i32, i32) {
    %c0_i32 = arith.constant 0 : i32
    %c0_i32_0 = arith.constant 0 : i32
    %c0_i32_1 = arith.constant 0 : i32
    return %c0_i32, %c0_i32_0 : i32, i32
  }
  func.func @transform_5(%arg0: i32) -> (i32, i32) {
    %c0_i32 = arith.constant 0 : i32
    %c0_i32_0 = arith.constant 0 : i32
    %c0_i32_1 = arith.constant 0 : i32
    return %c0_i32, %c0_i32_0 : i32, i32
  }
  func.func @transform_6(%arg0: i32) -> (i32, i32) {
    %c0_i32 = arith.constant 0 : i32
    %c0_i32_0 = arith.constant 0 : i32
    %c0_i32_1 = arith.constant 0 : i32
    return %c0_i32, %c0_i32_0 : i32, i32
  }
  func.func @transform_7(%arg0: i32) -> (i32, i32) {
    %c0_i32 = arith.constant 0 : i32
    %c0_i32_0 = arith.constant 0 : i32
    %c0_i32_1 = arith.constant 0 : i32
    return %c0_i32, %c0_i32_0 : i32, i32
  }
  func.func @transform_8(%arg0: i32) -> (i32, i32) {
    %c0_i32 = arith.constant 0 : i32
    %c0_i32_0 = arith.constant 0 : i32
    %c0_i32_1 = arith.constant 0 : i32
    return %c0_i32, %c0_i32_0 : i32, i32
  }
  func.func @transform_9(%arg0: i32) -> (i32, i32) {
    %c0_i32 = arith.constant 0 : i32
    %c0_i32_0 = arith.constant 0 : i32
    %c0_i32_1 = arith.constant 0 : i32
    return %c0_i32, %c0_i32_0 : i32, i32
  }
  func.func @transform_10(%arg0: i32) -> (i32, i32) {
    %c0_i32 = arith.constant 0 : i32
    %c0_i32_0 = arith.constant 0 : i32
    %c0_i32_1 = arith.constant 0 : i32
    return %c0_i32, %c0_i32_0 : i32, i32
  }
  func.func @transform_11(%arg0: i32) -> (i32, i32) {
    %c0_i32 = arith.constant 0 : i32
    %c0_i32_0 = arith.constant 0 : i32
    %c0_i32_1 = arith.constant 0 : i32
    return %c0_i32, %c0_i32_0 : i32, i32
  }
  func.func @transform_12(%arg0: i32) -> (i32, i32) {
    %c0_i32 = arith.constant 0 : i32
    %c0_i32_0 = arith.constant 0 : i32
    %c0_i32_1 = arith.constant 0 : i32
    return %c0_i32, %c0_i32_0 : i32, i32
  }
  func.func @transform_13(%arg0: i32) -> (i32, i32, i32) {
    %c0_i32 = arith.constant 0 : i32
    %c0_i32_0 = arith.constant 0 : i32
    %c0_i32_1 = arith.constant 0 : i32
    %c0_i32_2 = arith.constant 0 : i32
    return %c0_i32, %c0_i32_0, %c0_i32_1 : i32, i32, i32
  }
  func.func @transform_14(%arg0: i32) -> (i32, i32, i32) {
    %c0_i32 = arith.constant 0 : i32
    %c0_i32_0 = arith.constant 0 : i32
    %c0_i32_1 = arith.constant 0 : i32
    %c0_i32_2 = arith.constant 0 : i32
    return %c0_i32, %c0_i32_0, %c0_i32_1 : i32, i32, i32
  }
  func.func @transform_15(%arg0: i32) -> (i32, i32, i32) {
    %c0_i32 = arith.constant 0 : i32
    %c0_i32_0 = arith.constant 0 : i32
    %c0_i32_1 = arith.constant 0 : i32
    %c0_i32_2 = arith.constant 0 : i32
    return %c0_i32, %c0_i32_0, %c0_i32_1 : i32, i32, i32
  }
  func.func @transform_16(%arg0: i32) -> (i32, i32, i32) {
    %c0_i32 = arith.constant 0 : i32
    %c0_i32_0 = arith.constant 0 : i32
    %c0_i32_1 = arith.constant 0 : i32
    %c0_i32_2 = arith.constant 0 : i32
    return %c0_i32, %c0_i32_0, %c0_i32_1 : i32, i32, i32
  }
  func.func @transform_17(%arg0: i32) -> (i32, i32, i32) {
    %c0_i32 = arith.constant 0 : i32
    %c0_i32_0 = arith.constant 0 : i32
    %c0_i32_1 = arith.constant 0 : i32
    %c0_i32_2 = arith.constant 0 : i32
    return %c0_i32, %c0_i32_0, %c0_i32_1 : i32, i32, i32
  }
  func.func @transform_18(%arg0: i32) -> (i32, i32, i32) {
    %c0_i32 = arith.constant 0 : i32
    %c0_i32_0 = arith.constant 0 : i32
    %c0_i32_1 = arith.constant 0 : i32
    %c0_i32_2 = arith.constant 0 : i32
    return %c0_i32, %c0_i32_0, %c0_i32_1 : i32, i32, i32
  }
  func.func @transform_19(%arg0: i32) -> (i32, i32, i32) {
    %c0_i32 = arith.constant 0 : i32
    %c0_i32_0 = arith.constant 0 : i32
    %c0_i32_1 = arith.constant 0 : i32
    %c0_i32_2 = arith.constant 0 : i32
    return %c0_i32, %c0_i32_0, %c0_i32_1 : i32, i32, i32
  }
  func.func @transform_20(%arg0: i32) -> (i32, i32, i32) {
    %c0_i32 = arith.constant 0 : i32
    %c0_i32_0 = arith.constant 0 : i32
    %c0_i32_1 = arith.constant 0 : i32
    %c0_i32_2 = arith.constant 0 : i32
    return %c0_i32, %c0_i32_0, %c0_i32_1 : i32, i32, i32
  }
  func.func @transform_21(%arg0: i32) -> (i32, i32, i32) {
    %c0_i32 = arith.constant 0 : i32
    %c0_i32_0 = arith.constant 0 : i32
    %c0_i32_1 = arith.constant 0 : i32
    %c0_i32_2 = arith.constant 0 : i32
    return %c0_i32, %c0_i32_0, %c0_i32_1 : i32, i32, i32
  }
  func.func @transform_22(%arg0: i32) -> (i32, i32, i32) {
    %c0_i32 = arith.constant 0 : i32
    %c0_i32_0 = arith.constant 0 : i32
    %c0_i32_1 = arith.constant 0 : i32
    %c0_i32_2 = arith.constant 0 : i32
    return %c0_i32, %c0_i32_0, %c0_i32_1 : i32, i32, i32
  }
  func.func @transform_23(%arg0: i32) -> (i32, i32, i32) {
    %c0_i32 = arith.constant 0 : i32
    %c0_i32_0 = arith.constant 0 : i32
    %c0_i32_1 = arith.constant 0 : i32
    %c0_i32_2 = arith.constant 0 : i32
    return %c0_i32, %c0_i32_0, %c0_i32_1 : i32, i32, i32
  }
  func.func @transform_24(%arg0: i32) -> (i32, i32, i32) {
    %c0_i32 = arith.constant 0 : i32
    %c0_i32_0 = arith.constant 0 : i32
    %c0_i32_1 = arith.constant 0 : i32
    %c0_i32_2 = arith.constant 0 : i32
    return %c0_i32, %c0_i32_0, %c0_i32_1 : i32, i32, i32
  }
  func.func @transform_25(%arg0: i32) -> (i32, i32, i32) {
    %c0_i32 = arith.constant 0 : i32
    %c0_i32_0 = arith.constant 0 : i32
    %c0_i32_1 = arith.constant 0 : i32
    %c0_i32_2 = arith.constant 0 : i32
    return %c0_i32, %c0_i32_0, %c0_i32_1 : i32, i32, i32
  }
  func.func @transform_26(%arg0: i32) -> (i32, i32, i32) {
    %c0_i32 = arith.constant 0 : i32
    %c0_i32_0 = arith.constant 0 : i32
    %c0_i32_1 = arith.constant 0 : i32
    %c0_i32_2 = arith.constant 0 : i32
    return %c0_i32, %c0_i32_0, %c0_i32_1 : i32, i32, i32
  }
  func.func @transform_27(%arg0: i32) -> (i32, i32, i32) {
    %c0_i32 = arith.constant 0 : i32
    %c0_i32_0 = arith.constant 0 : i32
    %c0_i32_1 = arith.constant 0 : i32
    %c0_i32_2 = arith.constant 0 : i32
    return %c0_i32, %c0_i32_0, %c0_i32_1 : i32, i32, i32
  }
  func.func @transform_28(%arg0: i32) -> (i32, i32, i32) {
    %c0_i32 = arith.constant 0 : i32
    %c0_i32_0 = arith.constant 0 : i32
    %c0_i32_1 = arith.constant 0 : i32
    %c0_i32_2 = arith.constant 0 : i32
    return %c0_i32, %c0_i32_0, %c0_i32_1 : i32, i32, i32
  }
  func.func @transform_29(%arg0: i32) -> (i32, i32, i32) {
    %c0_i32 = arith.constant 0 : i32
    %c0_i32_0 = arith.constant 0 : i32
    %c0_i32_1 = arith.constant 0 : i32
    %c0_i32_2 = arith.constant 0 : i32
    return %c0_i32, %c0_i32_0, %c0_i32_1 : i32, i32, i32
  }
  func.func @transform_30(%arg0: i32) -> (i32, i32, i32) {
    %c0_i32 = arith.constant 0 : i32
    %c0_i32_0 = arith.constant 0 : i32
    %c0_i32_1 = arith.constant 0 : i32
    %c0_i32_2 = arith.constant 0 : i32
    return %c0_i32, %c0_i32_0, %c0_i32_1 : i32, i32, i32
  }
  func.func @transform_31(%arg0: i32) -> (i32, i32, i32) {
    %c0_i32 = arith.constant 0 : i32
    %c0_i32_0 = arith.constant 0 : i32
    %c0_i32_1 = arith.constant 0 : i32
    %c0_i32_2 = arith.constant 0 : i32
    return %c0_i32, %c0_i32_0, %c0_i32_1 : i32, i32, i32
  }
  func.func @transform_32(%arg0: i32) -> (i32, i32, i32) {
    %c0_i32 = arith.constant 0 : i32
    %c0_i32_0 = arith.constant 0 : i32
    %c0_i32_1 = arith.constant 0 : i32
    %c0_i32_2 = arith.constant 0 : i32
    return %c0_i32, %c0_i32_0, %c0_i32_1 : i32, i32, i32
  }
  func.func @transform_33(%arg0: i32) -> (i32, i32, i32) {
    %c0_i32 = arith.constant 0 : i32
    %c0_i32_0 = arith.constant 0 : i32
    %c0_i32_1 = arith.constant 0 : i32
    %c0_i32_2 = arith.constant 0 : i32
    return %c0_i32, %c0_i32_0, %c0_i32_1 : i32, i32, i32
  }
  func.func @transform_34(%arg0: i32) -> (i32, i32, i32) {
    %c0_i32 = arith.constant 0 : i32
    %c0_i32_0 = arith.constant 0 : i32
    %c0_i32_1 = arith.constant 0 : i32
    %c0_i32_2 = arith.constant 0 : i32
    return %c0_i32, %c0_i32_0, %c0_i32_1 : i32, i32, i32
  }
  func.func @transform_35(%arg0: i32) -> (i32, i32, i32) {
    %c0_i32 = arith.constant 0 : i32
    %c0_i32_0 = arith.constant 0 : i32
    %c0_i32_1 = arith.constant 0 : i32
    %c0_i32_2 = arith.constant 0 : i32
    return %c0_i32, %c0_i32_0, %c0_i32_1 : i32, i32, i32
  }
  func.func @transform_36(%arg0: i32) -> (i32, i32, i32) {
    %c0_i32 = arith.constant 0 : i32
    %c0_i32_0 = arith.constant 0 : i32
    %c0_i32_1 = arith.constant 0 : i32
    %c0_i32_2 = arith.constant 0 : i32
    return %c0_i32, %c0_i32_0, %c0_i32_1 : i32, i32, i32
  }
  func.func @transform_37(%arg0: i32) -> (i32, i32) {
    %c0_i32 = arith.constant 0 : i32
    %c0_i32_0 = arith.constant 0 : i32
    %c0_i32_1 = arith.constant 0 : i32
    return %c0_i32, %c0_i32_0 : i32, i32
  }
}

</mosaic_0001>

<bundles_post_ra>
// kernel: model_forward.1
= control target key start
LH: loop header
LB: loop body
LE: loop exit
PB: predicated region body
PF: predicated region fallthrough
CT: control target
= control target key end

     0   :  { %s22743_s6 = smov 1   ;;  %s22744_s10 = smov 2   ;;  %s24724_s0 = inlined_call_operand.smem [shape: u32[38], index: -1, kind: input, shape index: {}] }
   0x1   :  { %s22826_s5 = sld [smem:[%s24724_s0]]   ;;  %s22745_s14 = smov 3  }
   0x2   :  { %s22831_s9 = sld [smem:[%s24724_s0 + %s22743_s6]]   ;;  %s22746_s18 = smov 4  }
   0x3   :  { %s22836_s13 = sld [smem:[%s24724_s0 + %s22744_s10]]   ;;  %s22747_s22 = smov 5  }
   0x4   :  { %s22841_s17 = sld [smem:[%s24724_s0 + %s22745_s14]]   ;;  %s22748_s26 = smov 6  }
   0x5   :  { %s22846_s21 = sld [smem:[%s24724_s0 + %s22746_s18]]   ;;  %s22749_s30 = smov 7  }
   0x6   :  { %s22851_s25 = sld [smem:[%s24724_s0 + %s22747_s22]]   ;;  %s22750_s4 = smov 8  }
   0x7   :  { %24744 = sst [smem:[#allocation48_spill]] %s22826_s5  ;;  %s22751_s10 = smov 9  }
   0x8   :  { %s22856_s29 = sld [smem:[%s24724_s0 + %s22748_s26]]   ;;  %s22752_s15 = smov 10  }
   0x9   :  { %s22861_s3 = sld [smem:[%s24724_s0 + %s22749_s30]]   ;;  %s22753_s20 = smov 11  }
   0xa   :  { %s22866_s8 = sld [smem:[%s24724_s0 + %s22750_s4]]   ;;  %s22754_s26 = smov 12  }
   0xb   :  { %s22871_s14 = sld [smem:[%s24724_s0 + %s22751_s10]]   ;;  %s22755_s1 = smov 13  }
   0xc   :  { %s22876_s19 = sld [smem:[%s24724_s0 + %s22752_s15]]   ;;  %s22756_s7 = smov 14  }
   0xd   :  { %s22881_s24 = sld [smem:[%s24724_s0 + %s22753_s20]]   ;;  %s22757_s15 = smov 15  }
   0xe   :  { %24745 = sst [smem:[#allocation49_spill]] %s22856_s29  ;;  %s22758_s22 = smov 16  }
   0xf   :  { %24746 = sst [smem:[#allocation50_spill]] %s22861_s3  ;;  %s22759_s28 = smov 17  }
  0x10   :  { %24747 = sst [smem:[#allocation51_spill]] %s22866_s8 }
  0x11   :  { %24748 = sst [smem:[#allocation52_spill]] %s22871_s14 }
  0x12   :  { %s22886_s30 = sld [smem:[%s24724_s0 + %s22754_s26]]  }
  0x13   :  { %s22891_s6 = sld [smem:[%s24724_s0 + %s22755_s1]]  }
  0x14   :  { %s22896_s12 = sld [smem:[%s24724_s0 + %s22756_s7]]   ;;  %s22760_s7 = smov 18  }
  0x15   :  { %s22901_s20 = sld [smem:[%s24724_s0 + %s22757_s15]]   ;;  %s22761_s15 = smov 19  }
  0x16   :  { %s22906_s27 = sld [smem:[%s24724_s0 + %s22758_s22]]   ;;  %s22762_s22 = smov 20  }
  0x17   :  { %s22911_s4 = sld [smem:[%s24724_s0 + %s22759_s28]]   ;;  %s22763_s28 = smov 21  }
  0x18   :  { %24749 = sst [smem:[#allocation53_spill]] %s22886_s30 }
  0x19   :  { %s22916_s30 = sld [smem:[%s24724_s0 + %s22760_s7]]   ;;  %s22764_s7 = smov 22  }
  0x1a   :  { %24750 = sst [smem:[#allocation54_spill]] %s22896_s12 }
  0x1b   :  { %24751 = sst [smem:[#allocation55_spill]] %s22901_s20 }
  0x1c   :  { %s22921_s12 = sld [smem:[%s24724_s0 + %s22761_s15]]   ;;  %s22765_s15 = smov 23  }
  0x1d   :  { %24752 = sst [smem:[#allocation56_spill]] %s22911_s4 }
  0x1e   :  { %s22926_s20 = sld [smem:[%s24724_s0 + %s22762_s22]]   ;;  %s22766_s22 = smov 24  }
  0x1f   :  { %s22931_s4 = sld [smem:[%s24724_s0 + %s22763_s28]]   ;;  %s22767_s28 = smov 25  }
  0x20   :  { %s22936_s3 = sld [smem:[%s24724_s0 + %s22764_s7]]   ;;  %s22768_s7 = smov 26  }
  0x21   :  { %s22941_s29 = sld [smem:[%s24724_s0 + %s22765_s15]]   ;;  %s22769_s15 = smov 27  }
  0x22   :  { %24753 = sst [smem:[#allocation57_spill]] %s22921_s12 }
  0x23   :  { %s22956_s14 = sld [smem:[%s24724_s0 + %s22768_s7]]   ;;  %s22772_s7 = smov 30  }
  0x24   :  { %24754 = sst [smem:[#allocation58_spill]] %s22926_s20 }
  0x25   :  { %24755 = sst [smem:[#allocation59_spill]] %s22931_s4 }
  0x26   :  { %s22946_s20 = sld [smem:[%s24724_s0 + %s22766_s22]]   ;;  %s22770_s22 = smov 28  }
  0x27   :  { %24756 = sst [smem:[#allocation60_spill]] %s22941_s29 }
  0x28   :  { %s22951_s4 = sld [smem:[%s24724_s0 + %s22767_s28]]   ;;  %s22771_s28 = smov 29  }
  0x29   :  { %24758 = sst [smem:[#allocation62_spill]] %s22956_s14 }
  0x2a   :  { %s22961_s5 = sld [smem:[%s24724_s0 + %s22769_s15]]   ;;  %s22773_s15 = smov 31  }
  0x2b   :  { %s22966_s8 = sld [smem:[%s24724_s0 + %s22770_s22]]   ;;  %s22774_s22 = smov 32  }
  0x2c   :  { %s22976_s14 = sld [smem:[%s24724_s0 + %s22772_s7]]   ;;  %s22776_s7 = smov 34  }
  0x2d   :  { %s22986_s29 = sld [smem:[%s24724_s0 + %s22774_s22]]   ;;  %s22778_s22 = smov 36  }
  0x2e   :  { %24757 = sst [smem:[#allocation61_spill]] %s22951_s4 }
  0x2f   :  { %s22971_s4 = sld [smem:[%s24724_s0 + %s22771_s28]]   ;;  %s22775_s28 = smov 33  }
  0x30   :  { %24759 = sst [smem:[#allocation63_spill]] %s22961_s5 }
  0x31   :  { %s22981_s5 = sld [smem:[%s24724_s0 + %s22773_s15]]   ;;  %s22777_s15 = smov 35  }
  0x32   :  { %s22996_s12 = sld [smem:[%s24724_s0 + %s22776_s7]]  }
  0x33   :  { %24762 = sst [smem:[#allocation66_spill]] %s22986_s29 }
  0x34   :  { %s23006_s29 = sld [smem:[%s24724_s0 + %s22778_s22]]  }
  0x35   :  { %24760 = sst [smem:[#allocation64_spill]] %s22971_s4 }
  0x36   :  { %s22991_s4 = sld [smem:[%s24724_s0 + %s22775_s28]]   ;;  %s22779_s28 = smov 37  }
  0x37   :  { %24761 = sst [smem:[#allocation65_spill]] %s22981_s5 }
  0x38   :  { %s23001_s5 = sld [smem:[%s24724_s0 + %s22777_s15]]  }
  0x3c   :  { %24763 = sst [smem:[#allocation67_spill]] %s22991_s4 }
  0x3d   :  { %s23011_s4 = sld [smem:[%s24724_s0 + %s22779_s28]]  }
  0x3e   :  { %80 = vsyncpa [#allocation3], 0 }
  0x3f   :  { %81 = vsyncpa [#allocation5], 0 }
  0x40   :  { %82 = vsyncpa [#allocation8], 0 }
  0x41   :  { %83 = vsyncpa [#allocation11], 0 }
  0x42   :  { %84 = vsyncpa [#allocation14], 0 }
  0x43   :  { %85 = vsyncpa [#allocation17], 0 }
  0x44   :  { %86 = vsyncpa [#allocation20], 0 }
  0x45   :  { %87 = vsyncpa [#allocation23], 0 }
  0x46   :  { %88 = vsyncpa [#allocation26], 0 }
  0x47   :  { %89 = vsyncpa [#allocation29], 0 }
  0x48   :  { %90 = vsyncpa [#allocation32], 0 }
  0x49   :  { %91 = vsyncpa [#allocation35], 0  ;;  %s22780_s7 = smov [#allocation4]   ;;  %s22781_s11 = smov [#allocation7]  }
  0x4a   :  { %s111_s10 = sshll.u32 %s22780_s7, 4  ;;  %s135_s0 = sshll.u32 %s22781_s11, 4  ;;  %s112_s10 = int_to_ptr.vmem [resolvable:$true] %s111_s10  ;;  %s23013_s0 = int_to_ptr.vmem [resolvable:$true] %s135_s0 }
  0x4b   :  { %s22235_s15 = scalar_lea.hbm %s22836_s13, 256 }
  0x4c   :  { %p22236_p0 = scmp.ne.s32.totalorder %s22836_s13, %s22235_s15  ;;  %p22239_p1 = scmp.lt.u32.totalorder %s22235_s15, %s22836_s13 }
  0x4e   :  { %p22241_p2 = pnand %p22239_p1, %p22236_p0 }
  0x50   :  { %22244 = shalt.err (!%p22241_p2)
}
  0x51   :  { %s22245_s16 = scalar_lea.vmem %s112_s10, 256  ;;  %p22250_p4 = scmp.lt.s32.totalorder %s112_s10, %s112_s10 }
  0x52   :  { %p22246_p3 = scmp.ne.s32.totalorder %s112_s10, %s22245_s16  ;;  %p22251_p5 = scmp.lt.s32.totalorder %s22245_s16, %s22245_s16 }
  0x54   :  { %p22252_p6 = por %p22251_p5, %p22250_p4 }
  0x56   :  { %p22253_p7 = pnand %p22252_p6, %p22246_p3 }
  0x58   :  { %22256 = shalt.err (!%p22253_p7)
}
  0x59   :  { %s22782_s18 = smov 128   ;;  %s22783_s22 = smov 8  }
  0x5a   :  { %117 = dma.hbm_to_vmem [thread:$0]  %s22836_s13, 256, %s112_s10, [#allocation5], %s22782_s18, %s22782_s18, %s22783_s22  }
  0x5b   :  { %s22257_s23 = scalar_lea.hbm %s22846_s21, 256 }
  0x5c   :  { %p22258_p8 = scmp.ne.s32.totalorder %s22846_s21, %s22257_s23  ;;  %p22261_p9 = scmp.lt.u32.totalorder %s22257_s23, %s22846_s21 }
  0x5e   :  { %p22263_p10 = pnand %p22261_p9, %p22258_p8 }
  0x60   :  { %22266 = shalt.err (!%p22263_p10)
}
  0x61   :  { %s22267_s26 = scalar_lea.vmem %s23013_s0, 256  ;;  %p22272_p12 = scmp.lt.s32.totalorder %s23013_s0, %s23013_s0 }
  0x62   :  { %p22268_p11 = scmp.ne.s32.totalorder %s23013_s0, %s22267_s26  ;;  %p22273_p13 = scmp.lt.s32.totalorder %s22267_s26, %s22267_s26 }
  0x64   :  { %p22274_p0 = por %p22273_p13, %p22272_p12 }
  0x66   :  { %p22275_p1 = pnand %p22274_p0, %p22268_p11 }
  0x68   :  { %22278 = shalt.err (!%p22275_p1)
}
  0x69   :  { %141 = dma.hbm_to_vmem [thread:$0]  %s22846_s21, 256, %s23013_s0, [#allocation8], %s22782_s18, %s22782_s18, %s22783_s22  }
  0x6a   :  { %s22784_s13 = smov [#allocation10]   ;;  %s22785_s1 = smov [#allocation13]  }
  0x6b   :  { %s166_s28 = sshll.u32 %s22784_s13, 4  ;;  %s189_s2 = sshll.u32 %s22785_s1, 4  ;;  %s167_s28 = int_to_ptr.vmem [resolvable:$true] %s166_s28  ;;  %s23034_s2 = int_to_ptr.vmem [resolvable:$true] %s189_s2 }
  0x6c   :  { %s22279_s7 = scalar_lea.hbm %s22876_s19, 32 }
  0x6d   :  { %p22280_p2 = scmp.ne.s32.totalorder %s22876_s19, %s22279_s7  ;;  %p22283_p3 = scmp.lt.u32.totalorder %s22279_s7, %s22876_s19 }
  0x6f   :  { %p22285_p4 = pnand %p22283_p3, %p22280_p2 }
  0x71   :  { %22288 = shalt.err (!%p22285_p4)
}
  0x72   :  { %s22289_s10 = scalar_lea.vmem %s167_s28, 32  ;;  %p22294_p6 = scmp.lt.s32.totalorder %s167_s28, %s167_s28 }
  0x73   :  { %p22290_p5 = scmp.ne.s32.totalorder %s167_s28, %s22289_s10  ;;  %p22295_p7 = scmp.lt.s32.totalorder %s22289_s10, %s22289_s10 }
  0x75   :  { %p22296_p8 = por %p22295_p7, %p22294_p6 }
  0x77   :  { %p22297_p9 = pnand %p22296_p8, %p22290_p5 }
  0x79   :  { %22300 = shalt.err (!%p22297_p9)
}
  0x7a   :  { %169 = dma.hbm_to_vmem [thread:$0]  %s22876_s19, 32, %s167_s28, [#allocation11]  }
  0x7b   :  { %s22301_s21 = scalar_lea.hbm %s22891_s6, 512 }
  0x7c   :  { %p22302_p10 = scmp.ne.s32.totalorder %s22891_s6, %s22301_s21  ;;  %p22305_p11 = scmp.lt.u32.totalorder %s22301_s21, %s22891_s6 }
  0x7e   :  { %p22307_p12 = pnand %p22305_p11, %p22302_p10 }
  0x80   :  { %22310 = shalt.err (!%p22307_p12)
}
  0x81   :  { %s22311_s11 = scalar_lea.vmem %s23034_s2, 512  ;;  %p22316_p0 = scmp.lt.s32.totalorder %s23034_s2, %s23034_s2 }
  0x82   :  { %p22312_p13 = scmp.ne.s32.totalorder %s23034_s2, %s22311_s11  ;;  %p22317_p1 = scmp.lt.s32.totalorder %s22311_s11, %s22311_s11 }
  0x84   :  { %p22318_p2 = por %p22317_p1, %p22316_p0 }
  0x86   :  { %p22319_p3 = pnand %p22318_p2, %p22312_p13 }
  0x88   :  { %22322 = shalt.err (!%p22319_p3)
}
  0x89   :  { %195 = dma.hbm_to_vmem [thread:$0]  %s22891_s6, 512, %s23034_s2, [#allocation14], %s22782_s18, %s22782_s18, %s22783_s22  }
  0x8a   :  { %s22786_s19 = smov [#allocation16]   ;;  %s22323_s15 = scalar_lea.hbm %s22916_s30, 64 }
  0x8b   :  { %s219_s0 = sshll.u32 %s22786_s19, 4  ;;  %p22324_p4 = scmp.ne.s32.totalorder %s22916_s30, %s22323_s15  ;;  %s220_s0 = int_to_ptr.vmem [resolvable:$true] %s219_s0 }
  0x8c   :  { %p22327_p5 = scmp.lt.u32.totalorder %s22323_s15, %s22916_s30 }
  0x8e   :  { %p22329_p6 = pnand %p22327_p5, %p22324_p4 }
  0x90   :  { %22332 = shalt.err (!%p22329_p6)
}
  0x91   :  { %s22333_s16 = scalar_lea.vmem %s220_s0, 64  ;;  %p22338_p8 = scmp.lt.s32.totalorder %s220_s0, %s220_s0 }
  0x92   :  { %p22334_p7 = scmp.ne.s32.totalorder %s220_s0, %s22333_s16  ;;  %p22339_p9 = scmp.lt.s32.totalorder %s22333_s16, %s22333_s16 }
  0x94   :  { %p22340_p10 = por %p22339_p9, %p22338_p8 }
  0x96   :  { %p22341_p11 = pnand %p22340_p10, %p22334_p7 }
  0x98   :  { %22344 = shalt.err (!%p22341_p11)
}
  0x99   :  { %s22787_s23 = smov 16   ;;  %s22788_s6 = smov 1  }
  0x9a   :  { %225 = dma.hbm_to_vmem [thread:$0]  %s22916_s30, 64, %s220_s0, [#allocation17], %s22787_s23, %s22787_s23, %s22788_s6  }
  0x9b   :  { %s22789_s26 = smov [#allocation19]   ;;  %s22790_s28 = smov [#allocation22]  }
  0x9c   :  { %s247_s13 = sshll.u32 %s22789_s26, 4  ;;  %s271_s1 = sshll.u32 %s22790_s28, 4  ;;  %s248_s13 = int_to_ptr.vmem [resolvable:$true] %s247_s13  ;;  %s272_s1 = int_to_ptr.vmem [resolvable:$true] %s271_s1 }
  0x9d   :  { %s22345_s2 = scalar_lea.hbm %s22936_s3, 640 }
  0x9e   :  { %p22346_p12 = scmp.ne.s32.totalorder %s22936_s3, %s22345_s2  ;;  %p22349_p13 = scmp.lt.u32.totalorder %s22345_s2, %s22936_s3 }
  0xa0   :  { %p22351_p0 = pnand %p22349_p13, %p22346_p12 }
  0xa2   :  { %22354 = shalt.err (!%p22351_p0)
}
  0xa3   :  { %s22355_s7 = scalar_lea.vmem %s248_s13, 640  ;;  %p22360_p2 = scmp.lt.s32.totalorder %s248_s13, %s248_s13 }
  0xa4   :  { %p22356_p1 = scmp.ne.s32.totalorder %s248_s13, %s22355_s7  ;;  %p22361_p3 = scmp.lt.s32.totalorder %s22355_s7, %s22355_s7 }
  0xa6   :  { %p22362_p4 = por %p22361_p3, %p22360_p2 }
  0xa8   :  { %p22363_p5 = pnand %p22362_p4, %p22356_p1 }
  0xaa   :  { %22366 = shalt.err (!%p22363_p5)
}
  0xab   :  { %253 = dma.hbm_to_vmem [thread:$0]  %s22936_s3, 640, %s248_s13, [#allocation20], %s22782_s18, %s22782_s18, %s22783_s22  }
  0xac   :  { %s22367_s30 = scalar_lea.hbm %s22946_s20, 64 }
  0xad   :  { %p22368_p6 = scmp.ne.s32.totalorder %s22946_s20, %s22367_s30  ;;  %p22371_p7 = scmp.lt.u32.totalorder %s22367_s30, %s22946_s20 }
  0xaf   :  { %p22373_p8 = pnand %p22371_p7, %p22368_p6 }
  0xb1   :  { %22376 = shalt.err (!%p22373_p8)
}
  0xb2   :  { %s22377_s10 = scalar_lea.vmem %s272_s1, 64  ;;  %p22382_p10 = scmp.lt.s32.totalorder %s272_s1, %s272_s1 }
  0xb3   :  { %p22378_p9 = scmp.ne.s32.totalorder %s272_s1, %s22377_s10  ;;  %p22383_p11 = scmp.lt.s32.totalorder %s22377_s10, %s22377_s10 }
  0xb5   :  { %p22384_p12 = por %p22383_p11, %p22382_p10 }
  0xb7   :  { %p22385_p13 = pnand %p22384_p12, %p22378_p9 }
  0xb9   :  { %22388 = shalt.err (!%p22385_p13)
}
  0xba   :  { %277 = dma.hbm_to_vmem [thread:$0]  %s22946_s20, 64, %s272_s1, [#allocation23], %s22787_s23, %s22787_s23, %s22788_s6  }
  0xbb   :  { %s22791_s3 = smov [#allocation25]   ;;  %s22792_s11 = smov [#allocation28]  }
  0xbc   :  { %s299_s21 = sshll.u32 %s22791_s3, 4  ;;  %s323_s19 = sshll.u32 %s22792_s11, 4  ;;  %s300_s21 = int_to_ptr.vmem [resolvable:$true] %s299_s21  ;;  %s324_s19 = int_to_ptr.vmem [resolvable:$true] %s323_s19 }
  0xbd   :  { %s22389_s0 = scalar_lea.hbm %s22966_s8, 320 }
  0xbe   :  { %p22390_p0 = scmp.ne.s32.totalorder %s22966_s8, %s22389_s0  ;;  %p22393_p1 = scmp.lt.u32.totalorder %s22389_s0, %s22966_s8 }
  0xc0   :  { %p22395_p2 = pnand %p22393_p1, %p22390_p0 }
  0xc2   :  { %22398 = shalt.err (!%p22395_p2)
}
  0xc3   :  { %s22399_s15 = scalar_lea.vmem %s300_s21, 320  ;;  %p22404_p4 = scmp.lt.s32.totalorder %s300_s21, %s300_s21 }
  0xc4   :  { %p22400_p3 = scmp.ne.s32.totalorder %s300_s21, %s22399_s15  ;;  %p22405_p5 = scmp.lt.s32.totalorder %s22399_s15, %s22399_s15 }
  0xc6   :  { %p22406_p6 = por %p22405_p5, %p22404_p4 }
  0xc8   :  { %p22407_p7 = pnand %p22406_p6, %p22400_p3 }
  0xca   :  { %22410 = shalt.err (!%p22407_p7)
}
  0xcb   :  { %s22793_s16 = smov 64   ;;  %s22794_s20 = smov 4  }
  0xcc   :  { %305 = dma.hbm_to_vmem [thread:$0]  %s22966_s8, 320, %s300_s21, [#allocation26], %s22793_s16, %s22793_s16, %s22794_s20  }
  0xcd   :  { %s22411_s26 = scalar_lea.hbm %s22976_s14, 64 }
  0xce   :  { %p22412_p8 = scmp.ne.s32.totalorder %s22976_s14, %s22411_s26  ;;  %p22415_p9 = scmp.lt.u32.totalorder %s22411_s26, %s22976_s14 }
  0xd0   :  { %p22417_p10 = pnand %p22415_p9, %p22412_p8 }
  0xd2   :  { %22420 = shalt.err (!%p22417_p10)
}
  0xd3   :  { %s22421_s13 = scalar_lea.vmem %s324_s19, 64  ;;  %p22426_p12 = scmp.lt.s32.totalorder %s324_s19, %s324_s19 }
  0xd4   :  { %p22422_p11 = scmp.ne.s32.totalorder %s324_s19, %s22421_s13  ;;  %p22427_p13 = scmp.lt.s32.totalorder %s22421_s13, %s22421_s13 }
  0xd6   :  { %p22428_p0 = por %p22427_p13, %p22426_p12 }
  0xd8   :  { %p22429_p1 = pnand %p22428_p0, %p22422_p11 }
  0xda   :  { %22432 = shalt.err (!%p22429_p1)
}
  0xdb   :  { %329 = dma.hbm_to_vmem [thread:$0]  %s22976_s14, 64, %s324_s19, [#allocation29], %s22787_s23, %s22787_s23, %s22788_s6  }
  0xdc   :  { %s22795_s8 = smov [#allocation31]   ;;  %s22796_s1 = smov [#allocation2]  }
  0xdd   :  { %s351_s28 = sshll.u32 %s22795_s8, 4  ;;  %s99_s2 = sshll.u32 %s22796_s1, 4  ;;  %s352_s28 = int_to_ptr.vmem [resolvable:$true] %s351_s28  ;;  %s100_s2 = int_to_ptr.vmem [resolvable:$true] %s99_s2 }
  0xde   :  { %s22433_s7 = scalar_lea.hbm %s22996_s12, 160 }
  0xdf   :  { %p22434_p2 = scmp.ne.s32.totalorder %s22996_s12, %s22433_s7  ;;  %p22437_p3 = scmp.lt.u32.totalorder %s22433_s7, %s22996_s12 }
  0xe1   :  { %p22439_p4 = pnand %p22437_p3, %p22434_p2 }
  0xe3   :  { %22442 = shalt.err (!%p22439_p4)
}
  0xe4   :  { %s22443_s30 = scalar_lea.vmem %s352_s28, 160  ;;  %p22448_p6 = scmp.lt.s32.totalorder %s352_s28, %s352_s28 }
  0xe5   :  { %p22444_p5 = scmp.ne.s32.totalorder %s352_s28, %s22443_s30  ;;  %p22449_p7 = scmp.lt.s32.totalorder %s22443_s30, %s22443_s30 }
  0xe7   :  { %p22450_p8 = por %p22449_p7, %p22448_p6 }
  0xe9   :  { %p22451_p9 = pnand %p22450_p8, %p22444_p5 }
  0xeb   :  { %22454 = shalt.err (!%p22451_p9)
}
  0xec   :  { %s22797_s10 = smov 32   ;;  %s22798_s14 = smov 2  }
  0xed   :  { %357 = dma.hbm_to_vmem [thread:$0]  %s22996_s12, 160, %s352_s28, [#allocation32], %s22797_s10, %s22797_s10, %s22798_s14  }
  0xee   :  { %s22455_s3 = scalar_lea.hbm %s22831_s9, 256 }
  0xef   :  { %p22456_p10 = scmp.ne.s32.totalorder %s22831_s9, %s22455_s3  ;;  %p22459_p11 = scmp.lt.u32.totalorder %s22455_s3, %s22831_s9 }
  0xf1   :  { %p22461_p12 = pnand %p22459_p11, %p22456_p10 }
  0xf3   :  { %22464 = shalt.err (!%p22461_p12)
}
  0xf4   :  { %s22465_s21 = scalar_lea.vmem %s100_s2, 256  ;;  %p22470_p0 = scmp.lt.s32.totalorder %s100_s2, %s100_s2 }
  0xf5   :  { %p22466_p13 = scmp.ne.s32.totalorder %s100_s2, %s22465_s21  ;;  %p22471_p1 = scmp.lt.s32.totalorder %s22465_s21, %s22465_s21 }
  0xf7   :  { %p22472_p2 = por %p22471_p1, %p22470_p0 }
  0xf9   :  { %p22473_p3 = pnand %p22472_p2, %p22466_p13 }
  0xfb   :  { %22476 = shalt.err (!%p22473_p3)
}
  0xfc   :  { %105 = dma.hbm_to_vmem [thread:$0]  %s22831_s9, 256, %s100_s2, [#allocation3], %s22782_s18, %s22782_s18, %s22783_s22  }
  0xfd   :  { %s22799_s12 = smov [#allocation6]   ;;  %s22800_s19 = smov [#allocation9]  }
  0xfe   :  { %s123_s11 = sshll.u32 %s22799_s12, 4  ;;  %s148_s0 = sshll.u32 %s22800_s19, 4  ;;  %s124_s11 = int_to_ptr.vmem [resolvable:$true] %s123_s11  ;;  %s149_s0 = int_to_ptr.vmem [resolvable:$true] %s148_s0 }
  0xff   :  { %s22477_s15 = scalar_lea.hbm %s22841_s17, 256 }
 0x100   :  { %p22478_p4 = scmp.ne.s32.totalorder %s22841_s17, %s22477_s15  ;;  %p22481_p5 = scmp.lt.u32.totalorder %s22477_s15, %s22841_s17 }
 0x102   :  { %p22483_p6 = pnand %p22481_p5, %p22478_p4 }
 0x104   :  { %22486 = shalt.err (!%p22483_p6)
}
 0x105   :  { %s22487_s26 = scalar_lea.vmem %s124_s11, 256  ;;  %p22492_p8 = scmp.lt.s32.totalorder %s124_s11, %s124_s11 }
 0x106   :  { %p22488_p7 = scmp.ne.s32.totalorder %s124_s11, %s22487_s26  ;;  %p22493_p9 = scmp.lt.s32.totalorder %s22487_s26, %s22487_s26 }
 0x108   :  { %p22494_p10 = por %p22493_p9, %p22492_p8 }
 0x10a   :  { %p22495_p11 = pnand %p22494_p10, %p22488_p7 }
 0x10c   :  { %22498 = shalt.err (!%p22495_p11)
}
 0x10d   :  { %129 = dma.hbm_to_vmem [thread:$0]  %s22841_s17, 256, %s124_s11, [#allocation5], %s22782_s18, %s22782_s18, %s22783_s22  }
 0x10e   :  { %s22499_s9 = scalar_lea.hbm %s22851_s25, 64 }
 0x10f   :  { %p22500_p12 = scmp.ne.s32.totalorder %s22851_s25, %s22499_s9  ;;  %p22503_p13 = scmp.lt.u32.totalorder %s22499_s9, %s22851_s25 }
 0x111   :  { %p22505_p0 = pnand %p22503_p13, %p22500_p12 }
 0x113   :  { %22508 = shalt.err (!%p22505_p0)
}
 0x114   :  { %s22509_s13 = scalar_lea.vmem %s149_s0, 64  ;;  %p22514_p2 = scmp.lt.s32.totalorder %s149_s0, %s149_s0 }
 0x115   :  { %p22510_p1 = scmp.ne.s32.totalorder %s149_s0, %s22509_s13  ;;  %p22515_p3 = scmp.lt.s32.totalorder %s22509_s13, %s22509_s13 }
 0x117   :  { %p22516_p4 = por %p22515_p3, %p22514_p2 }
 0x119   :  { %p22517_p5 = pnand %p22516_p4, %p22510_p1 }
 0x11b   :  { %22520 = shalt.err (!%p22517_p5)
}
 0x11c   :  { %151 = dma.hbm_to_vmem [thread:$0]  %s22851_s25, 64, %s149_s0, [#allocation8]  }
 0x11d   :  { %s22801_s8 = smov [#allocation12]   ;;  %s22802_s28 = smov [#allocation15]  }
 0x11e   :  { %s175_s17 = sshll.u32 %s22801_s8, 4  ;;  %s205_s1 = sshll.u32 %s22802_s28, 4  ;;  %s176_s17 = int_to_ptr.vmem [resolvable:$true] %s175_s17  ;;  %s206_s1 = int_to_ptr.vmem [resolvable:$true] %s205_s1 }
 0x11f   :  { %s22521_s2 = scalar_lea.hbm %s22881_s24, 256 }
 0x120   :  { %p22522_p6 = scmp.ne.s32.totalorder %s22881_s24, %s22521_s2  ;;  %p22525_p7 = scmp.lt.u32.totalorder %s22521_s2, %s22881_s24 }
 0x122   :  { %p22527_p8 = pnand %p22525_p7, %p22522_p6 }
 0x124   :  { %22530 = shalt.err (!%p22527_p8)
}
 0x125   :  { %s22531_s7 = scalar_lea.vmem %s176_s17, 256  ;;  %p22536_p10 = scmp.lt.s32.totalorder %s176_s17, %s176_s17 }
 0x126   :  { %p22532_p9 = scmp.ne.s32.totalorder %s176_s17, %s22531_s7  ;;  %p22537_p11 = scmp.lt.s32.totalorder %s22531_s7, %s22531_s7 }
 0x128   :  { %p22538_p12 = por %p22537_p11, %p22536_p10 }
 0x12a   :  { %p22539_p13 = pnand %p22538_p12, %p22532_p9 }
 0x12c   :  { %22542 = shalt.err (!%p22539_p13)
}
 0x12d   :  { %181 = dma.hbm_to_vmem [thread:$0]  %s22881_s24, 256, %s176_s17, [#allocation11], %s22782_s18, %s22782_s18, %s22783_s22  }
 0x12e   :  { %s22543_s25 = scalar_lea.hbm %s22906_s27, 1280 }
 0x12f   :  { %p22544_p0 = scmp.ne.s32.totalorder %s22906_s27, %s22543_s25  ;;  %p22547_p1 = scmp.lt.u32.totalorder %s22543_s25, %s22906_s27 }
 0x131   :  { %p22549_p2 = pnand %p22547_p1, %p22544_p0 }
 0x133   :  { %22552 = shalt.err (!%p22549_p2)
}
 0x134   :  { %s22553_s30 = scalar_lea.vmem %s206_s1, 1280  ;;  %p22558_p4 = scmp.lt.s32.totalorder %s206_s1, %s206_s1 }
 0x135   :  { %p22554_p3 = scmp.ne.s32.totalorder %s206_s1, %s22553_s30  ;;  %p22559_p5 = scmp.lt.s32.totalorder %s22553_s30, %s22553_s30 }
 0x137   :  { %p22560_p6 = por %p22559_p5, %p22558_p4 }
 0x139   :  { %p22561_p7 = pnand %p22560_p6, %p22554_p3 }
 0x13b   :  { %22564 = shalt.err (!%p22561_p7)
}
 0x13c   :  { %s24764_s3 = sld [smem:[#allocation57_spill]]  ;;  %s22803_s24 = smov [#allocation18]  }
 0x13d   :  { %211 = dma.hbm_to_vmem [thread:$0]  %s22906_s27, 1280, %s206_s1, [#allocation14], %s22782_s18, %s22782_s18, %s22783_s22  }
 0x13e   :  { %s231_s21 = sshll.u32 %s22803_s24, 4  ;;  %s22804_s12 = smov [#allocation21]   ;;  %s232_s21 = int_to_ptr.vmem [resolvable:$true] %s231_s21 }
 0x13f   :  { %s259_s11 = sshll.u32 %s22804_s12, 4  ;;  %s260_s11 = int_to_ptr.vmem [resolvable:$true] %s259_s11 }
 0x142   :  { %s22565_s19 = scalar_lea.hbm %s24764_s3, 256 }
 0x143   :  { %p22566_p8 = scmp.ne.s32.totalorder %s24764_s3, %s22565_s19  ;;  %p22569_p9 = scmp.lt.u32.totalorder %s22565_s19, %s24764_s3 }
 0x145   :  { %p22571_p10 = pnand %p22569_p9, %p22566_p8 }
 0x147   :  { %22574 = shalt.err (!%p22571_p10)
}
 0x148   :  { %s22575_s0 = scalar_lea.vmem %s232_s21, 256  ;;  %p22580_p12 = scmp.lt.s32.totalorder %s232_s21, %s232_s21 }
 0x149   :  { %p22576_p11 = scmp.ne.s32.totalorder %s232_s21, %s22575_s0  ;;  %p22581_p13 = scmp.lt.s32.totalorder %s22575_s0, %s22575_s0 }
 0x14b   :  { %p22582_p0 = por %p22581_p13, %p22580_p12 }
 0x14d   :  { %p22583_p1 = pnand %p22582_p0, %p22576_p11 }
 0x14f   :  { %22586 = shalt.err (!%p22583_p1)
}
 0x150   :  { %s24765_s27 = sld [smem:[#allocation60_spill]] }
 0x151   :  { %237 = dma.hbm_to_vmem [thread:$0]  %s24764_s3, 256, %s232_s21, [#allocation17], %s22782_s18, %s22782_s18, %s22783_s22  }
 0x156   :  { %s22587_s15 = scalar_lea.hbm %s24765_s27, 10240 }
 0x157   :  { %p22588_p2 = scmp.ne.s32.totalorder %s24765_s27, %s22587_s15  ;;  %p22591_p3 = scmp.lt.u32.totalorder %s22587_s15, %s24765_s27 }
 0x159   :  { %p22593_p4 = pnand %p22591_p3, %p22588_p2 }
 0x15b   :  { %22596 = shalt.err (!%p22593_p4)
}
 0x15c   :  { %s22597_s26 = scalar_lea.vmem %s260_s11, 10240  ;;  %p22602_p6 = scmp.lt.s32.totalorder %s260_s11, %s260_s11 }
 0x15d   :  { %p22598_p5 = scmp.ne.s32.totalorder %s260_s11, %s22597_s26  ;;  %p22603_p7 = scmp.lt.s32.totalorder %s22597_s26, %s22597_s26 }
 0x15f   :  { %p22604_p8 = por %p22603_p7, %p22602_p6 }
 0x161   :  { %p22605_p9 = pnand %p22604_p8, %p22598_p5 }
 0x163   :  { %22608 = shalt.err (!%p22605_p9)
}
 0x164   :  { %s24766_s9 = sld [smem:[#allocation61_spill]]  ;;  %s22805_s13 = smov [#allocation24]  }
 0x165   :  { %265 = dma.hbm_to_vmem [thread:$0]  %s24765_s27, 10240, %s260_s11, [#allocation20], %s22782_s18, %s22782_s18, %s22783_s22  }
 0x166   :  { %s283_s8 = sshll.u32 %s22805_s13, 4  ;;  %s22806_s17 = smov [#allocation27]   ;;  %s284_s8 = int_to_ptr.vmem [resolvable:$true] %s283_s8 }
 0x167   :  { %s311_s28 = sshll.u32 %s22806_s17, 4  ;;  %s312_s28 = int_to_ptr.vmem [resolvable:$true] %s311_s28 }
 0x16a   :  { %s22609_s1 = scalar_lea.hbm %s24766_s9, 128 }
 0x16b   :  { %p22610_p10 = scmp.ne.s32.totalorder %s24766_s9, %s22609_s1  ;;  %p22613_p11 = scmp.lt.u32.totalorder %s22609_s1, %s24766_s9 }
 0x16d   :  { %p22615_p12 = pnand %p22613_p11, %p22610_p10 }
 0x16f   :  { %22618 = shalt.err (!%p22615_p12)
}
 0x170   :  { %s22619_s2 = scalar_lea.vmem %s284_s8, 128  ;;  %p22624_p0 = scmp.lt.s32.totalorder %s284_s8, %s284_s8 }
 0x171   :  { %p22620_p13 = scmp.ne.s32.totalorder %s284_s8, %s22619_s2  ;;  %p22625_p1 = scmp.lt.s32.totalorder %s22619_s2, %s22619_s2 }
 0x173   :  { %p22626_p2 = por %p22625_p1, %p22624_p0 }
 0x175   :  { %p22627_p3 = pnand %p22626_p2, %p22620_p13 }
 0x177   :  { %22630 = shalt.err (!%p22627_p3)
}
 0x178   :  { %s24767_s7 = sld [smem:[#allocation64_spill]] }
 0x179   :  { %289 = dma.hbm_to_vmem [thread:$0]  %s24766_s9, 128, %s284_s8, [#allocation23], %s22793_s16, %s22793_s16, %s22794_s20  }
 0x17e   :  { %s22631_s25 = scalar_lea.hbm %s24767_s7, 20480 }
 0x17f   :  { %p22632_p4 = scmp.ne.s32.totalorder %s24767_s7, %s22631_s25  ;;  %p22635_p5 = scmp.lt.u32.totalorder %s22631_s25, %s24767_s7 }
 0x181   :  { %p22637_p6 = pnand %p22635_p5, %p22632_p4 }
 0x183   :  { %22640 = shalt.err (!%p22637_p6)
}
 0x184   :  { %s22641_s30 = scalar_lea.vmem %s312_s28, 20480  ;;  %p22646_p8 = scmp.lt.s32.totalorder %s312_s28, %s312_s28 }
 0x185   :  { %p22642_p7 = scmp.ne.s32.totalorder %s312_s28, %s22641_s30  ;;  %p22647_p9 = scmp.lt.s32.totalorder %s22641_s30, %s22641_s30 }
 0x187   :  { %p22648_p10 = por %p22647_p9, %p22646_p8 }
 0x189   :  { %p22649_p11 = pnand %p22648_p10, %p22642_p7 }
 0x18b   :  { %22652 = shalt.err (!%p22649_p11)
}
 0x18c   :  { %s24768_s3 = sld [smem:[#allocation65_spill]]  ;;  %s22807_s20 = smov [#allocation30]  }
 0x18d   :  { %317 = dma.hbm_to_vmem [thread:$0]  %s24767_s7, 20480, %s312_s28, [#allocation26], %s22782_s18, %s22782_s18, %s22783_s22  }
 0x18e   :  { %s335_s24 = sshll.u32 %s22807_s20, 4  ;;  %s22808_s21 = smov [#allocation33]   ;;  %s336_s24 = int_to_ptr.vmem [resolvable:$true] %s335_s24 }
 0x18f   :  { %s363_s12 = sshll.u32 %s22808_s21, 4  ;;  %s364_s12 = int_to_ptr.vmem [resolvable:$true] %s363_s12 }
 0x192   :  { %s22653_s11 = scalar_lea.hbm %s24768_s3, 64 }
 0x193   :  { %p22654_p12 = scmp.ne.s32.totalorder %s24768_s3, %s22653_s11  ;;  %p22657_p13 = scmp.lt.u32.totalorder %s22653_s11, %s24768_s3 }
 0x195   :  { %p22659_p0 = pnand %p22657_p13, %p22654_p12 }
 0x197   :  { %22662 = shalt.err (!%p22659_p0)
}
 0x198   :  { %s22663_s19 = scalar_lea.vmem %s336_s24, 64  ;;  %p22668_p2 = scmp.lt.s32.totalorder %s336_s24, %s336_s24 }
 0x199   :  { %p22664_p1 = scmp.ne.s32.totalorder %s336_s24, %s22663_s19  ;;  %p22669_p3 = scmp.lt.s32.totalorder %s22663_s19, %s22663_s19 }
 0x19b   :  { %p22670_p4 = por %p22669_p3, %p22668_p2 }
 0x19d   :  { %p22671_p5 = pnand %p22670_p4, %p22664_p1 }
 0x19f   :  { %22674 = shalt.err (!%p22671_p5)
}
 0x1a0   :  { %341 = dma.hbm_to_vmem [thread:$0]  %s24768_s3, 64, %s336_s24, [#allocation29], %s22797_s10, %s22797_s10, %s22798_s14  }
 0x1a1   :  { %s22675_s0 = scalar_lea.hbm %s23001_s5, 40960 }
 0x1a2   :  { %p22676_p6 = scmp.ne.s32.totalorder %s23001_s5, %s22675_s0  ;;  %p22679_p7 = scmp.lt.u32.totalorder %s22675_s0, %s23001_s5 }
 0x1a4   :  { %p22681_p8 = pnand %p22679_p7, %p22676_p6 }
 0x1a6   :  { %22684 = shalt.err (!%p22681_p8)
}
 0x1a7   :  { %s22685_s27 = scalar_lea.vmem %s364_s12, 40960  ;;  %p22690_p10 = scmp.lt.s32.totalorder %s364_s12, %s364_s12 }
 0x1a8   :  { %p22686_p9 = scmp.ne.s32.totalorder %s364_s12, %s22685_s27  ;;  %p22691_p11 = scmp.lt.s32.totalorder %s22685_s27, %s22685_s27 }
 0x1aa   :  { %p22692_p12 = por %p22691_p11, %p22690_p10 }
 0x1ac   :  { %p22693_p13 = pnand %p22692_p12, %p22686_p9 }
 0x1ae   :  { %22696 = shalt.err (!%p22693_p13)
}
 0x1af   :  { %369 = dma.hbm_to_vmem [thread:$0]  %s23001_s5, 40960, %s364_s12, [#allocation32], %s22782_s18, %s22782_s18, %s22783_s22  }
 0x1b0   :  { %s22809_s14 = smov [#allocation34]   ;;  %s22697_s26 = scalar_lea.hbm %s23006_s29, 64 }
 0x1b1   :  { %s375_s15 = sshll.u32 %s22809_s14, 4  ;;  %p22698_p0 = scmp.ne.s32.totalorder %s23006_s29, %s22697_s26  ;;  %s376_s15 = int_to_ptr.vmem [resolvable:$true] %s375_s15 }
 0x1b2   :  { %p22701_p1 = scmp.lt.u32.totalorder %s22697_s26, %s23006_s29 }
 0x1b4   :  { %p22703_p2 = pnand %p22701_p1, %p22698_p0 }
 0x1b6   :  { %22706 = shalt.err (!%p22703_p2)
}
 0x1b7   :  { %s22707_s9 = scalar_lea.vmem %s376_s15, 64  ;;  %p22712_p4 = scmp.lt.s32.totalorder %s376_s15, %s376_s15 }
 0x1b8   :  { %p22708_p3 = scmp.ne.s32.totalorder %s376_s15, %s22707_s9  ;;  %p22713_p5 = scmp.lt.s32.totalorder %s22707_s9, %s22707_s9 }
 0x1ba   :  { %p22714_p6 = por %p22713_p5, %p22712_p4 }
 0x1bc   :  { %p22715_p7 = pnand %p22714_p6, %p22708_p3 }
 0x1be   :  { %22718 = shalt.err (!%p22715_p7)
}
 0x1bf   :  { %381 = dma.hbm_to_vmem [thread:$0]  %s23006_s29, 64, %s376_s15, [#allocation35], %s22787_s23, %s22787_s23, %s22788_s6  }
 0x1c0   :  { %22719 = dma.done.wait [#allocation3], 256  }
 0x1c1   :  { %22720 = vsyncadd [#allocation3], 4294967040 }
 0x1c2   :  { %22721 = dma.done.wait [#allocation5], 512  }
 0x1c3   :  { %22722 = vsyncadd [#allocation5], 4294966784 }
 0x1c4   :  { %22723 = dma.done.wait [#allocation8], 320  }
 0x1c5   :  { %22724 = vsyncadd [#allocation8], 4294966976 }
 0x1c6   :  { %22725 = dma.done.wait [#allocation11], 288  }
 0x1c7   :  { %22726 = vsyncadd [#allocation11], 4294967008 }
 0x1c8   :  { %22727 = dma.done.wait [#allocation14], 1792  }
 0x1c9   :  { %22728 = vsyncadd [#allocation14], 4294965504 }
 0x1ca   :  { %22729 = dma.done.wait [#allocation17], 320  }
 0x1cb   :  { %22730 = vsyncadd [#allocation17], 4294966976 }
 0x1cc   :  { %22731 = dma.done.wait [#allocation20], 10880  }
 0x1cd   :  { %22732 = vsyncadd [#allocation20], 4294956416 }
 0x1ce   :  { %22733 = dma.done.wait [#allocation23], 192  }
 0x1cf   :  { %22734 = vsyncadd [#allocation23], 4294967104 }
 0x1d0   :  { %22735 = dma.done.wait [#allocation26], 20800  }
 0x1d1   :  { %22736 = vsyncadd [#allocation26], 4294946496 }
 0x1d2   :  { %22737 = dma.done.wait [#allocation29], 128  }
 0x1d3   :  { %22738 = vsyncadd [#allocation29], 4294967168 }
 0x1d4   :  { %22739 = dma.done.wait [#allocation32], 41120  }
 0x1d5   :  { %22740 = vsyncadd [#allocation32], 4294926176 }
 0x1d6   :  { %22741 = dma.done.wait [#allocation35], 64  }
 0x1d7   :  { %22742 = vsyncadd [#allocation35], 4294967232  ;;  %s24769_s5 = sld [smem:[#allocation51_spill]]  ;;  %s24770_s29 = sld [smem:[#allocation48_spill]]  ;;  %vm455_vm0 = vcmask 130048   ;;  %vm544_vm1 = vcmask 1041408  }
 0x1d8   :  { %s24771_s18 = sld [smem:[#allocation52_spill]]  ;;  %v23181_v5 = vld [vmem:[#allocation10] sm:$0x3]  ;;  %vm537_vm2 = vcmask 15360   ;;  %v878_v26 = vld [vmem:[#allocation4] sm:$0xff]  ;;  %s24772_s6 = sld [smem:[#allocation49_spill]] }
 0x1d9   :  { %18319 = vmatprep.subr.msk.mxu0 %vm544_vm1, %v23181_v5  ;;  %v795_v25 = vld [vmem:[#allocation2] sm:$0xff]  ;;  %v796_v32 = vld [vmem:[#allocation2 + $0x8] sm:$0x1]  ;;  %v879_v33 = vld [vmem:[#allocation4 + $0x8] sm:$0x1]  ;;  %v22810_v54 = vmov 0.0|0.0  }
 0x1da   :  { %18320 = vmatpush3.msk.msra.mxu0 %vm544_vm1, %v23181_v5  ;;  %vm22811_vm7 = vmmov 0   ;;  %v22812_v55 = vmov 0.0   ;;  %v22813_v57 = vmov 0   ;;  %s24773_s13 = sld [smem:[#allocation50_spill]]  ;;  %vm1073_vm8 = vcmask 1040384   ;;  %s22815_s8 = smov 120  }
 0x1db   :  { %22154 = vset.pattern.permute.xlu0 %v22813_v57  ;;  %vm22814_vm9 = vmmov 1   ;;  %v1062_v62 = vld [vmem:[#allocation9] sm:$0xf]  ;;  %vm1069_vm11 = vcmask 72704   ;;  %vm1169_vm12 = vcmask 31744   ;;  %vm1147_vm13 = vcmask 11264  }
 0x1dc   :  { %vm23236_vm10 = vmpackc.low %vm1073_vm8, %vm22814_vm9  ;;  %vm1176_vm14 = vcmask 1043456   ;;  %vm1641_vm15 = vcmask 261120   ;;  %s24776_s17 = sld [smem:[#allocation56_spill]]  ;;  %s24777_s28 = sld [smem:[#allocation55_spill]]  ;;  %vm9837_vm8 = vcmask 97280  }
 0x1dd   :  { %v450_v0 = vld [vmem:[%s24769_s5] sm:$0xff]  ;;  %v451_v1 = vld [vmem:[%s24769_s5 + $0x8] sm:$0xff]  ;;  %s24778_s1 = sld [smem:[#allocation59_spill]]  ;;  %s22816_s2 = smov 112  }
 0x1de   :  { %v448_v2 = vld [vmem:[%s24770_s29] sm:$0xff]  ;;  %v20580_v3 = vpack.c.bf16 %v451_v1, %v450_v0  ;;  %v449_v4 = vld [vmem:[%s24770_s29 + $0x8] sm:$0xff]  ;;  %s24779_s7 = sld [smem:[#allocation63_spill]]  ;;  %s24782_s25 = sld [smem:[#allocation67_spill]] }
 0x1df   :  { %18304 = vmatprep.mubr.msk.f32.mxu1 %vm455_vm0, %v448_v2  ;;  %v452_v8 = vld [vmem:[%s24771_s18] sm:$0xff]  ;;  %v453_v9 = vld [vmem:[%s24771_s18 + $0x8] sm:$0xff]  ;;  %s24786_s30 = sld [smem:[#allocation62_spill]]  ;;  %s24787_s3 = sld [smem:[#allocation58_spill]] }
 0x1e0   :  { %20581 = vmatprep.subr.bf16.mxu1 %v20580_v3  ;;  %v20584_v10 = vpack.c.bf16 %v453_v9, %v452_v8  ;;  %v1063_v56 = vld [vmem:[%s24772_s6] sm:$0xf]  ;;  %s24789_s20 = sld [smem:[#allocation53_spill]] }
 0x1e1   :  { %20583 = vmatpush3.bf16.msra.mxu1 %v20580_v3  ;;  %1066 = vperm.xlu0 %22154, %v1063_v56   ;;  %v1167_v63 = vld [vmem:[%s24773_s13] sm:$0xff] }
 0x1e2   :  { %18307 = vmatprep.subr.msk.mxu1 %vm544_vm1, %v23181_v5 }
 0x1e4   :  { %18305 = vmatmul.mubr.msk.f32.vlgmr.msra.gmra.mrb[0].mxu1 %vm455_vm0, %v449_v4 }
 0x1e5   :  { %18308 = vmatpush3.msk.msra.mxu1 %vm544_vm1, %v23181_v5 }
 0x1e6   :  { %20585 = vmatprep.subr.bf16.mxu1 %v20584_v10 }
 0x260   :  { %v1067_v0 = vpop.permute.xlu0 %1066 }
 0x2b7   :  { %v18306_v6 = vpop.f32.mrb[0].mxu1 }
 0x2b8   :  { %v528_v7 = vpop.f32.mrb[1].mxu1 }
 0x2b9   :  { %18309 = vmatprep.mubr.msk.f32.mxu1 %vm537_vm2, %v528_v7 }
 0x2ba   :  { %18310 = vmatmul.mubr.msk.f32.vlgmr.msra.gmra.mrb[2].mxu1 %vm537_vm2, %v18306_v6 }
 0x2bb   :  { %20587 = vmatpush3.bf16.msra.mxu1 %v20584_v10 }
 0x38d   :  { %v23195_v11 = vpop.f32.mrb[2].mxu1 }
 0x38e   :  { %v624_v12 = vsub.f32 %v449_v4, %v23195_v11  ;;  %v23198_v13 = vpop.f32.mrb[3].mxu1 }
 0x38f   :  { %v623_v14 = vsub.f32 %v448_v2, %v23198_v13 }
 0x390   :  { %v626_v16 = vmul.f32 %v624_v12, %v624_v12 }
 0x391   :  { %v625_v15 = vmul.f32 %v623_v14, %v623_v14 }
 0x393   :  { %18316 = vmatprep.mubr.msk.f32.mxu1 %vm455_vm0, %v625_v15 }
 0x394   :  { %18317 = vmatmul.mubr.msk.f32.vlgmr.msra.gmra.mrb[4].mxu1 %vm455_vm0, %v626_v16 }
 0x395   :  { %18328 = vmatprep.mubr.msk.f32.mxu1 %vm455_vm0, %v795_v25 }
 0x467   :  { %v18318_v17 = vpop.f32.mrb[4].mxu1 }
 0x468   :  { %v705_v18 = vadd.f32 1e-05, %v18318_v17  ;;  %v699_v19 = vpop.f32.mrb[5].mxu1 }
 0x469   :  { %v700_v20 = vadd.f32 1e-05, %v699_v19 }
 0x46a   :  { %22180 = vrsqrt.f32 %v705_v18 }
 0x46b   :  { %22182 = vrsqrt.f32 %v700_v20 }
 0x474   :  { %v22181_v21 = vpop.eup %22180 }
 0x475   :  { %v22183_v22 = vpop.eup %22182  ;;  %v23203_v23 = vmul.f32 %v22181_v21, %v705_v18 }
 0x476   :  { %v23205_v24 = vmul.f32 %v22183_v22, %v700_v20  ;;  %18321 = vmatprep.mubr.msk.f32.mxu0 %vm537_vm2, %v22183_v22 }
 0x477   :  { %18322 = vmatmul.mubr.msk.f32.vlgmr.msra.gmra.mrb[0].mxu0 %vm537_vm2, %v22181_v21 }
 0x478   :  { %18335 = vmatprep.mubr.msk.f32.mxu0 %vm455_vm0, %v878_v26 }
 0x54a   :  { %v18323_v27 = vpop.f32.mrb[0].mxu0 }
 0x54b   :  { %v794_v28 = vmul.f32 %v18323_v27, %v624_v12  ;;  %v784_v29 = vpop.f32.mrb[1].mxu0 }
 0x54c   :  { %v793_v30 = vmul.f32 %v784_v29, %v623_v14 }
 0x54e   :  { %v20588_v31 = vpack.c.bf16 %v794_v28, %v793_v30  ;;  %v1168_v28 = vld [vmem:[%s24773_s13 + $0x8] sm:$0x1] }
 0x550   :  { %20589 = vmatprep.subr.bf16.mxu1 %v20588_v31  ;;  %20593 = vmatprep.subr.bf16.mxu0 %v20588_v31 }
 0x551   :  { %20591 = vmatpush3.bf16.msra.mxu1 %v20588_v31  ;;  %20595 = vmatpush3.bf16.msra.mxu0 %v20588_v31  ;;  %v1340_v31 = vld [vmem:[#allocation7] sm:$0xff] }
 0x552   :  { %20597 = vmatprep.subr.bf16.mxu1 %v20580_v3  ;;  %20600 = vmatprep.subr.bf16.mxu0 %v22810_v54 }
 0x554   :  { %18329 = vmatmul.mubr.msk.f32.vlgmr.msra.gmra.mrb[6].mxu1 %vm455_vm0, %v796_v32  ;;  %18336 = vmatmul.mubr.msk.f32.vlgmr.msra.gmra.mrb[2].mxu0 %vm455_vm0, %v879_v33 }
 0x555   :  { %20599 = vmatpush3.bf16.msra.mxu1 %v20580_v3  ;;  %18349 = vmatprep.mubr.msk.f32.mxu0 %vm22811_vm7, %v22812_v55 }
 0x627   :  { %v23213_v34 = vpop.f32.mrb[6].mxu1  ;;  %v23215_v35 = vpop.f32.mrb[2].mxu0 }
 0x628   :  { %v962_v36 = vmul.f32 %v23213_v34, %v23213_v34  ;;  %v964_v37 = vmul.f32 %v23215_v35, %v23215_v35  ;;  %v23221_v38 = vpop.f32.mrb[7].mxu1  ;;  %v23223_v39 = vpop.f32.mrb[3].mxu0 }
 0x629   :  { %v961_v40 = vmul.f32 %v23221_v38, %v23221_v38  ;;  %v963_v41 = vmul.f32 %v23223_v39, %v23223_v39 }
 0x62a   :  { %v966_v42 = vadd.f32 %v964_v37, %v962_v36 }
 0x62b   :  { %v965_v43 = vadd.f32 %v963_v41, %v961_v40 }
 0x62c   :  { %22184 = vrsqrt.f32 %v966_v42  ;;  %vm976_vm3 = vcmp.eq.f32.partialorder %v966_v42, inf  ;;  %v979_v51 = vand.u32 2147483648, %v966_v42  ;;  %vm978_vm6 = vcmp.eq.f32.partialorder %v966_v42, 0.0 }
 0x62d   :  { %22186 = vrsqrt.f32 %v965_v43  ;;  %vm969_vm4 = vcmp.eq.f32.partialorder %v965_v43, inf  ;;  %v972_v48 = vand.u32 2147483648, %v965_v43  ;;  %vm971_vm5 = vcmp.eq.f32.partialorder %v965_v43, 0.0 }
 0x636   :  { %v22185_v44 = vpop.eup %22184 }
 0x637   :  { %v22187_v45 = vpop.eup %22186  ;;  %v975_v46 = vmul.f32 %v22185_v44, %v966_v42 }
 0x638   :  { %v968_v47 = vmul.f32 %v22187_v45, %v965_v43 }
 0x639   :  { %v977_v49 = vsel %vm976_vm3, %v966_v42, %v975_v46  ;;  %vm1815_vm3 = vcmask 64512  }
 0x63a   :  { %v970_v50 = vsel %vm969_vm4, %v965_v43, %v968_v47  ;;  %v980_v53 = vsel %vm978_vm6, %v979_v51, %v977_v49  ;;  %vm2773_vm4 = vcmask 195584   ;;  %vm24092_vm6 = vmpackc.low %vm1176_vm14, %vm22814_vm9 }
 0x63b   :  { %v973_v52 = vsel %vm971_vm5, %v972_v48, %v970_v50  ;;  %vm9036_vm5 = vcmask 523264  }
 0x63c   :  { %18342 = vmatprep.mubr.msk.f32.mxu1 %vm455_vm0, %v973_v52 }
 0x63d   :  { %18343 = vmatmul.mubr.msk.f32.vlgmr.msra.gmra.mrb[8].mxu1 %vm455_vm0, %v980_v53 }
 0x63e   :  { %18354 = vmatprep.mubr.msk.f32.mxu1 %vm1169_vm12, %v1167_v63 }
 0x710   :  { %v18344_v58 = vpop.f32.mrb[8].mxu1 }
 0x711   :  { %v1053_v59 = vpop.f32.mrb[9].mxu1 }
 0x712   :  { %v20601_v61 = vpack.c.bf16 %v18344_v58, %v1053_v59 }
 0x714   :  { %20603 = vmatpush3.bf16.msk.msra.mxu0 %vm23236_vm10, %v20601_v61 }
 0x715   :  { %18357 = vmatprep.subr.msk.mxu0 %vm544_vm1, %v23181_v5 }
 0x717   :  { %18350 = vmatmul.mubr.msk.f32.vlgmr.msra.gmra.mrb[4].mxu0 %vm1069_vm11, %v1062_v62 }
 0x718   :  { %18358 = vmatpush3.msk.msra.mxu0 %vm544_vm1, %v23181_v5 }
 0x719   :  { %18376 = vmatprep.subr.msk.mxu0 %vm544_vm1, %v23181_v5 }
 0x7ea   :  { %v1143_v1 = vpop.f32.mrb[4].mxu0 }
 0x7eb   :  { %v1144_v2 = vadd.f32 %v1143_v1, %v1067_v0  ;;  %v18351_v3 = vpop.f32.mrb[5].mxu0 }
 0x7ed   :  { %v1148_v4 = vsel %vm1147_vm13, %v1144_v2, -inf }
 0x7ee   :  { %v1149_v6 = vrot.slane %v1148_v4, 4 }
 0x7f0   :  { %v1150_v7 = vmax.f32 %v1148_v4, %v1149_v6 }
 0x7f2   :  { %v1151_v8 = vrot.slane %v1150_v7, 2 }
 0x7f4   :  { %v1152_v9 = vmax.f32 %v1150_v7, %v1151_v8 }
 0x7f6   :  { %v1153_v10 = vrot.slane %v1152_v9, 1 }
 0x7f8   :  { %v1154_v12 = vmax.f32 %v1152_v9, %v1153_v10  ;;  %v1639_v10 = vld [vmem:[#allocation13] sm:$0xff] }
 0x7fa   :  { %v1155_v14 = vsub.f32 %v1144_v2, %v1154_v12  ;;  %v1724_v12 = vld [vmem:[#allocation13 + $0x10] sm:$0xff] }
 0x7fc   :  { %v1156_v15 = vmul.f32 1.442695, %v1155_v14 }
 0x7fe   :  { %22188 = vpow2.f32 %v1156_v15  ;;  %v1628_v15 = vld [vmem:[#allocation12 + $0x8] sm:$0xff] }
 0x808   :  { %v22189_v16 = vpop.eup %22188 }
 0x809   :  { %v1158_v17 = vsel %vm1147_vm13, %v22189_v16, 0.0 }
 0x80a   :  { %v1159_v18 = vrot.slane %v1158_v17, 4 }
 0x80c   :  { %v1160_v19 = vadd.f32 %v1159_v18, %v1158_v17 }
 0x80e   :  { %v1161_v20 = vrot.slane %v1160_v19, 2 }
 0x810   :  { %v1162_v21 = vadd.f32 %v1161_v20, %v1160_v19 }
 0x812   :  { %v1163_v22 = vrot.slane %v1162_v21, 1 }
 0x814   :  { %v1164_v25 = vadd.f32 %v1163_v22, %v1162_v21 }
 0x816   :  { %22190 = vrcp.f32 %v1164_v25 }
 0x820   :  { %v22191_v26 = vpop.eup %22190 }
 0x821   :  { %v1166_v27 = vmul.f32 %v22191_v26, %v22189_v16  ;;  %v1627_v16 = vld [vmem:[#allocation12] sm:$0xff] }
 0x823   :  { %18352 = vmatprep.subr.msk.mxu1 %vm1176_vm14, %v1166_v27 }
 0x824   :  { %18353 = vmatpush3.msk.msra.mxu1 %vm1176_vm14, %v1166_v27 }
 0x825   :  { %18355 = vmatmul.mubr.msk.f32.vlgmr.msra.gmra.mrb[10].mxu1 %vm1169_vm12, %v1168_v28  ;;  %v1640_v28 = vld [vmem:[#allocation13 + $0x8] sm:$0xff] }
 0x826   :  { %18366 = vmatprep.mubr.msk.f32.mxu1 %vm1069_vm11, %v1340_v31 }
 0x8f8   :  { %v18356_v29 = vpop.f32.mrb[10].mxu1 }
 0x8f9   :  { %v1246_v30 = vpop.f32.mrb[11].mxu1 }
 0x8fa   :  { %18359 = vmatprep.mubr.msk.f32.mxu0 %vm537_vm2, %v1246_v30 }
 0x8fb   :  { %18360 = vmatmul.mubr.msk.f32.vlgmr.msra.gmra.mrb[6].mxu0 %vm537_vm2, %v18356_v29  ;;  %v1725_v29 = vld [vmem:[#allocation13 + $0x18] sm:$0xff] }
 0x8fc   :  { %18378 = vmatprep.mubr.msk.f32.mxu0 %vm537_vm2, %v23205_v24  ;;  %18377 = vmatpush3.msk.msra.mxu0 %vm544_vm1, %v23181_v5 }
 0x8ff   :  { %18379 = vmatmul.mubr.msk.f32.vlgmr.msra.gmra.mrb[8].mxu0 %vm537_vm2, %v23203_v23  ;;  %v1341_v23 = vld [vmem:[#allocation7 + $0x8] sm:$0xff] }
 0x900   :  { %18389 = vmatprep.mubr.msk.f32.mxu0 %vm1641_vm15, %v1639_v10  ;;  %v16793_v10 = vld [vmem:[%s24776_s17 + $0x30] sm:$0xff] }
 0x9ce   :  { %v18361_v32 = vpop.f32.mrb[6].mxu0 }
 0x9cf   :  { %v1339_v33 = vmul.f32 %v18361_v32, %v23213_v34  ;;  %v1343_v36 = vmul.f32 %v18361_v32, %v23215_v35  ;;  %v1327_v37 = vpop.f32.mrb[7].mxu0  ;;  %v1336_v34 = vld [vmem:[#allocation6] sm:$0xff]  ;;  %v1337_v35 = vld [vmem:[#allocation6 + $0x8] sm:$0xff] }
 0x9d0   :  { %v1338_v40 = vmul.f32 %v1327_v37, %v23221_v38  ;;  %v1342_v41 = vmul.f32 %v1327_v37, %v23223_v39  ;;  %v1911_v37 = vld [vmem:[%s24776_s17] sm:$0xff] }
 0x9d2   :  { %v20604_v24 = vpack.c.bf16 %v1343_v36, %v1342_v41  ;;  %v20610_v42 = vpack.c.bf16 %v1339_v33, %v1338_v40  ;;  %v18380_v43 = vpop.f32.mrb[8].mxu0  ;;  %v1912_v40 = vld [vmem:[%s24776_s17 + $0x8] sm:$0xff] }
 0x9d3   :  { %v1584_v5 = vpop.f32.mrb[9].mxu0  ;;  %v20636_v41 = vpack.c.bf16 %v1912_v40, %v1911_v37 }
 0x9d4   :  { %20606 = vmatprep.subr.msk.bf16.mxu1 %vm23236_vm10, %v20604_v24 }
 0x9d5   :  { %20609 = vmatpush3.bf16.msk.msra.mxu1 %vm23236_vm10, %v20604_v24 }
 0x9d6   :  { %20612 = vmatprep.subr.msk.bf16.mxu1 %vm23236_vm10, %v20610_v42 }
 0x9d8   :  { %18367 = vmatmul.mubr.msk.f32.vlgmr.msra.gmra.mrb[12].mxu1 %vm1069_vm11, %v1341_v23 }
 0x9d9   :  { %20615 = vmatpush3.bf16.msk.msra.mxu1 %vm23236_vm10, %v20610_v42  ;;  %18373 = vmatprep.mubr.msk.f32.mxu1 %vm1069_vm11, %v1336_v34  ;;  %vm24390_vm10 = vmpackc.low %vm544_vm1, %vm22814_vm9 }
 0x9e0   :  { %18374 = vmatmul.mubr.msk.f32.vlgmr.msra.gmra.mrb[12].mxu1 %vm1069_vm11, %v1337_v35  ;;  %v23336_v35 = vld [vmem:[%s24777_s28] sm:$0xff]  ;;  %vm13349_vm11 = vcmask 80896  }
 0x9e1   :  { %18400 = vmatprep.mubr.msk.f32.mxu1 %vm1641_vm15, %v1724_v12  ;;  %v16794_v12 = vld [vmem:[%s24776_s17 + $0x38] sm:$0xff] }
 0xab3   :  { %v18375_v38 = vpop.f32.mrb[12].mxu1 }
 0xab4   :  { %v1594_v39 = vmul.f32 %v18380_v43, %v18375_v38  ;;  %v1503_v44 = vpop.f32.mrb[13].mxu1  ;;  %v23344_v38 = vld [vmem:[%s24777_s28 + $0x8] sm:$0xff] }
 0xab5   :  { %v1593_v45 = vmul.f32 %v1584_v5, %v1503_v44  ;;  %v23359_v44 = vld [vmem:[%s24777_s28 + $0x18] sm:$0xff] }
 0xab6   :  { %v1596_v46 = vadd.f32 %v23195_v11, %v1594_v39  ;;  %v23352_v39 = vld [vmem:[%s24777_s28 + $0x10] sm:$0xff] }
 0xab7   :  { %v1595_v47 = vadd.f32 %v1593_v45, %v23198_v13  ;;  %v23366_v45 = vld [vmem:[%s24777_s28 + $0x20] sm:$0xff] }
 0xab8   :  { %v1598_v48 = vsel %vm455_vm0, %v1596_v46, 0.0 }
 0xab9   :  { %v1597_v49 = vsel %vm455_vm0, %v1595_v47, 0.0 }
 0xaba   :  { %v1599_v50 = vadd.f32 %v1598_v48, %v1597_v49  ;;  %v23388_v48 = vld [vmem:[%s24777_s28 + $0x38] sm:$0xff]  ;;  %v23396_v49 = vld [vmem:[%s24777_s28 + $0x40] sm:$0xff] }
 0xabc   :  { %v1600_v51 = vrot.slane %v1599_v50, 4 }
 0xabe   :  { %v1601_v52 = vadd.f32 %v1600_v51, %v1599_v50  ;;  %v23403_v50 = vld [vmem:[%s24777_s28 + $0x48] sm:$0xff]  ;;  %v23410_v51 = vld [vmem:[%s24777_s28 + $0x50] sm:$0xff] }
 0xac0   :  { %v1602_v53 = vrot.slane %v1601_v52, 2 }
 0xac2   :  { %v1603_v56 = vadd.f32 %v1602_v53, %v1601_v52  ;;  %v23417_v52 = vld [vmem:[%s24777_s28 + $0x58] sm:$0xff]  ;;  %v23424_v53 = vld [vmem:[%s24777_s28 + $0x60] sm:$0xff] }
 0xac4   :  { %v1604_v57 = vrot.slane %v1603_v56, 1 }
 0xac6   :  { %v1605_v58 = vadd.f32 %v1604_v57, %v1603_v56  ;;  %v23431_v56 = vld [vmem:[%s24777_s28 + $0x68] sm:$0xff]  ;;  %v23438_v57 = vld [vmem:[%s24777_s28 + $0x70] sm:$0xff] }
 0xac8   :  { %v23283_v59 = vmul.f32 0.0625, %v1605_v58  ;;  %v16771_v58 = vld [vmem:[%s24776_s17 + $0x10] sm:$0xff] }
 0xaca   :  { %v1608_v60 = vsub.f32 %v1595_v47, %v23283_v59  ;;  %v1609_v61 = vsub.f32 %v1596_v46, %v23283_v59  ;;  %v23374_v46 = vld [vmem:[%s24777_s28 + $0x28] sm:$0xff]  ;;  %v23381_v47 = vld [vmem:[%s24777_s28 + $0x30] sm:$0xff] }
 0xacc   :  { %v1610_v11 = vmul.f32 %v1608_v60, %v1608_v60  ;;  %v1611_v62 = vmul.f32 %v1609_v61, %v1609_v61 }
 0xace   :  { %v1612_v13 = vsel %vm455_vm0, %v1610_v11, 0.0  ;;  %v1613_v63 = vsel %vm455_vm0, %v1611_v62, 0.0 }
 0xacf   :  { %v1614_v0 = vadd.f32 %v1613_v63, %v1612_v13 }
 0xad1   :  { %v1615_v1 = vrot.slane %v1614_v0, 4 }
 0xad3   :  { %v1616_v2 = vadd.f32 %v1615_v1, %v1614_v0  ;;  %v16782_v0 = vld [vmem:[%s24776_s17 + $0x20] sm:$0xff]  ;;  %v16783_v1 = vld [vmem:[%s24776_s17 + $0x28] sm:$0xff] }
 0xad5   :  { %v1617_v3 = vrot.slane %v1616_v2, 2 }
 0xad7   :  { %v1618_v4 = vadd.f32 %v1617_v3, %v1616_v2 }
 0xad9   :  { %v1619_v6 = vrot.slane %v1618_v4, 1 }
 0xadb   :  { %v1620_v7 = vadd.f32 %v1619_v6, %v1618_v4  ;;  %v20648_v4 = vpack.c.bf16 %v16783_v1, %v16782_v0  ;;  %v16812_v0 = vld [vmem:[%s24776_s17 + $0x58] sm:$0xff] }
 0xadd   :  { %v1621_v8 = vmul.f32 0.0625, %v1620_v7 }
 0xadf   :  { %v1622_v9 = vadd.f32 1e-05, %v1621_v8 }
 0xae1   :  { %22192 = vrsqrt.f32 %v1622_v9 }
 0xaeb   :  { %v22193_v14 = vpop.eup %22192 }
 0xaec   :  { %v1626_v17 = vmul.f32 %v22193_v14, %v1609_v61  ;;  %v1625_v18 = vmul.f32 %v22193_v14, %v1608_v60  ;;  %v23291_v19 = vmul.f32 %v22193_v14, %v1622_v9  ;;  %v16772_v60 = vld [vmem:[%s24776_s17 + $0x18] sm:$0xff] }
 0xaed   :  { %v20642_v61 = vpack.c.bf16 %v16772_v60, %v16771_v58 }
 0xaee   :  { %v23293_v20 = vadd.f32 %v1628_v15, %v1626_v17  ;;  %v23295_v21 = vadd.f32 %v1627_v16, %v1625_v18  ;;  %v20654_v16 = vpack.c.bf16 %v16794_v12, %v16793_v10 }
 0xaf0   :  { %1635 = vrot.lane.b32.xlu1 %v23293_v20, %s22815_s8  ;;  %1633 = vrot.lane.b32.xlu0 %v23295_v21, %s22815_s8  ;;  %v20616_v22 = vpack.c.bf16 %v23293_v20, %v23295_v21 }
 0xaf2   :  { %20617 = vmatprep.subr.bf16.mxu0 %v20616_v22  ;;  %20625 = vmatprep.subr.bf16.mxu1 %v20616_v22 }
 0xaf3   :  { %20619 = vmatpush3.bf16.msra.mxu0 %v20616_v22  ;;  %20627 = vmatpush3.bf16.msra.mxu1 %v20616_v22 }
 0xb62   :  { %v23303_v25 = vpop.permute.xlu1 %1635  ;;  %v23305_v26 = vpop.permute.xlu0 %1633 }
 0xb63   :  { %v20620_v27 = vpack.c.bf16 %v23303_v25, %v23305_v26 }
 0xb65   :  { %20621 = vmatprep.subr.bf16.mxu0 %v20620_v27  ;;  %20629 = vmatprep.subr.bf16.mxu1 %v20620_v27 }
 0xb66   :  { %20623 = vmatpush3.bf16.msra.mxu0 %v20620_v27  ;;  %20631 = vmatpush3.bf16.msra.mxu1 %v20620_v27 }
 0xb67   :  { %20632 = vmatprep.subr.bf16.mxu0 %v22810_v54  ;;  %20635 = vmatprep.subr.bf16.mxu1 %v22810_v54 }
 0xb69   :  { %18390 = vmatmul.mubr.msk.f32.vlgmr.msra.gmra.mrb[10].mxu0 %vm1641_vm15, %v1640_v28  ;;  %18401 = vmatmul.mubr.msk.f32.vlgmr.msra.gmra.mrb[14].mxu1 %vm1641_vm15, %v1725_v29  ;;  %v16804_v28 = vld [vmem:[%s24776_s17 + $0x40] sm:$0xff]  ;;  %v16805_v29 = vld [vmem:[%s24776_s17 + $0x48] sm:$0xff] }
 0xb6a   :  { %18407 = vmatprep.mubr.msk.f32.mxu0 %vm22811_vm7, %v22812_v55  ;;  %18420 = vmatprep.mubr.msk.f32.mxu1 %vm22811_vm7, %v22812_v55  ;;  %v20660_v40 = vpack.c.bf16 %v16805_v29, %v16804_v28  ;;  %v23505_v29 = vld [vmem:[#allocation15 + $0x8] sm:$0xff] }
 0xb6b   :  { %20637 = vmatpush3.bf16.msra.mxu1 %v20636_v41 }
 0xb6c   :  { %20641 = vmatprep.subr.bf16.mxu1 %v22810_v54 }
 0xc3c   :  { %v23317_v30 = vpop.f32.mrb[10].mxu0  ;;  %v23319_v31 = vpop.f32.mrb[14].mxu1 }
 0xc3d   :  { %v23321_v32 = vpop.f32.mrb[11].mxu0  ;;  %v23323_v33 = vpop.f32.mrb[15].mxu1 }
 0xc3e   :  { %v22155_v36 = vpack.i.bf16 %v23317_v30, %v23321_v32 }
 0xc40   :  { %22156 = vrot.lane.b32.xlu1 %v22155_v36, %s22783_s22 }
 0xcb2   :  { %v22157_v24 = vpop.permute.xlu1 %22156 }
 0xcb3   :  { %v22159_v42 = vunpack.i.h.bf16 %v22157_v24  ;;  %v22158_v43 = vunpack.i.l.bf16 %v22157_v24 }
 0xcb5   :  { %v1816_v5 = vsel %vm1815_vm3, %v23323_v33, %v22158_v43  ;;  %v1817_v23 = vsel %vm1815_vm3, %v23319_v31, %v22159_v42 }
 0xcb6   :  { %v20633_v34 = vpack.c.bf16 %v1817_v23, %v1816_v5 }
 0xcb8   :  { %20634 = vmatpush3.bf16.msra.mxu0 %v20633_v34 }
 0xcb9   :  { %20638 = vmatprep.subr.bf16.mxu0 %v22810_v54 }
 0xcbb   :  { %18408 = vmatmul.mubr.msk.f32.vlgmr.msra.gmra.mrb[12].mxu0 %vm455_vm0, %v23336_v35 }
 0xcbc   :  { %20640 = vmatpush3.bf16.msra.mxu0 %v20633_v34  ;;  %18410 = vmatprep.mubr.msk.f32.mxu0 %vm22811_vm7, %v22812_v55 }
 0xcbd   :  { %20644 = vmatprep.subr.bf16.mxu0 %v22810_v54 }
 0xcbf   :  { %18411 = vmatmul.mubr.msk.f32.gmra.mrb[14].mxu0 %vm455_vm0, %v23344_v38 }
 0xcc0   :  { %18413 = vmatprep.mubr.msk.f32.mxu0 %vm22811_vm7, %v22812_v55 }
 0xcc3   :  { %18414 = vmatmul.mubr.msk.f32.gmra.mrb[16].mxu0 %vm455_vm0, %v23352_v39 }
 0xcc4   :  { %18433 = vmatprep.mubr.msk.f32.mxu0 %vm22811_vm7, %v22812_v55 }
 0xcc7   :  { %18434 = vmatmul.mubr.msk.f32.vlgmr.msra.gmra.mrb[18].mxu0 %vm455_vm0, %v23359_v44 }
 0xcc8   :  { %20646 = vmatpush3.bf16.msra.mxu0 %v20633_v34  ;;  %18436 = vmatprep.mubr.msk.f32.mxu0 %vm22811_vm7, %v22812_v55 }
 0xcc9   :  { %20650 = vmatprep.subr.bf16.mxu0 %v22810_v54 }
 0xccb   :  { %18437 = vmatmul.mubr.msk.f32.gmra.mrb[20].mxu0 %vm455_vm0, %v23366_v45 }
 0xccc   :  { %18439 = vmatprep.mubr.msk.f32.mxu0 %vm22811_vm7, %v22812_v55 }
 0xccf   :  { %18440 = vmatmul.mubr.msk.f32.gmra.mrb[22].mxu0 %vm455_vm0, %v23374_v46 }
 0xcd0   :  { %18459 = vmatprep.mubr.msk.f32.mxu0 %vm22811_vm7, %v22812_v55 }
 0xcd3   :  { %18460 = vmatmul.mubr.msk.f32.vlgmr.msra.gmra.mrb[24].mxu0 %vm455_vm0, %v23381_v47 }
 0xcd4   :  { %20652 = vmatpush3.bf16.msra.mxu0 %v20633_v34  ;;  %18462 = vmatprep.mubr.msk.f32.mxu0 %vm22811_vm7, %v22812_v55 }
 0xcd5   :  { %20656 = vmatprep.subr.bf16.mxu0 %v22810_v54 }
 0xcd7   :  { %18463 = vmatmul.mubr.msk.f32.gmra.mrb[26].mxu0 %vm455_vm0, %v23388_v48 }
 0xcd8   :  { %18465 = vmatprep.mubr.msk.f32.mxu0 %vm22811_vm7, %v22812_v55 }
 0xcdb   :  { %18466 = vmatmul.mubr.msk.f32.gmra.mrb[28].mxu0 %vm455_vm0, %v23396_v49 }
 0xcdc   :  { %18485 = vmatprep.mubr.msk.f32.mxu0 %vm22811_vm7, %v22812_v55 }
 0xcdf   :  { %18486 = vmatmul.mubr.msk.f32.vlgmr.msra.gmra.mrb[30].mxu0 %vm455_vm0, %v23403_v50 }
 0xce0   :  { %20658 = vmatpush3.bf16.msra.mxu0 %v20633_v34  ;;  %18488 = vmatprep.mubr.msk.f32.mxu0 %vm22811_vm7, %v22812_v55 }
 0xce3   :  { %18489 = vmatmul.mubr.msk.f32.gmra.mrb[32].mxu0 %vm455_vm0, %v23410_v51 }
 0xce4   :  { %18491 = vmatprep.mubr.msk.f32.mxu0 %vm22811_vm7, %v22812_v55 }
 0xce7   :  { %18492 = vmatmul.mubr.msk.f32.gmra.mrb[34].mxu0 %vm455_vm0, %v23417_v52 }
 0xce8   :  { %18511 = vmatprep.mubr.msk.f32.mxu0 %vm22811_vm7, %v22812_v55 }
 0xceb   :  { %18512 = vmatmul.mubr.msk.f32.vlgmr.msra.gmra.mrb[36].mxu0 %vm455_vm0, %v23424_v53 }
 0xcec   :  { %18514 = vmatprep.mubr.msk.f32.mxu0 %vm22811_vm7, %v22812_v55 }
 0xcef   :  { %18515 = vmatmul.mubr.msk.f32.gmra.mrb[38].mxu0 %vm455_vm0, %v23431_v56 }
 0xcf0   :  { %18517 = vmatprep.mubr.msk.f32.mxu0 %vm22811_vm7, %v22812_v55 }
 0xcf3   :  { %18518 = vmatmul.mubr.msk.f32.gmra.mrb[40].mxu0 %vm455_vm0, %v23438_v57 }
 0xd8e   :  { %v1897_v11 = vpop.f32.mrb[12].mxu0 }
 0xd8f   :  { %v18409_v62 = vpop.f32.mrb[13].mxu0  ;;  %18421 = vmatmul.mubr.msk.f32.vlgmr.msra.gmra.mrb[16].mxu1 %vm455_vm0, %v1897_v11 }
 0xd90   :  { %18423 = vmatprep.mubr.msk.f32.mxu1 %vm22811_vm7, %v22812_v55  ;;  %20643 = vmatpush3.bf16.msra.mxu1 %v20642_v61 }
 0xd91   :  { %20647 = vmatprep.subr.bf16.mxu1 %v22810_v54 }
 0xd92   :  { %v1902_v13 = vpop.f32.mrb[14].mxu0 }
 0xd93   :  { %v18412_v63 = vpop.f32.mrb[15].mxu0  ;;  %18424 = vmatmul.mubr.msk.f32.gmra.mrb[18].mxu1 %vm455_vm0, %v1902_v13  ;;  %v23496_v13 = vld [vmem:[#allocation15] sm:$0xff] }
 0xd94   :  { %18426 = vmatprep.mubr.msk.f32.mxu1 %vm22811_vm7, %v22812_v55  ;;  %18539 = vmatprep.mubr.msk.f32.mxu0 %vm2773_vm4, %v23496_v13  ;;  %v16811_v63 = vld [vmem:[%s24776_s17 + $0x50] sm:$0xff] }
 0xd95   :  { %v20666_v1 = vpack.c.bf16 %v16812_v0, %v16811_v63 }
 0xd96   :  { %v1907_v2 = vpop.f32.mrb[16].mxu0 }
 0xd97   :  { %v18415_v3 = vpop.f32.mrb[17].mxu0  ;;  %18427 = vmatmul.mubr.msk.f32.gmra.mrb[20].mxu1 %vm455_vm0, %v1907_v2  ;;  %v16764_v2 = vld [vmem:[#allocation16] ss:$0 sm:$0xff] }
 0xd98   :  { %18446 = vmatprep.mubr.msk.f32.mxu1 %vm22811_vm7, %v22812_v55 }
 0xd9a   :  { %v2090_v6 = vpop.f32.mrb[18].mxu0 }
 0xd9b   :  { %v18435_v7 = vpop.f32.mrb[19].mxu0  ;;  %18447 = vmatmul.mubr.msk.f32.vlgmr.msra.gmra.mrb[16].mxu1 %vm455_vm0, %v2090_v6 }
 0xd9c   :  { %18449 = vmatprep.mubr.msk.f32.mxu1 %vm22811_vm7, %v22812_v55  ;;  %20649 = vmatpush3.bf16.msra.mxu1 %v20648_v4 }
 0xd9d   :  { %20653 = vmatprep.subr.bf16.mxu1 %v22810_v54 }
 0xd9e   :  { %v2095_v8 = vpop.f32.mrb[20].mxu0 }
 0xd9f   :  { %v18438_v9 = vpop.f32.mrb[21].mxu0  ;;  %18450 = vmatmul.mubr.msk.f32.gmra.mrb[18].mxu1 %vm455_vm0, %v2095_v8 }
 0xda0   :  { %18452 = vmatprep.mubr.msk.f32.mxu1 %vm22811_vm7, %v22812_v55 }
 0xda2   :  { %v2100_v14 = vpop.f32.mrb[22].mxu0 }
 0xda3   :  { %v18441_v15 = vpop.f32.mrb[23].mxu0  ;;  %18453 = vmatmul.mubr.msk.f32.gmra.mrb[20].mxu1 %vm455_vm0, %v2100_v14 }
 0xda4   :  { %18472 = vmatprep.mubr.msk.f32.mxu1 %vm22811_vm7, %v22812_v55 }
 0xda6   :  { %v2278_v17 = vpop.f32.mrb[24].mxu0 }
 0xda7   :  { %v18461_v18 = vpop.f32.mrb[25].mxu0  ;;  %18473 = vmatmul.mubr.msk.f32.vlgmr.msra.gmra.mrb[16].mxu1 %vm455_vm0, %v2278_v17 }
 0xda8   :  { %18475 = vmatprep.mubr.msk.f32.mxu1 %vm22811_vm7, %v22812_v55  ;;  %20655 = vmatpush3.bf16.msra.mxu1 %v20654_v16 }
 0xda9   :  { %20659 = vmatprep.subr.bf16.mxu1 %v22810_v54 }
 0xdaa   :  { %v2283_v22 = vpop.f32.mrb[26].mxu0 }
 0xdab   :  { %v18464_v27 = vpop.f32.mrb[27].mxu0  ;;  %18476 = vmatmul.mubr.msk.f32.gmra.mrb[18].mxu1 %vm455_vm0, %v2283_v22 }
 0xdac   :  { %18478 = vmatprep.mubr.msk.f32.mxu1 %vm22811_vm7, %v22812_v55 }
 0xdae   :  { %v2288_v36 = vpop.f32.mrb[28].mxu0 }
 0xdaf   :  { %v18467_v37 = vpop.f32.mrb[29].mxu0  ;;  %18479 = vmatmul.mubr.msk.f32.gmra.mrb[20].mxu1 %vm455_vm0, %v2288_v36  ;;  %v23507_v36 = vld [vmem:[#allocation15 + $0x10] sm:$0xff] }
 0xdb0   :  { %18498 = vmatprep.mubr.msk.f32.mxu1 %vm22811_vm7, %v22812_v55  ;;  %v23515_v37 = vld [vmem:[#allocation15 + $0x18] sm:$0xff] }
 0xdb2   :  { %v2466_v41 = vpop.f32.mrb[30].mxu0 }
 0xdb3   :  { %v18487_v24 = vpop.f32.mrb[31].mxu0  ;;  %18499 = vmatmul.mubr.msk.f32.vlgmr.msra.gmra.mrb[16].mxu1 %vm455_vm0, %v2466_v41  ;;  %v23525_v41 = vld [vmem:[#allocation15 + $0x28] sm:$0xff] }
 0xdb4   :  { %18501 = vmatprep.mubr.msk.f32.mxu1 %vm22811_vm7, %v22812_v55  ;;  %20661 = vmatpush3.bf16.msra.mxu1 %v20660_v40  ;;  %v23517_v40 = vld [vmem:[#allocation15 + $0x20] sm:$0xff]  ;;  %v16818_v24 = vld [vmem:[%s24776_s17 + $0x60] sm:$0xff] }
 0xdb5   :  { %20667 = vmatprep.subr.bf16.mxu1 %v20666_v1 }
 0xdb6   :  { %v2471_v42 = vpop.f32.mrb[32].mxu0 }
 0xdb7   :  { %v18490_v43 = vpop.f32.mrb[33].mxu0  ;;  %18502 = vmatmul.mubr.msk.f32.gmra.mrb[18].mxu1 %vm455_vm0, %v2471_v42  ;;  %v16819_v42 = vld [vmem:[%s24776_s17 + $0x68] sm:$0xff] }
 0xdb8   :  { %18504 = vmatprep.mubr.msk.f32.mxu1 %vm22811_vm7, %v22812_v55  ;;  %v20674_v43 = vpack.c.bf16 %v16819_v42, %v16818_v24 }
 0xdba   :  { %v2476_v5 = vpop.f32.mrb[34].mxu0 }
 0xdbb   :  { %v18493_v23 = vpop.f32.mrb[35].mxu0  ;;  %18505 = vmatmul.mubr.msk.f32.gmra.mrb[20].mxu1 %vm455_vm0, %v2476_v5  ;;  %v23535_v5 = vld [vmem:[#allocation15 + $0x40] sm:$0xff] }
 0xdbc   :  { %18524 = vmatprep.mubr.msk.f32.mxu1 %vm22811_vm7, %v22812_v55  ;;  %v23537_v23 = vld [vmem:[#allocation15 + $0x48] sm:$0xff] }
 0xdbe   :  { %v2654_v34 = vpop.f32.mrb[36].mxu0 }
 0xdbf   :  { %v18513_v58 = vpop.f32.mrb[37].mxu0  ;;  %18525 = vmatmul.mubr.msk.f32.vlgmr.msra.gmra.mrb[16].mxu1 %vm455_vm0, %v2654_v34  ;;  %v16824_v34 = vld [vmem:[%s24776_s17 + $0x70] sm:$0xff] }
 0xdc0   :  { %18527 = vmatprep.mubr.msk.f32.mxu1 %vm22811_vm7, %v22812_v55  ;;  %20669 = vmatpush3.bf16.msra.mxu1 %v20666_v1  ;;  %v16825_v58 = vld [vmem:[%s24776_s17 + $0x78] sm:$0xff] }
 0xdc1   :  { %20675 = vmatprep.subr.bf16.mxu1 %v20674_v43 }
 0xdc2   :  { %v2659_v60 = vpop.f32.mrb[38].mxu0 }
 0xdc3   :  { %v18516_v61 = vpop.f32.mrb[39].mxu0  ;;  %18528 = vmatmul.mubr.msk.f32.gmra.mrb[18].mxu1 %vm455_vm0, %v2659_v60 }
 0xdc4   :  { %18530 = vmatprep.mubr.msk.f32.mxu1 %vm22811_vm7, %v22812_v55 }
 0xdc6   :  { %v2664_v11 = vpop.f32.mrb[40].mxu0 }
 0xdc7   :  { %18531 = vmatmul.mubr.msk.f32.gmra.mrb[20].mxu1 %vm455_vm0, %v2664_v11  ;;  %v18519_v62 = vpop.f32.mrb[41].mxu0  ;;  %v20682_v11 = vpack.c.bf16 %v16825_v58, %v16824_v34 }
 0xe92   :  { %v2746_v3 = vpop.f32.mrb[16].mxu1 }
 0xe93   :  { %v21879_v4 = vadd.f32 %v16764_v2, %v2746_v3  ;;  %v18526_v6 = vpop.f32.mrb[17].mxu1  ;;  %v16830_v3 = vld [vmem:[%s24776_s17 + $0x80] sm:$0xff] }
 0xe95   :  { %v2763_v8 = vmul.f32 0.01, %v21879_v4 }
 0xe96   :  { %v2751_v7 = vpop.f32.mrb[18].mxu1 }
 0xe97   :  { %v21880_v9 = vadd.f32 %v16764_v2, %v2751_v7  ;;  %v18529_v10 = vpop.f32.mrb[19].mxu1  ;;  %v2766_v15 = vmax.f32 %v21879_v4, %v2763_v8  ;;  %v16831_v4 = vld [vmem:[%s24776_s17 + $0x88] sm:$0xff] }
 0xe98   :  { %v20690_v6 = vpack.c.bf16 %v16831_v4, %v16830_v3  ;;  %v23560_v7 = vld [vmem:[#allocation15 + $0x38] sm:$0xff]  ;;  %v16837_v10 = vld [vmem:[%s24776_s17 + $0x98] sm:$0xff] }
 0xe99   :  { %v2764_v12 = vmul.f32 0.01, %v21880_v9 }
 0xe9a   :  { %v2756_v14 = vpop.f32.mrb[20].mxu1 }
 0xe9b   :  { %v2767_v16 = vmax.f32 %v21880_v9, %v2764_v12  ;;  %v21881_v17 = vadd.f32 %v16764_v2, %v2756_v14  ;;  %v18532_v18 = vpop.f32.mrb[21].mxu1  ;;  %v23552_v2 = vld [vmem:[#allocation15 + $0x30] sm:$0xff]  ;;  %v16836_v9 = vld [vmem:[%s24776_s17 + $0x90] sm:$0xff] }
 0xe9c   :  { %v20698_v12 = vpack.c.bf16 %v16837_v10, %v16836_v9 }
 0xe9d   :  { %v20662_v22 = vpack.c.bf16 %v2767_v16, %v2766_v15  ;;  %v2765_v27 = vmul.f32 0.01, %v21881_v17 }
 0xe9f   :  { %v23502_v28 = vmax.f32 %v21881_v17, %v2765_v27  ;;  %20663 = vmatprep.subr.bf16.mxu0 %v20662_v22  ;;  %v16815_v17 = vld [vmem:[#allocation16 + $0x1] ss:$0 sm:$0xff] }
 0xea0   :  { %20665 = vmatpush3.bf16.msra.mxu0 %v20662_v22 }
 0xea1   :  { %18537 = vmatprep.subr.mxu0 %v23502_v28 }
 0xea4   :  { %18538 = vmatpush3.msra.mxu0 %v23502_v28 }
 0xea5   :  { %18540 = vmatmul.mubr.msk.f32.vlgmr.msra.gmra.mrb[42].mxu0 %vm2773_vm4, %v23505_v29  ;;  %20671 = vmatprep.subr.bf16.mxu0 %v20662_v22 }
 0xea6   :  { %20673 = vmatpush3.bf16.msra.mxu0 %v20662_v22  ;;  %18555 = vmatprep.mubr.msk.f32.mxu0 %vm2773_vm4, %v23507_v36 }
 0xea7   :  { %18553 = vmatprep.subr.mxu0 %v23502_v28 }
 0xeaa   :  { %18554 = vmatpush3.msra.mxu0 %v23502_v28 }
 0xeab   :  { %20679 = vmatprep.subr.bf16.mxu0 %v20662_v22  ;;  %18556 = vmatmul.mubr.msk.f32.vlgmr.msra.gmra.mrb[44].mxu0 %vm2773_vm4, %v23515_v37 }
 0xeac   :  { %20681 = vmatpush3.bf16.msra.mxu0 %v20662_v22  ;;  %18571 = vmatprep.mubr.msk.f32.mxu0 %vm2773_vm4, %v23517_v40 }
 0xead   :  { %18569 = vmatprep.subr.mxu0 %v23502_v28 }
 0xeb0   :  { %18570 = vmatpush3.msra.mxu0 %v23502_v28 }
 0xeb1   :  { %20695 = vmatprep.subr.bf16.mxu0 %v20662_v22  ;;  %18572 = vmatmul.mubr.msk.f32.vlgmr.msra.gmra.mrb[46].mxu0 %vm2773_vm4, %v23525_v41 }
 0xeb2   :  { %20697 = vmatpush3.bf16.msra.mxu0 %v20662_v22  ;;  %18603 = vmatprep.mubr.msk.f32.mxu0 %vm2773_vm4, %v23535_v5 }
 0xeb3   :  { %18601 = vmatprep.subr.mxu0 %v23502_v28 }
 0xeb6   :  { %18602 = vmatpush3.msra.mxu0 %v23502_v28 }
 0xeb7   :  { %20702 = vmatprep.subr.bf16.mxu0 %v22810_v54  ;;  %18604 = vmatmul.mubr.msk.f32.vlgmr.msra.gmra.mrb[48].mxu0 %vm2773_vm4, %v23537_v23 }
 0xeb8   :  { %18617 = vmatprep.mubr.msk.f32.mxu0 %vm22811_vm7, %v22812_v55 }
 0xf78   :  { %v18541_v60 = vpop.f32.mrb[42].mxu0 }
 0xf79   :  { %v2846_v61 = vpop.f32.mrb[43].mxu0 }
 0xf7a   :  { %18546 = vmatprep.mubr.msk.f32.mxu1 %vm455_vm0, %v2846_v61 }
 0xf7b   :  { %18547 = vmatmul.mubr.msk.f32.vlgmr.msra.gmra.mrb[22].mxu1 %vm455_vm0, %v18541_v60 }
 0xf7c   :  { %20677 = vmatpush3.bf16.msra.mxu1 %v20674_v43 }
 0xf7d   :  { %20683 = vmatprep.subr.bf16.mxu1 %v20682_v11 }
 0xf7e   :  { %v18557_v62 = vpop.f32.mrb[44].mxu0 }
 0xf7f   :  { %v3022_v63 = vpop.f32.mrb[45].mxu0 }
 0xf80   :  { %18562 = vmatprep.mubr.msk.f32.mxu1 %vm455_vm0, %v3022_v63  ;;  %v16843_v63 = vld [vmem:[%s24776_s17 + $0xa0] sm:$0xff] }
 0xf83   :  { %18563 = vmatmul.mubr.msk.f32.vlgmr.msra.gmra.mrb[22].mxu1 %vm455_vm0, %v18557_v62 }
 0xf84   :  { %20685 = vmatpush3.bf16.msra.mxu1 %v20682_v11  ;;  %v18573_v0 = vpop.f32.mrb[46].mxu0 }
 0xf85   :  { %20687 = vmatprep.subr.bf16.mxu1 %v20662_v22  ;;  %v3192_v1 = vpop.f32.mrb[47].mxu0 }
 0xf86   :  { %18578 = vmatprep.mubr.msk.f32.mxu1 %vm455_vm0, %v3192_v1 }
 0xf8a   :  { %v18605_v8 = vpop.f32.mrb[48].mxu0 }
 0xf8b   :  { %18579 = vmatmul.mubr.msk.f32.vlgmr.msra.gmra.mrb[22].mxu1 %vm455_vm0, %v18573_v0  ;;  %v3532_v14 = vpop.f32.mrb[49].mxu0  ;;  %v16844_v0 = vld [vmem:[%s24776_s17 + $0xa8] sm:$0xff] }
 0xf8c   :  { %20689 = vmatpush3.bf16.msra.mxu1 %v20662_v22  ;;  %18587 = vmatprep.mubr.msk.f32.mxu1 %vm2773_vm4, %v23552_v2  ;;  %v20706_v1 = vpack.c.bf16 %v16844_v0, %v16843_v63 }
 0xf8d   :  { %18585 = vmatprep.subr.mxu1 %v23502_v28 }
 0xf90   :  { %18586 = vmatpush3.msra.mxu1 %v23502_v28 }
 0xf91   :  { %18588 = vmatmul.mubr.msk.f32.vlgmr.msra.gmra.mrb[24].mxu1 %vm2773_vm4, %v23560_v7  ;;  %20691 = vmatprep.subr.bf16.mxu1 %v20690_v6 }
 0xf92   :  { %20693 = vmatpush3.bf16.msra.mxu1 %v20690_v6 }
 0xf93   :  { %20699 = vmatprep.subr.bf16.mxu1 %v20698_v12 }
0x1064   :  { %v18589_v15 = vpop.f32.mrb[24].mxu1 }
0x1065   :  { %v3362_v16 = vpop.f32.mrb[25].mxu1 }
0x1066   :  { %18594 = vmatprep.mubr.msk.f32.mxu1 %vm455_vm0, %v3362_v16 }
0x1067   :  { %18595 = vmatmul.mubr.msk.f32.vlgmr.msra.gmra.mrb[22].mxu1 %vm455_vm0, %v18589_v15 }
0x1068   :  { %20701 = vmatpush3.bf16.msra.mxu1 %v20698_v12  ;;  %18610 = vmatprep.mubr.msk.f32.mxu1 %vm455_vm0, %v3532_v14 }
0x1069   :  { %20705 = vmatprep.subr.bf16.mxu1 %v22810_v54 }
0x106f   :  { %18611 = vmatmul.mubr.msk.f32.vlgmr.msra.gmra.mrb[22].mxu1 %vm455_vm0, %v18605_v8 }
0x1070   :  { %18630 = vmatprep.mubr.msk.f32.mxu1 %vm22811_vm7, %v22812_v55  ;;  %20707 = vmatpush3.bf16.msra.mxu1 %v20706_v1 }
0x1071   :  { %20711 = vmatprep.subr.bf16.mxu1 %v22810_v54 }
0x1142   :  { %v18612_v18 = vpop.f32.mrb[22].mxu1 }
0x1143   :  { %v21882_v22 = vadd.f32 %v18612_v18, %v16815_v17  ;;  %v3616_v27 = vpop.f32.mrb[23].mxu1 }
0x1144   :  { %v21883_v28 = vadd.f32 %v16815_v17, %v3616_v27 }
0x1145   :  { %22194 = vtanh.f32 %v21882_v22 }
0x1146   :  { %22196 = vtanh.f32 %v21883_v28 }
0x114f   :  { %v22195_v24 = vpop.eup %22194 }
0x1150   :  { %v22197_v42 = vpop.eup %22196  ;;  %v3631_v43 = vmul.f32 1.442695, %v22195_v24  ;;  %v16876_v24 = vld [vmem:[%s24776_s17 + $0xe0] sm:$0xff] }
0x1151   :  { %v3629_v34 = vmul.f32 1.442695, %v22197_v42  ;;  %v16877_v42 = vld [vmem:[%s24776_s17 + $0xe8] sm:$0xff] }
0x1152   :  { %22198 = vpow2.f32 %v3631_v43 }
0x1153   :  { %22200 = vpow2.f32 %v3629_v34 }
0x115c   :  { %v22199_v58 = vpop.eup %22198 }
0x115d   :  { %v22201_v60 = vpop.eup %22200  ;;  %3639 = vrot.lane.b32.xlu1 %v22199_v58, %s22815_s8  ;;  %v23576_v61 = vmul.f32 %v22199_v58, %v23317_v30  ;;  %v20730_v58 = vpack.c.bf16 %v16877_v42, %v16876_v24  ;;  %v16903_v24 = vld [vmem:[%s24776_s17 + $0x128] sm:$0xff] }
0x115e   :  { %3637 = vrot.lane.b32.xlu0 %v22201_v60, %s22815_s8  ;;  %v23580_v11 = vmul.f32 %v22201_v60, %v23321_v32 }
0x1160   :  { %v22160_v62 = vpack.i.bf16 %v23576_v61, %v23580_v11 }
0x1162   :  { %22161 = vrot.lane.b32.xlu0 %v22160_v62, %s22783_s22 }
0x11cf   :  { %v3640_v4 = vpop.permute.xlu1 %3639 }
0x11d0   :  { %v3638_v3 = vpop.permute.xlu0 %3637  ;;  %v23589_v6 = vmul.f32 %v23319_v31, %v3640_v4  ;;  %v16852_v31 = vld [vmem:[%s24776_s17 + $0xb0] sm:$0xff] }
0x11d1   :  { %v23592_v32 = vmul.f32 %v3638_v3, %v23323_v33  ;;  %v16853_v33 = vld [vmem:[%s24776_s17 + $0xb8] sm:$0xff] }
0x11d4   :  { %v22162_v30 = vpop.permute.xlu0 %22161 }
0x11d5   :  { %v22164_v8 = vunpack.i.h.bf16 %v22162_v30  ;;  %v22163_v9 = vunpack.i.l.bf16 %v22162_v30 }
0x11d7   :  { %v3654_v10 = vsel %vm1815_vm3, %v23589_v6, %v22164_v8  ;;  %v3653_v12 = vsel %vm1815_vm3, %v23592_v32, %v22163_v9 }
0x11d8   :  { %v20703_v14 = vpack.c.bf16 %v3654_v10, %v3653_v12 }
0x11da   :  { %20704 = vmatpush3.bf16.msra.mxu0 %v20703_v14 }
0x11db   :  { %20708 = vmatprep.subr.bf16.mxu0 %v22810_v54 }
0x11dd   :  { %18618 = vmatmul.mubr.msk.f32.vlgmr.msra.gmra.mrb[50].mxu0 %vm455_vm0, %v23336_v35  ;;  %v20712_v35 = vpack.c.bf16 %v16853_v33, %v16852_v31 }
0x11de   :  { %20710 = vmatpush3.bf16.msra.mxu0 %v20703_v14  ;;  %18620 = vmatprep.mubr.msk.f32.mxu0 %vm22811_vm7, %v22812_v55 }
0x11df   :  { %20714 = vmatprep.subr.bf16.mxu0 %v22810_v54 }
0x11e1   :  { %18621 = vmatmul.mubr.msk.f32.gmra.mrb[52].mxu0 %vm455_vm0, %v23344_v38 }
0x11e2   :  { %18623 = vmatprep.mubr.msk.f32.mxu0 %vm22811_vm7, %v22812_v55 }
0x11e5   :  { %18624 = vmatmul.mubr.msk.f32.gmra.mrb[54].mxu0 %vm455_vm0, %v23352_v39 }
0x11e6   :  { %18643 = vmatprep.mubr.msk.f32.mxu0 %vm22811_vm7, %v22812_v55 }
0x11e9   :  { %18644 = vmatmul.mubr.msk.f32.vlgmr.msra.gmra.mrb[56].mxu0 %vm455_vm0, %v23359_v44 }
0x11ea   :  { %20716 = vmatpush3.bf16.msra.mxu0 %v20703_v14  ;;  %18646 = vmatprep.mubr.msk.f32.mxu0 %vm22811_vm7, %v22812_v55 }
0x11eb   :  { %20720 = vmatprep.subr.bf16.mxu0 %v22810_v54 }
0x11ed   :  { %18647 = vmatmul.mubr.msk.f32.gmra.mrb[58].mxu0 %vm455_vm0, %v23366_v45 }
0x11ee   :  { %18649 = vmatprep.mubr.msk.f32.mxu0 %vm22811_vm7, %v22812_v55 }
0x11f1   :  { %18650 = vmatmul.mubr.msk.f32.gmra.mrb[60].mxu0 %vm455_vm0, %v23374_v46  ;;  %v16860_v46 = vld [vmem:[%s24776_s17 + $0xc0] sm:$0xff] }
0x11f2   :  { %18669 = vmatprep.mubr.msk.f32.mxu0 %vm22811_vm7, %v22812_v55 }
0x11f5   :  { %18670 = vmatmul.mubr.msk.f32.vlgmr.msra.gmra.mrb[62].mxu0 %vm455_vm0, %v23381_v47  ;;  %v16861_v47 = vld [vmem:[%s24776_s17 + $0xc8] sm:$0xff] }
0x11f6   :  { %20722 = vmatpush3.bf16.msra.mxu0 %v20703_v14  ;;  %18672 = vmatprep.mubr.msk.f32.mxu0 %vm22811_vm7, %v22812_v55 }
0x11f7   :  { %20726 = vmatprep.subr.bf16.mxu0 %v22810_v54 }
0x11f9   :  { %18673 = vmatmul.mubr.msk.f32.gmra.mrb[64].mxu0 %vm455_vm0, %v23388_v48 }
0x11fa   :  { %18675 = vmatprep.mubr.msk.f32.mxu0 %vm22811_vm7, %v22812_v55 }
0x11fd   :  { %18676 = vmatmul.mubr.msk.f32.gmra.mrb[66].mxu0 %vm455_vm0, %v23396_v49 }
0x11fe   :  { %18695 = vmatprep.mubr.msk.f32.mxu0 %vm22811_vm7, %v22812_v55 }
0x1201   :  { %18696 = vmatmul.mubr.msk.f32.vlgmr.msra.gmra.mrb[68].mxu0 %vm455_vm0, %v23403_v50  ;;  %v20718_v50 = vpack.c.bf16 %v16861_v47, %v16860_v46 }
0x1202   :  { %20728 = vmatpush3.bf16.msra.mxu0 %v20703_v14  ;;  %18698 = vmatprep.mubr.msk.f32.mxu0 %vm22811_vm7, %v22812_v55  ;;  %v16848_v14 = vld [vmem:[#allocation16 + $0x2] ss:$0 sm:$0xff] }
0x1205   :  { %18699 = vmatmul.mubr.msk.f32.gmra.mrb[70].mxu0 %vm455_vm0, %v23410_v51 }
0x1206   :  { %18701 = vmatprep.mubr.msk.f32.mxu0 %vm22811_vm7, %v22812_v55 }
0x1209   :  { %18702 = vmatmul.mubr.msk.f32.gmra.mrb[72].mxu0 %vm455_vm0, %v23417_v52 }
0x120a   :  { %18721 = vmatprep.mubr.msk.f32.mxu0 %vm22811_vm7, %v22812_v55 }
0x120d   :  { %18722 = vmatmul.mubr.msk.f32.vlgmr.msra.gmra.mrb[74].mxu0 %vm455_vm0, %v23424_v53 }
0x120e   :  { %18724 = vmatprep.mubr.msk.f32.mxu0 %vm22811_vm7, %v22812_v55 }
0x1211   :  { %18725 = vmatmul.mubr.msk.f32.gmra.mrb[76].mxu0 %vm455_vm0, %v23431_v56 }
0x1212   :  { %18727 = vmatprep.mubr.msk.f32.mxu0 %vm22811_vm7, %v22812_v55 }
0x1215   :  { %18728 = vmatmul.mubr.msk.f32.gmra.mrb[78].mxu0 %vm455_vm0, %v23438_v57  ;;  %v16868_v57 = vld [vmem:[%s24776_s17 + $0xd0] sm:$0xff] }
0x1216   :  { %18749 = vmatprep.mubr.msk.f32.mxu0 %vm2773_vm4, %v23496_v13  ;;  %v16869_v13 = vld [vmem:[%s24776_s17 + $0xd8] sm:$0xff] }
0x1217   :  { %v20724_v17 = vpack.c.bf16 %v16869_v13, %v16868_v57  ;;  %v16884_v57 = vld [vmem:[%s24776_s17 + $0xf8] sm:$0xff] }
0x12b0   :  { %v3723_v38 = vpop.f32.mrb[50].mxu0 }
0x12b1   :  { %v18619_v39 = vpop.f32.mrb[51].mxu0  ;;  %18631 = vmatmul.mubr.msk.f32.vlgmr.msra.gmra.mrb[26].mxu1 %vm455_vm0, %v3723_v38 }
0x12b2   :  { %18633 = vmatprep.mubr.msk.f32.mxu1 %vm22811_vm7, %v22812_v55  ;;  %20713 = vmatpush3.bf16.msra.mxu1 %v20712_v35 }
0x12b3   :  { %20717 = vmatprep.subr.bf16.mxu1 %v22810_v54 }
0x12b4   :  { %v3728_v44 = vpop.f32.mrb[52].mxu0 }
0x12b5   :  { %v18622_v45 = vpop.f32.mrb[53].mxu0  ;;  %18634 = vmatmul.mubr.msk.f32.gmra.mrb[28].mxu1 %vm455_vm0, %v3728_v44 }
0x12b6   :  { %18636 = vmatprep.mubr.msk.f32.mxu1 %vm22811_vm7, %v22812_v55 }
0x12b8   :  { %v3733_v48 = vpop.f32.mrb[54].mxu0 }
0x12b9   :  { %v18625_v49 = vpop.f32.mrb[55].mxu0  ;;  %18637 = vmatmul.mubr.msk.f32.gmra.mrb[30].mxu1 %vm455_vm0, %v3733_v48 }
0x12ba   :  { %18656 = vmatprep.mubr.msk.f32.mxu1 %vm22811_vm7, %v22812_v55 }
0x12bc   :  { %v3904_v51 = vpop.f32.mrb[56].mxu0 }
0x12bd   :  { %v18645_v52 = vpop.f32.mrb[57].mxu0  ;;  %18657 = vmatmul.mubr.msk.f32.vlgmr.msra.gmra.mrb[26].mxu1 %vm455_vm0, %v3904_v51 }
0x12be   :  { %18659 = vmatprep.mubr.msk.f32.mxu1 %vm22811_vm7, %v22812_v55  ;;  %20719 = vmatpush3.bf16.msra.mxu1 %v20718_v50 }
0x12bf   :  { %20723 = vmatprep.subr.bf16.mxu1 %v22810_v54 }
0x12c0   :  { %v3909_v53 = vpop.f32.mrb[58].mxu0 }
0x12c1   :  { %v18648_v56 = vpop.f32.mrb[59].mxu0  ;;  %18660 = vmatmul.mubr.msk.f32.gmra.mrb[28].mxu1 %vm455_vm0, %v3909_v53 }
0x12c2   :  { %18662 = vmatprep.mubr.msk.f32.mxu1 %vm22811_vm7, %v22812_v55 }
0x12c4   :  { %v3914_v15 = vpop.f32.mrb[60].mxu0 }
0x12c5   :  { %v18651_v16 = vpop.f32.mrb[61].mxu0  ;;  %18663 = vmatmul.mubr.msk.f32.gmra.mrb[30].mxu1 %vm455_vm0, %v3914_v15  ;;  %v16896_v15 = vld [vmem:[%s24776_s17 + $0x110] sm:$0xff] }
0x12c6   :  { %18682 = vmatprep.mubr.msk.f32.mxu1 %vm22811_vm7, %v22812_v55 }
0x12c8   :  { %v4079_v18 = vpop.f32.mrb[62].mxu0 }
0x12c9   :  { %v18671_v22 = vpop.f32.mrb[63].mxu0  ;;  %18683 = vmatmul.mubr.msk.f32.vlgmr.msra.gmra.mrb[26].mxu1 %vm455_vm0, %v4079_v18 }
0x12ca   :  { %18685 = vmatprep.mubr.msk.f32.mxu1 %vm22811_vm7, %v22812_v55  ;;  %20725 = vmatpush3.bf16.msra.mxu1 %v20724_v17 }
0x12cb   :  { %20729 = vmatprep.subr.bf16.mxu1 %v22810_v54 }
0x12cc   :  { %v4084_v27 = vpop.f32.mrb[64].mxu0 }
0x12cd   :  { %v18674_v28 = vpop.f32.mrb[65].mxu0  ;;  %18686 = vmatmul.mubr.msk.f32.gmra.mrb[28].mxu1 %vm455_vm0, %v4084_v27 }
0x12ce   :  { %18688 = vmatprep.mubr.msk.f32.mxu1 %vm22811_vm7, %v22812_v55  ;;  %v16902_v28 = vld [vmem:[%s24776_s17 + $0x120] sm:$0xff] }
0x12cf   :  { %v20760_v42 = vpack.c.bf16 %v16903_v24, %v16902_v28  ;;  %v5799_v24 = vld [vmem:[#allocation21 + $0x30] sm:$0xff] }
0x12d0   :  { %v4089_v43 = vpop.f32.mrb[66].mxu0 }
0x12d1   :  { %v18677_v34 = vpop.f32.mrb[67].mxu0  ;;  %18689 = vmatmul.mubr.msk.f32.gmra.mrb[30].mxu1 %vm455_vm0, %v4089_v43  ;;  %v16908_v43 = vld [vmem:[%s24776_s17 + $0x130] sm:$0xff] }
0x12d2   :  { %18708 = vmatprep.mubr.msk.f32.mxu1 %vm22811_vm7, %v22812_v55  ;;  %v16909_v34 = vld [vmem:[%s24776_s17 + $0x138] sm:$0xff] }
0x12d4   :  { %v4254_v60 = vpop.f32.mrb[68].mxu0 }
0x12d5   :  { %v18697_v62 = vpop.f32.mrb[69].mxu0  ;;  %18709 = vmatmul.mubr.msk.f32.vlgmr.msra.gmra.mrb[26].mxu1 %vm455_vm0, %v4254_v60  ;;  %v20768_v60 = vpack.c.bf16 %v16909_v34, %v16908_v43 }
0x12d6   :  { %18711 = vmatprep.mubr.msk.f32.mxu1 %vm22811_vm7, %v22812_v55  ;;  %20731 = vmatpush3.bf16.msra.mxu1 %v20730_v58 }
0x12d8   :  { %v4259_v63 = vpop.f32.mrb[70].mxu0 }
0x12d9   :  { %v18700_v0 = vpop.f32.mrb[71].mxu0  ;;  %18712 = vmatmul.mubr.msk.f32.gmra.mrb[28].mxu1 %vm455_vm0, %v4259_v63 }
0x12da   :  { %18714 = vmatprep.mubr.msk.f32.mxu1 %vm22811_vm7, %v22812_v55 }
0x12dc   :  { %v4264_v1 = vpop.f32.mrb[72].mxu0 }
0x12dd   :  { %v18703_v3 = vpop.f32.mrb[73].mxu0  ;;  %18715 = vmatmul.mubr.msk.f32.gmra.mrb[30].mxu1 %vm455_vm0, %v4264_v1 }
0x12de   :  { %18734 = vmatprep.mubr.msk.f32.mxu1 %vm22811_vm7, %v22812_v55 }
0x12e0   :  { %v4429_v4 = vpop.f32.mrb[74].mxu0 }
0x12e1   :  { %v18723_v30 = vpop.f32.mrb[75].mxu0  ;;  %18735 = vmatmul.mubr.msk.f32.vlgmr.msra.gmra.mrb[26].mxu1 %vm455_vm0, %v4429_v4 }
0x12e2   :  { %18737 = vmatprep.mubr.msk.f32.mxu1 %vm22811_vm7, %v22812_v55 }
0x12e4   :  { %v4434_v8 = vpop.f32.mrb[76].mxu0 }
0x12e5   :  { %v18726_v9 = vpop.f32.mrb[77].mxu0  ;;  %18738 = vmatmul.mubr.msk.f32.gmra.mrb[28].mxu1 %vm455_vm0, %v4434_v8 }
0x12e6   :  { %18740 = vmatprep.mubr.msk.f32.mxu1 %vm22811_vm7, %v22812_v55 }
0x12e8   :  { %v4439_v10 = vpop.f32.mrb[78].mxu0 }
0x12e9   :  { %18741 = vmatmul.mubr.msk.f32.gmra.mrb[30].mxu1 %vm455_vm0, %v4439_v10  ;;  %v18729_v12 = vpop.f32.mrb[79].mxu0 }
0x12ea   :  { %18765 = vmatprep.mubr.msk.f32.mxu1 %vm2773_vm4, %v23507_v36  ;;  %v16883_v36 = vld [vmem:[%s24776_s17 + $0xf0] sm:$0xff] }
0x12eb   :  { %v20736_v13 = vpack.c.bf16 %v16884_v57, %v16883_v36  ;;  %v5622_v36 = vld [vmem:[#allocation21 + $0x18] sm:$0xff] }
0x13b4   :  { %v4521_v31 = vpop.f32.mrb[26].mxu1 }
0x13b5   :  { %v21884_v33 = vadd.f32 %v16848_v14, %v4521_v31  ;;  %v18736_v35 = vpop.f32.mrb[27].mxu1 }
0x13b7   :  { %v4538_v39 = vmul.f32 0.01, %v21884_v33 }
0x13b8   :  { %v4526_v38 = vpop.f32.mrb[28].mxu1 }
0x13b9   :  { %v21885_v44 = vadd.f32 %v16848_v14, %v4526_v38  ;;  %v18739_v45 = vpop.f32.mrb[29].mxu1  ;;  %v4541_v48 = vmax.f32 %v21884_v33, %v4538_v39 }
0x13bb   :  { %v4539_v46 = vmul.f32 0.01, %v21885_v44 }
0x13bc   :  { %v4531_v47 = vpop.f32.mrb[30].mxu1 }
0x13bd   :  { %v4542_v49 = vmax.f32 %v21885_v44, %v4539_v46  ;;  %v21886_v50 = vadd.f32 %v16848_v14, %v4531_v47  ;;  %v18742_v51 = vpop.f32.mrb[31].mxu1 }
0x13be   :  { %v5619_v51 = vld [vmem:[#allocation21] sm:$0xff] }
0x13bf   :  { %v20732_v52 = vpack.c.bf16 %v4542_v49, %v4541_v48  ;;  %v4540_v53 = vmul.f32 0.01, %v21886_v50 }
0x13c1   :  { %v4543_v56 = vmax.f32 %v21886_v50, %v4540_v53  ;;  %20733 = vmatprep.subr.bf16.mxu0 %v20732_v52  ;;  %20741 = vmatprep.subr.bf16.mxu1 %v20732_v52  ;;  %v5621_v53 = vld [vmem:[#allocation21 + $0x10] sm:$0xff] }
0x13c2   :  { %20735 = vmatpush3.bf16.msra.mxu0 %v20732_v52  ;;  %20743 = vmatpush3.bf16.msra.mxu1 %v20732_v52  ;;  %v20782_v57 = vpack.c.bf16 %v5622_v36, %v5621_v53 }
0x13c3   :  { %18747 = vmatprep.subr.mxu0 %v4543_v56  ;;  %18763 = vmatprep.subr.mxu1 %v4543_v56 }
0x13c6   :  { %18748 = vmatpush3.msra.mxu0 %v4543_v56  ;;  %18764 = vmatpush3.msra.mxu1 %v4543_v56 }
0x13c7   :  { %18750 = vmatmul.mubr.msk.f32.vlgmr.msra.gmra.mrb[80].mxu0 %vm2773_vm4, %v23505_v29  ;;  %20749 = vmatprep.subr.bf16.mxu1 %v20732_v52  ;;  %v16890_v29 = vld [vmem:[%s24776_s17 + $0x100] sm:$0xff] }
0x13c8   :  { %18766 = vmatmul.mubr.msk.f32.vlgmr.msra.gmra.mrb[32].mxu1 %vm2773_vm4, %v23515_v37  ;;  %20737 = vmatprep.subr.bf16.mxu0 %v20736_v13  ;;  %v16891_v37 = vld [vmem:[%s24776_s17 + $0x108] sm:$0xff] }
0x13c9   :  { %20751 = vmatpush3.bf16.msra.mxu1 %v20732_v52  ;;  %18781 = vmatprep.mubr.msk.f32.mxu1 %vm2773_vm4, %v23517_v40  ;;  %v20744_v40 = vpack.c.bf16 %v16891_v37, %v16890_v29  ;;  %v23785_v37 = vld [vmem:[%s24778_s1 + $0x8] sm:$0xff] }
0x13ca   :  { %18779 = vmatprep.subr.mxu1 %v4543_v56  ;;  %20739 = vmatpush3.bf16.msra.mxu0 %v20736_v13 }
0x13cb   :  { %20745 = vmatprep.subr.bf16.mxu0 %v20744_v40 }
0x13cd   :  { %18780 = vmatpush3.msra.mxu1 %v4543_v56 }
0x13ce   :  { %20765 = vmatprep.subr.bf16.mxu1 %v20732_v52  ;;  %18782 = vmatmul.mubr.msk.f32.vlgmr.msra.gmra.mrb[34].mxu1 %vm2773_vm4, %v23525_v41  ;;  %v16897_v41 = vld [vmem:[%s24776_s17 + $0x118] sm:$0xff] }
0x13cf   :  { %20767 = vmatpush3.bf16.msra.mxu1 %v20732_v52  ;;  %18813 = vmatprep.mubr.msk.f32.mxu1 %vm2773_vm4, %v23535_v5  ;;  %v20752_v18 = vpack.c.bf16 %v16897_v41, %v16896_v15  ;;  %v23795_v15 = vld [vmem:[%s24778_s1 + $0x18] sm:$0xff]  ;;  %v23798_v41 = vld [vmem:[%s24778_s1 + $0x20] sm:$0xff] }
0x13d0   :  { %18811 = vmatprep.subr.mxu1 %v4543_v56 }
0x13d3   :  { %18812 = vmatpush3.msra.mxu1 %v4543_v56 }
0x13d4   :  { %18814 = vmatmul.mubr.msk.f32.vlgmr.msra.gmra.mrb[36].mxu1 %vm2773_vm4, %v23537_v23  ;;  %20772 = vmatprep.subr.bf16.mxu1 %v22810_v54 }
0x13d5   :  { %18827 = vmatprep.mubr.msk.f32.mxu1 %vm22811_vm7, %v22812_v55 }
0x149a   :  { %v18751_v16 = vpop.f32.mrb[80].mxu0 }
0x149b   :  { %v4612_v17 = vpop.f32.mrb[81].mxu0  ;;  %v18767_v5 = vpop.f32.mrb[32].mxu1 }
0x149c   :  { %18756 = vmatprep.mubr.msk.f32.mxu0 %vm455_vm0, %v4612_v17  ;;  %v4779_v23 = vpop.f32.mrb[33].mxu1  ;;  %v23808_v17 = vld [vmem:[%s24778_s1 + $0x30] sm:$0xff] }
0x149d   :  { %18757 = vmatmul.mubr.msk.f32.vlgmr.msra.gmra.mrb[82].mxu0 %vm455_vm0, %v18751_v16  ;;  %v23805_v16 = vld [vmem:[%s24778_s1 + $0x28] sm:$0xff] }
0x149e   :  { %20747 = vmatpush3.bf16.msra.mxu0 %v20744_v40  ;;  %18772 = vmatprep.mubr.msk.f32.mxu0 %vm455_vm0, %v4779_v23  ;;  %v23788_v40 = vld [vmem:[%s24778_s1 + $0x10] sm:$0xff]  ;;  %v23825_v23 = vld [vmem:[%s24778_s1 + $0x48] sm:$0xff] }
0x149f   :  { %20753 = vmatprep.subr.bf16.mxu0 %v20752_v18 }
0x14a1   :  { %v18783_v22 = vpop.f32.mrb[34].mxu1 }
0x14a2   :  { %v4940_v27 = vpop.f32.mrb[35].mxu1 }
0x14a5   :  { %18773 = vmatmul.mubr.msk.f32.vlgmr.msra.gmra.mrb[82].mxu0 %vm455_vm0, %v18767_v5  ;;  %v23815_v5 = vld [vmem:[%s24778_s1 + $0x38] sm:$0xff] }
0x14a6   :  { %20755 = vmatpush3.bf16.msra.mxu0 %v20752_v18  ;;  %18788 = vmatprep.mubr.msk.f32.mxu0 %vm455_vm0, %v4940_v27  ;;  %v23818_v18 = vld [vmem:[%s24778_s1 + $0x40] sm:$0xff]  ;;  %v5798_v27 = vld [vmem:[#allocation21 + $0x28] sm:$0xff] }
0x14a7   :  { %20757 = vmatprep.subr.bf16.mxu0 %v20732_v52  ;;  %v18815_v58 = vpop.f32.mrb[36].mxu1 }
0x14a8   :  { %v5262_v62 = vpop.f32.mrb[37].mxu1 }
0x14ad   :  { %18789 = vmatmul.mubr.msk.f32.vlgmr.msra.gmra.mrb[82].mxu0 %vm455_vm0, %v18783_v22  ;;  %v5797_v22 = vld [vmem:[#allocation21 + $0x20] sm:$0xff] }
0x14ae   :  { %20759 = vmatpush3.bf16.msra.mxu0 %v20732_v52  ;;  %18797 = vmatprep.mubr.msk.f32.mxu0 %vm2773_vm4, %v23552_v2  ;;  %v16887_v2 = vld [vmem:[#allocation16 + $0x3] ss:$0 sm:$0xff]  ;;  %v5620_v52 = vld [vmem:[#allocation21 + $0x8] sm:$0xff]  ;;  %v20786_v28 = vpack.c.bf16 %v5798_v27, %v5797_v22 }
0x14af   :  { %18795 = vmatprep.subr.mxu0 %v4543_v56  ;;  %v6481_v22 = vld [vmem:[#allocation21 + $0xa0] sm:$0xff]  ;;  %v6482_v27 = vld [vmem:[#allocation21 + $0xa8] sm:$0xff] }
0x14b2   :  { %18796 = vmatpush3.msra.mxu0 %v4543_v56  ;;  %v20778_v56 = vpack.c.bf16 %v5620_v52, %v5619_v51 }
0x14b3   :  { %18798 = vmatmul.mubr.msk.f32.vlgmr.msra.gmra.mrb[84].mxu0 %vm2773_vm4, %v23560_v7  ;;  %20761 = vmatprep.subr.bf16.mxu0 %v20760_v42 }
0x14b4   :  { %20763 = vmatpush3.bf16.msra.mxu0 %v20760_v42  ;;  %v5800_v42 = vld [vmem:[#allocation21 + $0x38] sm:$0xff] }
0x14b5   :  { %20769 = vmatprep.subr.bf16.mxu0 %v20768_v60 }
0x1586   :  { %v18799_v63 = vpop.f32.mrb[84].mxu0 }
0x1587   :  { %v5101_v0 = vpop.f32.mrb[85].mxu0 }
0x1588   :  { %18804 = vmatprep.mubr.msk.f32.mxu0 %vm455_vm0, %v5101_v0 }
0x1589   :  { %18805 = vmatmul.mubr.msk.f32.vlgmr.msra.gmra.mrb[82].mxu0 %vm455_vm0, %v18799_v63 }
0x158a   :  { %20771 = vmatpush3.bf16.msra.mxu0 %v20768_v60  ;;  %18820 = vmatprep.mubr.msk.f32.mxu0 %vm455_vm0, %v5262_v62  ;;  %v5969_v60 = vld [vmem:[#allocation21 + $0x40] sm:$0xff]  ;;  %v5970_v62 = vld [vmem:[#allocation21 + $0x48] sm:$0xff] }
0x1591   :  { %18821 = vmatmul.mubr.msk.f32.vlgmr.msra.gmra.mrb[82].mxu0 %vm455_vm0, %v18815_v58  ;;  %v20790_v58 = vpack.c.bf16 %v5800_v42, %v5799_v24  ;;  %v23847_v24 = vld [vmem:[#allocation19 + $0x10] sm:$0xff]  ;;  %v20822_v42 = vpack.c.bf16 %v6482_v27, %v6481_v22  ;;  %v16945_v22 = vld [vmem:[#allocation22 + $0x1] ss:$0 sm:$0xff] }
0x1664   :  { %v18822_v7 = vpop.f32.mrb[82].mxu0 }
0x1665   :  { %v21887_v1 = vadd.f32 %v18822_v7, %v16887_v2  ;;  %v5346_v3 = vpop.f32.mrb[83].mxu0  ;;  %v5971_v7 = vld [vmem:[#allocation21 + $0x50] sm:$0xff] }
0x1666   :  { %v21888_v4 = vadd.f32 %v16887_v2, %v5346_v3  ;;  %v20794_v2 = vpack.c.bf16 %v5970_v62, %v5969_v60  ;;  %v23868_v62 = vld [vmem:[#allocation19 + $0x20] sm:$0xff] }
0x1667   :  { %22202 = vtanh.f32 %v21887_v1  ;;  %v5972_v1 = vld [vmem:[#allocation21 + $0x58] sm:$0xff] }
0x1668   :  { %22204 = vtanh.f32 %v21888_v4  ;;  %v20798_v4 = vpack.c.bf16 %v5972_v1, %v5971_v7  ;;  %v23877_v1 = vld [vmem:[#allocation19 + $0x8] sm:$0xff] }
0x1671   :  { %v22203_v30 = vpop.eup %22202 }
0x1672   :  { %v22205_v8 = vpop.eup %22204  ;;  %5365 = vrot.lane.b32.xlu0 %v22203_v30, %s22815_s8  ;;  %v5360_v35 = vadd.f32 %v22203_v30, %v23576_v61  ;;  %v5456_v61 = vld [vmem:[#allocation18 + $0x8] sm:$0xff] }
0x1673   :  { %5363 = vrot.lane.b32.xlu1 %v22205_v8, %s22815_s8  ;;  %v5359_v44 = vadd.f32 %v22205_v8, %v23580_v11  ;;  %v6141_v8 = vld [vmem:[#allocation21 + $0x60] sm:$0xff] }
0x16e4   :  { %v5366_v9 = vpop.permute.xlu0 %5365 }
0x16e5   :  { %v5370_v10 = vsub.f32 %v23589_v6, %v5366_v9  ;;  %v5364_v12 = vpop.permute.xlu1 %5363  ;;  %v5381_v6 = vld [vmem:[#allocation18] sm:$0xff] }
0x16e6   :  { %v5369_v14 = vsub.f32 %v23592_v32, %v5364_v12  ;;  %v23772_v32 = vld [vmem:[%s24778_s1] sm:$0xff]  ;;  %v6142_v9 = vld [vmem:[#allocation21 + $0x68] sm:$0xff] }
0x16e7   :  { %18839 = vmatprep.mubr.msk.f32.mxu0 %vm1815_vm3, %v23772_v32  ;;  %v20802_v12 = vpack.c.bf16 %v6142_v9, %v6141_v8 }
0x16e8   :  { %v22165_v31 = vpack.i.bf16 %v5370_v10, %v5369_v14 }
0x16ea   :  { %22166 = vrot.lane.b32.xlu1 %v22165_v31, %s22783_s22  ;;  %v6143_v31 = vld [vmem:[#allocation21 + $0x70] sm:$0xff] }
0x175c   :  { %v22167_v33 = vpop.permute.xlu1 %22166 }
0x175d   :  { %v22169_v38 = vunpack.i.h.bf16 %v22167_v33  ;;  %v22168_v39 = vunpack.i.l.bf16 %v22167_v33  ;;  %v6144_v33 = vld [vmem:[#allocation21 + $0x78] sm:$0xff] }
0x175f   :  { %v5380_v45 = vsel %vm1815_vm3, %v5360_v35, %v22169_v38  ;;  %v5379_v46 = vsel %vm1815_vm3, %v5359_v44, %v22168_v39  ;;  %v20806_v38 = vpack.c.bf16 %v6144_v33, %v6143_v31  ;;  %v6313_v44 = vld [vmem:[#allocation21 + $0x80] sm:$0xff] }
0x1760   :  { %v20773_v47 = vpack.c.bf16 %v5380_v45, %v5379_v46  ;;  %v6314_v45 = vld [vmem:[#allocation21 + $0x88] sm:$0xff]  ;;  %v6795_v33 = vld [vmem:[#allocation21 + $0xe0] sm:$0xff] }
0x1761   :  { %v20810_v46 = vpack.c.bf16 %v6314_v45, %v6313_v44  ;;  %v6798_v44 = vld [vmem:[#allocation21 + $0xf8] sm:$0xff] }
0x1762   :  { %20774 = vmatpush3.bf16.msra.mxu1 %v20773_v47 }
0x1763   :  { %20775 = vmatprep.subr.bf16.mxu1 %v22810_v54 }
0x1765   :  { %18828 = vmatmul.mubr.msk.f32.vlgmr.msra.gmra.mrb[38].mxu1 %vm455_vm0, %v5381_v6  ;;  %v6316_v6 = vld [vmem:[#allocation21 + $0x98] sm:$0xff] }
0x1766   :  { %20777 = vmatpush3.bf16.msra.mxu1 %v20773_v47  ;;  %18834 = vmatprep.mubr.msk.f32.mxu1 %vm22811_vm7, %v22812_v55  ;;  %v6315_v47 = vld [vmem:[#allocation21 + $0x90] sm:$0xff] }
0x1767   :  { %20779 = vmatprep.subr.bf16.mxu1 %v20778_v56 }
0x1769   :  { %18835 = vmatmul.mubr.msk.f32.vlgmr.msra.gmra.mrb[40].mxu1 %vm455_vm0, %v5456_v61  ;;  %v20814_v61 = vpack.c.bf16 %v6316_v6, %v6315_v47  ;;  %v6949_v6 = vld [vmem:[#allocation21 + $0x100] sm:$0xff] }
0x176a   :  { %20781 = vmatpush3.bf16.msra.mxu1 %v20778_v56 }
0x176b   :  { %20783 = vmatprep.subr.bf16.mxu1 %v20782_v57 }
0x176e   :  { %20785 = vmatpush3.bf16.msra.mxu1 %v20782_v57 }
0x176f   :  { %20787 = vmatprep.subr.bf16.mxu1 %v20786_v28 }
0x1838   :  { %v23776_v11 = vpop.f32.mrb[38].mxu1 }
0x1839   :  { %5531 = vrot.lane.b32.xlu0 %v23776_v11, %s22787_s23  ;;  %v18829_v48 = vpop.f32.mrb[39].mxu1 }
0x183a   :  { %v16918_v48 = vld [vmem:[#allocation22] ss:$0 sm:$0xff] }
0x183c   :  { %v23780_v49 = vpop.f32.mrb[40].mxu1 }
0x183d   :  { %v18836_v50 = vpop.f32.mrb[41].mxu1 }
0x18ab   :  { %v5532_v13 = vpop.permute.xlu0 %5531 }
0x18ac   :  { %v5534_v29 = vsel %vm455_vm0, %v23780_v49, %v5532_v13 }
0x18ad   :  { %18837 = vmatprep.subr.mxu0 %v5534_v29 }
0x18ae   :  { %18838 = vmatpush3.msra.mxu0 %v5534_v29 }
0x18af   :  { %18840 = vmatmul.mubr.msk.f32.vlgmr.msra.gmra.mrb[86].mxu0 %vm1815_vm3, %v23785_v37  ;;  %18853 = vmatprep.subr.mxu0 %v5534_v29 }
0x18b0   :  { %18854 = vmatpush3.msra.mxu0 %v5534_v29  ;;  %18855 = vmatprep.mubr.msk.f32.mxu0 %vm1815_vm3, %v23788_v40 }
0x18b1   :  { %18869 = vmatprep.subr.mxu0 %v5534_v29 }
0x18b3   :  { %18856 = vmatmul.mubr.msk.f32.vlgmr.msra.gmra.mrb[88].mxu0 %vm1815_vm3, %v23795_v15 }
0x18b4   :  { %18870 = vmatpush3.msra.mxu0 %v5534_v29  ;;  %18871 = vmatprep.mubr.msk.f32.mxu0 %vm1815_vm3, %v23798_v41 }
0x18b5   :  { %18885 = vmatprep.subr.mxu0 %v5534_v29 }
0x18b7   :  { %18872 = vmatmul.mubr.msk.f32.vlgmr.msra.gmra.mrb[90].mxu0 %vm1815_vm3, %v23805_v16 }
0x18b8   :  { %18886 = vmatpush3.msra.mxu0 %v5534_v29  ;;  %18887 = vmatprep.mubr.msk.f32.mxu0 %vm1815_vm3, %v23808_v17 }
0x18b9   :  { %18901 = vmatprep.subr.mxu0 %v5534_v29 }
0x18bb   :  { %18888 = vmatmul.mubr.msk.f32.vlgmr.msra.gmra.mrb[92].mxu0 %vm1815_vm3, %v23815_v5 }
0x18bc   :  { %18902 = vmatpush3.msra.mxu0 %v5534_v29  ;;  %18903 = vmatprep.mubr.msk.f32.mxu0 %vm1815_vm3, %v23818_v18 }
0x18bd   :  { %20818 = vmatprep.subr.bf16.mxu0 %v22810_v54 }
0x18bf   :  { %18904 = vmatmul.mubr.msk.f32.vlgmr.msra.gmra.mrb[94].mxu0 %vm1815_vm3, %v23825_v23 }
0x18c0   :  { %18921 = vmatprep.mubr.msk.f32.mxu0 %vm22811_vm7, %v22812_v55 }
0x1982   :  { %v18841_v43 = vpop.f32.mrb[86].mxu0 }
0x1983   :  { %v5610_v34 = vpop.f32.mrb[87].mxu0 }
0x1984   :  { %18850 = vmatprep.mubr.msk.f32.mxu1 %vm1641_vm15, %v5610_v34  ;;  %v6484_v34 = vld [vmem:[#allocation21 + $0xb8] sm:$0xff] }
0x1985   :  { %18851 = vmatmul.mubr.msk.f32.vlgmr.msra.gmra.mrb[42].mxu1 %vm1641_vm15, %v18841_v43  ;;  %v6483_v43 = vld [vmem:[#allocation21 + $0xb0] sm:$0xff] }
0x1986   :  { %20789 = vmatpush3.bf16.msra.mxu1 %v20786_v28  ;;  %v18857_v63 = vpop.f32.mrb[88].mxu0  ;;  %v23845_v28 = vld [vmem:[#allocation19] sm:$0xff]  ;;  %v20825_v60 = vpack.c.bf16 %v6484_v34, %v6483_v43 }
0x1987   :  { %20791 = vmatprep.subr.bf16.mxu1 %v20790_v58  ;;  %v5787_v0 = vpop.f32.mrb[89].mxu0 }
0x1988   :  { %18866 = vmatprep.mubr.msk.f32.mxu1 %vm1641_vm15, %v5787_v0  ;;  %v6642_v0 = vld [vmem:[#allocation21 + $0xc8] sm:$0xff] }
0x198a   :  { %20793 = vmatpush3.bf16.msra.mxu1 %v20790_v58  ;;  %v18873_v3 = vpop.f32.mrb[90].mxu0  ;;  %v23857_v58 = vld [vmem:[#allocation19 + $0x18] sm:$0xff] }
0x198b   :  { %20795 = vmatprep.subr.bf16.mxu1 %v20794_v2  ;;  %v5959_v30 = vpop.f32.mrb[91].mxu0 }
0x198d   :  { %18867 = vmatmul.mubr.msk.f32.vlgmr.msra.gmra.mrb[42].mxu1 %vm1641_vm15, %v18857_v63  ;;  %v6641_v63 = vld [vmem:[#allocation21 + $0xc0] sm:$0xff] }
0x198e   :  { %20797 = vmatpush3.bf16.msra.mxu1 %v20794_v2  ;;  %18882 = vmatprep.mubr.msk.f32.mxu1 %vm1641_vm15, %v5959_v30  ;;  %v18889_v10 = vpop.f32.mrb[92].mxu0  ;;  %v6644_v30 = vld [vmem:[#allocation21 + $0xd8] sm:$0xff] }
0x198f   :  { %20799 = vmatprep.subr.bf16.mxu1 %v20798_v4  ;;  %v6131_v14 = vpop.f32.mrb[93].mxu0 }
0x1992   :  { %20801 = vmatpush3.bf16.msra.mxu1 %v20798_v4  ;;  %v18905_v35 = vpop.f32.mrb[94].mxu0  ;;  %v6643_v4 = vld [vmem:[#allocation21 + $0xd0] sm:$0xff] }
0x1993   :  { %20803 = vmatprep.subr.bf16.mxu1 %v20802_v12  ;;  %v6303_v39 = vpop.f32.mrb[95].mxu0 }
0x1995   :  { %18883 = vmatmul.mubr.msk.f32.vlgmr.msra.gmra.mrb[42].mxu1 %vm1641_vm15, %v18873_v3  ;;  %v20831_v3 = vpack.c.bf16 %v6642_v0, %v6641_v63 }
0x1996   :  { %20805 = vmatpush3.bf16.msra.mxu1 %v20802_v12  ;;  %18898 = vmatprep.mubr.msk.f32.mxu1 %vm1641_vm15, %v6131_v14 }
0x1997   :  { %20807 = vmatprep.subr.bf16.mxu1 %v20806_v38 }
0x199a   :  { %20809 = vmatpush3.bf16.msra.mxu1 %v20806_v38 }
0x199b   :  { %20811 = vmatprep.subr.bf16.mxu1 %v20810_v46 }
0x199d   :  { %18899 = vmatmul.mubr.msk.f32.vlgmr.msra.gmra.mrb[42].mxu1 %vm1641_vm15, %v18889_v10 }
0x199e   :  { %20813 = vmatpush3.bf16.msra.mxu1 %v20810_v46  ;;  %18914 = vmatprep.mubr.msk.f32.mxu1 %vm1641_vm15, %v6303_v39  ;;  %v6797_v39 = vld [vmem:[#allocation21 + $0xf0] sm:$0xff] }
0x199f   :  { %20815 = vmatprep.subr.bf16.mxu1 %v20814_v61  ;;  %v20843_v47 = vpack.c.bf16 %v6798_v44, %v6797_v39 }
0x19a2   :  { %20817 = vmatpush3.bf16.msra.mxu1 %v20814_v61  ;;  %v6950_v61 = vld [vmem:[#allocation21 + $0x108] sm:$0xff] }
0x19a3   :  { %20836 = vmatprep.subr.bf16.mxu1 %v22810_v54 }
0x19a5   :  { %18915 = vmatmul.mubr.msk.f32.vlgmr.msra.gmra.mrb[42].mxu1 %vm1641_vm15, %v18905_v35  ;;  %v6796_v35 = vld [vmem:[#allocation21 + $0xe8] sm:$0xff] }
0x19a6   :  { %18957 = vmatprep.mubr.msk.f32.mxu1 %vm22811_vm7, %v22812_v55  ;;  %v20840_v38 = vpack.c.bf16 %v6796_v35, %v6795_v33 }
0x1a78   :  { %v18916_v50 = vpop.f32.mrb[42].mxu1 }
0x1a79   :  { %v21889_v51 = vadd.f32 %v18916_v50, %v16918_v48  ;;  %v6389_v52 = vpop.f32.mrb[43].mxu1  ;;  %v6951_v50 = vld [vmem:[#allocation21 + $0x110] sm:$0xff] }
0x1a7a   :  { %v21890_v53 = vadd.f32 %v16918_v48, %v6389_v52  ;;  %v20849_v48 = vpack.c.bf16 %v6950_v61, %v6949_v6 }
0x1a7b   :  { %v6401_v56 = vmul.f32 0.01, %v21889_v51 }
0x1a7c   :  { %v6400_v36 = vmul.f32 0.01, %v21890_v53 }
0x1a7d   :  { %v6403_v57 = vmax.f32 %v21889_v51, %v6401_v56  ;;  %v6952_v51 = vld [vmem:[#allocation21 + $0x118] sm:$0xff]  ;;  %v7104_v56 = vld [vmem:[#allocation21 + $0x128] sm:$0xff] }
0x1a7e   :  { %v6402_v13 = vmax.f32 %v21890_v53, %v6400_v36  ;;  %v20852_v52 = vpack.c.bf16 %v6952_v51, %v6951_v50  ;;  %v7103_v53 = vld [vmem:[#allocation21 + $0x120] sm:$0xff]  ;;  %v7770_v51 = vld [vmem:[#allocation21 + $0x1b0] sm:$0xff] }
0x1a7f   :  { %v20858_v36 = vpack.c.bf16 %v7104_v56, %v7103_v53  ;;  %v7931_v56 = vld [vmem:[#allocation21 + $0x1c0] sm:$0xff] }
0x1a80   :  { %v20819_v29 = vpack.c.bf16 %v6403_v57, %v6402_v13  ;;  %v7105_v57 = vld [vmem:[#allocation21 + $0x130] sm:$0xff]  ;;  %v7106_v13 = vld [vmem:[#allocation21 + $0x138] sm:$0xff] }
0x1a82   :  { %20820 = vmatpush3.bf16.msra.mxu0 %v20819_v29  ;;  %20838 = vmatpush3.bf16.msra.mxu1 %v20819_v29 }
0x1a83   :  { %20845 = vmatprep.subr.bf16.mxu1 %v22810_v54  ;;  %20821 = vmatprep.subr.bf16.mxu0 %v22810_v54 }
0x1a85   :  { %18922 = vmatmul.mubr.msk.f32.vlgmr.msra.gmra.mrb[96].mxu0 %vm455_vm0, %v23845_v28  ;;  %18958 = vmatmul.mubr.msk.f32.vlgmr.msra.gmra.mrb[44].mxu1 %vm455_vm0, %v23847_v24 }
0x1a86   :  { %20847 = vmatpush3.bf16.msra.mxu1 %v20819_v29  ;;  %18975 = vmatprep.mubr.msk.f32.mxu1 %vm22811_vm7, %v22812_v55 }
0x1a87   :  { %20854 = vmatprep.subr.bf16.mxu1 %v22810_v54  ;;  %20823 = vmatpush3.bf16.msra.mxu0 %v20822_v42 }
0x1a88   :  { %20824 = vmatprep.subr.bf16.mxu0 %v22810_v54  ;;  %18932 = vmatprep.mubr.msk.f32.mxu0 %vm22811_vm7, %v22812_v55 }
0x1a89   :  { %18976 = vmatmul.mubr.msk.f32.vlgmr.msra.gmra.mrb[46].mxu1 %vm455_vm0, %v23857_v58 }
0x1a8a   :  { %20856 = vmatpush3.bf16.msra.mxu1 %v20819_v29  ;;  %18993 = vmatprep.mubr.msk.f32.mxu1 %vm22811_vm7, %v22812_v55 }
0x1a8b   :  { %20826 = vmatpush3.bf16.msra.mxu0 %v20825_v60 }
0x1a8c   :  { %20827 = vmatprep.subr.bf16.mxu0 %v22810_v54 }
0x1a8d   :  { %18994 = vmatmul.mubr.msk.f32.vlgmr.msra.gmra.mrb[48].mxu1 %vm455_vm0, %v23868_v62 }
0x1a8e   :  { %19009 = vmatprep.mubr.msk.f32.mxu1 %vm1815_vm3, %v23772_v32  ;;  %v20834_v32 = vpack.c.bf16 %v6644_v30, %v6643_v4 }
0x1b58   :  { %v6476_v2 = vpop.f32.mrb[96].mxu0  ;;  %v6790_v8 = vpop.f32.mrb[44].mxu1 }
0x1b59   :  { %18933 = vmatmul.mubr.msk.f32.vlgmr.msra.gmra.mrb[98].mxu0 %vm1641_vm15, %v6476_v2  ;;  %v18923_v7 = vpop.f32.mrb[97].mxu0  ;;  %v18959_v9 = vpop.f32.mrb[45].mxu1  ;;  %v7273_v2 = vld [vmem:[#allocation21 + $0x140] sm:$0xff] }
0x1b5a   :  { %20829 = vmatpush3.bf16.msra.mxu0 %v20819_v29  ;;  %18939 = vmatprep.mubr.msk.f32.mxu0 %vm22811_vm7, %v22812_v55  ;;  %v20861_v29 = vpack.c.bf16 %v7106_v13, %v7105_v57  ;;  %v7276_v9 = vld [vmem:[#allocation21 + $0x158] sm:$0xff]  ;;  %v7933_v13 = vld [vmem:[#allocation21 + $0x1d0] sm:$0xff] }
0x1b5b   :  { %20830 = vmatprep.subr.bf16.mxu0 %v22810_v54 }
0x1b5c   :  { %v6944_v10 = vpop.f32.mrb[46].mxu1 }
0x1b5d   :  { %18940 = vmatmul.mubr.msk.f32.vlgmr.msra.gmra.mrb[100].mxu0 %vm455_vm0, %v23877_v1  ;;  %v18977_v12 = vpop.f32.mrb[47].mxu1 }
0x1b5e   :  { %20832 = vmatpush3.bf16.msra.mxu0 %v20831_v3  ;;  %18950 = vmatprep.mubr.msk.f32.mxu0 %vm22811_vm7, %v22812_v55  ;;  %v7445_v12 = vld [vmem:[#allocation21 + $0x178] sm:$0xff] }
0x1b5f   :  { %20833 = vmatprep.subr.bf16.mxu0 %v22810_v54 }
0x1b60   :  { %v7098_v14 = vpop.f32.mrb[48].mxu1 }
0x1b61   :  { %v18995_v31 = vpop.f32.mrb[49].mxu1 }
0x1b62   :  { %20835 = vmatpush3.bf16.msra.mxu0 %v20834_v32 }
0x1b63   :  { %20839 = vmatprep.subr.bf16.mxu0 %v22810_v54 }
0x1c30   :  { %v6636_v45 = vpop.f32.mrb[100].mxu0 }
0x1c31   :  { %18951 = vmatmul.mubr.msk.f32.vlgmr.msra.gmra.mrb[98].mxu0 %vm1641_vm15, %v6636_v45  ;;  %v18941_v46 = vpop.f32.mrb[101].mxu0 }
0x1c32   :  { %20841 = vmatpush3.bf16.msra.mxu0 %v20840_v38  ;;  %18968 = vmatprep.mubr.msk.f32.mxu0 %vm22811_vm7, %v22812_v55  ;;  %v7607_v46 = vld [vmem:[#allocation21 + $0x190] sm:$0xff] }
0x1c33   :  { %20842 = vmatprep.subr.bf16.mxu0 %v22810_v54 }
0x1c36   :  { %20844 = vmatpush3.bf16.msra.mxu0 %v20843_v47 }
0x1c37   :  { %20848 = vmatprep.subr.bf16.mxu0 %v22810_v54 }
0x1c39   :  { %18969 = vmatmul.mubr.msk.f32.vlgmr.msra.gmra.mrb[98].mxu0 %vm1641_vm15, %v6790_v8  ;;  %v7275_v8 = vld [vmem:[#allocation21 + $0x150] sm:$0xff] }
0x1c3a   :  { %20850 = vmatpush3.bf16.msra.mxu0 %v20849_v48  ;;  %18986 = vmatprep.mubr.msk.f32.mxu0 %vm22811_vm7, %v22812_v55  ;;  %v7769_v48 = vld [vmem:[#allocation21 + $0x1a8] sm:$0xff] }
0x1c3b   :  { %20851 = vmatprep.subr.bf16.mxu0 %v22810_v54 }
0x1c3e   :  { %20853 = vmatpush3.bf16.msra.mxu0 %v20852_v52  ;;  %v7771_v52 = vld [vmem:[#allocation21 + $0x1b8] sm:$0xff] }
0x1c3f   :  { %20857 = vmatprep.subr.bf16.mxu0 %v22810_v54  ;;  %v20891_v53 = vpack.c.bf16 %v7771_v52, %v7770_v51  ;;  %v8698_v51 = vld [vmem:[#allocation21 + $0x268] sm:$0xff] }
0x1c41   :  { %18987 = vmatmul.mubr.msk.f32.vlgmr.msra.gmra.mrb[98].mxu0 %vm1641_vm15, %v6944_v10 }
0x1c42   :  { %20859 = vmatpush3.bf16.msra.mxu0 %v20858_v36  ;;  %19004 = vmatprep.mubr.msk.f32.mxu0 %vm22811_vm7, %v22812_v55  ;;  %v7932_v36 = vld [vmem:[#allocation21 + $0x1c8] sm:$0xff] }
0x1c43   :  { %20860 = vmatprep.subr.bf16.mxu0 %v22810_v54  ;;  %v20895_v57 = vpack.c.bf16 %v7932_v36, %v7931_v56  ;;  %v8700_v56 = vld [vmem:[#allocation21 + $0x278] sm:$0xff] }
0x1c46   :  { %20862 = vmatpush3.bf16.msra.mxu0 %v20861_v29  ;;  %v7934_v29 = vld [vmem:[#allocation21 + $0x1d8] sm:$0xff] }
0x1c49   :  { %19005 = vmatmul.mubr.msk.f32.vlgmr.msra.gmra.mrb[98].mxu0 %vm1641_vm15, %v7098_v14  ;;  %v7606_v14 = vld [vmem:[#allocation21 + $0x188] sm:$0xff] }
0x1c4a   :  { %19041 = vmatprep.mubr.msk.f32.mxu0 %vm1815_vm3, %v23798_v41  ;;  %v7274_v41 = vld [vmem:[#allocation21 + $0x148] sm:$0xff] }
0x1c4b   :  { %v20863_v30 = vpack.c.bf16 %v7274_v41, %v7273_v2 }
0x1d1c   :  { %v7176_v27 = vpop.f32.mrb[98].mxu0 }
0x1d1d   :  { %v21891_v42 = vadd.f32 %v16945_v22, %v7176_v27  ;;  %v19006_v43 = vpop.f32.mrb[99].mxu0  ;;  %v20899_v22 = vpack.c.bf16 %v7934_v29, %v7933_v13  ;;  %v16958_v27 = vld [vmem:[#allocation22 + $0x2] ss:$0 sm:$0xff] }
0x1d1f   :  { %22206 = vtanh.f32 %v21891_v42 }
0x1d29   :  { %v22207_v34 = vpop.eup %22206 }
0x1d2a   :  { %v7182_v60 = vmul.f32 1.442695, %v22207_v34 }
0x1d2c   :  { %22208 = vpow2.f32 %v7182_v60 }
0x1d36   :  { %v22209_v63 = vpop.eup %22208 }
0x1d37   :  { %7186 = vrot.lane.b32.xlu1 %v22209_v63, %s22816_s2  ;;  %v23905_v0 = vmul.f32 %v22209_v63, %v23776_v11  ;;  %v20867_v11 = vpack.c.bf16 %v7276_v9, %v7275_v8  ;;  %v8097_v9 = vld [vmem:[#allocation21 + $0x1f0] sm:$0xff] }
0x1d39   :  { %7191 = vrot.lane.b32.xlu0 %v23905_v0, %s22787_s23 }
0x1da9   :  { %v7187_v7 = vpop.permute.xlu1 %7186 }
0x1daa   :  { %v23910_v3 = vmul.f32 %v7187_v7, %v23780_v49  ;;  %v7442_v49 = vld [vmem:[#allocation21 + $0x160] sm:$0xff] }
0x1dab   :  { %v7192_v4 = vpop.permute.xlu0 %7191 }
0x1dac   :  { %v7194_v32 = vsel %vm455_vm0, %v23910_v3, %v7192_v4 }
0x1dad   :  { %19007 = vmatprep.subr.mxu1 %v7194_v32  ;;  %19039 = vmatprep.subr.mxu0 %v7194_v32 }
0x1dae   :  { %19008 = vmatpush3.msra.mxu1 %v7194_v32  ;;  %19040 = vmatpush3.msra.mxu0 %v7194_v32 }
0x1daf   :  { %19010 = vmatmul.mubr.msk.f32.vlgmr.msra.gmra.mrb[50].mxu1 %vm1815_vm3, %v23785_v37  ;;  %20864 = vmatprep.subr.bf16.mxu1 %v20863_v30  ;;  %v7443_v37 = vld [vmem:[#allocation21 + $0x168] sm:$0xff] }
0x1db0   :  { %19042 = vmatmul.mubr.msk.f32.vlgmr.msra.gmra.mrb[102].mxu0 %vm1815_vm3, %v23805_v16  ;;  %19055 = vmatprep.subr.mxu0 %v7194_v32  ;;  %v20871_v10 = vpack.c.bf16 %v7443_v37, %v7442_v49 }
0x1db1   :  { %20866 = vmatpush3.bf16.msra.mxu1 %v20863_v30  ;;  %19056 = vmatpush3.msra.mxu0 %v7194_v32  ;;  %v8095_v30 = vld [vmem:[#allocation21 + $0x1e0] sm:$0xff] }
0x1db2   :  { %19071 = vmatprep.subr.mxu0 %v7194_v32  ;;  %19057 = vmatprep.mubr.msk.f32.mxu0 %vm1815_vm3, %v23808_v17 }
0x1db3   :  { %20868 = vmatprep.subr.bf16.mxu1 %v20867_v11 }
0x1db4   :  { %19058 = vmatmul.mubr.msk.f32.vlgmr.msra.gmra.mrb[104].mxu0 %vm1815_vm3, %v23815_v5  ;;  %v7444_v5 = vld [vmem:[#allocation21 + $0x170] sm:$0xff] }
0x1db5   :  { %19072 = vmatpush3.msra.mxu0 %v7194_v32  ;;  %20870 = vmatpush3.bf16.msra.mxu1 %v20867_v11  ;;  %v8098_v11 = vld [vmem:[#allocation21 + $0x1f8] sm:$0xff] }
0x1db6   :  { %19023 = vmatprep.subr.mxu1 %v7194_v32  ;;  %19073 = vmatprep.mubr.msk.f32.mxu0 %vm1815_vm3, %v23818_v18  ;;  %v20875_v18 = vpack.c.bf16 %v7445_v12, %v7444_v5  ;;  %v20910_v49 = vpack.c.bf16 %v8098_v11, %v8097_v9  ;;  %v9029_v9 = vld [vmem:[#allocation27 + $0x8] sm:$0xff] }
0x1db7   :  { %20903 = vmatprep.subr.bf16.mxu0 %v22810_v54 }
0x1db8   :  { %19074 = vmatmul.mubr.msk.f32.vlgmr.msra.gmra.mrb[106].mxu0 %vm1815_vm3, %v23825_v23  ;;  %v7605_v23 = vld [vmem:[#allocation21 + $0x180] sm:$0xff] }
0x1db9   :  { %19091 = vmatprep.mubr.msk.f32.mxu0 %vm22811_vm7, %v22812_v55  ;;  %v20879_v31 = vpack.c.bf16 %v7606_v14, %v7605_v23 }
0x1e82   :  { %v19011_v16 = vpop.f32.mrb[50].mxu1 }
0x1e83   :  { %v7263_v17 = vpop.f32.mrb[51].mxu1  ;;  %v19043_v33 = vpop.f32.mrb[102].mxu0 }
0x1e84   :  { %19020 = vmatprep.mubr.msk.f32.mxu1 %vm1641_vm15, %v7263_v17  ;;  %v7595_v35 = vpop.f32.mrb[103].mxu0  ;;  %v8252_v17 = vld [vmem:[#allocation21 + $0x210] sm:$0xff] }
0x1e85   :  { %19021 = vmatmul.mubr.msk.f32.vlgmr.msra.gmra.mrb[52].mxu1 %vm1641_vm15, %v19011_v16 }
0x1e86   :  { %19024 = vmatpush3.msra.mxu1 %v7194_v32  ;;  %19025 = vmatprep.mubr.msk.f32.mxu1 %vm1815_vm3, %v23788_v40  ;;  %v7608_v40 = vld [vmem:[#allocation21 + $0x198] sm:$0xff]  ;;  %v8096_v32 = vld [vmem:[#allocation21 + $0x1e8] sm:$0xff] }
0x1e87   :  { %20872 = vmatprep.subr.bf16.mxu1 %v20871_v10  ;;  %v19059_v38 = vpop.f32.mrb[104].mxu0  ;;  %v20883_v61 = vpack.c.bf16 %v7608_v40, %v7607_v46  ;;  %v20907_v8 = vpack.c.bf16 %v8096_v32, %v8095_v30  ;;  %v8548_v40 = vld [vmem:[#allocation21 + $0x240] sm:$0xff] }
0x1e88   :  { %v7758_v39 = vpop.f32.mrb[105].mxu0 }
0x1e89   :  { %19026 = vmatmul.mubr.msk.f32.vlgmr.msra.gmra.mrb[54].mxu1 %vm1815_vm3, %v23795_v15  ;;  %v7768_v15 = vld [vmem:[#allocation21 + $0x1a0] sm:$0xff] }
0x1e8a   :  { %20874 = vmatpush3.bf16.msra.mxu1 %v20871_v10  ;;  %v20887_v50 = vpack.c.bf16 %v7769_v48, %v7768_v15  ;;  %v8253_v10 = vld [vmem:[#allocation21 + $0x218] sm:$0xff] }
0x1e8b   :  { %20876 = vmatprep.subr.bf16.mxu1 %v20875_v18  ;;  %v19075_v44 = vpop.f32.mrb[106].mxu0  ;;  %v8551_v15 = vld [vmem:[#allocation21 + $0x258] sm:$0xff] }
0x1e8c   :  { %v7921_v45 = vpop.f32.mrb[107].mxu0 }
0x1e8e   :  { %20878 = vmatpush3.bf16.msra.mxu1 %v20875_v18 }
0x1e8f   :  { %20880 = vmatprep.subr.bf16.mxu1 %v20879_v31 }
0x1f5c   :  { %v19027_v47 = vpop.f32.mrb[54].mxu1 }
0x1f5d   :  { %v7432_v6 = vpop.f32.mrb[55].mxu1 }
0x1f5e   :  { %19036 = vmatprep.mubr.msk.f32.mxu1 %vm1641_vm15, %v7432_v6 }
0x1f5f   :  { %19037 = vmatmul.mubr.msk.f32.vlgmr.msra.gmra.mrb[52].mxu1 %vm1641_vm15, %v19027_v47  ;;  %v8549_v47 = vld [vmem:[#allocation21 + $0x248] sm:$0xff] }
0x1f60   :  { %20882 = vmatpush3.bf16.msra.mxu1 %v20879_v31  ;;  %19052 = vmatprep.mubr.msk.f32.mxu1 %vm1641_vm15, %v7595_v35  ;;  %v8400_v35 = vld [vmem:[#allocation21 + $0x228] sm:$0xff]  ;;  %v20934_v6 = vpack.c.bf16 %v8549_v47, %v8548_v40  ;;  %v9214_v40 = vld [vmem:[#allocation27 + $0x58] sm:$0xff] }
0x1f61   :  { %20884 = vmatprep.subr.bf16.mxu1 %v20883_v61 }
0x1f64   :  { %20886 = vmatpush3.bf16.msra.mxu1 %v20883_v61  ;;  %v8550_v61 = vld [vmem:[#allocation21 + $0x250] sm:$0xff] }
0x1f65   :  { %20888 = vmatprep.subr.bf16.mxu1 %v20887_v50  ;;  %v20937_v48 = vpack.c.bf16 %v8551_v15, %v8550_v61 }
0x1f67   :  { %19053 = vmatmul.mubr.msk.f32.vlgmr.msra.gmra.mrb[52].mxu1 %vm1641_vm15, %v19043_v33  ;;  %v8399_v33 = vld [vmem:[#allocation21 + $0x220] sm:$0xff] }
0x1f68   :  { %20890 = vmatpush3.bf16.msra.mxu1 %v20887_v50  ;;  %19068 = vmatprep.mubr.msk.f32.mxu1 %vm1641_vm15, %v7758_v39  ;;  %v8402_v39 = vld [vmem:[#allocation21 + $0x238] sm:$0xff]  ;;  %v8697_v50 = vld [vmem:[#allocation21 + $0x260] sm:$0xff] }
0x1f69   :  { %20892 = vmatprep.subr.bf16.mxu1 %v20891_v53  ;;  %v20943_v52 = vpack.c.bf16 %v8698_v51, %v8697_v50  ;;  %v9215_v50 = vld [vmem:[#allocation27 + $0x60] sm:$0xff]  ;;  %v9216_v51 = vld [vmem:[#allocation27 + $0x68] sm:$0xff] }
0x1f6c   :  { %20894 = vmatpush3.bf16.msra.mxu1 %v20891_v53  ;;  %v8699_v53 = vld [vmem:[#allocation21 + $0x270] sm:$0xff] }
0x1f6d   :  { %20896 = vmatprep.subr.bf16.mxu1 %v20895_v57  ;;  %v20946_v36 = vpack.c.bf16 %v8700_v56, %v8699_v53  ;;  %v20972_v53 = vpack.c.bf16 %v9216_v51, %v9215_v50  ;;  %v9745_v51 = vld [vmem:[#allocation27 + $0x130] sm:$0xff] }
0x1f6f   :  { %19069 = vmatmul.mubr.msk.f32.vlgmr.msra.gmra.mrb[52].mxu1 %vm1641_vm15, %v19059_v38  ;;  %v20925_v38 = vpack.c.bf16 %v8400_v35, %v8399_v33  ;;  %v9035_v33 = vld [vmem:[#allocation27 + $0x38] sm:$0xff] }
0x1f70   :  { %20898 = vmatpush3.bf16.msra.mxu1 %v20895_v57  ;;  %19084 = vmatprep.mubr.msk.f32.mxu1 %vm1641_vm15, %v7921_v45  ;;  %v16977_v57 = vld [vmem:[#allocation22 + $0x3] ss:$0 sm:$0xff] }
0x1f71   :  { %20900 = vmatprep.subr.bf16.mxu1 %v20899_v22  ;;  %v24059_v35 = vld [vmem:[%s24779_s7 + $0x40] sm:$0xff] }
0x1f74   :  { %20902 = vmatpush3.bf16.msra.mxu1 %v20899_v22 }
0x1f75   :  { %20921 = vmatprep.subr.bf16.mxu1 %v22810_v54 }
0x1f77   :  { %19085 = vmatmul.mubr.msk.f32.vlgmr.msra.gmra.mrb[52].mxu1 %vm1641_vm15, %v19075_v44 }
0x1f78   :  { %19127 = vmatprep.mubr.msk.f32.mxu1 %vm22811_vm7, %v22812_v55 }
0x204a   :  { %v19086_v42 = vpop.f32.mrb[52].mxu1 }
0x204b   :  { %v21892_v43 = vadd.f32 %v19086_v42, %v16958_v27  ;;  %v8007_v34 = vpop.f32.mrb[53].mxu1 }
0x204c   :  { %v21893_v60 = vadd.f32 %v16958_v27, %v8007_v34 }
0x204d   :  { %v8019_v63 = vmul.f32 0.01, %v21892_v43 }
0x204e   :  { %v8018_v2 = vmul.f32 0.01, %v21893_v60 }
0x204f   :  { %v8021_v41 = vmax.f32 %v21892_v43, %v8019_v63  ;;  %v8787_v63 = vld [vmem:[#allocation24] sm:$0xf] }
0x2050   :  { %v8020_v7 = vmax.f32 %v21893_v60, %v8018_v2 }
0x2052   :  { %v20904_v4 = vpack.c.bf16 %v8021_v41, %v8020_v7  ;;  %v8862_v41 = vld [vmem:[#allocation24 + $0x4] sm:$0xf] }
0x2054   :  { %20905 = vmatpush3.bf16.msra.mxu0 %v20904_v4  ;;  %20923 = vmatpush3.bf16.msra.mxu1 %v20904_v4 }
0x2055   :  { %20930 = vmatprep.subr.bf16.mxu1 %v22810_v54  ;;  %20906 = vmatprep.subr.bf16.mxu0 %v22810_v54 }
0x2057   :  { %19092 = vmatmul.mubr.msk.f32.vlgmr.msra.gmra.mrb[108].mxu0 %vm455_vm0, %v23845_v28  ;;  %19128 = vmatmul.mubr.msk.f32.vlgmr.msra.gmra.mrb[56].mxu1 %vm455_vm0, %v23847_v24  ;;  %v8250_v28 = vld [vmem:[#allocation21 + $0x200] sm:$0xff]  ;;  %v8251_v24 = vld [vmem:[#allocation21 + $0x208] sm:$0xff] }
0x2058   :  { %20932 = vmatpush3.bf16.msra.mxu1 %v20904_v4  ;;  %19145 = vmatprep.mubr.msk.f32.mxu1 %vm22811_vm7, %v22812_v55  ;;  %v20916_v16 = vpack.c.bf16 %v8251_v24, %v8250_v28  ;;  %v24025_v24 = vld [vmem:[%s24779_s7 + $0x18] sm:$0xf] }
0x2059   :  { %20939 = vmatprep.subr.bf16.mxu1 %v22810_v54  ;;  %20908 = vmatpush3.bf16.msra.mxu0 %v20907_v8  ;;  %v9028_v8 = vld [vmem:[#allocation27] sm:$0xff] }
0x205a   :  { %20909 = vmatprep.subr.bf16.mxu0 %v22810_v54  ;;  %19102 = vmatprep.mubr.msk.f32.mxu0 %vm22811_vm7, %v22812_v55 }
0x205b   :  { %19146 = vmatmul.mubr.msk.f32.vlgmr.msra.gmra.mrb[58].mxu1 %vm455_vm0, %v23857_v58 }
0x205c   :  { %20941 = vmatpush3.bf16.msra.mxu1 %v20904_v4  ;;  %19163 = vmatprep.mubr.msk.f32.mxu1 %vm22811_vm7, %v22812_v55 }
0x205d   :  { %20911 = vmatpush3.bf16.msra.mxu0 %v20910_v49  ;;  %19177 = vmatprep.subr.mxu1 %v22812_v55  ;;  %v24020_v49 = vld [vmem:[%s24779_s7 + $0x8] sm:$0xf] }
0x205e   :  { %20912 = vmatprep.subr.bf16.mxu0 %v22810_v54 }
0x205f   :  { %19164 = vmatmul.mubr.msk.f32.vlgmr.msra.gmra.mrb[60].mxu1 %vm455_vm0, %v23868_v62  ;;  %v20919_v62 = vpack.c.bf16 %v8253_v10, %v8252_v17  ;;  %v20948_v17 = vpack.c.bf16 %v9029_v9, %v9028_v8  ;;  %v9393_v9 = vld [vmem:[#allocation27 + $0xb0] sm:$0xff] }
0x2060   :  { %19179 = vmatprep.mubr.msk.f32.mxu1 %vm22811_vm7, %v22812_v55 }
0x212a   :  { %v8090_v37 = vpop.f32.mrb[108].mxu0  ;;  %v8394_v5 = vpop.f32.mrb[56].mxu1 }
0x212b   :  { %19103 = vmatmul.mubr.msk.f32.vlgmr.msra.gmra.mrb[110].mxu0 %vm1641_vm15, %v8090_v37  ;;  %v19093_v58 = vpop.f32.mrb[109].mxu0  ;;  %v19129_v12 = vpop.f32.mrb[57].mxu1  ;;  %v9030_v37 = vld [vmem:[#allocation27 + $0x10] sm:$0xff] }
0x212c   :  { %20914 = vmatpush3.bf16.msra.mxu0 %v20904_v4  ;;  %19109 = vmatprep.mubr.msk.f32.mxu0 %vm22811_vm7, %v22812_v55  ;;  %v9031_v58 = vld [vmem:[#allocation27 + $0x18] sm:$0xff]  ;;  %v9033_v12 = vld [vmem:[#allocation27 + $0x28] sm:$0xff] }
0x212d   :  { %20915 = vmatprep.subr.bf16.mxu0 %v22810_v54  ;;  %v20952_v10 = vpack.c.bf16 %v9031_v58, %v9030_v37  ;;  %v9563_v37 = vld [vmem:[#allocation27 + $0xc0] sm:$0xff]  ;;  %v9564_v58 = vld [vmem:[#allocation27 + $0xc8] sm:$0xff] }
0x212e   :  { %v8543_v18 = vpop.f32.mrb[58].mxu1 }
0x212f   :  { %19110 = vmatmul.mubr.msk.f32.vlgmr.msra.gmra.mrb[112].mxu0 %vm455_vm0, %v23877_v1  ;;  %v19147_v23 = vpop.f32.mrb[59].mxu1  ;;  %v8401_v1 = vld [vmem:[#allocation21 + $0x230] sm:$0xff] }
0x2130   :  { %20917 = vmatpush3.bf16.msra.mxu0 %v20916_v16  ;;  %19120 = vmatprep.mubr.msk.f32.mxu0 %vm22811_vm7, %v22812_v55  ;;  %v20928_v46 = vpack.c.bf16 %v8402_v39, %v8401_v1  ;;  %v24030_v16 = vld [vmem:[%s24779_s7 + $0x20] sm:$0xff]  ;;  %v24067_v1 = vld [vmem:[%s24779_s7 + $0x48] sm:$0xf] }
0x2131   :  { %20918 = vmatprep.subr.bf16.mxu0 %v22810_v54  ;;  %v9211_v39 = vld [vmem:[#allocation27 + $0x40] sm:$0xff] }
0x2132   :  { %v8692_v14 = vpop.f32.mrb[60].mxu1 }
0x2133   :  { %v19165_v31 = vpop.f32.mrb[61].mxu1 }
0x2134   :  { %20920 = vmatpush3.bf16.msra.mxu0 %v20919_v62  ;;  %v24042_v62 = vld [vmem:[%s24779_s7 + $0x28] sm:$0xf]  ;;  %v9034_v31 = vld [vmem:[#allocation27 + $0x30] sm:$0xff] }
0x2135   :  { %20924 = vmatprep.subr.bf16.mxu0 %v22810_v54 }
0x2202   :  { %v8245_v44 = vpop.f32.mrb[112].mxu0 }
0x2203   :  { %19121 = vmatmul.mubr.msk.f32.vlgmr.msra.gmra.mrb[110].mxu0 %vm1641_vm15, %v8245_v44  ;;  %v19111_v45 = vpop.f32.mrb[113].mxu0  ;;  %v9212_v44 = vld [vmem:[#allocation27 + $0x48] sm:$0xff] }
0x2204   :  { %20926 = vmatpush3.bf16.msra.mxu0 %v20925_v38  ;;  %19138 = vmatprep.mubr.msk.f32.mxu0 %vm22811_vm7, %v22812_v55  ;;  %v20960_v38 = vpack.c.bf16 %v9035_v33, %v9034_v31  ;;  %v20964_v45 = vpack.c.bf16 %v9212_v44, %v9211_v39  ;;  %v9568_v31 = vld [vmem:[#allocation27 + $0xe8] sm:$0xff]  ;;  %v9570_v39 = vld [vmem:[#allocation27 + $0xf8] sm:$0xff] }
0x2205   :  { %20927 = vmatprep.subr.bf16.mxu0 %v22810_v54 }
0x2208   :  { %20929 = vmatpush3.bf16.msra.mxu0 %v20928_v46  ;;  %v9213_v46 = vld [vmem:[#allocation27 + $0x50] sm:$0xff] }
0x2209   :  { %20933 = vmatprep.subr.bf16.mxu0 %v22810_v54  ;;  %v20968_v15 = vpack.c.bf16 %v9214_v40, %v9213_v46  ;;  %v9740_v46 = vld [vmem:[#allocation27 + $0x108] sm:$0xff] }
0x220b   :  { %19139 = vmatmul.mubr.msk.f32.vlgmr.msra.gmra.mrb[110].mxu0 %vm1641_vm15, %v8394_v5  ;;  %v9032_v5 = vld [vmem:[#allocation27 + $0x20] sm:$0xff] }
0x220c   :  { %20935 = vmatpush3.bf16.msra.mxu0 %v20934_v6  ;;  %19156 = vmatprep.mubr.msk.f32.mxu0 %vm22811_vm7, %v22812_v55  ;;  %v20956_v23 = vpack.c.bf16 %v9033_v12, %v9032_v5  ;;  %v9566_v5 = vld [vmem:[#allocation27 + $0xd8] sm:$0xff] }
0x220d   :  { %20936 = vmatprep.subr.bf16.mxu0 %v22810_v54 }
0x2210   :  { %20938 = vmatpush3.bf16.msra.mxu0 %v20937_v48 }
0x2211   :  { %20942 = vmatprep.subr.bf16.mxu0 %v22810_v54 }
0x2213   :  { %19157 = vmatmul.mubr.msk.f32.vlgmr.msra.gmra.mrb[110].mxu0 %vm1641_vm15, %v8543_v18  ;;  %v24046_v18 = vld [vmem:[%s24779_s7 + $0x30] sm:$0xff] }
0x2214   :  { %20944 = vmatpush3.bf16.msra.mxu0 %v20943_v52  ;;  %19174 = vmatprep.mubr.msk.f32.mxu0 %vm22811_vm7, %v22812_v55 }
0x2215   :  { %20945 = vmatprep.subr.bf16.mxu0 %v22810_v54 }
0x2218   :  { %20947 = vmatpush3.bf16.msra.mxu0 %v20946_v36  ;;  %v9217_v36 = vld [vmem:[#allocation27 + $0x70] sm:$0xff] }
0x221b   :  { %19175 = vmatmul.mubr.msk.f32.vlgmr.msra.gmra.mrb[110].mxu0 %vm1641_vm15, %v8692_v14  ;;  %v24055_v14 = vld [vmem:[%s24779_s7 + $0x38] sm:$0xf] }
0x22ee   :  { %v8770_v13 = vpop.f32.mrb[110].mxu0 }
0x22ef   :  { %v21894_v29 = vadd.f32 %v16977_v57, %v8770_v13  ;;  %v19176_v22 = vpop.f32.mrb[111].mxu0  ;;  %v9218_v57 = vld [vmem:[#allocation27 + $0x78] sm:$0xff] }
0x22f1   :  { %22210 = vtanh.f32 %v21894_v29  ;;  %v20976_v29 = vpack.c.bf16 %v9218_v57, %v9217_v36 }
0x22fb   :  { %v22211_v27 = vpop.eup %22210 }
0x22fc   :  { %8778 = vrot.lane.b32.xlu1 %v22211_v27, %s22816_s2  ;;  %v8776_v34 = vadd.f32 %v22211_v27, %v23905_v0  ;;  %v24007_v0 = vld [vmem:[%s24779_s7 + $0x10] sm:$0xff]  ;;  %v9387_v27 = vld [vmem:[#allocation27 + $0x80] sm:$0xff] }
0x22fd   :  { %19213 = vmatprep.mubr.msk.f32.mxu0 %vm1169_vm12, %v24007_v0 }
0x236e   :  { %v8779_v42 = vpop.permute.xlu1 %8778 }
0x236f   :  { %v8781_v43 = vsub.f32 %v23910_v3, %v8779_v42  ;;  %v24004_v3 = vld [vmem:[%s24779_s7] sm:$0xff]  ;;  %v9388_v42 = vld [vmem:[#allocation27 + $0x88] sm:$0xff] }
0x2371   :  { %8783 = vrot.lane.b32.xlu0 %v8781_v43, %s22787_s23  ;;  %s22817_s23 = smov 96  }
0x23e3   :  { %v8784_v60 = vpop.permute.xlu0 %8783 }
0x23e4   :  { %v8786_v2 = vsel %vm455_vm0, %v8776_v34, %v8784_v60  ;;  %v20980_v34 = vpack.c.bf16 %v9388_v42, %v9387_v27 }
0x23e5   :  { %19178 = vmatpush3.msra.mxu1 %v8786_v2 }
0x23e6   :  { %19180 = vmatmul.mubr.msk.f32.vlgmr.msra.gmra.mrb[62].mxu1 %vm1815_vm3, %v8787_v63  ;;  %19182 = vmatprep.subr.mxu1 %v22812_v55  ;;  %v9389_v63 = vld [vmem:[#allocation27 + $0x90] sm:$0xff] }
0x23e7   :  { %19183 = vmatpush3.msra.mxu1 %v8786_v2  ;;  %19184 = vmatprep.mubr.msk.f32.mxu1 %vm22811_vm7, %v22812_v55  ;;  %v9390_v2 = vld [vmem:[#allocation27 + $0x98] sm:$0xff] }
0x23ea   :  { %19185 = vmatmul.mubr.msk.f32.vlgmr.msra.gmra.mrb[64].mxu1 %vm1815_vm3, %v8862_v41  ;;  %v20984_v41 = vpack.c.bf16 %v9390_v2, %v9389_v63  ;;  %v9915_v63 = vld [vmem:[#allocation27 + $0x140] sm:$0xff] }
0x23eb   :  { %19189 = vmatprep.mubr.msk.f32.mxu1 %vm1169_vm12, %v24004_v3 }
0x24b9   :  { %v24013_v7 = vpop.f32.mrb[62].mxu1 }
0x24ba   :  { %8937 = vrot.lane.b32.xlu1 %v24013_v7, %s22797_s10  ;;  %v19181_v4 = vpop.f32.mrb[63].mxu1 }
0x24bb   :  { %v9391_v4 = vld [vmem:[#allocation27 + $0xa0] sm:$0xff] }
0x24bd   :  { %v24017_v30 = vpop.f32.mrb[64].mxu1 }
0x24be   :  { %v19186_v32 = vpop.f32.mrb[65].mxu1 }
0x24bf   :  { %v9392_v32 = vld [vmem:[#allocation27 + $0xa8] sm:$0xff] }
0x24c0   :  { %v20988_v8 = vpack.c.bf16 %v9392_v32, %v9391_v4  ;;  %v9917_v32 = vld [vmem:[#allocation27 + $0x150] sm:$0xff] }
0x252c   :  { %v8938_v11 = vpop.permute.xlu1 %8937 }
0x252d   :  { %v8940_v28 = vsel %vm1641_vm15, %v24017_v30, %v8938_v11  ;;  %v9394_v11 = vld [vmem:[#allocation27 + $0xb8] sm:$0xff] }
0x252e   :  { %19187 = vmatprep.subr.msk.mxu1 %vm1176_vm14, %v8940_v28  ;;  %19211 = vmatprep.subr.msk.mxu0 %vm1176_vm14, %v8940_v28 }
0x252f   :  { %19188 = vmatpush3.msk.msra.mxu1 %vm1176_vm14, %v8940_v28  ;;  %19212 = vmatpush3.msk.msra.mxu0 %vm1176_vm14, %v8940_v28 }
0x2530   :  { %19190 = vmatmul.mubr.msk.f32.vlgmr.msra.gmra.mrb[66].mxu1 %vm1169_vm12, %v24020_v49  ;;  %19214 = vmatmul.mubr.msk.f32.vlgmr.msra.gmra.mrb[114].mxu0 %vm1169_vm12, %v24025_v24 }
0x2531   :  { %19235 = vmatprep.subr.msk.mxu0 %vm1176_vm14, %v8940_v28  ;;  %19237 = vmatprep.mubr.msk.f32.mxu0 %vm1169_vm12, %v24030_v16 }
0x2532   :  { %19236 = vmatpush3.msk.msra.mxu0 %vm1176_vm14, %v8940_v28  ;;  %20949 = vmatprep.subr.bf16.mxu1 %v20948_v17 }
0x2533   :  { %19259 = vmatprep.subr.msk.mxu0 %vm1176_vm14, %v8940_v28  ;;  %20951 = vmatpush3.bf16.msra.mxu1 %v20948_v17  ;;  %v20996_v17 = vpack.c.bf16 %v9564_v58, %v9563_v37  ;;  %v9921_v58 = vld [vmem:[#allocation27 + $0x170] sm:$0xff] }
0x2534   :  { %19238 = vmatmul.mubr.msk.f32.vlgmr.msra.gmra.mrb[116].mxu0 %vm1169_vm12, %v24042_v62  ;;  %20953 = vmatprep.subr.bf16.mxu1 %v20952_v10 }
0x2535   :  { %19260 = vmatpush3.msk.msra.mxu0 %vm1176_vm14, %v8940_v28  ;;  %19261 = vmatprep.mubr.msk.f32.mxu0 %vm1169_vm12, %v24046_v18 }
0x2536   :  { %19283 = vmatprep.subr.msk.mxu0 %vm1176_vm14, %v8940_v28 }
0x2537   :  { %20955 = vmatpush3.bf16.msra.mxu1 %v20952_v10  ;;  %v9565_v10 = vld [vmem:[#allocation27 + $0xd0] sm:$0xff] }
0x2538   :  { %19262 = vmatmul.mubr.msk.f32.vlgmr.msra.gmra.mrb[118].mxu0 %vm1169_vm12, %v24055_v14  ;;  %20957 = vmatprep.subr.bf16.mxu1 %v20956_v23  ;;  %v21000_v12 = vpack.c.bf16 %v9566_v5, %v9565_v10  ;;  %v10079_v5 = vld [vmem:[#allocation27 + $0x180] sm:$0xff] }
0x2539   :  { %19284 = vmatpush3.msk.msra.mxu0 %vm1176_vm14, %v8940_v28  ;;  %19285 = vmatprep.mubr.msk.f32.mxu0 %vm1169_vm12, %v24059_v35  ;;  %v20992_v28 = vpack.c.bf16 %v9394_v11, %v9393_v9  ;;  %v9919_v11 = vld [vmem:[#allocation27 + $0x160] sm:$0xff] }
0x253a   :  { %21028 = vmatprep.subr.bf16.mxu0 %v22810_v54 }
0x253b   :  { %20959 = vmatpush3.bf16.msra.mxu1 %v20956_v23  ;;  %v9567_v23 = vld [vmem:[#allocation27 + $0xe0] sm:$0xff] }
0x253c   :  { %19286 = vmatmul.mubr.msk.f32.vlgmr.msra.gmra.mrb[120].mxu0 %vm1169_vm12, %v24067_v1  ;;  %20961 = vmatprep.subr.bf16.mxu1 %v20960_v38  ;;  %v21004_v33 = vpack.c.bf16 %v9568_v31, %v9567_v23 }
0x253d   :  { %19311 = vmatprep.mubr.msk.f32.mxu0 %vm22811_vm7, %v22812_v55 }
0x253f   :  { %20963 = vmatpush3.bf16.msra.mxu1 %v20960_v38  ;;  %v9569_v38 = vld [vmem:[#allocation27 + $0xf0] sm:$0xff] }
0x2540   :  { %20965 = vmatprep.subr.bf16.mxu1 %v20964_v45  ;;  %v21008_v44 = vpack.c.bf16 %v9570_v39, %v9569_v38  ;;  %v10081_v39 = vld [vmem:[#allocation27 + $0x190] sm:$0xff] }
0x2603   :  { %v19191_v47 = vpop.f32.mrb[66].mxu1  ;;  %v19215_v6 = vpop.f32.mrb[114].mxu0 }
0x2604   :  { %v9019_v61 = vpop.f32.mrb[67].mxu1  ;;  %v9201_v48 = vpop.f32.mrb[115].mxu0 }
0x2605   :  { %19208 = vmatprep.mubr.msk.f32.mxu1 %vm9036_vm5, %v9019_v61 }
0x2606   :  { %19209 = vmatmul.mubr.msk.f32.vlgmr.msra.gmra.mrb[68].mxu1 %vm9036_vm5, %v19191_v47  ;;  %v9741_v47 = vld [vmem:[#allocation27 + $0x110] sm:$0xff] }
0x2607   :  { %20967 = vmatpush3.bf16.msra.mxu1 %v20964_v45  ;;  %19232 = vmatprep.mubr.msk.f32.mxu1 %vm9036_vm5, %v9201_v48  ;;  %v19239_v52 = vpop.f32.mrb[116].mxu0  ;;  %v9739_v45 = vld [vmem:[#allocation27 + $0x100] sm:$0xff]  ;;  %v9744_v48 = vld [vmem:[#allocation27 + $0x128] sm:$0xff] }
0x2608   :  { %20969 = vmatprep.subr.bf16.mxu1 %v20968_v15  ;;  %v9377_v56 = vpop.f32.mrb[117].mxu0  ;;  %v21012_v40 = vpack.c.bf16 %v9740_v46, %v9739_v45  ;;  %v10083_v46 = vld [vmem:[#allocation27 + $0x1a0] sm:$0xff] }
0x260b   :  { %20971 = vmatpush3.bf16.msra.mxu1 %v20968_v15  ;;  %v19263_v13 = vpop.f32.mrb[118].mxu0  ;;  %v9743_v15 = vld [vmem:[#allocation27 + $0x120] sm:$0xff] }
0x260c   :  { %20973 = vmatprep.subr.bf16.mxu1 %v20972_v53  ;;  %v9553_v22 = vpop.f32.mrb[119].mxu0  ;;  %v21020_v50 = vpack.c.bf16 %v9744_v48, %v9743_v15  ;;  %v10237_v48 = vld [vmem:[#allocation27 + $0x1c0] sm:$0xff] }
0x260f   :  { %20975 = vmatpush3.bf16.msra.mxu1 %v20972_v53  ;;  %v24077_v43 = vpop.f32.mrb[120].mxu0 }
0x2610   :  { %20977 = vmatprep.subr.bf16.mxu1 %v20976_v29  ;;  %v9729_v60 = vpop.f32.mrb[121].mxu0 }
0x2613   :  { %20979 = vmatpush3.bf16.msra.mxu1 %v20976_v29 }
0x2614   :  { %20981 = vmatprep.subr.bf16.mxu1 %v20980_v34 }
0x2616   :  { %19233 = vmatmul.mubr.msk.f32.vlgmr.msra.gmra.mrb[68].mxu1 %vm9036_vm5, %v19215_v6  ;;  %v9742_v6 = vld [vmem:[#allocation27 + $0x118] sm:$0xff] }
0x2617   :  { %20983 = vmatpush3.bf16.msra.mxu1 %v20980_v34  ;;  %19256 = vmatprep.mubr.msk.f32.mxu1 %vm9036_vm5, %v9377_v56  ;;  %v21016_v61 = vpack.c.bf16 %v9742_v6, %v9741_v47  ;;  %v16993_v56 = vld [vmem:[#allocation28] ss:$0 sm:$0xff]  ;;  %v10085_v6 = vld [vmem:[#allocation27 + $0x1b0] sm:$0xff] }
0x2618   :  { %20985 = vmatprep.subr.bf16.mxu1 %v20984_v41 }
0x261b   :  { %20987 = vmatpush3.bf16.msra.mxu1 %v20984_v41  ;;  %v24104_v41 = vld [vmem:[#allocation25] sm:$0xf] }
0x261c   :  { %20989 = vmatprep.subr.bf16.mxu1 %v20988_v8 }
0x261f   :  { %20991 = vmatpush3.bf16.msra.mxu1 %v20988_v8  ;;  %v9918_v8 = vld [vmem:[#allocation27 + $0x158] sm:$0xff] }
0x2620   :  { %20993 = vmatprep.subr.bf16.mxu1 %v20992_v28  ;;  %v21036_v9 = vpack.c.bf16 %v9918_v8, %v9917_v32  ;;  %v10396_v32 = vld [vmem:[#allocation27 + $0x208] sm:$0xff] }
0x2623   :  { %20995 = vmatpush3.bf16.msra.mxu1 %v20992_v28  ;;  %v9920_v28 = vld [vmem:[#allocation27 + $0x168] sm:$0xff] }
0x2624   :  { %20997 = vmatprep.subr.bf16.mxu1 %v20996_v17  ;;  %v21039_v37 = vpack.c.bf16 %v9920_v28, %v9919_v11  ;;  %v24161_v11 = vld [vmem:[#allocation25 + $0xc] sm:$0xf] }
0x2626   :  { %19257 = vmatmul.mubr.msk.f32.vlgmr.msra.gmra.mrb[68].mxu1 %vm9036_vm5, %v19239_v52  ;;  %v9746_v52 = vld [vmem:[#allocation27 + $0x138] sm:$0xff] }
0x2627   :  { %20999 = vmatpush3.bf16.msra.mxu1 %v20996_v17  ;;  %19280 = vmatprep.mubr.msk.f32.mxu1 %vm9036_vm5, %v9553_v22  ;;  %v21024_v53 = vpack.c.bf16 %v9746_v52, %v9745_v51  ;;  %v9922_v17 = vld [vmem:[#allocation27 + $0x178] sm:$0xff] }
0x2628   :  { %21001 = vmatprep.subr.bf16.mxu1 %v21000_v12  ;;  %v21042_v10 = vpack.c.bf16 %v9922_v17, %v9921_v58  ;;  %v10400_v17 = vld [vmem:[#allocation27 + $0x228] sm:$0xff] }
0x262b   :  { %21003 = vmatpush3.bf16.msra.mxu1 %v21000_v12  ;;  %v10080_v12 = vld [vmem:[#allocation27 + $0x188] sm:$0xff] }
0x262c   :  { %21005 = vmatprep.subr.bf16.mxu1 %v21004_v33  ;;  %v21049_v38 = vpack.c.bf16 %v10080_v12, %v10079_v5  ;;  %v10401_v5 = vld [vmem:[#allocation27 + $0x230] sm:$0xff]  ;;  %v10402_v12 = vld [vmem:[#allocation27 + $0x238] sm:$0xff] }
0x262f   :  { %21007 = vmatpush3.bf16.msra.mxu1 %v21004_v33  ;;  %v24121_v33 = vld [vmem:[#allocation25 + $0x4] sm:$0xf] }
0x2630   :  { %21009 = vmatprep.subr.bf16.mxu1 %v21008_v44 }
0x2633   :  { %21011 = vmatpush3.bf16.msra.mxu1 %v21008_v44  ;;  %v10082_v44 = vld [vmem:[#allocation27 + $0x198] sm:$0xff] }
0x2634   :  { %21013 = vmatprep.subr.bf16.mxu1 %v21012_v40  ;;  %v21052_v45 = vpack.c.bf16 %v10082_v44, %v10081_v39  ;;  %v10553_v39 = vld [vmem:[#allocation27 + $0x240] sm:$0xff]  ;;  %v10554_v44 = vld [vmem:[#allocation27 + $0x248] sm:$0xff] }
0x2636   :  { %19281 = vmatmul.mubr.msk.f32.vlgmr.msra.gmra.mrb[68].mxu1 %vm9036_vm5, %v19263_v13 }
0x2637   :  { %21015 = vmatpush3.bf16.msra.mxu1 %v21012_v40  ;;  %19304 = vmatprep.mubr.msk.f32.mxu1 %vm9036_vm5, %v9729_v60  ;;  %v10084_v40 = vld [vmem:[#allocation27 + $0x1a8] sm:$0xff]  ;;  %v11891_v60 = vld [vmem:[#allocation27 + $0x460] sm:$0xff] }
0x2638   :  { %21017 = vmatprep.subr.bf16.mxu1 %v21016_v61  ;;  %v21055_v47 = vpack.c.bf16 %v10084_v40, %v10083_v46  ;;  %v10555_v46 = vld [vmem:[#allocation27 + $0x250] sm:$0xff]  ;;  %v10556_v40 = vld [vmem:[#allocation27 + $0x258] sm:$0xff] }
0x263b   :  { %21019 = vmatpush3.bf16.msra.mxu1 %v21016_v61  ;;  %v10086_v61 = vld [vmem:[#allocation27 + $0x1b8] sm:$0xff] }
0x263c   :  { %21021 = vmatprep.subr.bf16.mxu1 %v21020_v50  ;;  %v21058_v15 = vpack.c.bf16 %v10086_v61, %v10085_v6  ;;  %v21100_v61 = vpack.c.bf16 %v10556_v40, %v10555_v46  ;;  %v11070_v40 = vld [vmem:[#allocation27 + $0x300] sm:$0xff] }
0x263f   :  { %21023 = vmatpush3.bf16.msra.mxu1 %v21020_v50  ;;  %v10238_v50 = vld [vmem:[#allocation27 + $0x1c8] sm:$0xff] }
0x2640   :  { %21025 = vmatprep.subr.bf16.mxu1 %v21024_v53 }
0x2643   :  { %21027 = vmatpush3.bf16.msra.mxu1 %v21024_v53  ;;  %v24138_v53 = vld [vmem:[#allocation25 + $0x8] sm:$0xf] }
0x2644   :  { %21092 = vmatprep.subr.bf16.mxu1 %v22810_v54 }
0x2646   :  { %19305 = vmatmul.mubr.msk.f32.vlgmr.msra.gmra.mrb[68].mxu1 %vm9036_vm5, %v24077_v43  ;;  %v9916_v43 = vld [vmem:[#allocation27 + $0x148] sm:$0xff] }
0x2647   :  { %19415 = vmatprep.mubr.msk.f32.mxu1 %vm22811_vm7, %v22812_v55  ;;  %v21033_v4 = vpack.c.bf16 %v9916_v43, %v9915_v63  ;;  %v24149_v43 = vld [vmem:[#allocation25 + $0x10] sm:$0xf] }
0x2719   :  { %v19306_v36 = vpop.f32.mrb[68].mxu1 }
0x271a   :  { %v21895_v57 = vadd.f32 %v19306_v36, %v16993_v56  ;;  %v9819_v13 = vpop.f32.mrb[69].mxu1  ;;  %v10239_v36 = vld [vmem:[#allocation27 + $0x1d0] sm:$0xff] }
0x271b   :  { %v21896_v29 = vadd.f32 %v16993_v56, %v9819_v13  ;;  %v21065_v56 = vpack.c.bf16 %v10238_v50, %v10237_v48  ;;  %v10558_v48 = vld [vmem:[#allocation27 + $0x268] sm:$0xff] }
0x271c   :  { %v9831_v22 = vmul.f32 0.01, %v21895_v57 }
0x271d   :  { %v9830_v27 = vmul.f32 0.01, %v21896_v29 }
0x271e   :  { %v9833_v42 = vmax.f32 %v21895_v57, %v9831_v22  ;;  %v10240_v57 = vld [vmem:[#allocation27 + $0x1d8] sm:$0xff]  ;;  %v10242_v22 = vld [vmem:[#allocation27 + $0x1e8] sm:$0xff] }
0x271f   :  { %v9832_v34 = vmax.f32 %v21896_v29, %v9830_v27  ;;  %v21068_v13 = vpack.c.bf16 %v10240_v57, %v10239_v36  ;;  %v10241_v29 = vld [vmem:[#allocation27 + $0x1e0] sm:$0xff] }
0x2720   :  { %v21071_v27 = vpack.c.bf16 %v10242_v22, %v10241_v29  ;;  %v17025_v36 = vld [vmem:[#allocation28 + $0x1] ss:$0 sm:$0xff] }
0x2721   :  { %v24096_v2 = vpack.c.bf16 %v9833_v42, %v9832_v34  ;;  %v10243_v42 = vld [vmem:[#allocation27 + $0x1f0] sm:$0xff]  ;;  %v10244_v34 = vld [vmem:[#allocation27 + $0x1f8] sm:$0xff] }
0x2722   :  { %v21074_v63 = vpack.c.bf16 %v10244_v34, %v10243_v42 }
0x2723   :  { %21031 = vmatpush3.bf16.msk.msra.mxu0 %vm24092_vm6, %v24096_v2  ;;  %21095 = vmatpush3.bf16.msk.msra.mxu1 %vm24092_vm6, %v24096_v2 }
0x2724   :  { %21032 = vmatprep.subr.bf16.mxu0 %v22810_v54 }
0x2726   :  { %19312 = vmatmul.mubr.msk.f32.vlgmr.msra.gmra.mrb[122].mxu0 %vm9837_vm8, %v24104_v41  ;;  %19416 = vmatmul.mubr.msk.f32.vlgmr.msra.gmra.mrb[70].mxu1 %vm9837_vm8, %v24149_v43 }
0x2727   :  { %21034 = vmatpush3.bf16.msra.mxu0 %v21033_v4  ;;  %19330 = vmatprep.mubr.msk.f32.mxu0 %vm22811_vm7, %v22812_v55  ;;  %v10395_v4 = vld [vmem:[#allocation27 + $0x200] sm:$0xff] }
0x2728   :  { %21035 = vmatprep.subr.bf16.mxu0 %v22810_v54  ;;  %19439 = vmatprep.mubr.msk.f32.mxu1 %vm1169_vm12, %v24004_v3  ;;  %v21081_v28 = vpack.c.bf16 %v10396_v32, %v10395_v4  ;;  %v10398_v3 = vld [vmem:[#allocation27 + $0x218] sm:$0xff] }
0x272b   :  { %21037 = vmatpush3.bf16.msra.mxu0 %v21036_v9 }
0x272c   :  { %21038 = vmatprep.subr.bf16.mxu0 %v22810_v54 }
0x272f   :  { %21040 = vmatpush3.bf16.msra.mxu0 %v21039_v37  ;;  %v10397_v37 = vld [vmem:[#allocation27 + $0x210] sm:$0xff] }
0x2730   :  { %21041 = vmatprep.subr.bf16.mxu0 %v22810_v54  ;;  %v21084_v58 = vpack.c.bf16 %v10398_v3, %v10397_v37  ;;  %v10732_v37 = vld [vmem:[#allocation27 + $0x290] sm:$0xff]  ;;  %v10733_v3 = vld [vmem:[#allocation27 + $0x298] sm:$0xff] }
0x2733   :  { %21043 = vmatpush3.bf16.msra.mxu0 %v21042_v10 }
0x2734   :  { %21044 = vmatprep.subr.bf16.mxu0 %v22810_v54 }
0x27f9   :  { %v9910_v23 = vpop.f32.mrb[122].mxu0 }
0x27fa   :  { %19331 = vmatmul.mubr.msk.f32.vlgmr.msra.gmra.mrb[124].mxu0 %vm9036_vm5, %v9910_v23  ;;  %v19313_v31 = vpop.f32.mrb[123].mxu0  ;;  %v21090_v23 = vpack.c.bf16 %v10402_v12, %v10401_v5 }
0x27fb   :  { %21047 = vmatpush3.bf16.msk.msra.mxu0 %vm24092_vm6, %v24096_v2  ;;  %19337 = vmatprep.mubr.msk.f32.mxu0 %vm22811_vm7, %v22812_v55  ;;  %v10548_v31 = vpop.f32.mrb[70].mxu1 }
0x27fc   :  { %21048 = vmatprep.subr.bf16.mxu0 %v22810_v54 }
0x27fe   :  { %19338 = vmatmul.mubr.msk.f32.vlgmr.msra.gmra.mrb[126].mxu0 %vm9837_vm8, %v24121_v33 }
0x27ff   :  { %21050 = vmatpush3.bf16.msra.mxu0 %v21049_v38  ;;  %19356 = vmatprep.mubr.msk.f32.mxu0 %vm22811_vm7, %v22812_v55  ;;  %v19417_v38 = vpop.f32.mrb[71].mxu1 }
0x2800   :  { %21051 = vmatprep.subr.bf16.mxu0 %v22810_v54  ;;  %v10908_v38 = vld [vmem:[#allocation27 + $0x2e8] sm:$0xff] }
0x2803   :  { %21053 = vmatpush3.bf16.msra.mxu0 %v21052_v45  ;;  %v21097_v45 = vpack.c.bf16 %v10554_v44, %v10553_v39  ;;  %v10909_v44 = vld [vmem:[#allocation27 + $0x2f0] sm:$0xff] }
0x2804   :  { %21054 = vmatprep.subr.bf16.mxu0 %v22810_v54 }
0x2807   :  { %21056 = vmatpush3.bf16.msra.mxu0 %v21055_v47 }
0x2808   :  { %21057 = vmatprep.subr.bf16.mxu0 %v22810_v54 }
0x280b   :  { %21059 = vmatpush3.bf16.msra.mxu0 %v21058_v15  ;;  %v10557_v15 = vld [vmem:[#allocation27 + $0x260] sm:$0xff] }
0x280c   :  { %21060 = vmatprep.subr.bf16.mxu0 %v22810_v54  ;;  %v21103_v50 = vpack.c.bf16 %v10558_v48, %v10557_v15 }
0x28d1   :  { %v10074_v51 = vpop.f32.mrb[126].mxu0 }
0x28d2   :  { %19357 = vmatmul.mubr.msk.f32.vlgmr.msra.gmra.mrb[124].mxu0 %vm9036_vm5, %v10074_v51  ;;  %v19339_v52 = vpop.f32.mrb[127].mxu0  ;;  %v10559_v51 = vld [vmem:[#allocation27 + $0x270] sm:$0xff] }
0x28d3   :  { %21063 = vmatpush3.bf16.msk.msra.mxu0 %vm24092_vm6, %v24096_v2  ;;  %19363 = vmatprep.mubr.msk.f32.mxu0 %vm22811_vm7, %v22812_v55  ;;  %v10560_v52 = vld [vmem:[#allocation27 + $0x278] sm:$0xff] }
0x28d4   :  { %21064 = vmatprep.subr.bf16.mxu0 %v22810_v54 }
0x28d6   :  { %19364 = vmatmul.mubr.msk.f32.vlgmr.msra.gmra.mrb[128].mxu0 %vm9837_vm8, %v24138_v53 }
0x28d7   :  { %21066 = vmatpush3.bf16.msra.mxu0 %v21065_v56  ;;  %19382 = vmatprep.mubr.msk.f32.mxu0 %vm22811_vm7, %v22812_v55  ;;  %v21106_v56 = vpack.c.bf16 %v10560_v52, %v10559_v51  ;;  %v11072_v51 = vld [vmem:[#allocation27 + $0x310] sm:$0xff]  ;;  %v11073_v52 = vld [vmem:[#allocation27 + $0x318] sm:$0xff] }
0x28d8   :  { %21067 = vmatprep.subr.bf16.mxu0 %v22810_v54 }
0x28db   :  { %21069 = vmatpush3.bf16.msra.mxu0 %v21068_v13 }
0x28dc   :  { %21070 = vmatprep.subr.bf16.mxu0 %v22810_v54 }
0x28df   :  { %21072 = vmatpush3.bf16.msra.mxu0 %v21071_v27 }
0x28e0   :  { %21073 = vmatprep.subr.bf16.mxu0 %v22810_v54 }
0x28e3   :  { %21075 = vmatpush3.bf16.msra.mxu0 %v21074_v63  ;;  %v10730_v63 = vld [vmem:[#allocation27 + $0x280] sm:$0xff] }
0x28e4   :  { %21076 = vmatprep.subr.bf16.mxu0 %v22810_v54 }
0x29a9   :  { %v10232_v8 = vpop.f32.mrb[128].mxu0 }
0x29aa   :  { %19383 = vmatmul.mubr.msk.f32.vlgmr.msra.gmra.mrb[124].mxu0 %vm9036_vm5, %v10232_v8  ;;  %v19365_v9 = vpop.f32.mrb[129].mxu0 }
0x29ab   :  { %21079 = vmatpush3.bf16.msk.msra.mxu0 %vm24092_vm6, %v24096_v2  ;;  %19389 = vmatprep.mubr.msk.f32.mxu0 %vm22811_vm7, %v22812_v55  ;;  %v10399_v2 = vld [vmem:[#allocation27 + $0x220] sm:$0xff] }
0x29ac   :  { %21080 = vmatprep.subr.bf16.mxu0 %v22810_v54  ;;  %v21087_v10 = vpack.c.bf16 %v10400_v17, %v10399_v2  ;;  %v10737_v17 = vld [vmem:[#allocation27 + $0x2b8] sm:$0xff] }
0x29ae   :  { %19390 = vmatmul.mubr.msk.f32.vlgmr.msra.gmra.mrb[130].mxu0 %vm9837_vm8, %v24161_v11 }
0x29af   :  { %21082 = vmatpush3.bf16.msra.mxu0 %v21081_v28  ;;  %19408 = vmatprep.mubr.msk.f32.mxu0 %vm22811_vm7, %v22812_v55 }
0x29b0   :  { %21083 = vmatprep.subr.bf16.mxu0 %v22810_v54 }
0x29b3   :  { %21085 = vmatpush3.bf16.msra.mxu0 %v21084_v58  ;;  %v10735_v58 = vld [vmem:[#allocation27 + $0x2a8] sm:$0xff] }
0x29b4   :  { %21086 = vmatprep.subr.bf16.mxu0 %v22810_v54 }
0x29b7   :  { %21088 = vmatpush3.bf16.msra.mxu0 %v21087_v10 }
0x29b8   :  { %21089 = vmatprep.subr.bf16.mxu0 %v22810_v54 }
0x29bb   :  { %21091 = vmatpush3.bf16.msra.mxu0 %v21090_v23  ;;  %v10906_v23 = vld [vmem:[#allocation27 + $0x2d8] sm:$0xff] }
0x29bc   :  { %21096 = vmatprep.subr.bf16.mxu0 %v22810_v54 }
0x2a81   :  { %v10390_v47 = vpop.f32.mrb[130].mxu0 }
0x2a82   :  { %19409 = vmatmul.mubr.msk.f32.vlgmr.msra.gmra.mrb[124].mxu0 %vm9036_vm5, %v10390_v47  ;;  %v19391_v6 = vpop.f32.mrb[131].mxu0 }
0x2a83   :  { %21098 = vmatpush3.bf16.msra.mxu0 %v21097_v45  ;;  %19434 = vmatprep.mubr.msk.f32.mxu0 %vm22811_vm7, %v22812_v55  ;;  %v10910_v45 = vld [vmem:[#allocation27 + $0x2f8] sm:$0xff] }
0x2a84   :  { %21099 = vmatprep.subr.bf16.mxu0 %v22810_v54  ;;  %v21136_v46 = vpack.c.bf16 %v10910_v45, %v10909_v44 }
0x2a87   :  { %21101 = vmatpush3.bf16.msra.mxu0 %v21100_v61 }
0x2a88   :  { %21102 = vmatprep.subr.bf16.mxu0 %v22810_v54 }
0x2a8b   :  { %21104 = vmatpush3.bf16.msra.mxu0 %v21103_v50 }
0x2a8c   :  { %21105 = vmatprep.subr.bf16.mxu0 %v22810_v54 }
0x2a8f   :  { %21107 = vmatpush3.bf16.msra.mxu0 %v21106_v56 }
0x2a92   :  { %19435 = vmatmul.mubr.msk.f32.vlgmr.msra.gmra.mrb[124].mxu0 %vm9036_vm5, %v10548_v31  ;;  %v10907_v31 = vld [vmem:[#allocation27 + $0x2e0] sm:$0xff] }
0x2a93   :  { %19487 = vmatprep.mubr.msk.f32.mxu0 %vm1169_vm12, %v24030_v16  ;;  %v10731_v16 = vld [vmem:[#allocation27 + $0x288] sm:$0xff]  ;;  %v21132_v39 = vpack.c.bf16 %v10908_v38, %v10907_v31  ;;  %v11411_v31 = vld [vmem:[#allocation27 + $0x3b8] sm:$0xff] }
0x2a94   :  { %v21108_v9 = vpack.c.bf16 %v10731_v16, %v10730_v63  ;;  %v11237_v16 = vld [vmem:[#allocation27 + $0x340] sm:$0xff] }
0x2b65   :  { %v10630_v57 = vpop.f32.mrb[124].mxu0 }
0x2b66   :  { %v21897_v13 = vadd.f32 %v17025_v36, %v10630_v57  ;;  %v19436_v29 = vpop.f32.mrb[125].mxu0  ;;  %v21144_v57 = vpack.c.bf16 %v11073_v52, %v11072_v51  ;;  %v11577_v51 = vld [vmem:[#allocation27 + $0x3d0] sm:$0xff]  ;;  %v11578_v52 = vld [vmem:[#allocation27 + $0x3d8] sm:$0xff] }
0x2b67   :  { %v11075_v29 = vld [vmem:[#allocation27 + $0x328] sm:$0xff] }
0x2b68   :  { %22212 = vtanh.f32 %v21897_v13  ;;  %v11074_v13 = vld [vmem:[#allocation27 + $0x320] sm:$0xff] }
0x2b72   :  { %v22213_v22 = vpop.eup %22212 }
0x2b73   :  { %v10636_v27 = vmul.f32 1.442695, %v22213_v22  ;;  %v21148_v22 = vpack.c.bf16 %v11075_v29, %v11074_v13  ;;  %v11582_v13 = vld [vmem:[#allocation27 + $0x3f8] sm:$0xff] }
0x2b75   :  { %22214 = vpow2.f32 %v10636_v27  ;;  %v11076_v27 = vld [vmem:[#allocation27 + $0x330] sm:$0xff] }
0x2b7f   :  { %v22215_v42 = vpop.eup %22214 }
0x2b80   :  { %10640 = vrot.lane.b32.xlu0 %v22215_v42, %s22817_s23  ;;  %v24183_v34 = vmul.f32 %v22215_v42, %v24013_v7  ;;  %v21112_v7 = vpack.c.bf16 %v10733_v3, %v10732_v37  ;;  %v11077_v42 = vld [vmem:[#allocation27 + $0x338] sm:$0xff]  ;;  %v11241_v3 = vld [vmem:[#allocation27 + $0x360] sm:$0xff] }
0x2b81   :  { %v21152_v63 = vpack.c.bf16 %v11077_v42, %v11076_v27  ;;  %v11735_v27 = vld [vmem:[#allocation27 + $0x408] sm:$0xff] }
0x2b82   :  { %10645 = vrot.lane.b32.xlu1 %v24183_v34, %s22797_s10 }
0x2bf2   :  { %v10641_v4 = vpop.permute.xlu0 %10640 }
0x2bf3   :  { %v24188_v32 = vmul.f32 %v10641_v4, %v24017_v30  ;;  %v10734_v30 = vld [vmem:[#allocation27 + $0x2a0] sm:$0xff]  ;;  %v11238_v4 = vld [vmem:[#allocation27 + $0x348] sm:$0xff] }
0x2bf4   :  { %v10646_v8 = vpop.permute.xlu1 %10645  ;;  %v21116_v2 = vpack.c.bf16 %v10735_v58, %v10734_v30  ;;  %v11243_v58 = vld [vmem:[#allocation27 + $0x370] sm:$0xff] }
0x2bf5   :  { %v10648_v28 = vsel %vm1641_vm15, %v24188_v32, %v10646_v8  ;;  %v21156_v8 = vpack.c.bf16 %v11238_v4, %v11237_v16  ;;  %v11736_v16 = vld [vmem:[#allocation27 + $0x410] sm:$0xff]  ;;  %v11737_v4 = vld [vmem:[#allocation27 + $0x418] sm:$0xff] }
0x2bf6   :  { %19437 = vmatprep.subr.msk.mxu1 %vm1176_vm14, %v10648_v28  ;;  %19485 = vmatprep.subr.msk.mxu0 %vm1176_vm14, %v10648_v28 }
0x2bf7   :  { %19438 = vmatpush3.msk.msra.mxu1 %vm1176_vm14, %v10648_v28  ;;  %19486 = vmatpush3.msk.msra.mxu0 %vm1176_vm14, %v10648_v28 }
0x2bf8   :  { %19440 = vmatmul.mubr.msk.f32.vlgmr.msra.gmra.mrb[72].mxu1 %vm1169_vm12, %v24020_v49  ;;  %21109 = vmatprep.subr.bf16.mxu1 %v21108_v9  ;;  %v10736_v49 = vld [vmem:[#allocation27 + $0x2b0] sm:$0xff] }
0x2bf9   :  { %19488 = vmatmul.mubr.msk.f32.vlgmr.msra.gmra.mrb[132].mxu0 %vm1169_vm12, %v24042_v62  ;;  %19509 = vmatprep.subr.msk.mxu0 %vm1176_vm14, %v10648_v28  ;;  %v21120_v62 = vpack.c.bf16 %v10737_v17, %v10736_v49  ;;  %v11404_v17 = vld [vmem:[#allocation27 + $0x380] sm:$0xff] }
0x2bfa   :  { %21111 = vmatpush3.bf16.msra.mxu1 %v21108_v9  ;;  %19510 = vmatpush3.msk.msra.mxu0 %vm1176_vm14, %v10648_v28  ;;  %v11239_v9 = vld [vmem:[#allocation27 + $0x350] sm:$0xff] }
0x2bfb   :  { %19533 = vmatprep.subr.msk.mxu0 %vm1176_vm14, %v10648_v28  ;;  %19511 = vmatprep.mubr.msk.f32.mxu0 %vm1169_vm12, %v24046_v18  ;;  %v10903_v18 = vld [vmem:[#allocation27 + $0x2c0] sm:$0xff] }
0x2bfc   :  { %21113 = vmatprep.subr.bf16.mxu1 %v21112_v7 }
0x2bfd   :  { %19512 = vmatmul.mubr.msk.f32.vlgmr.msra.gmra.mrb[134].mxu0 %vm1169_vm12, %v24055_v14  ;;  %v10904_v14 = vld [vmem:[#allocation27 + $0x2c8] sm:$0xff] }
0x2bfe   :  { %19534 = vmatpush3.msk.msra.mxu0 %vm1176_vm14, %v10648_v28  ;;  %21115 = vmatpush3.bf16.msra.mxu1 %v21112_v7  ;;  %v21124_v12 = vpack.c.bf16 %v10904_v14, %v10903_v18  ;;  %v11242_v7 = vld [vmem:[#allocation27 + $0x368] sm:$0xff]  ;;  %v11406_v14 = vld [vmem:[#allocation27 + $0x390] sm:$0xff] }
0x2bff   :  { %21117 = vmatprep.subr.bf16.mxu1 %v21116_v2  ;;  %19535 = vmatprep.mubr.msk.f32.mxu0 %vm1169_vm12, %v24059_v35  ;;  %v10905_v35 = vld [vmem:[#allocation27 + $0x2d0] sm:$0xff]  ;;  %v21164_v30 = vpack.c.bf16 %v11242_v7, %v11241_v3  ;;  %v11741_v7 = vld [vmem:[#allocation27 + $0x438] sm:$0xff] }
0x2c00   :  { %21188 = vmatprep.subr.bf16.mxu0 %v22810_v54  ;;  %v11740_v3 = vld [vmem:[#allocation27 + $0x430] sm:$0xff] }
0x2c01   :  { %19536 = vmatmul.mubr.msk.f32.vlgmr.msra.gmra.mrb[136].mxu0 %vm1169_vm12, %v24067_v1  ;;  %v21128_v1 = vpack.c.bf16 %v10906_v23, %v10905_v35  ;;  %v11409_v35 = vld [vmem:[#allocation27 + $0x3a8] sm:$0xff] }
0x2c02   :  { %21119 = vmatpush3.bf16.msra.mxu1 %v21116_v2  ;;  %19561 = vmatprep.mubr.msk.f32.mxu0 %vm22811_vm7, %v22812_v55  ;;  %v11244_v2 = vld [vmem:[#allocation27 + $0x378] sm:$0xff] }
0x2c03   :  { %21121 = vmatprep.subr.bf16.mxu1 %v21120_v62  ;;  %v21168_v49 = vpack.c.bf16 %v11244_v2, %v11243_v58  ;;  %v11888_v58 = vld [vmem:[#allocation27 + $0x448] sm:$0xff] }
0x2c06   :  { %21123 = vmatpush3.bf16.msra.mxu1 %v21120_v62  ;;  %v11405_v62 = vld [vmem:[#allocation27 + $0x388] sm:$0xff] }
0x2c07   :  { %19461 = vmatprep.subr.msk.mxu1 %vm1176_vm14, %v10648_v28  ;;  %v21172_v18 = vpack.c.bf16 %v11405_v62, %v11404_v17  ;;  %v11889_v62 = vld [vmem:[#allocation27 + $0x450] sm:$0xff] }
0x2ccb   :  { %v19441_v10 = vpop.f32.mrb[72].mxu1 }
0x2ccc   :  { %v10720_v5 = vpop.f32.mrb[73].mxu1  ;;  %v19489_v6 = vpop.f32.mrb[132].mxu0 }
0x2ccd   :  { %19458 = vmatprep.mubr.msk.f32.mxu1 %vm9036_vm5, %v10720_v5  ;;  %v11060_v61 = vpop.f32.mrb[133].mxu0 }
0x2cce   :  { %19459 = vmatmul.mubr.msk.f32.vlgmr.msra.gmra.mrb[74].mxu1 %vm9036_vm5, %v19441_v10  ;;  %v11407_v10 = vld [vmem:[#allocation27 + $0x398] sm:$0xff] }
0x2ccf   :  { %19462 = vmatpush3.msk.msra.mxu1 %vm1176_vm14, %v10648_v28  ;;  %19463 = vmatprep.mubr.msk.f32.mxu1 %vm1169_vm12, %v24007_v0  ;;  %v11071_v0 = vld [vmem:[#allocation27 + $0x308] sm:$0xff]  ;;  %v11240_v28 = vld [vmem:[#allocation27 + $0x358] sm:$0xff]  ;;  %v21176_v5 = vpack.c.bf16 %v11407_v10, %v11406_v14 }
0x2cd0   :  { %21125 = vmatprep.subr.bf16.mxu1 %v21124_v12  ;;  %v21140_v47 = vpack.c.bf16 %v11071_v0, %v11070_v40  ;;  %v19513_v15 = vpop.f32.mrb[134].mxu0  ;;  %v21160_v37 = vpack.c.bf16 %v11240_v28, %v11239_v9  ;;  %v11738_v9 = vld [vmem:[#allocation27 + $0x420] sm:$0xff]  ;;  %v11739_v28 = vld [vmem:[#allocation27 + $0x428] sm:$0xff] }
0x2cd1   :  { %v11227_v48 = vpop.f32.mrb[135].mxu0  ;;  %v11892_v10 = vld [vmem:[#allocation27 + $0x468] sm:$0xff] }
0x2cd2   :  { %19464 = vmatmul.mubr.msk.f32.vlgmr.msra.gmra.mrb[76].mxu1 %vm1169_vm12, %v24025_v24 }
0x2cd3   :  { %21127 = vmatpush3.bf16.msra.mxu1 %v21124_v12  ;;  %v11408_v12 = vld [vmem:[#allocation27 + $0x3a0] sm:$0xff] }
0x2cd4   :  { %21129 = vmatprep.subr.bf16.mxu1 %v21128_v1  ;;  %v24223_v24 = vpop.f32.mrb[136].mxu0  ;;  %v21180_v23 = vpack.c.bf16 %v11409_v35, %v11408_v12  ;;  %v11893_v12 = vld [vmem:[#allocation27 + $0x470] sm:$0xff]  ;;  %v11894_v35 = vld [vmem:[#allocation27 + $0x478] sm:$0xff] }
0x2cd5   :  { %v11394_v50 = vpop.f32.mrb[137].mxu0 }
0x2cd7   :  { %21131 = vmatpush3.bf16.msra.mxu1 %v21128_v1  ;;  %v11410_v1 = vld [vmem:[#allocation27 + $0x3b0] sm:$0xff] }
0x2cd8   :  { %21133 = vmatprep.subr.bf16.mxu1 %v21132_v39  ;;  %v21184_v38 = vpack.c.bf16 %v11411_v31, %v11410_v1 }
0x2cdb   :  { %21135 = vmatpush3.bf16.msra.mxu1 %v21132_v39  ;;  %v17043_v39 = vld [vmem:[#allocation28 + $0x2] ss:$0 sm:$0xff] }
0x2cdc   :  { %21137 = vmatprep.subr.bf16.mxu1 %v21136_v46 }
0x2cdf   :  { %21139 = vmatpush3.bf16.msra.mxu1 %v21136_v46 }
0x2ce0   :  { %21141 = vmatprep.subr.bf16.mxu1 %v21140_v47 }
0x2da5   :  { %v19465_v56 = vpop.f32.mrb[76].mxu1 }
0x2da6   :  { %v10893_v36 = vpop.f32.mrb[77].mxu1 }
0x2da7   :  { %19482 = vmatprep.mubr.msk.f32.mxu1 %vm9036_vm5, %v10893_v36  ;;  %v11579_v36 = vld [vmem:[#allocation27 + $0x3e0] sm:$0xff] }
0x2da8   :  { %19483 = vmatmul.mubr.msk.f32.vlgmr.msra.gmra.mrb[74].mxu1 %vm9036_vm5, %v19465_v56  ;;  %v21196_v56 = vpack.c.bf16 %v11578_v52, %v11577_v51  ;;  %v12193_v52 = vld [vmem:[#allocation27 + $0x4c0] sm:$0xff] }
0x2da9   :  { %21143 = vmatpush3.bf16.msra.mxu1 %v21140_v47  ;;  %19506 = vmatprep.mubr.msk.f32.mxu1 %vm9036_vm5, %v11060_v61 }
0x2daa   :  { %21145 = vmatprep.subr.bf16.mxu1 %v21144_v57 }
0x2dad   :  { %21147 = vmatpush3.bf16.msra.mxu1 %v21144_v57  ;;  %v11580_v57 = vld [vmem:[#allocation27 + $0x3e8] sm:$0xff] }
0x2dae   :  { %21149 = vmatprep.subr.bf16.mxu1 %v21148_v22 }
0x2db1   :  { %21151 = vmatpush3.bf16.msra.mxu1 %v21148_v22  ;;  %v11734_v22 = vld [vmem:[#allocation27 + $0x400] sm:$0xff] }
0x2db2   :  { %21153 = vmatprep.subr.bf16.mxu1 %v21152_v63 }
0x2db5   :  { %21155 = vmatpush3.bf16.msra.mxu1 %v21152_v63  ;;  %v21209_v63 = vpack.c.bf16 %v11735_v27, %v11734_v22  ;;  %v12199_v27 = vld [vmem:[#allocation27 + $0x4f0] sm:$0xff] }
0x2db6   :  { %21157 = vmatprep.subr.bf16.mxu1 %v21156_v8 }
0x2db8   :  { %19507 = vmatmul.mubr.msk.f32.vlgmr.msra.gmra.mrb[74].mxu1 %vm9036_vm5, %v19489_v6 }
0x2db9   :  { %21159 = vmatpush3.bf16.msra.mxu1 %v21156_v8  ;;  %19530 = vmatprep.mubr.msk.f32.mxu1 %vm9036_vm5, %v11227_v48  ;;  %v11576_v48 = vld [vmem:[#allocation27 + $0x3c8] sm:$0xff]  ;;  %v21212_v8 = vpack.c.bf16 %v11737_v4, %v11736_v16 }
0x2dba   :  { %21161 = vmatprep.subr.bf16.mxu1 %v21160_v37 }
0x2dbd   :  { %21163 = vmatpush3.bf16.msra.mxu1 %v21160_v37  ;;  %v21215_v37 = vpack.c.bf16 %v11739_v28, %v11738_v9 }
0x2dbe   :  { %21165 = vmatprep.subr.bf16.mxu1 %v21164_v30 }
0x2dc1   :  { %21167 = vmatpush3.bf16.msra.mxu1 %v21164_v30  ;;  %v21218_v30 = vpack.c.bf16 %v11741_v7, %v11740_v3 }
0x2dc2   :  { %21169 = vmatprep.subr.bf16.mxu1 %v21168_v49 }
0x2dc5   :  { %21171 = vmatpush3.bf16.msra.mxu1 %v21168_v49 }
0x2dc6   :  { %21173 = vmatprep.subr.bf16.mxu1 %v21172_v18 }
0x2dc8   :  { %19531 = vmatmul.mubr.msk.f32.vlgmr.msra.gmra.mrb[74].mxu1 %vm9036_vm5, %v19513_v15  ;;  %v11575_v15 = vld [vmem:[#allocation27 + $0x3c0] sm:$0xff] }
0x2dc9   :  { %21175 = vmatpush3.bf16.msra.mxu1 %v21172_v18  ;;  %19554 = vmatprep.mubr.msk.f32.mxu1 %vm9036_vm5, %v11394_v50  ;;  %v11890_v18 = vld [vmem:[#allocation27 + $0x458] sm:$0xff] }
0x2dca   :  { %21177 = vmatprep.subr.bf16.mxu1 %v21176_v5  ;;  %v21228_v14 = vpack.c.bf16 %v11890_v18, %v11889_v62  ;;  %v12531_v18 = vld [vmem:[#allocation33] sm:$0xff] }
0x2dcd   :  { %21179 = vmatpush3.bf16.msra.mxu1 %v21176_v5  ;;  %v21231_v5 = vpack.c.bf16 %v11892_v10, %v11891_v60  ;;  %v12446_v10 = vld [vmem:[%s24782_s25 + $0x8] sm:$0x3] }
0x2dce   :  { %21181 = vmatprep.subr.bf16.mxu1 %v21180_v23 }
0x2dd1   :  { %21183 = vmatpush3.bf16.msra.mxu1 %v21180_v23  ;;  %v21234_v23 = vpack.c.bf16 %v11894_v35, %v11893_v12  ;;  %v17089_v12 = vld [vmem:[%s24782_s25 + $0x18] sm:$0x3]  ;;  %v12533_v35 = vld [vmem:[#allocation33 + $0x10] sm:$0xff] }
0x2dd2   :  { %21185 = vmatprep.subr.bf16.mxu1 %v21184_v38 }
0x2dd5   :  { %21187 = vmatpush3.bf16.msra.mxu1 %v21184_v38 }
0x2dd6   :  { %21236 = vmatprep.subr.bf16.mxu1 %v22810_v54 }
0x2dd8   :  { %19555 = vmatmul.mubr.msk.f32.vlgmr.msra.gmra.mrb[74].mxu1 %vm9036_vm5, %v24223_v24  ;;  %v21193_v24 = vpack.c.bf16 %v11576_v48, %v11575_v15  ;;  %v12045_v15 = vld [vmem:[#allocation27 + $0x4a8] sm:$0xff] }
0x2dd9   :  { %19639 = vmatprep.mubr.msk.f32.mxu1 %vm22811_vm7, %v22812_v55 }
0x2eab   :  { %v19556_v44 = vpop.f32.mrb[74].mxu1 }
0x2eac   :  { %v21898_v45 = vadd.f32 %v19556_v44, %v17043_v39  ;;  %v11484_v46 = vpop.f32.mrb[75].mxu1  ;;  %v12041_v44 = vld [vmem:[#allocation27 + $0x488] sm:$0xff] }
0x2ead   :  { %v21899_v40 = vadd.f32 %v17043_v39, %v11484_v46  ;;  %v12040_v39 = vld [vmem:[#allocation27 + $0x480] sm:$0xff]  ;;  %v12042_v46 = vld [vmem:[#allocation27 + $0x490] sm:$0xff] }
0x2eae   :  { %v11496_v0 = vmul.f32 0.01, %v21898_v45 }
0x2eaf   :  { %v11495_v47 = vmul.f32 0.01, %v21899_v40 }
0x2eb0   :  { %v11498_v6 = vmax.f32 %v21898_v45, %v11496_v0  ;;  %v21241_v45 = vpack.c.bf16 %v12041_v44, %v12040_v39  ;;  %v12535_v39 = vld [vmem:[#allocation33 + $0x20] sm:$0xff]  ;;  %v12536_v44 = vld [vmem:[#allocation33 + $0x28] sm:$0xff] }
0x2eb1   :  { %v11497_v61 = vmax.f32 %v21899_v40, %v11495_v47  ;;  %v12043_v40 = vld [vmem:[#allocation27 + $0x498] sm:$0xff] }
0x2eb3   :  { %v24237_v50 = vpack.c.bf16 %v11498_v6, %v11497_v61  ;;  %v21244_v6 = vpack.c.bf16 %v12043_v40, %v12042_v46  ;;  %v12044_v61 = vld [vmem:[#allocation27 + $0x4a0] sm:$0xff]  ;;  %v21276_v46 = vpack.c.bf16 %v12536_v44, %v12535_v39  ;;  %v17099_v40 = vld [vmem:[%s24782_s25 + $0x38] sm:$0x3] }
0x2eb4   :  { %v21247_v48 = vpack.c.bf16 %v12045_v15, %v12044_v61  ;;  %v17104_v15 = vld [vmem:[%s24782_s25 + $0x48] sm:$0x3] }
0x2eb5   :  { %21191 = vmatpush3.bf16.msk.msra.mxu0 %vm24092_vm6, %v24237_v50  ;;  %21239 = vmatpush3.bf16.msk.msra.mxu1 %vm24092_vm6, %v24237_v50  ;;  %v12729_v44 = vld [vmem:[#allocation33 + $0xf0] sm:$0xff] }
0x2eb6   :  { %21252 = vmatprep.subr.bf16.mxu1 %v22810_v54  ;;  %21192 = vmatprep.subr.bf16.mxu0 %v22810_v54 }
0x2eb8   :  { %19562 = vmatmul.mubr.msk.f32.vlgmr.msra.gmra.mrb[138].mxu0 %vm9837_vm8, %v24104_v41  ;;  %19640 = vmatmul.mubr.msk.f32.vlgmr.msra.gmra.mrb[78].mxu1 %vm9837_vm8, %v24161_v11  ;;  %v21199_v41 = vpack.c.bf16 %v11580_v57, %v11579_v36  ;;  %v11581_v11 = vld [vmem:[#allocation27 + $0x3f0] sm:$0xff] }
0x2eb9   :  { %21255 = vmatpush3.bf16.msk.msra.mxu1 %vm24092_vm6, %v24237_v50  ;;  %21194 = vmatpush3.bf16.msra.mxu0 %v21193_v24  ;;  %v21202_v29 = vpack.c.bf16 %v11582_v13, %v11581_v11  ;;  %v12047_v24 = vld [vmem:[#allocation27 + $0x4b8] sm:$0xff]  ;;  %v12195_v57 = vld [vmem:[#allocation27 + $0x4d0] sm:$0xff]  ;;  %v12197_v13 = vld [vmem:[#allocation27 + $0x4e0] sm:$0xff] }
0x2eba   :  { %21195 = vmatprep.subr.bf16.mxu0 %v22810_v54  ;;  %19580 = vmatprep.mubr.msk.f32.mxu0 %vm22811_vm7, %v22812_v55 }
0x2ebb   :  { %19665 = vmatprep.mubr.msk.f32.mxu1 %vm22811_vm7, %v22812_v55  ;;  %19687 = vmatprep.subr.mxu1 %v22812_v55 }
0x2ebc   :  { %19666 = vmatmul.mubr.msk.f32.vlgmr.msra.gmra.mrb[80].mxu1 %vm9837_vm8, %v24149_v43 }
0x2ebd   :  { %21197 = vmatpush3.bf16.msra.mxu0 %v21196_v56  ;;  %19689 = vmatprep.mubr.msk.f32.mxu1 %vm22811_vm7, %v22812_v55  ;;  %v12194_v56 = vld [vmem:[#allocation27 + $0x4c8] sm:$0xff] }
0x2ebe   :  { %21198 = vmatprep.subr.bf16.mxu0 %v22810_v54  ;;  %v21257_v36 = vpack.c.bf16 %v12194_v56, %v12193_v52  ;;  %v12542_v52 = vld [vmem:[#allocation33 + $0x58] sm:$0xff] }
0x2ec1   :  { %21200 = vmatpush3.bf16.msra.mxu0 %v21199_v41  ;;  %v12196_v41 = vld [vmem:[#allocation27 + $0x4d8] sm:$0xff] }
0x2ec2   :  { %21201 = vmatprep.subr.bf16.mxu0 %v22810_v54  ;;  %v21260_v11 = vpack.c.bf16 %v12196_v41, %v12195_v57  ;;  %v12544_v57 = vld [vmem:[#allocation33 + $0x68] sm:$0xff] }
0x2ec5   :  { %21203 = vmatpush3.bf16.msra.mxu0 %v21202_v29  ;;  %v12198_v29 = vld [vmem:[#allocation27 + $0x4e8] sm:$0xff] }
0x2ec6   :  { %21204 = vmatprep.subr.bf16.mxu0 %v22810_v54  ;;  %v21263_v22 = vpack.c.bf16 %v12198_v29, %v12197_v13  ;;  %v12546_v13 = vld [vmem:[#allocation33 + $0x78] sm:$0xff] }
0x2f8b   :  { %v11570_v42 = vpop.f32.mrb[138].mxu0 }
0x2f8c   :  { %19581 = vmatmul.mubr.msk.f32.vlgmr.msra.gmra.mrb[140].mxu0 %vm9036_vm5, %v11570_v42  ;;  %v19563_v43 = vpop.f32.mrb[139].mxu0  ;;  %v12200_v42 = vld [vmem:[#allocation27 + $0x4f8] sm:$0xff] }
0x2f8d   :  { %21207 = vmatpush3.bf16.msk.msra.mxu0 %vm24092_vm6, %v24237_v50  ;;  %19587 = vmatprep.mubr.msk.f32.mxu0 %vm22811_vm7, %v22812_v55  ;;  %v21266_v43 = vpack.c.bf16 %v12200_v42, %v12199_v27  ;;  %v12716_v27 = vld [vmem:[#allocation33 + $0x88] sm:$0xff] }
0x2f8e   :  { %21208 = vmatprep.subr.bf16.mxu0 %v22810_v54 }
0x2f90   :  { %19588 = vmatmul.mubr.msk.f32.vlgmr.msra.gmra.mrb[142].mxu0 %vm9837_vm8, %v24121_v33  ;;  %v11887_v33 = vld [vmem:[#allocation27 + $0x440] sm:$0xff] }
0x2f91   :  { %21210 = vmatpush3.bf16.msra.mxu0 %v21209_v63  ;;  %19606 = vmatprep.mubr.msk.f32.mxu0 %vm22811_vm7, %v22812_v55  ;;  %v21225_v17 = vpack.c.bf16 %v11888_v58, %v11887_v33  ;;  %v17067_v63 = vld [vmem:[#allocation28 + $0x3] ss:$0 sm:$0xff]  ;;  %v17088_v58 = vld [vmem:[%s24782_s25 + $0x10] sm:$0xff] }
0x2f92   :  { %21211 = vmatprep.subr.bf16.mxu0 %v22810_v54 }
0x2f95   :  { %21213 = vmatpush3.bf16.msra.mxu0 %v21212_v8 }
0x2f96   :  { %21214 = vmatprep.subr.bf16.mxu0 %v22810_v54 }
0x2f99   :  { %21216 = vmatpush3.bf16.msra.mxu0 %v21215_v37 }
0x2f9a   :  { %21217 = vmatprep.subr.bf16.mxu0 %v22810_v54 }
0x2f9d   :  { %21219 = vmatpush3.bf16.msra.mxu0 %v21218_v30  ;;  %v12287_v30 = vld [vmem:[#allocation30] sm:$0x3] }
0x2f9e   :  { %21220 = vmatprep.subr.bf16.mxu0 %v22810_v54 }
0x3063   :  { %v11729_v2 = vpop.f32.mrb[142].mxu0 }
0x3064   :  { %19607 = vmatmul.mubr.msk.f32.vlgmr.msra.gmra.mrb[140].mxu0 %vm9036_vm5, %v11729_v2  ;;  %v19589_v49 = vpop.f32.mrb[143].mxu0 }
0x3065   :  { %21223 = vmatpush3.bf16.msk.msra.mxu0 %vm24092_vm6, %v24237_v50  ;;  %19613 = vmatprep.mubr.msk.f32.mxu0 %vm22811_vm7, %v22812_v55  ;;  %v12046_v50 = vld [vmem:[#allocation27 + $0x4b0] sm:$0xff] }
0x3066   :  { %21224 = vmatprep.subr.bf16.mxu0 %v22810_v54  ;;  %v21250_v51 = vpack.c.bf16 %v12047_v24, %v12046_v50  ;;  %v12540_v50 = vld [vmem:[#allocation33 + $0x48] sm:$0xff] }
0x3068   :  { %19614 = vmatmul.mubr.msk.f32.vlgmr.msra.gmra.mrb[144].mxu0 %vm9837_vm8, %v24138_v53  ;;  %v12035_v53 = vpop.f32.mrb[78].mxu1 }
0x3069   :  { %21226 = vmatpush3.bf16.msra.mxu0 %v21225_v17  ;;  %19632 = vmatprep.mubr.msk.f32.mxu0 %vm22811_vm7, %v22812_v55  ;;  %v19641_v1 = vpop.f32.mrb[79].mxu1 }
0x306a   :  { %21227 = vmatprep.subr.bf16.mxu0 %v22810_v54  ;;  %v12188_v31 = vpop.f32.mrb[80].mxu1 }
0x306b   :  { %v19667_v38 = vpop.f32.mrb[81].mxu1 }
0x306c   :  { %v17094_v38 = vld [vmem:[%s24782_s25 + $0x28] sm:$0x3] }
0x306d   :  { %21229 = vmatpush3.bf16.msra.mxu0 %v21228_v14  ;;  %v12532_v14 = vld [vmem:[#allocation33 + $0x8] sm:$0xff] }
0x306e   :  { %21230 = vmatprep.subr.bf16.mxu0 %v22810_v54  ;;  %v21268_v1 = vpack.c.bf16 %v12532_v14, %v12531_v18  ;;  %v12723_v14 = vld [vmem:[#allocation33 + $0xc0] sm:$0xff] }
0x3071   :  { %21232 = vmatpush3.bf16.msra.mxu0 %v21231_v5 }
0x3072   :  { %21233 = vmatprep.subr.bf16.mxu0 %v22810_v54 }
0x3075   :  { %21235 = vmatpush3.bf16.msra.mxu0 %v21234_v23  ;;  %v12534_v23 = vld [vmem:[#allocation33 + $0x18] sm:$0xff] }
0x3076   :  { %21240 = vmatprep.subr.bf16.mxu0 %v22810_v54 }
0x313b   :  { %v11882_v0 = vpop.f32.mrb[144].mxu0 }
0x313c   :  { %19633 = vmatmul.mubr.msk.f32.vlgmr.msra.gmra.mrb[140].mxu0 %vm9036_vm5, %v11882_v0  ;;  %v19615_v47 = vpop.f32.mrb[145].mxu0  ;;  %v12537_v0 = vld [vmem:[#allocation33 + $0x30] sm:$0xff] }
0x313d   :  { %21242 = vmatpush3.bf16.msra.mxu0 %v21241_v45  ;;  %19658 = vmatprep.mubr.msk.f32.mxu0 %vm22811_vm7, %v22812_v55  ;;  %v17098_v45 = vld [vmem:[%s24782_s25 + $0x30] sm:$0xff] }
0x313e   :  { %21243 = vmatprep.subr.bf16.mxu0 %v22810_v54  ;;  %v12538_v47 = vld [vmem:[#allocation33 + $0x38] sm:$0xff] }
0x313f   :  { %v21280_v61 = vpack.c.bf16 %v12538_v47, %v12537_v0  ;;  %v12894_v0 = vld [vmem:[#allocation33 + $0x108] sm:$0xff] }
0x3141   :  { %21245 = vmatpush3.bf16.msra.mxu0 %v21244_v6  ;;  %v17103_v6 = vld [vmem:[%s24782_s25 + $0x40] sm:$0xff] }
0x3142   :  { %21246 = vmatprep.subr.bf16.mxu0 %v22810_v54 }
0x3145   :  { %21248 = vmatpush3.bf16.msra.mxu0 %v21247_v48  ;;  %v12539_v48 = vld [vmem:[#allocation33 + $0x40] sm:$0xff] }
0x3146   :  { %21249 = vmatprep.subr.bf16.mxu0 %v22810_v54  ;;  %v21284_v24 = vpack.c.bf16 %v12540_v50, %v12539_v48  ;;  %v12897_v48 = vld [vmem:[#allocation33 + $0x120] sm:$0xff]  ;;  %v12898_v50 = vld [vmem:[#allocation33 + $0x128] sm:$0xff] }
0x3149   :  { %21251 = vmatpush3.bf16.msra.mxu0 %v21250_v51  ;;  %v12541_v51 = vld [vmem:[#allocation33 + $0x50] sm:$0xff] }
0x314a   :  { %21256 = vmatprep.subr.bf16.mxu0 %v22810_v54  ;;  %v21288_v56 = vpack.c.bf16 %v12542_v52, %v12541_v51  ;;  %v12899_v51 = vld [vmem:[#allocation33 + $0x130] sm:$0xff]  ;;  %v12900_v52 = vld [vmem:[#allocation33 + $0x138] sm:$0xff] }
0x314c   :  { %19659 = vmatmul.mubr.msk.f32.vlgmr.msra.gmra.mrb[140].mxu0 %vm9036_vm5, %v12035_v53  ;;  %v24343_v53 = vld [vmem:[%s24782_s25 + $0x20] sm:$0xff] }
0x314d   :  { %21258 = vmatpush3.bf16.msra.mxu0 %v21257_v36  ;;  %19684 = vmatprep.mubr.msk.f32.mxu0 %vm22811_vm7, %v22812_v55  ;;  %v12543_v36 = vld [vmem:[#allocation33 + $0x60] sm:$0xff] }
0x314e   :  { %21259 = vmatprep.subr.bf16.mxu0 %v22810_v54  ;;  %v21292_v41 = vpack.c.bf16 %v12544_v57, %v12543_v36  ;;  %v12901_v36 = vld [vmem:[#allocation33 + $0x140] sm:$0xff]  ;;  %v12902_v57 = vld [vmem:[#allocation33 + $0x148] sm:$0xff] }
0x3151   :  { %21261 = vmatpush3.bf16.msra.mxu0 %v21260_v11  ;;  %v12545_v11 = vld [vmem:[#allocation33 + $0x70] sm:$0xff] }
0x3152   :  { %21262 = vmatprep.subr.bf16.mxu0 %v22810_v54  ;;  %v21296_v29 = vpack.c.bf16 %v12546_v13, %v12545_v11  ;;  %v12903_v11 = vld [vmem:[#allocation33 + $0x150] sm:$0xff]  ;;  %v12904_v13 = vld [vmem:[#allocation33 + $0x158] sm:$0xff] }
0x3155   :  { %21264 = vmatpush3.bf16.msra.mxu0 %v21263_v22  ;;  %v12715_v22 = vld [vmem:[#allocation33 + $0x80] sm:$0xff] }
0x3156   :  { %21265 = vmatprep.subr.bf16.mxu0 %v22810_v54  ;;  %v21300_v42 = vpack.c.bf16 %v12716_v27, %v12715_v22  ;;  %v12905_v22 = vld [vmem:[#allocation33 + $0x160] sm:$0xff]  ;;  %v12906_v27 = vld [vmem:[#allocation33 + $0x168] sm:$0xff] }
0x3159   :  { %21267 = vmatpush3.bf16.msra.mxu0 %v21266_v43  ;;  %v12717_v43 = vld [vmem:[#allocation33 + $0x90] sm:$0xff] }
0x315c   :  { %19685 = vmatmul.mubr.msk.f32.vlgmr.msra.gmra.mrb[140].mxu0 %vm9036_vm5, %v12188_v31  ;;  %v21272_v31 = vpack.c.bf16 %v12534_v23, %v12533_v35  ;;  %v12725_v35 = vld [vmem:[#allocation33 + $0xd0] sm:$0xff]  ;;  %v12726_v23 = vld [vmem:[#allocation33 + $0xd8] sm:$0xff] }
0x315d   :  { %19739 = vmatprep.mubr.msk.f32.mxu0 %vm537_vm2, %v17088_v58  ;;  %v12722_v58 = vld [vmem:[#allocation33 + $0xb8] sm:$0xff] }
0x322f   :  { %v12270_v16 = vpop.f32.mrb[140].mxu0 }
0x3230   :  { %v21900_v4 = vadd.f32 %v17067_v63, %v12270_v16  ;;  %v19686_v8 = vpop.f32.mrb[141].mxu0  ;;  %v12718_v63 = vld [vmem:[#allocation33 + $0x98] sm:$0xff] }
0x3232   :  { %22216 = vtanh.f32 %v21900_v4 }
0x323c   :  { %v22217_v9 = vpop.eup %22216 }
0x323d   :  { %12278 = vrot.lane.b32.xlu0 %v22217_v9, %s22817_s23  ;;  %v12276_v3 = vadd.f32 %v22217_v9, %v24183_v34  ;;  %v24324_v34 = vld [vmem:[%s24782_s25] sm:$0xff]  ;;  %v21304_v9 = vpack.c.bf16 %v12718_v63, %v12717_v43  ;;  %v12908_v63 = vld [vmem:[#allocation33 + $0x178] sm:$0xff] }
0x323e   :  { %v12907_v43 = vld [vmem:[#allocation33 + $0x170] sm:$0xff] }
0x32af   :  { %v12279_v28 = vpop.permute.xlu0 %12278 }
0x32b0   :  { %v12281_v37 = vsub.f32 %v24188_v32, %v12279_v28  ;;  %v12365_v32 = vld [vmem:[#allocation30 + $0x2] sm:$0x3] }
0x32b2   :  { %12283 = vrot.lane.b32.xlu1 %v12281_v37, %s22797_s10  ;;  %v12719_v37 = vld [vmem:[#allocation33 + $0xa0] sm:$0xff]  ;;  %s24785_s10 = sld [smem:[#allocation66_spill]] }
0x3324   :  { %v12284_v7 = vpop.permute.xlu1 %12283 }
0x3325   :  { %v12286_v33 = vsel %vm1641_vm15, %v12276_v3, %v12284_v7  ;;  %v12720_v3 = vld [vmem:[#allocation33 + $0xa8] sm:$0xff] }
0x3326   :  { %19688 = vmatpush3.msk.msra.mxu1 %vm1176_vm14, %v12286_v33 }
0x3327   :  { %19690 = vmatmul.mubr.msk.f32.vlgmr.msra.gmra.mrb[82].mxu1 %vm1169_vm12, %v12287_v30  ;;  %19692 = vmatprep.subr.mxu1 %v22812_v55  ;;  %v21308_v30 = vpack.c.bf16 %v12720_v3, %v12719_v37  ;;  %v13074_v37 = vld [vmem:[#allocation33 + $0x198] sm:$0xff] }
0x3328   :  { %19693 = vmatpush3.msk.msra.mxu1 %vm1176_vm14, %v12286_v33  ;;  %19694 = vmatprep.mubr.msk.f32.mxu1 %vm22811_vm7, %v22812_v55 }
0x332b   :  { %19695 = vmatmul.mubr.msk.f32.vlgmr.msra.gmra.mrb[84].mxu1 %vm1169_vm12, %v12365_v32  ;;  %v12721_v32 = vld [vmem:[#allocation33 + $0xb0] sm:$0xff] }
0x332c   :  { %19699 = vmatprep.mubr.msk.f32.mxu1 %vm537_vm2, %v24324_v34 }
0x33fa   :  { %v24330_v2 = vpop.f32.mrb[82].mxu1 }
0x33fb   :  { %12440 = vrot.lane.b32.xlu0 %v24330_v2, %s22793_s16  ;;  %v19691_v49 = vpop.f32.mrb[83].mxu1 }
0x33fe   :  { %v24334_v17 = vpop.f32.mrb[84].mxu1 }
0x33ff   :  { %v19696_v62 = vpop.f32.mrb[85].mxu1 }
0x3400   :  { %v21312_v62 = vpack.c.bf16 %v12722_v58, %v12721_v32  ;;  %v13077_v58 = vld [vmem:[#allocation33 + $0x1b0] sm:$0xff] }
0x346d   :  { %v12441_v60 = vpop.permute.xlu0 %12440 }
0x346e   :  { %v12443_v5 = vsel %vm9036_vm5, %v24334_v17, %v12441_v60  ;;  %v12724_v60 = vld [vmem:[#allocation33 + $0xc8] sm:$0xff] }
0x346f   :  { %19697 = vmatprep.subr.msk.mxu1 %vm544_vm1, %v12443_v5  ;;  %19737 = vmatprep.subr.msk.mxu0 %vm544_vm1, %v12443_v5 }
0x3470   :  { %19698 = vmatpush3.msk.msra.mxu1 %vm544_vm1, %v12443_v5  ;;  %19738 = vmatpush3.msk.msra.mxu0 %vm544_vm1, %v12443_v5 }
0x3471   :  { %19700 = vmatmul.mubr.msk.f32.vlgmr.msra.gmra.mrb[86].mxu1 %vm537_vm2, %v12446_v10  ;;  %19740 = vmatmul.mubr.msk.f32.vlgmr.msra.gmra.mrb[146].mxu0 %vm537_vm2, %v17089_v12 }
0x3472   :  { %19777 = vmatprep.subr.msk.mxu0 %vm544_vm1, %v12443_v5  ;;  %19779 = vmatprep.mubr.msk.f32.mxu0 %vm537_vm2, %v24343_v53 }
0x3473   :  { %19778 = vmatpush3.msk.msra.mxu0 %vm544_vm1, %v12443_v5  ;;  %21269 = vmatprep.subr.bf16.mxu1 %v21268_v1 }
0x3474   :  { %19817 = vmatprep.subr.msk.mxu0 %vm544_vm1, %v12443_v5  ;;  %21271 = vmatpush3.bf16.msra.mxu1 %v21268_v1  ;;  %v21320_v1 = vpack.c.bf16 %v12726_v23, %v12725_v35  ;;  %v13081_v23 = vld [vmem:[#allocation33 + $0x1d0] sm:$0xff] }
0x3475   :  { %19780 = vmatmul.mubr.msk.f32.vlgmr.msra.gmra.mrb[148].mxu0 %vm537_vm2, %v17094_v38  ;;  %21273 = vmatprep.subr.bf16.mxu1 %v21272_v31  ;;  %v12728_v38 = vld [vmem:[#allocation33 + $0xe8] sm:$0xff] }
0x3476   :  { %19818 = vmatpush3.msk.msra.mxu0 %vm544_vm1, %v12443_v5  ;;  %19819 = vmatprep.mubr.msk.f32.mxu0 %vm537_vm2, %v17098_v45  ;;  %v12730_v45 = vld [vmem:[#allocation33 + $0xf8] sm:$0xff] }
0x3477   :  { %19857 = vmatprep.subr.msk.mxu0 %vm544_vm1, %v12443_v5 }
0x3478   :  { %21275 = vmatpush3.bf16.msra.mxu1 %v21272_v31  ;;  %v12727_v31 = vld [vmem:[#allocation33 + $0xe0] sm:$0xff] }
0x3479   :  { %19820 = vmatmul.mubr.msk.f32.vlgmr.msra.gmra.mrb[150].mxu0 %vm537_vm2, %v17099_v40  ;;  %21277 = vmatprep.subr.bf16.mxu1 %v21276_v46  ;;  %v21324_v39 = vpack.c.bf16 %v12728_v38, %v12727_v31  ;;  %v12893_v40 = vld [vmem:[#allocation33 + $0x100] sm:$0xff]  ;;  %v13084_v38 = vld [vmem:[#allocation33 + $0x1e8] sm:$0xff] }
0x347a   :  { %19858 = vmatpush3.msk.msra.mxu0 %vm544_vm1, %v12443_v5  ;;  %19859 = vmatprep.mubr.msk.f32.mxu0 %vm537_vm2, %v17103_v6  ;;  %v21316_v5 = vpack.c.bf16 %v12724_v60, %v12723_v14  ;;  %v21332_v47 = vpack.c.bf16 %v12894_v0, %v12893_v40  ;;  %v12895_v6 = vld [vmem:[#allocation33 + $0x110] sm:$0xff]  ;;  %v13079_v60 = vld [vmem:[#allocation33 + $0x1c0] sm:$0xff]  ;;  %v13250_v40 = vld [vmem:[#allocation33 + $0x208] sm:$0xff] }
0x347b   :  { %21428 = vmatprep.subr.bf16.mxu0 %v22810_v54  ;;  %v13083_v31 = vld [vmem:[#allocation33 + $0x1e0] sm:$0xff] }
0x347c   :  { %21279 = vmatpush3.bf16.msra.mxu1 %v21276_v46  ;;  %v21328_v46 = vpack.c.bf16 %v12730_v45, %v12729_v44  ;;  %v13086_v44 = vld [vmem:[#allocation33 + $0x1f8] sm:$0xff] }
0x347d   :  { %19860 = vmatmul.mubr.msk.f32.vlgmr.msra.gmra.mrb[152].mxu0 %vm537_vm2, %v17104_v15  ;;  %21281 = vmatprep.subr.bf16.mxu1 %v21280_v61 }
0x347e   :  { %19901 = vmatprep.mubr.msk.f32.mxu0 %vm22811_vm7, %v22812_v55 }
0x3480   :  { %21283 = vmatpush3.bf16.msra.mxu1 %v21280_v61  ;;  %v12896_v61 = vld [vmem:[#allocation33 + $0x118] sm:$0xff] }
0x3481   :  { %21285 = vmatprep.subr.bf16.mxu1 %v21284_v24  ;;  %v21336_v15 = vpack.c.bf16 %v12896_v61, %v12895_v6  ;;  %v13252_v6 = vld [vmem:[#allocation33 + $0x218] sm:$0xff] }
0x3484   :  { %21287 = vmatpush3.bf16.msra.mxu1 %v21284_v24  ;;  %v21340_v24 = vpack.c.bf16 %v12898_v50, %v12897_v48  ;;  %v13254_v48 = vld [vmem:[#allocation33 + $0x228] sm:$0xff] }
0x3485   :  { %21289 = vmatprep.subr.bf16.mxu1 %v21288_v56 }
0x3488   :  { %21291 = vmatpush3.bf16.msra.mxu1 %v21288_v56  ;;  %v21344_v56 = vpack.c.bf16 %v12900_v52, %v12899_v51  ;;  %v13256_v51 = vld [vmem:[#allocation33 + $0x238] sm:$0xff] }
0x3489   :  { %21293 = vmatprep.subr.bf16.mxu1 %v21292_v41 }
0x348c   :  { %21295 = vmatpush3.bf16.msra.mxu1 %v21292_v41  ;;  %v21348_v41 = vpack.c.bf16 %v12902_v57, %v12901_v36  ;;  %v13258_v36 = vld [vmem:[#allocation33 + $0x248] sm:$0xff] }
0x348d   :  { %21297 = vmatprep.subr.bf16.mxu1 %v21296_v29 }
0x3490   :  { %21299 = vmatpush3.bf16.msra.mxu1 %v21296_v29  ;;  %v21352_v29 = vpack.c.bf16 %v12904_v13, %v12903_v11  ;;  %v13260_v11 = vld [vmem:[#allocation33 + $0x258] sm:$0xff]  ;;  %v13261_v13 = vld [vmem:[#allocation33 + $0x260] sm:$0xff] }
0x3491   :  { %21301 = vmatprep.subr.bf16.mxu1 %v21300_v42 }
0x3544   :  { %v19701_v16 = vpop.f32.mrb[86].mxu1  ;;  %v19741_v4 = vpop.f32.mrb[146].mxu0 }
0x3545   :  { %v12522_v8 = vpop.f32.mrb[87].mxu1  ;;  %v12705_v28 = vpop.f32.mrb[147].mxu0 }
0x3546   :  { %19734 = vmatprep.mubr.f32.mxu1 %v12522_v8  ;;  %v13072_v8 = vld [vmem:[#allocation33 + $0x188] sm:$0xff] }
0x3547   :  { %19735 = vmatmul.mubr.f32.vlgmr.msra.gmra.mrb[88].mxu1 %v19701_v16  ;;  %v21360_v16 = vpack.c.bf16 %v12908_v63, %v12907_v43  ;;  %v17087_v43 = vld [vmem:[#allocation34] ss:$0 sm:$0xff] }
0x3548   :  { %21303 = vmatpush3.bf16.msra.mxu1 %v21300_v42  ;;  %19774 = vmatprep.mubr.f32.mxu1 %v12705_v28  ;;  %v24370_v7 = vpop.f32.mrb[148].mxu0  ;;  %v21356_v42 = vpack.c.bf16 %v12906_v27, %v12905_v22  ;;  %v13073_v28 = vld [vmem:[#allocation33 + $0x190] sm:$0xff]  ;;  %v13264_v27 = vld [vmem:[#allocation33 + $0x278] sm:$0xff] }
0x3549   :  { %21305 = vmatprep.subr.bf16.mxu1 %v21304_v9  ;;  %v12883_v33 = vpop.f32.mrb[149].mxu0  ;;  %v21368_v3 = vpack.c.bf16 %v13074_v37, %v13073_v28  ;;  %v13263_v22 = vld [vmem:[#allocation33 + $0x270] sm:$0xff] }
0x354c   :  { %21307 = vmatpush3.bf16.msra.mxu1 %v21304_v9  ;;  %v24372_v49 = vpop.f32.mrb[150].mxu0 }
0x354d   :  { %21309 = vmatprep.subr.bf16.mxu1 %v21308_v30  ;;  %v24374_v18 = vpop.f32.mrb[151].mxu0 }
0x3550   :  { %21311 = vmatpush3.bf16.msra.mxu1 %v21308_v30  ;;  %v24376_v10 = vpop.f32.mrb[152].mxu0  ;;  %v13075_v30 = vld [vmem:[#allocation33 + $0x1a0] sm:$0xff] }
0x3551   :  { %21313 = vmatprep.subr.bf16.mxu1 %v21312_v62  ;;  %v24378_v12 = vpop.f32.mrb[153].mxu0 }
0x3554   :  { %21315 = vmatpush3.bf16.msra.mxu1 %v21312_v62  ;;  %v13078_v62 = vld [vmem:[#allocation33 + $0x1b8] sm:$0xff] }
0x3555   :  { %21317 = vmatprep.subr.bf16.mxu1 %v21316_v5  ;;  %v21376_v14 = vpack.c.bf16 %v13078_v62, %v13077_v58  ;;  %v13348_v58 = vld [vmem:[#allocation31] sm:$0x3] }
0x3558   :  { %21319 = vmatpush3.bf16.msra.mxu1 %v21316_v5  ;;  %v13080_v5 = vld [vmem:[#allocation33 + $0x1c8] sm:$0xff] }
0x3559   :  { %21321 = vmatprep.subr.bf16.mxu1 %v21320_v1  ;;  %v21380_v35 = vpack.c.bf16 %v13080_v5, %v13079_v60  ;;  %v13430_v60 = vld [vmem:[#allocation33 + $0x298] sm:$0xff] }
0x355c   :  { %21323 = vmatpush3.bf16.msra.mxu1 %v21320_v1  ;;  %v13082_v1 = vld [vmem:[#allocation33 + $0x1d8] sm:$0xff] }
0x355d   :  { %21325 = vmatprep.subr.bf16.mxu1 %v21324_v39 }
0x3560   :  { %21327 = vmatpush3.bf16.msra.mxu1 %v21324_v39  ;;  %v13085_v39 = vld [vmem:[#allocation33 + $0x1f0] sm:$0xff] }
0x3561   :  { %21329 = vmatprep.subr.bf16.mxu1 %v21328_v46  ;;  %v21392_v45 = vpack.c.bf16 %v13086_v44, %v13085_v39  ;;  %v13436_v39 = vld [vmem:[#allocation33 + $0x2c8] sm:$0xff] }
0x3564   :  { %21331 = vmatpush3.bf16.msra.mxu1 %v21328_v46  ;;  %v13249_v46 = vld [vmem:[#allocation33 + $0x200] sm:$0xff] }
0x3565   :  { %21333 = vmatprep.subr.bf16.mxu1 %v21332_v47  ;;  %v21396_v0 = vpack.c.bf16 %v13250_v40, %v13249_v46  ;;  %v13438_v46 = vld [vmem:[#allocation33 + $0x2d8] sm:$0xff] }
0x3567   :  { %19775 = vmatmul.mubr.f32.vlgmr.msra.gmra.mrb[88].mxu1 %v19741_v4  ;;  %v13071_v4 = vld [vmem:[#allocation33 + $0x180] sm:$0xff] }
0x3568   :  { %21335 = vmatpush3.bf16.msra.mxu1 %v21332_v47  ;;  %19814 = vmatprep.mubr.f32.mxu1 %v12883_v33  ;;  %v21364_v9 = vpack.c.bf16 %v13072_v8, %v13071_v4  ;;  %v13076_v33 = vld [vmem:[#allocation33 + $0x1a8] sm:$0xff]  ;;  %v13251_v47 = vld [vmem:[#allocation33 + $0x210] sm:$0xff] }
0x3569   :  { %21337 = vmatprep.subr.bf16.mxu1 %v21336_v15  ;;  %v21372_v32 = vpack.c.bf16 %v13076_v33, %v13075_v30  ;;  %v21400_v61 = vpack.c.bf16 %v13252_v6, %v13251_v47  ;;  %v13427_v33 = vld [vmem:[#allocation33 + $0x280] sm:$0xff]  ;;  %v13440_v47 = vld [vmem:[#allocation33 + $0x2e8] sm:$0xff] }
0x356a   :  { %v15448_v30 = vld [vmem:[#allocation33 + $0x8a0] sm:$0xff] }
0x356c   :  { %21339 = vmatpush3.bf16.msra.mxu1 %v21336_v15  ;;  %v13253_v15 = vld [vmem:[#allocation33 + $0x220] sm:$0xff] }
0x356d   :  { %21341 = vmatprep.subr.bf16.mxu1 %v21340_v24  ;;  %v21404_v50 = vpack.c.bf16 %v13254_v48, %v13253_v15  ;;  %v13442_v15 = vld [vmem:[#allocation33 + $0x2f8] sm:$0xff] }
0x3570   :  { %21343 = vmatpush3.bf16.msra.mxu1 %v21340_v24  ;;  %v13255_v24 = vld [vmem:[#allocation33 + $0x230] sm:$0xff] }
0x3571   :  { %21345 = vmatprep.subr.bf16.mxu1 %v21344_v56  ;;  %v21408_v52 = vpack.c.bf16 %v13256_v51, %v13255_v24  ;;  %v13597_v24 = vld [vmem:[#allocation33 + $0x308] sm:$0xff] }
0x3574   :  { %21347 = vmatpush3.bf16.msra.mxu1 %v21344_v56  ;;  %v13257_v56 = vld [vmem:[#allocation33 + $0x240] sm:$0xff] }
0x3575   :  { %21349 = vmatprep.subr.bf16.mxu1 %v21348_v41  ;;  %v21412_v57 = vpack.c.bf16 %v13258_v36, %v13257_v56  ;;  %v13521_v56 = vld [vmem:[#allocation31 + $0x2] sm:$0x3] }
0x3578   :  { %21351 = vmatpush3.bf16.msra.mxu1 %v21348_v41  ;;  %v13259_v41 = vld [vmem:[#allocation33 + $0x250] sm:$0xff] }
0x3579   :  { %21353 = vmatprep.subr.bf16.mxu1 %v21352_v29 }
0x357c   :  { %21355 = vmatpush3.bf16.msra.mxu1 %v21352_v29  ;;  %v13262_v29 = vld [vmem:[#allocation33 + $0x268] sm:$0xff] }
0x357d   :  { %21357 = vmatprep.subr.bf16.mxu1 %v21356_v42 }
0x3580   :  { %21359 = vmatpush3.bf16.msra.mxu1 %v21356_v42  ;;  %v21424_v42 = vpack.c.bf16 %v13264_v27, %v13263_v22  ;;  %v13603_v22 = vld [vmem:[#allocation33 + $0x338] sm:$0xff] }
0x3581   :  { %21361 = vmatprep.subr.bf16.mxu1 %v21360_v16 }
0x3584   :  { %21363 = vmatpush3.bf16.msra.mxu1 %v21360_v16 }
0x3585   :  { %21365 = vmatprep.subr.bf16.mxu1 %v21364_v9 }
0x3587   :  { %19815 = vmatmul.mubr.f32.vlgmr.msra.gmra.mrb[88].mxu1 %v24370_v7  ;;  %v21384_v7 = vpack.c.bf16 %v13082_v1, %v13081_v23  ;;  %v13432_v23 = vld [vmem:[#allocation33 + $0x2a8] sm:$0xff] }
0x3588   :  { %21367 = vmatpush3.bf16.msra.mxu1 %v21364_v9  ;;  %19854 = vmatprep.mubr.f32.mxu1 %v24374_v18  ;;  %v21388_v18 = vpack.c.bf16 %v13084_v38, %v13083_v31  ;;  %v13434_v31 = vld [vmem:[#allocation33 + $0x2b8] sm:$0xff] }
0x3589   :  { %21369 = vmatprep.subr.bf16.mxu1 %v21368_v3 }
0x358c   :  { %21371 = vmatpush3.bf16.msra.mxu1 %v21368_v3 }
0x358d   :  { %21373 = vmatprep.subr.bf16.mxu1 %v21372_v32 }
0x3590   :  { %21375 = vmatpush3.bf16.msra.mxu1 %v21372_v32 }
0x3591   :  { %21377 = vmatprep.subr.bf16.mxu1 %v21376_v14 }
0x3594   :  { %21379 = vmatpush3.bf16.msra.mxu1 %v21376_v14  ;;  %v13429_v14 = vld [vmem:[#allocation33 + $0x290] sm:$0xff] }
0x3595   :  { %21381 = vmatprep.subr.bf16.mxu1 %v21380_v35  ;;  %v21436_v5 = vpack.c.bf16 %v13430_v60, %v13429_v14 }
0x3598   :  { %21383 = vmatpush3.bf16.msra.mxu1 %v21380_v35  ;;  %v13431_v35 = vld [vmem:[#allocation33 + $0x2a0] sm:$0xff] }
0x3599   :  { %21385 = vmatprep.subr.bf16.mxu1 %v21384_v7  ;;  %v21439_v1 = vpack.c.bf16 %v13432_v23, %v13431_v35  ;;  %v13761_v23 = vld [vmem:[#allocation33 + $0x390] sm:$0xff] }
0x359c   :  { %21387 = vmatpush3.bf16.msra.mxu1 %v21384_v7  ;;  %v13433_v7 = vld [vmem:[#allocation33 + $0x2b0] sm:$0xff] }
0x359d   :  { %21389 = vmatprep.subr.bf16.mxu1 %v21388_v18  ;;  %v21442_v38 = vpack.c.bf16 %v13434_v31, %v13433_v7  ;;  %v13763_v31 = vld [vmem:[#allocation33 + $0x3a0] sm:$0xff] }
0x35a0   :  { %21391 = vmatpush3.bf16.msra.mxu1 %v21388_v18  ;;  %v13435_v18 = vld [vmem:[#allocation33 + $0x2c0] sm:$0xff] }
0x35a1   :  { %21393 = vmatprep.subr.bf16.mxu1 %v21392_v45  ;;  %v21445_v44 = vpack.c.bf16 %v13436_v39, %v13435_v18  ;;  %v13765_v39 = vld [vmem:[#allocation33 + $0x3b0] sm:$0xff] }
0x35a4   :  { %21395 = vmatpush3.bf16.msra.mxu1 %v21392_v45  ;;  %v13437_v45 = vld [vmem:[#allocation33 + $0x2d0] sm:$0xff] }
0x35a5   :  { %21397 = vmatprep.subr.bf16.mxu1 %v21396_v0  ;;  %v21448_v40 = vpack.c.bf16 %v13438_v46, %v13437_v45  ;;  %v13767_v46 = vld [vmem:[#allocation33 + $0x3c0] sm:$0xff] }
0x35a7   :  { %19855 = vmatmul.mubr.f32.vlgmr.msra.gmra.mrb[88].mxu1 %v24372_v49  ;;  %v21416_v49 = vpack.c.bf16 %v13260_v11, %v13259_v41  ;;  %v13599_v41 = vld [vmem:[#allocation33 + $0x318] sm:$0xff] }
0x35a8   :  { %21399 = vmatpush3.bf16.msra.mxu1 %v21396_v0  ;;  %19894 = vmatprep.mubr.f32.mxu1 %v24378_v12  ;;  %v21420_v12 = vpack.c.bf16 %v13262_v29, %v13261_v13  ;;  %v13439_v0 = vld [vmem:[#allocation33 + $0x2e0] sm:$0xff]  ;;  %v13601_v13 = vld [vmem:[#allocation33 + $0x328] sm:$0xff] }
0x35a9   :  { %21401 = vmatprep.subr.bf16.mxu1 %v21400_v61  ;;  %v21451_v6 = vpack.c.bf16 %v13440_v47, %v13439_v0  ;;  %v13769_v47 = vld [vmem:[#allocation33 + $0x3d0] sm:$0xff] }
0x35ac   :  { %21403 = vmatpush3.bf16.msra.mxu1 %v21400_v61  ;;  %v13441_v61 = vld [vmem:[#allocation33 + $0x2f0] sm:$0xff] }
0x35ad   :  { %21405 = vmatprep.subr.bf16.mxu1 %v21404_v50  ;;  %v21454_v48 = vpack.c.bf16 %v13442_v15, %v13441_v61  ;;  %v13771_v15 = vld [vmem:[#allocation33 + $0x3e0] sm:$0xff] }
0x35b0   :  { %21407 = vmatpush3.bf16.msra.mxu1 %v21404_v50  ;;  %v13596_v50 = vld [vmem:[#allocation33 + $0x300] sm:$0xff] }
0x35b1   :  { %21409 = vmatprep.subr.bf16.mxu1 %v21408_v52  ;;  %v21461_v36 = vpack.c.bf16 %v13597_v24, %v13596_v50  ;;  %v13773_v24 = vld [vmem:[#allocation33 + $0x3f0] sm:$0xff] }
0x35b4   :  { %21411 = vmatpush3.bf16.msra.mxu1 %v21408_v52 }
0x35b5   :  { %21413 = vmatprep.subr.bf16.mxu1 %v21412_v57 }
0x35b8   :  { %21415 = vmatpush3.bf16.msra.mxu1 %v21412_v57  ;;  %v13598_v57 = vld [vmem:[#allocation33 + $0x310] sm:$0xff] }
0x35b9   :  { %21417 = vmatprep.subr.bf16.mxu1 %v21416_v49  ;;  %v21464_v11 = vpack.c.bf16 %v13599_v41, %v13598_v57  ;;  %v13923_v57 = vld [vmem:[#allocation33 + $0x408] sm:$0xff] }
0x35bc   :  { %21419 = vmatpush3.bf16.msra.mxu1 %v21416_v49  ;;  %v13600_v49 = vld [vmem:[#allocation33 + $0x320] sm:$0xff] }
0x35bd   :  { %21421 = vmatprep.subr.bf16.mxu1 %v21420_v12  ;;  %v21467_v29 = vpack.c.bf16 %v13601_v13, %v13600_v49  ;;  %v24459_v49 = vld [vmem:[#allocation31 + $0x6] sm:$0x3] }
0x35c0   :  { %21423 = vmatpush3.bf16.msra.mxu1 %v21420_v12  ;;  %v13602_v12 = vld [vmem:[#allocation33 + $0x330] sm:$0xff] }
0x35c1   :  { %21425 = vmatprep.subr.bf16.mxu1 %v21424_v42  ;;  %v21470_v27 = vpack.c.bf16 %v13603_v22, %v13602_v12  ;;  %v13925_v12 = vld [vmem:[#allocation33 + $0x418] sm:$0xff]  ;;  %v13927_v22 = vld [vmem:[#allocation33 + $0x428] sm:$0xff] }
0x35c4   :  { %21427 = vmatpush3.bf16.msra.mxu1 %v21424_v42  ;;  %v13604_v42 = vld [vmem:[#allocation33 + $0x340] sm:$0xff] }
0x35c5   :  { %21540 = vmatprep.subr.bf16.mxu1 %v22810_v54 }
0x35c7   :  { %19895 = vmatmul.mubr.f32.vlgmr.msra.gmra.mrb[88].mxu1 %v24376_v10  ;;  %v13428_v10 = vld [vmem:[#allocation33 + $0x288] sm:$0xff] }
0x35c8   :  { %20069 = vmatprep.mubr.msk.f32.mxu1 %vm22811_vm7, %v22812_v55  ;;  %v21433_v62 = vpack.c.bf16 %v13428_v10, %v13427_v33  ;;  %v13611_v33 = vld [vmem:[#allocation33 + $0x378] sm:$0xff] }
0x369a   :  { %v19896_v63 = vpop.f32.mrb[88].mxu1 }
0x369b   :  { %v21901_v16 = vadd.f32 %v19896_v63, %v17087_v43  ;;  %v13331_v4 = vpop.f32.mrb[89].mxu1 }
0x369c   :  { %v21902_v8 = vadd.f32 %v17087_v43, %v13331_v4  ;;  %v13605_v43 = vld [vmem:[#allocation33 + $0x348] sm:$0xff]  ;;  %v13607_v4 = vld [vmem:[#allocation33 + $0x358] sm:$0xff] }
0x369d   :  { %v13343_v9 = vmul.f32 0.01, %v21901_v16  ;;  %v21473_v63 = vpack.c.bf16 %v13605_v43, %v13604_v42  ;;  %v13928_v42 = vld [vmem:[#allocation33 + $0x430] sm:$0xff]  ;;  %v13929_v43 = vld [vmem:[#allocation33 + $0x438] sm:$0xff] }
0x369e   :  { %v13342_v28 = vmul.f32 0.01, %v21902_v8 }
0x369f   :  { %v13345_v37 = vmax.f32 %v21901_v16, %v13343_v9  ;;  %v13606_v16 = vld [vmem:[#allocation33 + $0x350] sm:$0xff]  ;;  %v13608_v9 = vld [vmem:[#allocation33 + $0x360] sm:$0xff] }
0x36a0   :  { %v13344_v3 = vmax.f32 %v21902_v8, %v13342_v28  ;;  %v21476_v8 = vpack.c.bf16 %v13607_v4, %v13606_v16  ;;  %v13609_v28 = vld [vmem:[#allocation33 + $0x368] sm:$0xff]  ;;  %v13930_v16 = vld [vmem:[#allocation33 + $0x440] sm:$0xff] }
0x36a1   :  { %v13931_v4 = vld [vmem:[#allocation33 + $0x448] sm:$0xff] }
0x36a2   :  { %v24394_v32 = vpack.c.bf16 %v13345_v37, %v13344_v3  ;;  %v21479_v37 = vpack.c.bf16 %v13609_v28, %v13608_v9  ;;  %v13610_v3 = vld [vmem:[#allocation33 + $0x370] sm:$0xff]  ;;  %v13933_v28 = vld [vmem:[#allocation33 + $0x458] sm:$0xff] }
0x36a3   :  { %v21482_v10 = vpack.c.bf16 %v13611_v33, %v13610_v3  ;;  %v13932_v9 = vld [vmem:[#allocation33 + $0x450] sm:$0xff]  ;;  %v13934_v3 = vld [vmem:[#allocation33 + $0x460] sm:$0xff]  ;;  %v13935_v33 = vld [vmem:[#allocation33 + $0x468] sm:$0xff] }
0x36a4   :  { %21431 = vmatpush3.bf16.msk.msra.mxu0 %vm24390_vm10, %v24394_v32  ;;  %21543 = vmatpush3.bf16.msk.msra.mxu1 %vm24390_vm10, %v24394_v32 }
0x36a5   :  { %21432 = vmatprep.subr.bf16.mxu0 %v22810_v54 }
0x36a7   :  { %19902 = vmatmul.mubr.msk.f32.vlgmr.msra.gmra.mrb[154].mxu0 %vm13349_vm11, %v13348_v58  ;;  %v13759_v58 = vld [vmem:[#allocation33 + $0x380] sm:$0xff] }
0x36a8   :  { %21434 = vmatpush3.bf16.msra.mxu0 %v21433_v62  ;;  %19936 = vmatprep.mubr.msk.f32.mxu0 %vm22811_vm7, %v22812_v55  ;;  %v13760_v62 = vld [vmem:[#allocation33 + $0x388] sm:$0xff] }
0x36a9   :  { %21435 = vmatprep.subr.bf16.mxu0 %v22810_v54  ;;  %v21489_v35 = vpack.c.bf16 %v13760_v62, %v13759_v58  ;;  %v13936_v58 = vld [vmem:[#allocation33 + $0x470] sm:$0xff]  ;;  %v13937_v62 = vld [vmem:[#allocation33 + $0x478] sm:$0xff] }
0x36ac   :  { %21437 = vmatpush3.bf16.msra.mxu0 %v21436_v5  ;;  %v13684_v5 = vld [vmem:[#allocation31 + $0x4] sm:$0x3] }
0x36ad   :  { %21438 = vmatprep.subr.bf16.mxu0 %v22810_v54 }
0x36b0   :  { %21440 = vmatpush3.bf16.msra.mxu0 %v21439_v1  ;;  %v13762_v1 = vld [vmem:[#allocation33 + $0x398] sm:$0xff] }
0x36b1   :  { %21441 = vmatprep.subr.bf16.mxu0 %v22810_v54  ;;  %v21492_v7 = vpack.c.bf16 %v13762_v1, %v13761_v23  ;;  %v14086_v23 = vld [vmem:[#allocation33 + $0x488] sm:$0xff] }
0x36b4   :  { %21443 = vmatpush3.bf16.msra.mxu0 %v21442_v38  ;;  %v13764_v38 = vld [vmem:[#allocation33 + $0x3a8] sm:$0xff] }
0x36b5   :  { %21444 = vmatprep.subr.bf16.mxu0 %v22810_v54  ;;  %v21495_v18 = vpack.c.bf16 %v13764_v38, %v13763_v31  ;;  %v14088_v31 = vld [vmem:[#allocation33 + $0x498] sm:$0xff] }
0x36b8   :  { %21446 = vmatpush3.bf16.msra.mxu0 %v21445_v44  ;;  %v13766_v44 = vld [vmem:[#allocation33 + $0x3b8] sm:$0xff] }
0x36b9   :  { %21447 = vmatprep.subr.bf16.mxu0 %v22810_v54  ;;  %v21498_v45 = vpack.c.bf16 %v13766_v44, %v13765_v39  ;;  %v14089_v44 = vld [vmem:[#allocation33 + $0x4a0] sm:$0xff] }
0x36bc   :  { %21449 = vmatpush3.bf16.msra.mxu0 %v21448_v40  ;;  %v13768_v40 = vld [vmem:[#allocation33 + $0x3c8] sm:$0xff] }
0x36bd   :  { %21450 = vmatprep.subr.bf16.mxu0 %v22810_v54  ;;  %v21501_v0 = vpack.c.bf16 %v13768_v40, %v13767_v46  ;;  %v14091_v40 = vld [vmem:[#allocation33 + $0x4b0] sm:$0xff] }
0x36c0   :  { %21452 = vmatpush3.bf16.msra.mxu0 %v21451_v6  ;;  %v13770_v6 = vld [vmem:[#allocation33 + $0x3d8] sm:$0xff] }
0x36c1   :  { %21453 = vmatprep.subr.bf16.mxu0 %v22810_v54  ;;  %v21504_v61 = vpack.c.bf16 %v13770_v6, %v13769_v47  ;;  %v14093_v6 = vld [vmem:[#allocation33 + $0x4c0] sm:$0xff] }
0x36c4   :  { %21455 = vmatpush3.bf16.msra.mxu0 %v21454_v48  ;;  %v13772_v48 = vld [vmem:[#allocation33 + $0x3e8] sm:$0xff] }
0x36c5   :  { %21456 = vmatprep.subr.bf16.mxu0 %v22810_v54  ;;  %v21507_v50 = vpack.c.bf16 %v13772_v48, %v13771_v15  ;;  %v14095_v48 = vld [vmem:[#allocation33 + $0x4d0] sm:$0xff] }
0x377a   :  { %v13422_v51 = vpop.f32.mrb[154].mxu0 }
0x377b   :  { %19937 = vmatmul.mubr.f32.vlgmr.msra.gmra.mrb[156].mxu0 %v13422_v51  ;;  %v19903_v52 = vpop.f32.mrb[155].mxu0  ;;  %v13774_v51 = vld [vmem:[#allocation33 + $0x3f8] sm:$0xff] }
0x377c   :  { %21459 = vmatpush3.bf16.msk.msra.mxu0 %vm24390_vm10, %v24394_v32  ;;  %19943 = vmatprep.mubr.msk.f32.mxu0 %vm22811_vm7, %v22812_v55  ;;  %v21510_v52 = vpack.c.bf16 %v13774_v51, %v13773_v24  ;;  %v14097_v51 = vld [vmem:[#allocation33 + $0x4e0] sm:$0xff] }
0x377d   :  { %21460 = vmatprep.subr.bf16.mxu0 %v22810_v54 }
0x377f   :  { %19944 = vmatmul.mubr.msk.f32.vlgmr.msra.gmra.mrb[158].mxu0 %vm13349_vm11, %v13521_v56  ;;  %v24448_v56 = vld [vmem:[#allocation31 + $0x8] sm:$0x3] }
0x3780   :  { %21462 = vmatpush3.bf16.msra.mxu0 %v21461_v36  ;;  %19978 = vmatprep.mubr.msk.f32.mxu0 %vm22811_vm7, %v22812_v55  ;;  %v13922_v36 = vld [vmem:[#allocation33 + $0x400] sm:$0xff] }
0x3781   :  { %21463 = vmatprep.subr.bf16.mxu0 %v22810_v54  ;;  %20070 = vmatmul.mubr.msk.f32.vlgmr.msra.gmra.mrb[90].mxu1 %vm13349_vm11, %v24448_v56  ;;  %v21517_v13 = vpack.c.bf16 %v13923_v57, %v13922_v36  ;;  %v14099_v57 = vld [vmem:[#allocation33 + $0x4f0] sm:$0xff] }
0x3782   :  { %20109 = vmatprep.mubr.msk.f32.mxu1 %vm537_vm2, %v24324_v34 }
0x3784   :  { %21465 = vmatpush3.bf16.msra.mxu0 %v21464_v11 }
0x3785   :  { %21466 = vmatprep.subr.bf16.mxu0 %v22810_v54 }
0x3788   :  { %21468 = vmatpush3.bf16.msra.mxu0 %v21467_v29  ;;  %v13924_v29 = vld [vmem:[#allocation33 + $0x410] sm:$0xff] }
0x3789   :  { %21469 = vmatprep.subr.bf16.mxu0 %v22810_v54  ;;  %v21520_v34 = vpack.c.bf16 %v13925_v12, %v13924_v29 }
0x378c   :  { %21471 = vmatpush3.bf16.msra.mxu0 %v21470_v27 }
0x378d   :  { %21472 = vmatprep.subr.bf16.mxu0 %v22810_v54 }
0x3790   :  { %21474 = vmatpush3.bf16.msra.mxu0 %v21473_v63  ;;  %v21526_v63 = vpack.c.bf16 %v13929_v43, %v13928_v42  ;;  %v14267_v43 = vld [vmem:[#allocation33 + $0x500] sm:$0xff] }
0x3791   :  { %21475 = vmatprep.subr.bf16.mxu0 %v22810_v54 }
0x3794   :  { %21477 = vmatpush3.bf16.msra.mxu0 %v21476_v8  ;;  %v21529_v8 = vpack.c.bf16 %v13931_v4, %v13930_v16 }
0x3795   :  { %21478 = vmatprep.subr.bf16.mxu0 %v22810_v54 }
0x3798   :  { %21480 = vmatpush3.bf16.msra.mxu0 %v21479_v37  ;;  %v21532_v37 = vpack.c.bf16 %v13933_v28, %v13932_v9  ;;  %v14269_v28 = vld [vmem:[#allocation33 + $0x510] sm:$0xff] }
0x3799   :  { %21481 = vmatprep.subr.bf16.mxu0 %v22810_v54 }
0x379c   :  { %21483 = vmatpush3.bf16.msra.mxu0 %v21482_v10  ;;  %v21535_v10 = vpack.c.bf16 %v13935_v33, %v13934_v3  ;;  %v14271_v3 = vld [vmem:[#allocation33 + $0x520] sm:$0xff]  ;;  %v14272_v33 = vld [vmem:[#allocation33 + $0x528] sm:$0xff] }
0x379d   :  { %21484 = vmatprep.subr.bf16.mxu0 %v22810_v54 }
0x3852   :  { %v13591_v14 = vpop.f32.mrb[158].mxu0 }
0x3853   :  { %19979 = vmatmul.mubr.f32.vlgmr.msra.gmra.mrb[156].mxu0 %v13591_v14  ;;  %v19945_v60 = vpop.f32.mrb[159].mxu0  ;;  %v21538_v14 = vpack.c.bf16 %v13937_v62, %v13936_v58  ;;  %v22226_v58 = vld [vmem:[%s24782_s25 + $0x30] sm:$0xff]  ;;  %v21576_v62 = vpack.c.bf16 %v14272_v33, %v14271_v3  ;;  %v14612_v33 = vld [vmem:[#allocation33 + $0x608] sm:$0xff] }
0x3854   :  { %21487 = vmatpush3.bf16.msk.msra.mxu0 %vm24390_vm10, %v24394_v32  ;;  %19985 = vmatprep.mubr.msk.f32.mxu0 %vm22811_vm7, %v22812_v55  ;;  %v14080_v60 = vpop.f32.mrb[90].mxu1  ;;  %v14611_v3 = vld [vmem:[#allocation33 + $0x600] sm:$0xff] }
0x3855   :  { %21488 = vmatprep.subr.bf16.mxu0 %v22810_v54 }
0x3857   :  { %19986 = vmatmul.mubr.msk.f32.vlgmr.msra.gmra.mrb[160].mxu0 %vm13349_vm11, %v13684_v5  ;;  %v20071_v5 = vpop.f32.mrb[91].mxu1 }
0x3858   :  { %21490 = vmatpush3.bf16.msra.mxu0 %v21489_v35  ;;  %20020 = vmatprep.mubr.msk.f32.mxu0 %vm22811_vm7, %v22812_v55  ;;  %v14085_v35 = vld [vmem:[#allocation33 + $0x480] sm:$0xff] }
0x3859   :  { %21491 = vmatprep.subr.bf16.mxu0 %v22810_v54  ;;  %v21545_v1 = vpack.c.bf16 %v14086_v23, %v14085_v35  ;;  %v22227_v5 = vld [vmem:[%s24782_s25 + $0x38] sm:$0x3]  ;;  %v22228_v23 = vld [vmem:[%s24782_s25 + $0x40] sm:$0xff] }
0x385c   :  { %21493 = vmatpush3.bf16.msra.mxu0 %v21492_v7  ;;  %v14087_v7 = vld [vmem:[#allocation33 + $0x490] sm:$0xff] }
0x385d   :  { %21494 = vmatprep.subr.bf16.mxu0 %v22810_v54  ;;  %v21548_v39 = vpack.c.bf16 %v14088_v31, %v14087_v7  ;;  %v14276_v7 = vld [vmem:[#allocation33 + $0x548] sm:$0xff]  ;;  %v22229_v31 = vld [vmem:[%s24782_s25 + $0x48] sm:$0x3] }
0x3860   :  { %21496 = vmatpush3.bf16.msra.mxu0 %v21495_v18 }
0x3861   :  { %21497 = vmatprep.subr.bf16.mxu0 %v22810_v54 }
0x3864   :  { %21499 = vmatpush3.bf16.msra.mxu0 %v21498_v45  ;;  %v14090_v45 = vld [vmem:[#allocation33 + $0x4a8] sm:$0xff] }
0x3865   :  { %21500 = vmatprep.subr.bf16.mxu0 %v22810_v54  ;;  %v21551_v46 = vpack.c.bf16 %v14090_v45, %v14089_v44  ;;  %v14279_v45 = vld [vmem:[#allocation33 + $0x560] sm:$0xff] }
0x3868   :  { %21502 = vmatpush3.bf16.msra.mxu0 %v21501_v0  ;;  %v14092_v0 = vld [vmem:[#allocation33 + $0x4b8] sm:$0xff] }
0x3869   :  { %21503 = vmatprep.subr.bf16.mxu0 %v22810_v54  ;;  %v21554_v47 = vpack.c.bf16 %v14092_v0, %v14091_v40  ;;  %v14281_v0 = vld [vmem:[#allocation33 + $0x570] sm:$0xff] }
0x386c   :  { %21505 = vmatpush3.bf16.msra.mxu0 %v21504_v61  ;;  %v14094_v61 = vld [vmem:[#allocation33 + $0x4c8] sm:$0xff] }
0x386d   :  { %21506 = vmatprep.subr.bf16.mxu0 %v22810_v54  ;;  %v21557_v15 = vpack.c.bf16 %v14094_v61, %v14093_v6  ;;  %v14442_v61 = vld [vmem:[#allocation33 + $0x580] sm:$0xff] }
0x3870   :  { %21508 = vmatpush3.bf16.msra.mxu0 %v21507_v50  ;;  %v14096_v50 = vld [vmem:[#allocation33 + $0x4d8] sm:$0xff] }
0x3871   :  { %21509 = vmatprep.subr.bf16.mxu0 %v22810_v54  ;;  %v21560_v24 = vpack.c.bf16 %v14096_v50, %v14095_v48 }
0x3874   :  { %21511 = vmatpush3.bf16.msra.mxu0 %v21510_v52  ;;  %v14098_v52 = vld [vmem:[#allocation33 + $0x4e8] sm:$0xff] }
0x3875   :  { %21512 = vmatprep.subr.bf16.mxu0 %v22810_v54  ;;  %v21563_v36 = vpack.c.bf16 %v14098_v52, %v14097_v51  ;;  %v14444_v51 = vld [vmem:[#allocation33 + $0x590] sm:$0xff]  ;;  %v14445_v52 = vld [vmem:[#allocation33 + $0x598] sm:$0xff] }
0x392a   :  { %v13754_v41 = vpop.f32.mrb[160].mxu0 }
0x392b   :  { %20021 = vmatmul.mubr.f32.vlgmr.msra.gmra.mrb[156].mxu0 %v13754_v41  ;;  %v19987_v11 = vpop.f32.mrb[161].mxu0  ;;  %v14100_v41 = vld [vmem:[#allocation33 + $0x4f8] sm:$0xff] }
0x392c   :  { %21515 = vmatpush3.bf16.msk.msra.mxu0 %vm24390_vm10, %v24394_v32  ;;  %20027 = vmatprep.mubr.msk.f32.mxu0 %vm22811_vm7, %v22812_v55  ;;  %v13926_v32 = vld [vmem:[#allocation33 + $0x420] sm:$0xff]  ;;  %v21566_v11 = vpack.c.bf16 %v14100_v41, %v14099_v57  ;;  %v21604_v57 = vpack.c.bf16 %v14445_v52, %v14444_v51  ;;  %v14625_v52 = vld [vmem:[#allocation33 + $0x670] sm:$0xff] }
0x392d   :  { %21516 = vmatprep.subr.bf16.mxu0 %v22810_v54  ;;  %v21523_v27 = vpack.c.bf16 %v13927_v22, %v13926_v32  ;;  %v14446_v41 = vld [vmem:[#allocation33 + $0x5a0] sm:$0xff] }
0x392f   :  { %20028 = vmatmul.mubr.msk.f32.vlgmr.msra.gmra.mrb[162].mxu0 %vm13349_vm11, %v24459_v49 }
0x3930   :  { %21518 = vmatpush3.bf16.msra.mxu0 %v21517_v13  ;;  %20062 = vmatprep.mubr.msk.f32.mxu0 %vm22811_vm7, %v22812_v55  ;;  %v17110_v13 = vld [vmem:[#allocation34 + $0x1] ss:$0 sm:$0xff] }
0x3931   :  { %21519 = vmatprep.subr.bf16.mxu0 %v22810_v54 }
0x3934   :  { %21521 = vmatpush3.bf16.msra.mxu0 %v21520_v34 }
0x3935   :  { %21522 = vmatprep.subr.bf16.mxu0 %v22810_v54 }
0x3938   :  { %21524 = vmatpush3.bf16.msra.mxu0 %v21523_v27 }
0x3939   :  { %21525 = vmatprep.subr.bf16.mxu0 %v22810_v54 }
0x393c   :  { %21527 = vmatpush3.bf16.msra.mxu0 %v21526_v63 }
0x393d   :  { %21528 = vmatprep.subr.bf16.mxu0 %v22810_v54 }
0x3940   :  { %21530 = vmatpush3.bf16.msra.mxu0 %v21529_v8 }
0x3941   :  { %21531 = vmatprep.subr.bf16.mxu0 %v22810_v54 }
0x3944   :  { %21533 = vmatpush3.bf16.msra.mxu0 %v21532_v37  ;;  %v14270_v37 = vld [vmem:[#allocation33 + $0x518] sm:$0xff] }
0x3945   :  { %21534 = vmatprep.subr.bf16.mxu0 %v22810_v54 }
0x3948   :  { %21536 = vmatpush3.bf16.msra.mxu0 %v21535_v10  ;;  %v22225_v10 = vld [vmem:[%s24782_s25 + $0x28] sm:$0x3] }
0x3949   :  { %21537 = vmatprep.subr.bf16.mxu0 %v22810_v54 }
0x394c   :  { %21539 = vmatpush3.bf16.msra.mxu0 %v21538_v14  ;;  %v14273_v14 = vld [vmem:[#allocation33 + $0x530] sm:$0xff] }
0x394d   :  { %21544 = vmatprep.subr.bf16.mxu0 %v22810_v54 }
0x3a02   :  { %v13917_v38 = vpop.f32.mrb[162].mxu0 }
0x3a03   :  { %20063 = vmatmul.mubr.f32.vlgmr.msra.gmra.mrb[156].mxu0 %v13917_v38  ;;  %v20029_v18 = vpop.f32.mrb[163].mxu0 }
0x3a04   :  { %21546 = vmatpush3.bf16.msra.mxu0 %v21545_v1  ;;  %20104 = vmatprep.mubr.msk.f32.mxu0 %vm22811_vm7, %v22812_v55  ;;  %v14275_v1 = vld [vmem:[#allocation33 + $0x540] sm:$0xff]  ;;  %v14277_v18 = vld [vmem:[#allocation33 + $0x550] sm:$0xff] }
0x3a05   :  { %21547 = vmatprep.subr.bf16.mxu0 %v22810_v54  ;;  %v21584_v38 = vpack.c.bf16 %v14276_v7, %v14275_v1  ;;  %v14614_v1 = vld [vmem:[#allocation33 + $0x618] sm:$0xff] }
0x3a08   :  { %21549 = vmatpush3.bf16.msra.mxu0 %v21548_v39  ;;  %v14278_v39 = vld [vmem:[#allocation33 + $0x558] sm:$0xff] }
0x3a09   :  { %21550 = vmatprep.subr.bf16.mxu0 %v22810_v54  ;;  %v21588_v44 = vpack.c.bf16 %v14278_v39, %v14277_v18  ;;  %v14615_v18 = vld [vmem:[#allocation33 + $0x620] sm:$0xff]  ;;  %v14616_v39 = vld [vmem:[#allocation33 + $0x628] sm:$0xff] }
0x3a0c   :  { %21552 = vmatpush3.bf16.msra.mxu0 %v21551_v46  ;;  %v14280_v46 = vld [vmem:[#allocation33 + $0x568] sm:$0xff] }
0x3a0d   :  { %21553 = vmatprep.subr.bf16.mxu0 %v22810_v54  ;;  %v21592_v40 = vpack.c.bf16 %v14280_v46, %v14279_v45  ;;  %v14617_v45 = vld [vmem:[#allocation33 + $0x630] sm:$0xff]  ;;  %v14618_v46 = vld [vmem:[#allocation33 + $0x638] sm:$0xff] }
0x3a10   :  { %21555 = vmatpush3.bf16.msra.mxu0 %v21554_v47  ;;  %v14282_v47 = vld [vmem:[#allocation33 + $0x578] sm:$0xff] }
0x3a11   :  { %21556 = vmatprep.subr.bf16.mxu0 %v22810_v54  ;;  %v21596_v6 = vpack.c.bf16 %v14282_v47, %v14281_v0  ;;  %v14619_v0 = vld [vmem:[#allocation33 + $0x640] sm:$0xff]  ;;  %v14620_v47 = vld [vmem:[#allocation33 + $0x648] sm:$0xff] }
0x3a14   :  { %21558 = vmatpush3.bf16.msra.mxu0 %v21557_v15  ;;  %v14443_v15 = vld [vmem:[#allocation33 + $0x588] sm:$0xff] }
0x3a15   :  { %21559 = vmatprep.subr.bf16.mxu0 %v22810_v54 }
0x3a18   :  { %21561 = vmatpush3.bf16.msra.mxu0 %v21560_v24  ;;  %v21600_v24 = vpack.c.bf16 %v14443_v15, %v14442_v61  ;;  %v14621_v61 = vld [vmem:[#allocation33 + $0x650] sm:$0xff]  ;;  %v14622_v15 = vld [vmem:[#allocation33 + $0x658] sm:$0xff] }
0x3a19   :  { %21562 = vmatprep.subr.bf16.mxu0 %v22810_v54 }
0x3a1c   :  { %21564 = vmatpush3.bf16.msra.mxu0 %v21563_v36  ;;  %v22230_v36 = vld [vmem:[%s24782_s25 + $0x10] sm:$0xff] }
0x3a1d   :  { %21565 = vmatprep.subr.bf16.mxu0 %v22810_v54 }
0x3a20   :  { %21567 = vmatpush3.bf16.msra.mxu0 %v21566_v11  ;;  %v14447_v11 = vld [vmem:[#allocation33 + $0x5a8] sm:$0xff] }
0x3a23   :  { %20105 = vmatmul.mubr.f32.vlgmr.msra.gmra.mrb[156].mxu0 %v14080_v60  ;;  %v14274_v60 = vld [vmem:[#allocation33 + $0x538] sm:$0xff] }
0x3a24   :  { %20189 = vmatprep.mubr.msk.f32.mxu0 %vm537_vm2, %v24343_v53  ;;  %v14268_v53 = vld [vmem:[#allocation33 + $0x508] sm:$0xff]  ;;  %v21580_v35 = vpack.c.bf16 %v14274_v60, %v14273_v14 }
0x3a25   :  { %v21568_v8 = vpack.c.bf16 %v14268_v53, %v14267_v43  ;;  %v14452_v53 = vld [vmem:[#allocation33 + $0x5d0] sm:$0xff] }
0x3af6   :  { %v14167_v29 = vpop.f32.mrb[156].mxu0 }
0x3af7   :  { %v21903_v12 = vadd.f32 %v17110_v13, %v14167_v29  ;;  %v20106_v34 = vpop.f32.mrb[157].mxu0  ;;  %v22231_v13 = vld [vmem:[%s24782_s25 + $0x18] sm:$0x3]  ;;  %v21608_v29 = vpack.c.bf16 %v14447_v11, %v14446_v41  ;;  %v14781_v11 = vld [vmem:[#allocation33 + $0x688] sm:$0xff] }
0x3af8   :  { %v14449_v34 = vld [vmem:[#allocation33 + $0x5b8] sm:$0xff]  ;;  %v14780_v41 = vld [vmem:[#allocation33 + $0x680] sm:$0xff] }
0x3af9   :  { %22218 = vtanh.f32 %v21903_v12  ;;  %v14448_v12 = vld [vmem:[#allocation33 + $0x5b0] sm:$0xff] }
0x3b03   :  { %v22219_v32 = vpop.eup %22218 }
0x3b04   :  { %v14173_v22 = vmul.f32 1.442695, %v22219_v32  ;;  %v21612_v32 = vpack.c.bf16 %v14449_v34, %v14448_v12  ;;  %v14783_v12 = vld [vmem:[#allocation33 + $0x698] sm:$0xff] }
0x3b06   :  { %22220 = vpow2.f32 %v14173_v22  ;;  %v14450_v22 = vld [vmem:[#allocation33 + $0x5c0] sm:$0xff] }
0x3b10   :  { %v22221_v27 = vpop.eup %22220 }
0x3b11   :  { %14177 = vrot.lane.b32.xlu1 %v22221_v27, %s22793_s16  ;;  %v24487_v42 = vmul.f32 %v22221_v27, %v24330_v2  ;;  %v22224_v2 = vld [vmem:[%s24782_s25 + $0x8] sm:$0x3]  ;;  %v14451_v27 = vld [vmem:[#allocation33 + $0x5c8] sm:$0xff] }
0x3b12   :  { %v21616_v43 = vpack.c.bf16 %v14451_v27, %v14450_v22  ;;  %v14785_v22 = vld [vmem:[#allocation33 + $0x6a8] sm:$0xff] }
0x3b13   :  { %14182 = vrot.lane.b32.xlu0 %v24487_v42, %s22793_s16 }
0x3b83   :  { %v14178_v63 = vpop.permute.xlu1 %14177 }
0x3b84   :  { %v24492_v16 = vmul.f32 %v14178_v63, %v24334_v17  ;;  %v21572_v17 = vpack.c.bf16 %v14270_v37, %v14269_v28  ;;  %v14453_v63 = vld [vmem:[#allocation33 + $0x5d8] sm:$0xff]  ;;  %v14456_v37 = vld [vmem:[#allocation33 + $0x5f0] sm:$0xff] }
0x3b85   :  { %v14183_v4 = vpop.permute.xlu0 %14182 }
0x3b86   :  { %v24496_v9 = vsel %vm9036_vm5, %v24492_v16, %v14183_v4  ;;  %v21620_v4 = vpack.c.bf16 %v14453_v63, %v14452_v53  ;;  %v14787_v53 = vld [vmem:[#allocation33 + $0x6b8] sm:$0xff] }
0x3b87   :  { %20107 = vmatprep.subr.msk.mxu1 %vm544_vm1, %v24496_v9  ;;  %20187 = vmatprep.subr.msk.mxu0 %vm544_vm1, %v24496_v9 }
0x3b88   :  { %20108 = vmatpush3.msk.msra.mxu1 %vm544_vm1, %v24496_v9  ;;  %20188 = vmatpush3.msk.msra.mxu0 %vm544_vm1, %v24496_v9 }
0x3b89   :  { %20110 = vmatmul.mubr.msk.f32.vlgmr.msra.gmra.mrb[92].mxu1 %vm537_vm2, %v22224_v2  ;;  %21569 = vmatprep.subr.bf16.mxu1 %v21568_v8  ;;  %v14457_v2 = vld [vmem:[#allocation33 + $0x5f8] sm:$0xff] }
0x3b8a   :  { %20190 = vmatmul.mubr.msk.f32.vlgmr.msra.gmra.mrb[164].mxu0 %vm537_vm2, %v22225_v10  ;;  %20227 = vmatprep.subr.msk.mxu0 %vm544_vm1, %v24496_v9  ;;  %v21632_v10 = vpack.c.bf16 %v14612_v33, %v14611_v3  ;;  %v14793_v3 = vld [vmem:[#allocation33 + $0x6e8] sm:$0xff] }
0x3b8b   :  { %21571 = vmatpush3.bf16.msra.mxu1 %v21568_v8  ;;  %20228 = vmatpush3.msk.msra.mxu0 %vm544_vm1, %v24496_v9  ;;  %v14454_v8 = vld [vmem:[#allocation33 + $0x5e0] sm:$0xff] }
0x3b8c   :  { %20267 = vmatprep.subr.msk.mxu0 %vm544_vm1, %v24496_v9  ;;  %20229 = vmatprep.mubr.msk.f32.mxu0 %vm537_vm2, %v22226_v58 }
0x3b8d   :  { %21573 = vmatprep.subr.bf16.mxu1 %v21572_v17 }
0x3b8e   :  { %20230 = vmatmul.mubr.msk.f32.vlgmr.msra.gmra.mrb[166].mxu0 %vm537_vm2, %v22227_v5 }
0x3b8f   :  { %20268 = vmatpush3.msk.msra.mxu0 %vm544_vm1, %v24496_v9  ;;  %21575 = vmatpush3.bf16.msra.mxu1 %v21572_v17  ;;  %v21628_v17 = vpack.c.bf16 %v14457_v2, %v14456_v37  ;;  %v14791_v37 = vld [vmem:[#allocation33 + $0x6d8] sm:$0xff] }
0x3b90   :  { %21577 = vmatprep.subr.bf16.mxu1 %v21576_v62  ;;  %20269 = vmatprep.mubr.msk.f32.mxu0 %vm537_vm2, %v22228_v23  ;;  %v14613_v23 = vld [vmem:[#allocation33 + $0x610] sm:$0xff] }
0x3b91   :  { %21728 = vmatprep.subr.bf16.mxu0 %v22810_v54 }
0x3b92   :  { %20270 = vmatmul.mubr.msk.f32.vlgmr.msra.gmra.mrb[168].mxu0 %vm537_vm2, %v22229_v31 }
0x3b93   :  { %21579 = vmatpush3.bf16.msra.mxu1 %v21576_v62  ;;  %20311 = vmatprep.mubr.msk.f32.mxu0 %vm22811_vm7, %v22812_v55 }
0x3b94   :  { %21581 = vmatprep.subr.bf16.mxu1 %v21580_v35 }
0x3b97   :  { %21583 = vmatpush3.bf16.msra.mxu1 %v21580_v35 }
0x3b98   :  { %21585 = vmatprep.subr.bf16.mxu1 %v21584_v38 }
0x3b9b   :  { %21587 = vmatpush3.bf16.msra.mxu1 %v21584_v38  ;;  %v21636_v38 = vpack.c.bf16 %v14614_v1, %v14613_v23  ;;  %v14950_v23 = vld [vmem:[#allocation33 + $0x708] sm:$0xff] }
0x3b9c   :  { %21589 = vmatprep.subr.bf16.mxu1 %v21588_v44 }
0x3b9f   :  { %21591 = vmatpush3.bf16.msra.mxu1 %v21588_v44  ;;  %v21640_v44 = vpack.c.bf16 %v14616_v39, %v14615_v18  ;;  %v14953_v18 = vld [vmem:[#allocation33 + $0x720] sm:$0xff]  ;;  %v14954_v39 = vld [vmem:[#allocation33 + $0x728] sm:$0xff] }
0x3ba0   :  { %21593 = vmatprep.subr.bf16.mxu1 %v21592_v40 }
0x3ba3   :  { %21595 = vmatpush3.bf16.msra.mxu1 %v21592_v40  ;;  %v21644_v40 = vpack.c.bf16 %v14618_v46, %v14617_v45  ;;  %v14955_v45 = vld [vmem:[#allocation33 + $0x730] sm:$0xff]  ;;  %v14956_v46 = vld [vmem:[#allocation33 + $0x738] sm:$0xff] }
0x3ba4   :  { %21597 = vmatprep.subr.bf16.mxu1 %v21596_v6 }
0x3ba7   :  { %21599 = vmatpush3.bf16.msra.mxu1 %v21596_v6  ;;  %v21648_v6 = vpack.c.bf16 %v14620_v47, %v14619_v0  ;;  %v14957_v0 = vld [vmem:[#allocation33 + $0x740] sm:$0xff]  ;;  %v14958_v47 = vld [vmem:[#allocation33 + $0x748] sm:$0xff] }
0x3ba8   :  { %20147 = vmatprep.subr.msk.mxu1 %vm544_vm1, %v24496_v9 }
0x3c5c   :  { %v20111_v48 = vpop.f32.mrb[92].mxu1 }
0x3c5d   :  { %v14257_v50 = vpop.f32.mrb[93].mxu1  ;;  %v20191_v58 = vpop.f32.mrb[164].mxu0 }
0x3c5e   :  { %20144 = vmatprep.mubr.f32.mxu1 %v14257_v50  ;;  %v14601_v62 = vpop.f32.mrb[165].mxu0  ;;  %v14623_v50 = vld [vmem:[#allocation33 + $0x660] sm:$0xff] }
0x3c5f   :  { %20145 = vmatmul.mubr.f32.vlgmr.msra.gmra.mrb[94].mxu1 %v20111_v48  ;;  %v21652_v48 = vpack.c.bf16 %v14622_v15, %v14621_v61  ;;  %v14959_v61 = vld [vmem:[#allocation33 + $0x750] sm:$0xff]  ;;  %v14960_v15 = vld [vmem:[#allocation33 + $0x758] sm:$0xff] }
0x3c60   :  { %20148 = vmatpush3.msk.msra.mxu1 %vm544_vm1, %v24496_v9  ;;  %20149 = vmatprep.mubr.msk.f32.mxu1 %vm537_vm2, %v22230_v36  ;;  %v14455_v9 = vld [vmem:[#allocation33 + $0x5e8] sm:$0xff]  ;;  %v14626_v36 = vld [vmem:[#allocation33 + $0x678] sm:$0xff] }
0x3c61   :  { %21601 = vmatprep.subr.bf16.mxu1 %v21600_v24  ;;  %v21624_v28 = vpack.c.bf16 %v14455_v9, %v14454_v8  ;;  %v24537_v14 = vpop.f32.mrb[166].mxu0  ;;  %v14789_v8 = vld [vmem:[#allocation33 + $0x6c8] sm:$0xff] }
0x3c62   :  { %v14770_v60 = vpop.f32.mrb[167].mxu0 }
0x3c63   :  { %20150 = vmatmul.mubr.msk.f32.vlgmr.msra.gmra.mrb[96].mxu1 %vm537_vm2, %v22231_v13  ;;  %v21664_v13 = vpack.c.bf16 %v14781_v11, %v14780_v41 }
0x3c64   :  { %21603 = vmatpush3.bf16.msra.mxu1 %v21600_v24  ;;  %v14624_v24 = vld [vmem:[#allocation33 + $0x668] sm:$0xff] }
0x3c65   :  { %21605 = vmatprep.subr.bf16.mxu1 %v21604_v57  ;;  %v24539_v5 = vpop.f32.mrb[168].mxu0  ;;  %v21656_v51 = vpack.c.bf16 %v14624_v24, %v14623_v50  ;;  %v14962_v50 = vld [vmem:[#allocation33 + $0x768] sm:$0xff]  ;;  %v14963_v24 = vld [vmem:[#allocation33 + $0x770] sm:$0xff] }
0x3c66   :  { %v24541_v35 = vpop.f32.mrb[169].mxu0 }
0x3c68   :  { %21607 = vmatpush3.bf16.msra.mxu1 %v21604_v57  ;;  %v21660_v57 = vpack.c.bf16 %v14626_v36, %v14625_v52  ;;  %v17122_v36 = vld [vmem:[#allocation34 + $0x2] ss:$0 sm:$0xff] }
0x3c69   :  { %21609 = vmatprep.subr.bf16.mxu1 %v21608_v29 }
0x3c6c   :  { %21611 = vmatpush3.bf16.msra.mxu1 %v21608_v29  ;;  %v14782_v29 = vld [vmem:[#allocation33 + $0x690] sm:$0xff] }
0x3c6d   :  { %21613 = vmatprep.subr.bf16.mxu1 %v21612_v32  ;;  %v21668_v34 = vpack.c.bf16 %v14783_v12, %v14782_v29 }
0x3c70   :  { %21615 = vmatpush3.bf16.msra.mxu1 %v21612_v32  ;;  %v14784_v32 = vld [vmem:[#allocation33 + $0x6a0] sm:$0xff] }
0x3c71   :  { %21617 = vmatprep.subr.bf16.mxu1 %v21616_v43  ;;  %v21672_v27 = vpack.c.bf16 %v14785_v22, %v14784_v32  ;;  %v15122_v22 = vld [vmem:[#allocation33 + $0x780] sm:$0xff] }
0x3c74   :  { %21619 = vmatpush3.bf16.msra.mxu1 %v21616_v43  ;;  %v14786_v43 = vld [vmem:[#allocation33 + $0x6b0] sm:$0xff] }
0x3c75   :  { %21621 = vmatprep.subr.bf16.mxu1 %v21620_v4  ;;  %v21676_v63 = vpack.c.bf16 %v14787_v53, %v14786_v43  ;;  %v15124_v53 = vld [vmem:[#allocation33 + $0x790] sm:$0xff] }
0x3c78   :  { %21623 = vmatpush3.bf16.msra.mxu1 %v21620_v4  ;;  %v14788_v4 = vld [vmem:[#allocation33 + $0x6c0] sm:$0xff] }
0x3c79   :  { %21625 = vmatprep.subr.bf16.mxu1 %v21624_v28  ;;  %v21680_v9 = vpack.c.bf16 %v14789_v8, %v14788_v4  ;;  %v22232_v4 = vld [vmem:[#allocation31] sm:$0x3] }
0x3c7c   :  { %21627 = vmatpush3.bf16.msra.mxu1 %v21624_v28  ;;  %v14790_v28 = vld [vmem:[#allocation33 + $0x6d0] sm:$0xff] }
0x3c7d   :  { %21629 = vmatprep.subr.bf16.mxu1 %v21628_v17  ;;  %v21684_v2 = vpack.c.bf16 %v14791_v37, %v14790_v28  ;;  %v15127_v28 = vld [vmem:[#allocation33 + $0x7a8] sm:$0xff]  ;;  %v15128_v37 = vld [vmem:[#allocation33 + $0x7b0] sm:$0xff] }
0x3c80   :  { %21631 = vmatpush3.bf16.msra.mxu1 %v21628_v17  ;;  %v14792_v17 = vld [vmem:[#allocation33 + $0x6e0] sm:$0xff] }
0x3c81   :  { %21633 = vmatprep.subr.bf16.mxu1 %v21632_v10  ;;  %v21688_v33 = vpack.c.bf16 %v14793_v3, %v14792_v17  ;;  %v15130_v3 = vld [vmem:[#allocation33 + $0x7c0] sm:$0xff] }
0x3d36   :  { %v20151_v7 = vpop.f32.mrb[96].mxu1 }
0x3d37   :  { %v14432_v31 = vpop.f32.mrb[97].mxu1 }
0x3d38   :  { %20184 = vmatprep.mubr.f32.mxu1 %v14432_v31  ;;  %v14952_v31 = vld [vmem:[#allocation33 + $0x718] sm:$0xff] }
0x3d39   :  { %20185 = vmatmul.mubr.f32.vlgmr.msra.gmra.mrb[94].mxu1 %v20151_v7  ;;  %v14951_v7 = vld [vmem:[#allocation33 + $0x710] sm:$0xff] }
0x3d3a   :  { %21635 = vmatpush3.bf16.msra.mxu1 %v21632_v10  ;;  %20224 = vmatprep.mubr.f32.mxu1 %v14601_v62  ;;  %v14794_v10 = vld [vmem:[#allocation33 + $0x6f0] sm:$0xff] }
0x3d3b   :  { %21637 = vmatprep.subr.bf16.mxu1 %v21636_v38 }
0x3d3e   :  { %21639 = vmatpush3.bf16.msra.mxu1 %v21636_v38  ;;  %v21700_v38 = vpack.c.bf16 %v14952_v31, %v14951_v7  ;;  %v15136_v7 = vld [vmem:[#allocation33 + $0x7f0] sm:$0xff]  ;;  %v15137_v31 = vld [vmem:[#allocation33 + $0x7f8] sm:$0xff] }
0x3d3f   :  { %21641 = vmatprep.subr.bf16.mxu1 %v21640_v44 }
0x3d42   :  { %21643 = vmatpush3.bf16.msra.mxu1 %v21640_v44  ;;  %v21704_v44 = vpack.c.bf16 %v14954_v39, %v14953_v18  ;;  %v15286_v18 = vld [vmem:[#allocation33 + $0x800] sm:$0xff]  ;;  %v15287_v39 = vld [vmem:[#allocation33 + $0x808] sm:$0xff] }
0x3d43   :  { %21645 = vmatprep.subr.bf16.mxu1 %v21644_v40 }
0x3d46   :  { %21647 = vmatpush3.bf16.msra.mxu1 %v21644_v40  ;;  %v21708_v40 = vpack.c.bf16 %v14956_v46, %v14955_v45  ;;  %v21761_v46 = vpack.c.bf16 %v15287_v39, %v15286_v18 }
0x3d47   :  { %21649 = vmatprep.subr.bf16.mxu1 %v21648_v6 }
0x3d4a   :  { %21651 = vmatpush3.bf16.msra.mxu1 %v21648_v6  ;;  %v21712_v6 = vpack.c.bf16 %v14958_v47, %v14957_v0  ;;  %v15289_v0 = vld [vmem:[#allocation33 + $0x818] sm:$0xff] }
0x3d4b   :  { %21653 = vmatprep.subr.bf16.mxu1 %v21652_v48  ;;  %v22233_v47 = vld [vmem:[#allocation31 + $0x2] sm:$0x3] }
0x3d4e   :  { %21655 = vmatpush3.bf16.msra.mxu1 %v21652_v48  ;;  %v14961_v48 = vld [vmem:[#allocation33 + $0x760] sm:$0xff] }
0x3d4f   :  { %21657 = vmatprep.subr.bf16.mxu1 %v21656_v51 }
0x3d52   :  { %21659 = vmatpush3.bf16.msra.mxu1 %v21656_v51  ;;  %v14964_v51 = vld [vmem:[#allocation33 + $0x778] sm:$0xff] }
0x3d53   :  { %21661 = vmatprep.subr.bf16.mxu1 %v21660_v57  ;;  %v21724_v52 = vpack.c.bf16 %v14964_v51, %v14963_v24  ;;  %v15294_v24 = vld [vmem:[#allocation33 + $0x840] sm:$0xff]  ;;  %v15295_v51 = vld [vmem:[#allocation33 + $0x848] sm:$0xff] }
0x3d56   :  { %21663 = vmatpush3.bf16.msra.mxu1 %v21660_v57 }
0x3d57   :  { %21665 = vmatprep.subr.bf16.mxu1 %v21664_v13 }
0x3d59   :  { %20225 = vmatmul.mubr.f32.vlgmr.msra.gmra.mrb[94].mxu1 %v20191_v58  ;;  %v14795_v58 = vld [vmem:[#allocation33 + $0x6f8] sm:$0xff] }
0x3d5a   :  { %21667 = vmatpush3.bf16.msra.mxu1 %v21664_v13  ;;  %20264 = vmatprep.mubr.f32.mxu1 %v14770_v60  ;;  %v21692_v62 = vpack.c.bf16 %v14795_v58, %v14794_v10  ;;  %v14949_v60 = vld [vmem:[#allocation33 + $0x700] sm:$0xff]  ;;  %v15133_v58 = vld [vmem:[#allocation33 + $0x7d8] sm:$0xff] }
0x3d5b   :  { %21669 = vmatprep.subr.bf16.mxu1 %v21668_v34  ;;  %v21696_v1 = vpack.c.bf16 %v14950_v23, %v14949_v60  ;;  %v15134_v60 = vld [vmem:[#allocation33 + $0x7e0] sm:$0xff]  ;;  %v15135_v23 = vld [vmem:[#allocation33 + $0x7e8] sm:$0xff] }
0x3d5e   :  { %21671 = vmatpush3.bf16.msra.mxu1 %v21668_v34 }
0x3d5f   :  { %21673 = vmatprep.subr.bf16.mxu1 %v21672_v27 }
0x3d62   :  { %21675 = vmatpush3.bf16.msra.mxu1 %v21672_v27  ;;  %v15123_v27 = vld [vmem:[#allocation33 + $0x788] sm:$0xff] }
0x3d63   :  { %21677 = vmatprep.subr.bf16.mxu1 %v21676_v63 }
0x3d66   :  { %21679 = vmatpush3.bf16.msra.mxu1 %v21676_v63  ;;  %v15125_v63 = vld [vmem:[#allocation33 + $0x798] sm:$0xff] }
0x3d67   :  { %21681 = vmatprep.subr.bf16.mxu1 %v21680_v9  ;;  %v21736_v8 = vpack.c.bf16 %v15125_v63, %v15124_v53 }
0x3d6a   :  { %21683 = vmatpush3.bf16.msra.mxu1 %v21680_v9  ;;  %v15126_v9 = vld [vmem:[#allocation33 + $0x7a0] sm:$0xff] }
0x3d6b   :  { %21685 = vmatprep.subr.bf16.mxu1 %v21684_v2 }
0x3d6e   :  { %21687 = vmatpush3.bf16.msra.mxu1 %v21684_v2  ;;  %v15129_v2 = vld [vmem:[#allocation33 + $0x7b8] sm:$0xff] }
0x3d6f   :  { %21689 = vmatprep.subr.bf16.mxu1 %v21688_v33  ;;  %v21742_v17 = vpack.c.bf16 %v15129_v2, %v15128_v37  ;;  %v15450_v37 = vld [vmem:[#allocation33 + $0x8b0] sm:$0xff]  ;;  %v15451_v2 = vld [vmem:[#allocation33 + $0x8b8] sm:$0xff] }
0x3d72   :  { %21691 = vmatpush3.bf16.msra.mxu1 %v21688_v33  ;;  %v15131_v33 = vld [vmem:[#allocation33 + $0x7c8] sm:$0xff] }
0x3d73   :  { %21693 = vmatprep.subr.bf16.mxu1 %v21692_v62  ;;  %v21745_v10 = vpack.c.bf16 %v15131_v33, %v15130_v3  ;;  %v15452_v3 = vld [vmem:[#allocation33 + $0x8c0] sm:$0xff]  ;;  %v15453_v33 = vld [vmem:[#allocation33 + $0x8c8] sm:$0xff] }
0x3d76   :  { %21695 = vmatpush3.bf16.msra.mxu1 %v21692_v62 }
0x3d77   :  { %21697 = vmatprep.subr.bf16.mxu1 %v21696_v1 }
0x3d79   :  { %20265 = vmatmul.mubr.f32.vlgmr.msra.gmra.mrb[94].mxu1 %v24537_v14  ;;  %v21716_v14 = vpack.c.bf16 %v14960_v15, %v14959_v61  ;;  %v15290_v61 = vld [vmem:[#allocation33 + $0x820] sm:$0xff]  ;;  %v15291_v15 = vld [vmem:[#allocation33 + $0x828] sm:$0xff] }
0x3d7a   :  { %21699 = vmatpush3.bf16.msra.mxu1 %v21696_v1  ;;  %20304 = vmatprep.mubr.f32.mxu1 %v24541_v35  ;;  %v21720_v35 = vpack.c.bf16 %v14962_v50, %v14961_v48  ;;  %v21751_v1 = vpack.c.bf16 %v15135_v23, %v15134_v60  ;;  %v15292_v48 = vld [vmem:[#allocation33 + $0x830] sm:$0xff]  ;;  %v15293_v50 = vld [vmem:[#allocation33 + $0x838] sm:$0xff]  ;;  %v15456_v60 = vld [vmem:[#allocation33 + $0x8e0] sm:$0xff] }
0x3d7b   :  { %21701 = vmatprep.subr.bf16.mxu1 %v21700_v38  ;;  %v15457_v23 = vld [vmem:[#allocation33 + $0x8e8] sm:$0xff] }
0x3d7e   :  { %21703 = vmatpush3.bf16.msra.mxu1 %v21700_v38  ;;  %v21754_v38 = vpack.c.bf16 %v15137_v31, %v15136_v7  ;;  %v15458_v7 = vld [vmem:[#allocation33 + $0x8f0] sm:$0xff]  ;;  %v15459_v31 = vld [vmem:[#allocation33 + $0x8f8] sm:$0xff] }
0x3d7f   :  { %21705 = vmatprep.subr.bf16.mxu1 %v21704_v44 }
0x3d82   :  { %21707 = vmatpush3.bf16.msra.mxu1 %v21704_v44 }
0x3d83   :  { %21709 = vmatprep.subr.bf16.mxu1 %v21708_v40 }
0x3d86   :  { %21711 = vmatpush3.bf16.msra.mxu1 %v21708_v40  ;;  %v15288_v40 = vld [vmem:[#allocation33 + $0x810] sm:$0xff] }
0x3d87   :  { %21713 = vmatprep.subr.bf16.mxu1 %v21712_v6 }
0x3d8a   :  { %21715 = vmatpush3.bf16.msra.mxu1 %v21712_v6  ;;  %v21764_v6 = vpack.c.bf16 %v15289_v0, %v15288_v40  ;;  %v15603_v40 = vld [vmem:[#allocation33 + $0x908] sm:$0xff] }
0x3d8b   :  { %21717 = vmatprep.subr.bf16.mxu1 %v21716_v14 }
0x3d8e   :  { %21719 = vmatpush3.bf16.msra.mxu1 %v21716_v14  ;;  %v21767_v14 = vpack.c.bf16 %v15291_v15, %v15290_v61 }
0x3d8f   :  { %21721 = vmatprep.subr.bf16.mxu1 %v21720_v35 }
0x3d92   :  { %21723 = vmatpush3.bf16.msra.mxu1 %v21720_v35  ;;  %v21770_v35 = vpack.c.bf16 %v15293_v50, %v15292_v48  ;;  %v15606_v48 = vld [vmem:[#allocation33 + $0x920] sm:$0xff]  ;;  %v15607_v50 = vld [vmem:[#allocation33 + $0x928] sm:$0xff] }
0x3d93   :  { %21725 = vmatprep.subr.bf16.mxu1 %v21724_v52 }
0x3d96   :  { %21727 = vmatpush3.bf16.msra.mxu1 %v21724_v52  ;;  %v21773_v52 = vpack.c.bf16 %v15295_v51, %v15294_v24  ;;  %v15608_v24 = vld [vmem:[#allocation33 + $0x930] sm:$0xff]  ;;  %v15609_v51 = vld [vmem:[#allocation33 + $0x938] sm:$0xff] }
0x3d97   :  { %21812 = vmatprep.subr.bf16.mxu1 %v22810_v54 }
0x3d99   :  { %20305 = vmatmul.mubr.f32.vlgmr.msra.gmra.mrb[94].mxu1 %v24539_v5  ;;  %v21733_v5 = vpack.c.bf16 %v15123_v27, %v15122_v22  ;;  %v15444_v22 = vld [vmem:[#allocation33 + $0x880] sm:$0xff]  ;;  %v15445_v27 = vld [vmem:[#allocation33 + $0x888] sm:$0xff] }
0x3d9a   :  { %20437 = vmatprep.mubr.msk.f32.mxu1 %vm22811_vm7, %v22812_v55  ;;  %v21789_v63 = vpack.c.bf16 %v15445_v27, %v15444_v22  ;;  %v15616_v22 = vld [vmem:[#allocation33 + $0x970] sm:$0xff]  ;;  %v15617_v27 = vld [vmem:[#allocation33 + $0x978] sm:$0xff] }
0x3e6c   :  { %v20306_v57 = vpop.f32.mrb[94].mxu1 }
0x3e6d   :  { %v21904_v41 = vadd.f32 %v20306_v57, %v17122_v36  ;;  %v15031_v11 = vpop.f32.mrb[95].mxu1  ;;  %v15297_v57 = vld [vmem:[#allocation33 + $0x858] sm:$0xff] }
0x3e6e   :  { %v21905_v13 = vadd.f32 %v17122_v36, %v15031_v11  ;;  %v15296_v36 = vld [vmem:[#allocation33 + $0x850] sm:$0xff]  ;;  %v15298_v11 = vld [vmem:[#allocation33 + $0x860] sm:$0xff] }
0x3e6f   :  { %v15043_v29 = vmul.f32 0.01, %v21904_v41 }
0x3e70   :  { %v15042_v12 = vmul.f32 0.01, %v21905_v13 }
0x3e71   :  { %v15045_v34 = vmax.f32 %v21904_v41, %v15043_v29  ;;  %v21776_v41 = vpack.c.bf16 %v15297_v57, %v15296_v36  ;;  %v15610_v36 = vld [vmem:[#allocation33 + $0x940] sm:$0xff]  ;;  %v15611_v57 = vld [vmem:[#allocation33 + $0x948] sm:$0xff] }
0x3e72   :  { %v15044_v32 = vmax.f32 %v21905_v13, %v15042_v12  ;;  %v15299_v13 = vld [vmem:[#allocation33 + $0x868] sm:$0xff]  ;;  %v15300_v12 = vld [vmem:[#allocation33 + $0x870] sm:$0xff] }
0x3e73   :  { %v21779_v29 = vpack.c.bf16 %v15299_v13, %v15298_v11  ;;  %v15612_v11 = vld [vmem:[#allocation33 + $0x950] sm:$0xff]  ;;  %v15613_v13 = vld [vmem:[#allocation33 + $0x958] sm:$0xff] }
0x3e74   :  { %v24549_v43 = vpack.c.bf16 %v15045_v34, %v15044_v32  ;;  %v15301_v34 = vld [vmem:[#allocation33 + $0x878] sm:$0xff] }
0x3e75   :  { %v21782_v32 = vpack.c.bf16 %v15301_v34, %v15300_v12  ;;  %v15614_v12 = vld [vmem:[#allocation33 + $0x960] sm:$0xff]  ;;  %v15615_v34 = vld [vmem:[#allocation33 + $0x968] sm:$0xff] }
0x3e76   :  { %21731 = vmatpush3.bf16.msk.msra.mxu0 %vm24390_vm10, %v24549_v43  ;;  %21815 = vmatpush3.bf16.msk.msra.mxu1 %vm24390_vm10, %v24549_v43 }
0x3e77   :  { %21840 = vmatprep.subr.bf16.mxu1 %v22810_v54  ;;  %21732 = vmatprep.subr.bf16.mxu0 %v22810_v54 }
0x3e79   :  { %20312 = vmatmul.mubr.msk.f32.vlgmr.msra.gmra.mrb[170].mxu0 %vm13349_vm11, %v22232_v4  ;;  %20438 = vmatmul.mubr.msk.f32.vlgmr.msra.gmra.mrb[98].mxu1 %vm13349_vm11, %v24459_v49  ;;  %v21739_v49 = vpack.c.bf16 %v15127_v28, %v15126_v9  ;;  %v15446_v4 = vld [vmem:[#allocation33 + $0x890] sm:$0xff]  ;;  %v22234_v9 = vld [vmem:[#allocation31 + $0x4] sm:$0x3] }
0x3e7a   :  { %21843 = vmatpush3.bf16.msk.msra.mxu1 %vm24390_vm10, %v24549_v43  ;;  %21734 = vmatpush3.bf16.msra.mxu0 %v21733_v5 }
0x3e7b   :  { %21735 = vmatprep.subr.bf16.mxu0 %v22810_v54  ;;  %20346 = vmatprep.mubr.msk.f32.mxu0 %vm22811_vm7, %v22812_v55 }
0x3e7c   :  { %20479 = vmatprep.mubr.msk.f32.mxu1 %vm22811_vm7, %v22812_v55  ;;  %20517 = vmatprep.subr.mxu1 %v22812_v55 }
0x3e7d   :  { %20480 = vmatmul.mubr.msk.f32.vlgmr.msra.gmra.mrb[100].mxu1 %vm13349_vm11, %v24448_v56  ;;  %v15132_v56 = vld [vmem:[#allocation33 + $0x7d0] sm:$0xff] }
0x3e7e   :  { %21737 = vmatpush3.bf16.msra.mxu0 %v21736_v8  ;;  %20519 = vmatprep.mubr.msk.f32.mxu1 %vm22811_vm7, %v22812_v55  ;;  %v21748_v62 = vpack.c.bf16 %v15133_v58, %v15132_v56  ;;  %v15447_v8 = vld [vmem:[#allocation33 + $0x898] sm:$0xff]  ;;  %v15454_v56 = vld [vmem:[#allocation33 + $0x8d0] sm:$0xff] }
0x3e7f   :  { %21738 = vmatprep.subr.bf16.mxu0 %v22810_v54  ;;  %v21792_v28 = vpack.c.bf16 %v15447_v8, %v15446_v4  ;;  %v15455_v58 = vld [vmem:[#allocation33 + $0x8d8] sm:$0xff]  ;;  %v15762_v8 = vld [vmem:[#allocation33 + $0x990] sm:$0xff] }
0x3e82   :  { %21740 = vmatpush3.bf16.msra.mxu0 %v21739_v49 }
0x3e83   :  { %21741 = vmatprep.subr.bf16.mxu0 %v22810_v54 }
0x3e86   :  { %21743 = vmatpush3.bf16.msra.mxu0 %v21742_v17  ;;  %v21798_v17 = vpack.c.bf16 %v15451_v2, %v15450_v37  ;;  %v15766_v37 = vld [vmem:[#allocation33 + $0x9b0] sm:$0xff]  ;;  %v15767_v2 = vld [vmem:[#allocation33 + $0x9b8] sm:$0xff] }
0x3e87   :  { %21744 = vmatprep.subr.bf16.mxu0 %v22810_v54 }
0x3e8a   :  { %21746 = vmatpush3.bf16.msra.mxu0 %v21745_v10  ;;  %v21801_v10 = vpack.c.bf16 %v15453_v33, %v15452_v3  ;;  %v15768_v3 = vld [vmem:[#allocation33 + $0x9c0] sm:$0xff]  ;;  %v15769_v33 = vld [vmem:[#allocation33 + $0x9c8] sm:$0xff] }
0x3e8b   :  { %21747 = vmatprep.subr.bf16.mxu0 %v22810_v54 }
0x3e8e   :  { %21749 = vmatpush3.bf16.msra.mxu0 %v21748_v62  ;;  %v21804_v62 = vpack.c.bf16 %v15455_v58, %v15454_v56  ;;  %v15770_v56 = vld [vmem:[#allocation33 + $0x9d0] sm:$0xff]  ;;  %v15771_v58 = vld [vmem:[#allocation33 + $0x9d8] sm:$0xff] }
0x3e8f   :  { %21750 = vmatprep.subr.bf16.mxu0 %v22810_v54 }
0x3e92   :  { %21752 = vmatpush3.bf16.msra.mxu0 %v21751_v1  ;;  %v21807_v1 = vpack.c.bf16 %v15457_v23, %v15456_v60  ;;  %v15772_v60 = vld [vmem:[#allocation33 + $0x9e0] sm:$0xff]  ;;  %v15773_v23 = vld [vmem:[#allocation33 + $0x9e8] sm:$0xff] }
0x3e93   :  { %21753 = vmatprep.subr.bf16.mxu0 %v22810_v54 }
0x3e96   :  { %21755 = vmatpush3.bf16.msra.mxu0 %v21754_v38  ;;  %v21810_v38 = vpack.c.bf16 %v15459_v31, %v15458_v7  ;;  %v15774_v7 = vld [vmem:[#allocation33 + $0x9f0] sm:$0xff]  ;;  %v15775_v31 = vld [vmem:[#allocation33 + $0x9f8] sm:$0xff] }
0x3e97   :  { %21756 = vmatprep.subr.bf16.mxu0 %v22810_v54 }
0x3f4c   :  { %v15117_v44 = vpop.f32.mrb[170].mxu0  ;;  %v15597_v18 = vpop.f32.mrb[98].mxu1 }
0x3f4d   :  { %20347 = vmatmul.mubr.f32.vlgmr.msra.gmra.mrb[172].mxu0 %v15117_v44  ;;  %v20313_v45 = vpop.f32.mrb[171].mxu0  ;;  %v20439_v39 = vpop.f32.mrb[99].mxu1 }
0x3f4e   :  { %21759 = vmatpush3.bf16.msk.msra.mxu0 %vm24390_vm10, %v24549_v43  ;;  %20353 = vmatprep.mubr.msk.f32.mxu0 %vm22811_vm7, %v22812_v55 }
0x3f4f   :  { %21760 = vmatprep.subr.bf16.mxu0 %v22810_v54 }
0x3f50   :  { %v24616_v44 = vpop.f32.mrb[100].mxu1 }
0x3f51   :  { %20354 = vmatmul.mubr.msk.f32.vlgmr.msra.gmra.mrb[174].mxu0 %vm13349_vm11, %v22233_v47  ;;  %v20481_v45 = vpop.f32.mrb[101].mxu1  ;;  %v15604_v47 = vld [vmem:[#allocation33 + $0x910] sm:$0xff] }
0x3f52   :  { %21762 = vmatpush3.bf16.msra.mxu0 %v21761_v46  ;;  %20388 = vmatprep.mubr.msk.f32.mxu0 %vm22811_vm7, %v22812_v55  ;;  %v15602_v46 = vld [vmem:[#allocation33 + $0x900] sm:$0xff] }
0x3f53   :  { %21763 = vmatprep.subr.bf16.mxu0 %v22810_v54  ;;  %v21817_v0 = vpack.c.bf16 %v15603_v40, %v15602_v46 }
0x3f56   :  { %21765 = vmatpush3.bf16.msra.mxu0 %v21764_v6  ;;  %v15605_v6 = vld [vmem:[#allocation33 + $0x918] sm:$0xff] }
0x3f57   :  { %21766 = vmatprep.subr.bf16.mxu0 %v22810_v54 }
0x3f5a   :  { %21768 = vmatpush3.bf16.msra.mxu0 %v21767_v14  ;;  %v21820_v14 = vpack.c.bf16 %v15605_v6, %v15604_v47 }
0x3f5b   :  { %21769 = vmatprep.subr.bf16.mxu0 %v22810_v54 }
0x3f5e   :  { %21771 = vmatpush3.bf16.msra.mxu0 %v21770_v35  ;;  %v21823_v35 = vpack.c.bf16 %v15607_v50, %v15606_v48  ;;  %v17151_v50 = vld [vmem:[%s24786_s30 + $0x8] sm:$0xff] }
0x3f5f   :  { %21772 = vmatprep.subr.bf16.mxu0 %v22810_v54 }
0x3f62   :  { %21774 = vmatpush3.bf16.msra.mxu0 %v21773_v52  ;;  %v21826_v52 = vpack.c.bf16 %v15609_v51, %v15608_v24  ;;  %v16015_v24 = vld [vmem:[%s24786_s30] sm:$0xff]  ;;  %v17156_v51 = vld [vmem:[%s24787_s3 + $0x10] sm:$0xff] }
0x3f63   :  { %21775 = vmatprep.subr.bf16.mxu0 %v22810_v54 }
0x3f66   :  { %21777 = vmatpush3.bf16.msra.mxu0 %v21776_v41  ;;  %v21829_v41 = vpack.c.bf16 %v15611_v57, %v15610_v36 }
0x3f67   :  { %21778 = vmatprep.subr.bf16.mxu0 %v22810_v54 }
0x3f6a   :  { %21780 = vmatpush3.bf16.msra.mxu0 %v21779_v29  ;;  %v21832_v29 = vpack.c.bf16 %v15613_v13, %v15612_v11  ;;  %v16171_v11 = vld [vmem:[%s24787_s3] sm:$0xff]  ;;  %v16172_v13 = vld [vmem:[%s24787_s3 + $0x8] sm:$0xff] }
0x3f6b   :  { %21781 = vmatprep.subr.bf16.mxu0 %v22810_v54 }
0x3f6e   :  { %21783 = vmatpush3.bf16.msra.mxu0 %v21782_v32  ;;  %v21835_v32 = vpack.c.bf16 %v15615_v34, %v15614_v12 }
0x3f6f   :  { %21784 = vmatprep.subr.bf16.mxu0 %v22810_v54 }
0x4024   :  { %v15281_v5 = vpop.f32.mrb[174].mxu0 }
0x4025   :  { %20389 = vmatmul.mubr.f32.vlgmr.msra.gmra.mrb[172].mxu0 %v15281_v5  ;;  %v20355_v53 = vpop.f32.mrb[175].mxu0  ;;  %v21838_v5 = vpack.c.bf16 %v15617_v27, %v15616_v22 }
0x4026   :  { %21787 = vmatpush3.bf16.msk.msra.mxu0 %vm24390_vm10, %v24549_v43  ;;  %20395 = vmatprep.mubr.msk.f32.mxu0 %vm22811_vm7, %v22812_v55  ;;  %v15449_v43 = vld [vmem:[#allocation33 + $0x8a8] sm:$0xff]  ;;  %v15760_v53 = vld [vmem:[#allocation33 + $0x980] sm:$0xff] }
0x4027   :  { %21788 = vmatprep.subr.bf16.mxu0 %v22810_v54  ;;  %v21795_v49 = vpack.c.bf16 %v15449_v43, %v15448_v30  ;;  %v15764_v30 = vld [vmem:[#allocation33 + $0x9a0] sm:$0xff]  ;;  %v15765_v43 = vld [vmem:[#allocation33 + $0x9a8] sm:$0xff] }
0x4029   :  { %20396 = vmatmul.mubr.msk.f32.vlgmr.msra.gmra.mrb[176].mxu0 %vm13349_vm11, %v22234_v9  ;;  %v15763_v9 = vld [vmem:[#allocation33 + $0x998] sm:$0xff] }
0x402a   :  { %21790 = vmatpush3.bf16.msra.mxu0 %v21789_v63  ;;  %20430 = vmatprep.mubr.msk.f32.mxu0 %vm22811_vm7, %v22812_v55  ;;  %v15761_v63 = vld [vmem:[#allocation33 + $0x988] sm:$0xff] }
0x402b   :  { %21791 = vmatprep.subr.bf16.mxu0 %v22810_v54  ;;  %v21845_v4 = vpack.c.bf16 %v15761_v63, %v15760_v53 }
0x402e   :  { %21793 = vmatpush3.bf16.msra.mxu0 %v21792_v28  ;;  %v21848_v28 = vpack.c.bf16 %v15763_v9, %v15762_v8 }
0x402f   :  { %21794 = vmatprep.subr.bf16.mxu0 %v22810_v54 }
0x4032   :  { %21796 = vmatpush3.bf16.msra.mxu0 %v21795_v49  ;;  %v21851_v49 = vpack.c.bf16 %v15765_v43, %v15764_v30 }
0x4033   :  { %21797 = vmatprep.subr.bf16.mxu0 %v22810_v54 }
0x4036   :  { %21799 = vmatpush3.bf16.msra.mxu0 %v21798_v17  ;;  %v21854_v17 = vpack.c.bf16 %v15767_v2, %v15766_v37 }
0x4037   :  { %21800 = vmatprep.subr.bf16.mxu0 %v22810_v54 }
0x403a   :  { %21802 = vmatpush3.bf16.msra.mxu0 %v21801_v10  ;;  %v21857_v10 = vpack.c.bf16 %v15769_v33, %v15768_v3 }
0x403b   :  { %21803 = vmatprep.subr.bf16.mxu0 %v22810_v54 }
0x403e   :  { %21805 = vmatpush3.bf16.msra.mxu0 %v21804_v62  ;;  %v21860_v62 = vpack.c.bf16 %v15771_v58, %v15770_v56 }
0x403f   :  { %21806 = vmatprep.subr.bf16.mxu0 %v22810_v54 }
0x4042   :  { %21808 = vmatpush3.bf16.msra.mxu0 %v21807_v1  ;;  %v21863_v1 = vpack.c.bf16 %v15773_v23, %v15772_v60 }
0x4043   :  { %21809 = vmatprep.subr.bf16.mxu0 %v22810_v54 }
0x4046   :  { %21811 = vmatpush3.bf16.msra.mxu0 %v21810_v38  ;;  %v21866_v38 = vpack.c.bf16 %v15775_v31, %v15774_v7  ;;  %v16567_v31 = vld [vmem:[%s24789_s20] sm:$0xff] }
0x4047   :  { %21816 = vmatprep.subr.bf16.mxu0 %v22810_v54 }
0x40fc   :  { %v15439_v61 = vpop.f32.mrb[176].mxu0 }
0x40fd   :  { %20431 = vmatmul.mubr.f32.vlgmr.msra.gmra.mrb[172].mxu0 %v15439_v61  ;;  %v20397_v15 = vpop.f32.mrb[177].mxu0 }
0x40fe   :  { %21818 = vmatpush3.bf16.msra.mxu0 %v21817_v0  ;;  %20472 = vmatprep.mubr.msk.f32.mxu0 %vm22811_vm7, %v22812_v55 }
0x40ff   :  { %21819 = vmatprep.subr.bf16.mxu0 %v22810_v54 }
0x4102   :  { %21821 = vmatpush3.bf16.msra.mxu0 %v21820_v14 }
0x4103   :  { %21822 = vmatprep.subr.bf16.mxu0 %v22810_v54 }
0x4106   :  { %21824 = vmatpush3.bf16.msra.mxu0 %v21823_v35 }
0x4107   :  { %21825 = vmatprep.subr.bf16.mxu0 %v22810_v54 }
0x410a   :  { %21827 = vmatpush3.bf16.msra.mxu0 %v21826_v52 }
0x410b   :  { %21828 = vmatprep.subr.bf16.mxu0 %v22810_v54 }
0x410e   :  { %21830 = vmatpush3.bf16.msra.mxu0 %v21829_v41  ;;  %v17157_v41 = vld [vmem:[%s24787_s3 + $0x18] sm:$0xff] }
0x410f   :  { %21831 = vmatprep.subr.bf16.mxu0 %v22810_v54 }
0x4112   :  { %21833 = vmatpush3.bf16.msra.mxu0 %v21832_v29 }
0x4113   :  { %21834 = vmatprep.subr.bf16.mxu0 %v22810_v54 }
0x4116   :  { %21836 = vmatpush3.bf16.msra.mxu0 %v21835_v32 }
0x4117   :  { %21837 = vmatprep.subr.bf16.mxu0 %v22810_v54 }
0x411a   :  { %21839 = vmatpush3.bf16.msra.mxu0 %v21838_v5 }
0x411b   :  { %21844 = vmatprep.subr.bf16.mxu0 %v22810_v54 }
0x411d   :  { %20473 = vmatmul.mubr.f32.vlgmr.msra.gmra.mrb[172].mxu0 %v15597_v18  ;;  %v17137_v18 = vld [vmem:[#allocation34 + $0x3] ss:$0 sm:$0xff] }
0x411e   :  { %21846 = vmatpush3.bf16.msra.mxu0 %v21845_v4  ;;  %20514 = vmatprep.mubr.msk.f32.mxu0 %vm22811_vm7, %v22812_v55 }
0x411f   :  { %21847 = vmatprep.subr.bf16.mxu0 %v22810_v54 }
0x4122   :  { %21849 = vmatpush3.bf16.msra.mxu0 %v21848_v28 }
0x4123   :  { %21850 = vmatprep.subr.bf16.mxu0 %v22810_v54 }
0x4126   :  { %21852 = vmatpush3.bf16.msra.mxu0 %v21851_v49 }
0x4127   :  { %21853 = vmatprep.subr.bf16.mxu0 %v22810_v54 }
0x412a   :  { %21855 = vmatpush3.bf16.msra.mxu0 %v21854_v17 }
0x412b   :  { %21856 = vmatprep.subr.bf16.mxu0 %v22810_v54 }
0x412e   :  { %21858 = vmatpush3.bf16.msra.mxu0 %v21857_v10 }
0x412f   :  { %21859 = vmatprep.subr.bf16.mxu0 %v22810_v54 }
0x4132   :  { %21861 = vmatpush3.bf16.msra.mxu0 %v21860_v62 }
0x4133   :  { %21862 = vmatprep.subr.bf16.mxu0 %v22810_v54 }
0x4136   :  { %21864 = vmatpush3.bf16.msra.mxu0 %v21863_v1 }
0x4137   :  { %21865 = vmatprep.subr.bf16.mxu0 %v22810_v54 }
0x413a   :  { %21867 = vmatpush3.bf16.msra.mxu0 %v21866_v38 }
0x413d   :  { %20515 = vmatmul.mubr.f32.vlgmr.msra.gmra.mrb[172].mxu0 %v24616_v44  ;;  %v17146_v44 = vld [vmem:[%s24785_s10 + $0x4] sm:$0xf] }
0x4210   :  { %v15842_v39 = vpop.f32.mrb[172].mxu0 }
0x4211   :  { %v21906_v45 = vadd.f32 %v17137_v18, %v15842_v39  ;;  %v20516_v46 = vpop.f32.mrb[173].mxu0 }
0x4213   :  { %22222 = vtanh.f32 %v21906_v45 }
0x421d   :  { %v22223_v40 = vpop.eup %22222 }
0x421e   :  { %15850 = vrot.lane.b32.xlu1 %v22223_v40, %s22793_s16  ;;  %v15848_v6 = vadd.f32 %v22223_v40, %v24487_v42  ;;  %v15859_v42 = vld [vmem:[%s24785_s10] sm:$0xf] }
0x4290   :  { %v15851_v0 = vpop.permute.xlu1 %15850 }
0x4291   :  { %v15853_v47 = vsub.f32 %v24492_v16, %v15851_v0 }
0x4293   :  { %15855 = vrot.lane.b32.xlu0 %v15853_v47, %s22793_s16 }
0x4305   :  { %v15856_v61 = vpop.permute.xlu0 %15855 }
0x4306   :  { %v15858_v15 = vsel %vm9036_vm5, %v15848_v6, %v15856_v61 }
0x4307   :  { %15863 = vrot.lane.b32.xlu1 %v15858_v15, %s22793_s16  ;;  %s24788_s16 = sld [smem:[#allocation54_spill]] }
0x430d   :  { %v17162_v29 = vld [vmem:[%s24788_s16 + $0x20] sm:$0xff]  ;;  %v17163_v4 = vld [vmem:[%s24788_s16 + $0x28] sm:$0xff]  ;;  %v17164_v8 = vld [vmem:[%s24788_s16 + $0x30] sm:$0xff] }
0x430e   :  { %v17165_v9 = vld [vmem:[%s24788_s16 + $0x38] sm:$0xff]  ;;  %v16342_v28 = vld [vmem:[%s24788_s16] sm:$0xff]  ;;  %v16343_v30 = vld [vmem:[%s24788_s16 + $0x8] sm:$0xff] }
0x430f   :  { %v16344_v43 = vld [vmem:[%s24788_s16 + $0x10] sm:$0xff]  ;;  %v16345_v49 = vld [vmem:[%s24788_s16 + $0x18] sm:$0xff] }
0x4379   :  { %v15864_v14 = vpop.permute.xlu1 %15863 }
0x437a   :  { %20518 = vmatpush3.msk.msra.mxu1 %vm544_vm1, %v15864_v14 }
0x437b   :  { %20520 = vmatmul.mubr.msk.f32.vlgmr.msra.gmra.mrb[102].mxu1 %vm537_vm2, %v17146_v44  ;;  %20522 = vmatprep.subr.mxu1 %v22812_v55 }
0x437c   :  { %20523 = vmatpush3.msk.msra.mxu1 %vm544_vm1, %v15858_v15  ;;  %20524 = vmatprep.mubr.msk.f32.mxu1 %vm22811_vm7, %v22812_v55 }
0x437d   :  { %20527 = vmatprep.subr.mxu1 %v22812_v55 }
0x4383   :  { %20525 = vmatmul.mubr.msk.f32.vlgmr.msra.gmra.mrb[102].mxu1 %vm537_vm2, %v15859_v42 }
0x4384   :  { %20529 = vmatprep.mubr.msk.f32.mxu1 %vm22811_vm7, %v22812_v55 }
0x4456   :  { %v16011_v16 = vpop.f32.mrb[102].mxu1 }
0x4457   :  { %16019 = vrot.lane.b32.xlu0 %v16011_v16, %s22817_s23  ;;  %v20526_v48 = vpop.f32.mrb[103].mxu1 }
0x44c9   :  { %v16020_v35 = vpop.permute.xlu0 %16019 }
0x44ca   :  { %20528 = vmatpush3.msk.msra.mxu1 %vm1176_vm14, %v16020_v35 }
0x44cb   :  { %20530 = vmatmul.mubr.msk.f32.vlgmr.msra.gmra.mrb[104].mxu1 %vm1169_vm12, %v17151_v50  ;;  %20532 = vmatprep.subr.mxu1 %v22812_v55 }
0x44cc   :  { %20533 = vmatpush3.msk.msra.mxu1 %vm1176_vm14, %v16011_v16  ;;  %20534 = vmatprep.mubr.msk.f32.mxu1 %vm22811_vm7, %v22812_v55 }
0x44d3   :  { %20535 = vmatmul.mubr.msk.f32.vlgmr.msra.gmra.mrb[104].mxu1 %vm1169_vm12, %v16015_v24 }
0x44d4   :  { %20539 = vmatprep.mubr.msk.f32.mxu1 %vm1815_vm3, %v17156_v51 }
0x45a6   :  { %v16167_v52 = vpop.f32.mrb[104].mxu1 }
0x45a7   :  { %16177 = vrot.lane.b32.xlu1 %v16167_v52, %s22816_s2  ;;  %v20536_v36 = vpop.f32.mrb[105].mxu1 }
0x4619   :  { %v16178_v57 = vpop.permute.xlu1 %16177 }
0x461a   :  { %20537 = vmatprep.subr.mxu1 %v16178_v57 }
0x461b   :  { %20538 = vmatpush3.msra.mxu1 %v16178_v57 }
0x461c   :  { %20540 = vmatmul.mubr.msk.f32.vlgmr.msra.gmra.mrb[106].mxu1 %vm1815_vm3, %v17157_v41  ;;  %20542 = vmatprep.subr.mxu1 %v16167_v52 }
0x461d   :  { %20543 = vmatpush3.msra.mxu1 %v16167_v52  ;;  %20544 = vmatprep.mubr.msk.f32.mxu1 %vm1815_vm3, %v16171_v11 }
0x4624   :  { %20545 = vmatmul.mubr.msk.f32.vlgmr.msra.gmra.mrb[106].mxu1 %vm1815_vm3, %v16172_v13 }
0x4625   :  { %20551 = vmatprep.mubr.msk.f32.mxu1 %vm455_vm0, %v17162_v29 }
0x46f7   :  { %v20546_v12 = vpop.f32.mrb[106].mxu1 }
0x46f8   :  { %v16333_v34 = vpop.f32.mrb[107].mxu1 }
0x46f9   :  { %v22170_v32 = vpack.i.bf16 %v20546_v12, %v16333_v34  ;;  %v21872_v22 = vpack.c.bf16 %v20546_v12, %v16333_v34 }
0x46fb   :  { %22171 = vrot.lane.b32.xlu0 %v22170_v32, %s22815_s8 }
0x476d   :  { %v22172_v27 = vpop.permute.xlu0 %22171 }
0x476e   :  { %v22174_v5 = vunpack.i.h.bf16 %v22172_v27  ;;  %v22173_v53 = vunpack.i.l.bf16 %v22172_v27 }
0x4770   :  { %v21868_v63 = vpack.c.bf16 %v22174_v5, %v22173_v53 }
0x4772   :  { %21869 = vmatprep.subr.bf16.mxu1 %v21868_v63 }
0x4773   :  { %21871 = vmatpush3.bf16.msra.mxu1 %v21868_v63 }
0x4774   :  { %21873 = vmatprep.subr.bf16.mxu1 %v21872_v22 }
0x4776   :  { %20552 = vmatmul.mubr.msk.f32.vlgmr.msra.gmra.mrb[108].mxu1 %vm455_vm0, %v17163_v4 }
0x4777   :  { %21875 = vmatpush3.bf16.msra.mxu1 %v21872_v22  ;;  %20554 = vmatprep.mubr.msk.f32.mxu1 %vm455_vm0, %v17164_v8 }
0x4778   :  { %21876 = vmatprep.subr.bf16.mxu1 %v22810_v54 }
0x477a   :  { %20555 = vmatmul.mubr.msk.f32.gmra.mrb[110].mxu1 %vm455_vm0, %v17165_v9 }
0x477b   :  { %20561 = vmatprep.mubr.msk.f32.mxu1 %vm455_vm0, %v16342_v28 }
0x477e   :  { %20562 = vmatmul.mubr.msk.f32.vlgmr.msra.gmra.mrb[108].mxu1 %vm455_vm0, %v16343_v30 }
0x477f   :  { %20564 = vmatprep.mubr.msk.f32.mxu1 %vm455_vm0, %v16344_v43 }
0x4782   :  { %20565 = vmatmul.mubr.msk.f32.gmra.mrb[110].mxu1 %vm455_vm0, %v16345_v49 }
0x4783   :  { %20571 = vmatprep.mubr.msk.f32.mxu1 %vm22811_vm7, %v22812_v55 }
0x4851   :  { %v20563_v37 = vpop.f32.mrb[108].mxu1 }
0x4852   :  { %v16534_v2 = vpop.f32.mrb[109].mxu1  ;;  %v16554_v58 = vadd.f32 %v20563_v37, %v23293_v20  ;;  %v16569_v20 = vld [vmem:[%s24789_s20 + $0x10] sm:$0xff] }
0x4853   :  { %v16553_v62 = vadd.f32 %v16534_v2, %v23295_v21 }
0x4855   :  { %v20566_v54 = vpop.f32.mrb[110].mxu1 }
0x4856   :  { %v16556_v17 = vadd.f32 %v20566_v54, %v23303_v25  ;;  %v16544_v3 = vpop.f32.mrb[111].mxu1 }
0x4857   :  { %v16555_v33 = vadd.f32 %v16544_v3, %v23305_v26  ;;  %v16568_v26 = vld [vmem:[%s24789_s20 + $0x8] sm:$0xff] }
0x4859   :  { %v22175_v10 = vpack.i.bf16 %v16556_v17, %v16555_v33 }
0x485b   :  { %22176 = vrot.lane.b32.xlu1 %v22175_v10, %s22783_s22 }
0x48cd   :  { %v22177_v56 = vpop.permute.xlu1 %22176 }
0x48ce   :  { %v22179_v60 = vunpack.i.h.bf16 %v22177_v56  ;;  %v22178_v23 = vunpack.i.l.bf16 %v22177_v56 }
0x48d0   :  { %v16566_v1 = vsel %vm1815_vm3, %v16554_v58, %v22179_v60  ;;  %v16565_v7 = vsel %vm1815_vm3, %v16553_v62, %v22178_v23 }
0x48d1   :  { %v21877_v25 = vpack.c.bf16 %v16566_v1, %v16565_v7 }
0x48d3   :  { %21878 = vmatpush3.bf16.msra.mxu1 %v21877_v25 }
0x48d6   :  { %20572 = vmatmul.mubr.msk.f32.vlgmr.msra.gmra.mrb[112].mxu1 %vm455_vm0, %v16567_v31 }
0x48d7   :  { %20574 = vmatprep.mubr.msk.f32.mxu1 %vm22811_vm7, %v22812_v55 }
0x48da   :  { %20575 = vmatmul.mubr.msk.f32.gmra.mrb[114].mxu1 %vm455_vm0, %v16568_v26 }
0x48db   :  { %20577 = vmatprep.mubr.msk.f32.mxu1 %vm22811_vm7, %v22812_v55 }
0x48de   :  { %20578 = vmatmul.mubr.msk.f32.gmra.mrb[116].mxu1 %vm455_vm0, %v16569_v20 }
0x49a9   :  { %v16645_v21 = vpop.f32.mrb[112].mxu1 }
0x49aa   :  { %v16659_v38 = vmul.f32 %v16645_v21, %v23291_v19  ;;  %v20573_v18 = vpop.f32.mrb[113].mxu1 }
0x49ac   :  { %v16662_v39 = vadd.f32 %v16659_v38, %v23283_v59 }
0x49ad   :  { %v16650_v45 = vpop.f32.mrb[114].mxu1 }
0x49ae   :  { %16665 = vst.msk [vmem:[%s23011_s4] sm:$0xff] %vm455_vm0, %v16662_v39  ;;  %v16660_v46 = vmul.f32 %v16650_v45, %v23291_v19  ;;  %v20576_v40 = vpop.f32.mrb[115].mxu1 }
0x49b0   :  { %v16663_v0 = vadd.f32 %v16660_v46, %v23283_v59 }
0x49b1   :  { %v16655_v47 = vpop.f32.mrb[116].mxu1 }
0x49b2   :  { %16666 = vst.msk [vmem:[%s23011_s4 + $0x8] sm:$0xff] %vm455_vm0, %v16663_v0  ;;  %v16661_v55 = vmul.f32 %v16655_v47, %v23291_v19  ;;  %v20579_v6 = vpop.f32.mrb[117].mxu1 }
0x49b4   :  { %v16664_v61 = vadd.f32 %v16661_v55, %v23283_v59 }
0x49b6   :  { %16667 = vst.msk [vmem:[%s23011_s4 + $0x10] sm:$0xff] %vm455_vm0, %v16664_v61 }
0x49b7   :  { %16672 = vsyncpa [#allocation3], 1 }
0x49b8   :  { %16673 = vsyncpa [#allocation5], 1 }
0x49b9   :  { %16674 = vsyncpa [#allocation8], 1 }
0x49ba   :  { %16675 = vsyncpa [#allocation11], 1 }
0x49bb   :  { %16676 = vsyncpa [#allocation14], 1 }
0x49bc   :  { %16677 = vsyncpa [#allocation17], 1 }
0x49bd   :  { %16678 = vsyncpa [#allocation20], 1 }
0x49be   :  { %16679 = vsyncpa [#allocation23], 1 }
0x49bf   :  { %16680 = vsyncpa [#allocation26], 1 }
0x49c0   :  { %16681 = vsyncpa [#allocation29], 1 }
0x49c1   :  { %16682 = vsyncpa [#allocation32], 1 }
0x49c2   :  { %16683 = vsyncpa [#allocation35], 1 }

</bundles_post_ra>
